<compile_context>
chip_gen: v7x
topology: tpu7x:2x2x1
jax: 0.10.0
libtpu: 0.0.40
codegen_flags: <defaults>
</compile_context>

<pallas_src>
import functools
import math

import jax
import jax.numpy as jnp
from jax.experimental import pallas as pl
from jax.experimental.pallas import tpu as pltpu


# ----------------------------- small helpers -------------------------------

def _ceil_to(x, m):
    return ((x + m - 1) // m) * m


def _pad_to(a, axis, multiple):
    size = a.shape[axis]
    pad = (-size) % multiple
    if pad == 0:
        return a
    widths = [(0, 0)] * a.ndim
    widths[axis] = (0, pad)
    return jnp.pad(a, widths)


def _leaky_relu(x, alpha):
    return jnp.where(x > 0, x, alpha * x)


def _masked_softmax(scores, mask):
    # Softmax over the last axis; entries with mask==0 are filled with -9e15
    # (mirrors torch masked_fill + softmax). Row max is taken AFTER masking, so
    # every non-empty row is exact; an all-masked row comes out uniform.
    s = jnp.where(mask > 0, scores, -9e15)
    s = s - jnp.max(s, axis=-1, keepdims=True)
    e = jnp.exp(s)
    return e * pl.reciprocal(jnp.sum(e, axis=-1, keepdims=True), approx=True)


def _hypergat_layer(x_att, xv, ht, ht_t, a1w, a2w, w3a, alpha):
    """One dense HyperGAT layer on a (Bt, N, *) batch tile, fully in VMEM.

    x_att: (Bt, N, Fa) features that produce attention scores
    xv:    (Bt, N, Dv) value features aggregated into hyperedges
    ht:    (Bt, E, N)  incidence {0,1} (edge-major); ht_t: (Bt, N, E)
    a1w:   (1, Fa)  fused stage-1 node-score row  = (W2 @ a1)^T
    a2w:   (Fa, 1)  fused stage-2 node-score col  =  W2 @ a2_node
    w3a:   (1, Dv)  fused stage-2 edge-score row  = (W3 @ a2_edge)^T
    """
    Bt, N, Fa = x_att.shape

    # Stage-1 node scores computed lane-major over N (mul + lane reduce; no
    # transpose, no 2-lane matmul).
    s1 = _leaky_relu(jnp.sum(x_att * a1w[None], axis=-1), alpha)       # (Bt, N)

    # node -> hyperedge: masked softmax over member nodes (per-edge max).
    att_e = _masked_softmax(s1[:, None, :], ht)                        # (Bt, E, N)
    edge = jnp.einsum('ben,bnd->bed',
                      att_e.astype(jnp.bfloat16), xv.astype(jnp.bfloat16),
                      preferred_element_type=jnp.float32)              # (Bt, E, Dv)

    # hyperedge -> node: masked softmax over incident edges.
    node_part = jnp.reshape(
        jnp.dot(jnp.reshape(x_att, (Bt * N, Fa)), a2w,
                preferred_element_type=jnp.float32), (Bt, N, 1))       # (Bt, N, 1)
    edge_part = jnp.sum(edge * w3a[None], axis=-1)[:, None, :]         # (Bt, 1, E)
    sn = _leaky_relu(node_part + edge_part, alpha)                     # (Bt, N, E)
    att_n = _masked_softmax(sn, ht_t)                                  # (Bt, N, E)
    node = jnp.einsum('bne,bed->bnd',
                      att_n.astype(jnp.bfloat16), edge.astype(jnp.bfloat16),
                      preferred_element_type=jnp.float32)              # (Bt, N, Dv)
    return node, att_n


# ----------------------------- fused Pallas kernel --------------------------

def fused_hgnn_kernel(x_ref, ht_ref, htt_ref,
                      a1w1_ref, a2w1_ref, w3a1_ref,
                      w1_ref, b_ref, a1w2_ref, a2w2_ref, w3a2_ref,
                      out_ref, att_ref, *, alpha):
    x = x_ref[...]                                   # (Bt, N, F) f32
    ht = ht_ref[...].astype(jnp.float32)             # (Bt, E, N) {0,1}
    ht_t = htt_ref[...].astype(jnp.float32)          # (Bt, N, E) {0,1}

    # ---- layer 1 (transfer=False: values are the raw node features) ----
    x1, _ = _hypergat_layer(x, x, ht, ht_t,
                            a1w1_ref[...], a2w1_ref[...], w3a1_ref[...], alpha)
    # concat=True -> ELU (clamped exp so the unselected branch never overflows)
    x1 = jnp.where(x1 > 0, x1, jnp.exp(jnp.minimum(x1, 0.0)) - 1.0)

    # ---- layer 2 (transfer=True: values are x1 @ W1 + b) ----
    Bt, N, F = x1.shape
    H = w1_ref.shape[1]
    xv2 = jnp.dot(jnp.reshape(x1, (Bt * N, F)).astype(jnp.bfloat16),
                  w1_ref[...].astype(jnp.bfloat16),
                  preferred_element_type=jnp.float32) + b_ref[...]
    xv2 = jnp.reshape(xv2, (Bt, N, H))

    x2, att_n = _hypergat_layer(x1, xv2, ht, ht_t,
                                a1w2_ref[...], a2w2_ref[...], w3a2_ref[...], alpha)

    out_ref[...] = x2        # final node embeddings ("hypergraph")
    att_ref[...] = att_n     # last layer edge->node attention ("edge_att")


# --------------------------- model construction ---------------------------

def init_params(key, initial_feature, hidden_size):
    """uniform(-stdv, stdv), stdv = 1/sqrt(hidden_size) — matches reset_parameters."""
    stdv = 1.0 / math.sqrt(hidden_size)
    F, H = initial_feature, hidden_size

    def u(k, shape):
        return jax.random.uniform(k, shape, jnp.float32, minval=-stdv, maxval=stdv)

    keys = jax.random.split(key, 14)
    # gat1: F -> F (transfer=False, concat=True)
    gat1 = (u(keys[0], (F, F)),   # W1 (unused, transfer=False)
            u(keys[1], (1, F)),   # bias (unused, transfer=False)
            u(keys[2], (F, F)),   # W2 (node attention proj)
            u(keys[3], (F, F)),   # W3 (edge attention proj)
            u(keys[4], (F, 1)),   # a1
            u(keys[5], (F, 1)),   # a2 (node part)
            u(keys[6], (F, 1)))   # a2 (edge part)
    # gat2: F -> H (transfer=True, concat=False)
    gat2 = (u(keys[7], (F, H)),   # W1
            u(keys[8], (1, H)),   # bias
            u(keys[9], (F, H)),   # W2
            u(keys[10], (H, H)),  # W3
            u(keys[11], (H, 1)),  # a1
            u(keys[12], (H, 1)),  # a2 (node part)
            u(keys[13], (H, 1)))  # a2 (edge part)
    return {"gat1": gat1, "gat2": gat2}


# ------------------------------- wrapper -----------------------------------

def news_hypergraph_forward(nodes, HT, params, *, alpha=0.2, batch_tile=None,
                            vmem_limit_bytes=48 * 1024 * 1024):
    """NewsHypergraph.forward: returns (hypergraph node embeddings, edge attention).

    Both HGNN_ATT layers run fused in one pallas_call; the grid iterates over
    batch tiles of Bt elements ('parallel' so megacore splits the batch).
    E, N, F, H are padded to multiples of 128 for lane-dense tiles and stripped
    from the outputs.
    """
    B, N, F = nodes.shape
    _, E, _ = HT.shape
    _w1_1, _b_1, w2_1, w3_1, a1_1, a2n_1, a2e_1 = params["gat1"]
    w1_2, b_2, w2_2, w3_2, a1_2, a2n_2, a2e_2 = params["gat2"]
    H = w1_2.shape[1]

    # Collapse tiny score projections once in XLA (exact algebra):
    #   x @ W2 @ a == x @ (W2 @ a);  (edge @ W3) @ a == edge @ (W3 @ a)
    a1w1 = (w2_1 @ a1_1).reshape(1, F)     # stage-1 node score (row, layer 1)
    a2w1 = w2_1 @ a2n_1                    # stage-2 node score (col, layer 1)
    w3a1 = (w3_1 @ a2e_1).reshape(1, F)    # stage-2 edge score (row, layer 1)
    a1w2 = (w2_2 @ a1_2).reshape(1, F)
    a2w2 = w2_2 @ a2n_2
    w3a2 = (w3_2 @ a2e_2).reshape(1, H)

    LANE = 128
    Np, Ep = _ceil_to(N, LANE), _ceil_to(E, LANE)
    Fp, Hp = _ceil_to(F, LANE), _ceil_to(H, LANE)
    Bt = batch_tile if batch_tile is not None else min(B, 8)
    Bp = _ceil_to(B, Bt)

    # Pad inputs (zeros). Padded nodes belong to no edge and padded edges are
    # empty, so they never contaminate real rows (exp-underflow -> 0 weight).
    x_p = _pad_to(_pad_to(_pad_to(nodes, 2, Fp), 1, Np), 0, Bt)
    ht_p = _pad_to(_pad_to(_pad_to(HT, 2, Np), 1, Ep), 0, Bt).astype(jnp.bfloat16)
    htt_p = jnp.swapaxes(ht_p, 1, 2)       # node-major copy (bf16)
    # TODO(synk): for large E*N drop htt_p and do one in-kernel transpose instead.

    a1w1_p = _pad_to(a1w1, 1, Fp)
    a2w1_p = _pad_to(a2w1, 0, Fp)
    w3a1_p = _pad_to(w3a1, 1, Fp)
    w1_p = _pad_to(_pad_to(w1_2, 0, Fp), 1, Hp)
    b_p = _pad_to(b_2, 1, Hp)
    a1w2_p = _pad_to(a1w2, 1, Fp)
    a2w2_p = _pad_to(a2w2, 0, Fp)
    w3a2_p = _pad_to(w3a2, 1, Hp)

    kernel = functools.partial(fused_hgnn_kernel, alpha=alpha)

    def const2d(arr):
        return pl.BlockSpec(arr.shape, lambda bi: (0, 0))

    in_specs = [
        pl.BlockSpec((Bt, Np, Fp), lambda bi: (bi, 0, 0)),     # nodes
        pl.BlockSpec((Bt, Ep, Np), lambda bi: (bi, 0, 0)),     # HT   (edge-major, bf16)
        pl.BlockSpec((Bt, Np, Ep), lambda bi: (bi, 0, 0)),     # HT^T (node-major, bf16)
        const2d(a1w1_p), const2d(a2w1_p), const2d(w3a1_p),
        const2d(w1_p), const2d(b_p),
        const2d(a1w2_p), const2d(a2w2_p), const2d(w3a2_p),
    ]
    out_specs = (
        pl.BlockSpec((Bt, Np, Hp), lambda bi: (bi, 0, 0)),
        pl.BlockSpec((Bt, Np, Ep), lambda bi: (bi, 0, 0)),
    )
    out_shape = (
        jax.ShapeDtypeStruct((Bp, Np, Hp), jnp.float32),
        jax.ShapeDtypeStruct((Bp, Np, Ep), jnp.float32),
    )

    out, att = pl.pallas_call(
        kernel,
        out_shape=out_shape,
        grid=(Bp // Bt,),
        in_specs=in_specs,
        out_specs=out_specs,
        compiler_params=pltpu.CompilerParams(
            dimension_semantics=("parallel",),
            vmem_limit_bytes=vmem_limit_bytes),
    )(x_p, ht_p, htt_p, a1w1_p, a2w1_p, w3a1_p, w1_p, b_p, a1w2_p, a2w2_p, w3a2_p)

    return out[:B, :N, :H], att[:B, :N, :E]


# ------------------------- pure-JAX reference (check) -----------------------

def _reference_forward(nodes, HT, params, alpha=0.2):
    _w1_1, _b_1, w2_1, w3_1, a1_1, a2n_1, a2e_1 = params["gat1"]
    w1_2, b_2, w2_2, w3_2, a1_2, a2n_2, a2e_2 = params["gat2"]

    def leaky(x):
        return jnp.where(x > 0, x, alpha * x)

    def masked_softmax(s, m):
        return jax.nn.softmax(jnp.where(m > 0, s, -9e15), axis=-1)

    def layer(x_att, xv, HTb, w2, w3, a1, a2n, a2e):
        s1 = leaky(jnp.einsum('bnf,fk->bnk', x_att, w2 @ a1))[..., 0]      # (B,N)
        att_e = masked_softmax(jnp.broadcast_to(s1[:, None, :], HTb.shape), HTb)
        edge = jnp.einsum('ben,bnd->bed', att_e, xv)
        node_part = jnp.einsum('bnf,fk->bnk', x_att, w2 @ a2n)             # (B,N,1)
        edge_part = jnp.einsum('bed,dk->bek', edge, w3 @ a2e)[..., 0]      # (B,E)
        sn = leaky(node_part + edge_part[:, None, :])
        att_n = masked_softmax(sn, jnp.swapaxes(HTb, 1, 2))
        return jnp.einsum('bne,bed->bnd', att_n, edge), att_n

    x1, _ = layer(nodes, nodes, HT, w2_1, w3_1, a1_1, a2n_1, a2e_1)
    x1 = jnp.where(x1 > 0, x1, jnp.exp(jnp.minimum(x1, 0.0)) - 1.0)
    xv2 = jnp.einsum('bnf,fh->bnh', x1, w1_2) + b_2
    return layer(x1, xv2, HT, w2_2, w3_2, a1_2, a2n_2, a2e_2)


# --------------------------------- main ------------------------------------

if __name__ == "__main__":
    key = jax.random.PRNGKey(0)
    k_nodes, k_ht, k_params = jax.random.split(key, 3)

    B, N, E = 2, 16, 8          # batch, num nodes, num hyperedges
    F, HID = 32, 32             # initialFeatureSize, hiddenSize

    nodes = jax.random.normal(k_nodes, (B, N, F), jnp.float32)
    HT = (jax.random.uniform(k_ht, (B, E, N)) < 0.4).astype(jnp.float32)
    # every node belongs to >=1 edge and every edge has >=1 node
    conn = jnp.zeros((B, E, N), jnp.float32).at[
        :, jnp.arange(N) % E, jnp.arange(N)].set(1.0)
    HT = jnp.maximum(HT, conn)

    params = init_params(k_params, F, HID)

    hypergraph, edge_att = news_hypergraph_forward(nodes, HT, params)
    jax.block_until_ready((hypergraph, edge_att))

    assert hypergraph.shape == (B, N, HID)
    assert edge_att.shape == (B, N, E)
    assert bool(jnp.all(jnp.isfinite(hypergraph)))
    assert bool(jnp.all(jnp.isfinite(edge_att)))
    # attention rows should sum to ~1 (approx reciprocal + stripped zero padding)
    assert bool(jnp.all(jnp.abs(jnp.sum(edge_att, axis=-1) - 1.0) < 1e-2))

    # loose check vs a pure-JAX reference (bf16 MXU operands + approx reciprocal)
    ref_out, ref_att = _reference_forward(nodes, HT, params)
    assert bool(jnp.max(jnp.abs(hypergraph - ref_out)) < 5e-2)
    assert bool(jnp.max(jnp.abs(edge_att - ref_att)) < 5e-2)

    print("KERNEL_OK")
</pallas_src>

<mosaic_0001>
module attributes {stable_mosaic.version = 11 : i64} {
  func.func @fused_hgnn_kernel(%arg0: i32, %arg1: memref<2x128x128xf32, #tpu.memory_space<vmem>>, %arg2: memref<2x128x128xbf16, #tpu.memory_space<vmem>>, %arg3: memref<2x128x128xbf16, #tpu.memory_space<vmem>>, %arg4: memref<1x128xf32, #tpu.memory_space<vmem>>, %arg5: memref<128x1xf32, #tpu.memory_space<vmem>>, %arg6: memref<1x128xf32, #tpu.memory_space<vmem>>, %arg7: memref<128x128xf32, #tpu.memory_space<vmem>>, %arg8: memref<1x128xf32, #tpu.memory_space<vmem>>, %arg9: memref<1x128xf32, #tpu.memory_space<vmem>>, %arg10: memref<128x1xf32, #tpu.memory_space<vmem>>, %arg11: memref<1x128xf32, #tpu.memory_space<vmem>>, %arg12: memref<2x128x128xf32, #tpu.memory_space<vmem>>, %arg13: memref<2x128x128xf32, #tpu.memory_space<vmem>>) attributes {dimension_semantics = [#tpu.dimension_semantics<parallel>], iteration_bounds = array<i64: 1>, scalar_prefetch = 0 : i64, scratch_operands = 0 : i64, tpu.core_type = #tpu.core_type<tc>, window_params = [{transform_indices = @transform_0, window_bounds = array<i64: 2, 128, 128>}, {transform_indices = @transform_1, window_bounds = array<i64: 2, 128, 128>}, {transform_indices = @transform_2, window_bounds = array<i64: 2, 128, 128>}, {pipeline_mode = #tpu.pipeline_mode<synchronous>, transform_indices = @transform_3, window_bounds = array<i64: 1, 128>}, {pipeline_mode = #tpu.pipeline_mode<synchronous>, transform_indices = @transform_4, window_bounds = array<i64: 128, 1>}, {pipeline_mode = #tpu.pipeline_mode<synchronous>, transform_indices = @transform_5, window_bounds = array<i64: 1, 128>}, {pipeline_mode = #tpu.pipeline_mode<synchronous>, transform_indices = @transform_6, window_bounds = array<i64: 128, 128>}, {pipeline_mode = #tpu.pipeline_mode<synchronous>, transform_indices = @transform_7, window_bounds = array<i64: 1, 128>}, {pipeline_mode = #tpu.pipeline_mode<synchronous>, transform_indices = @transform_8, window_bounds = array<i64: 1, 128>}, {pipeline_mode = #tpu.pipeline_mode<synchronous>, transform_indices = @transform_9, window_bounds = array<i64: 128, 1>}, {pipeline_mode = #tpu.pipeline_mode<synchronous>, transform_indices = @transform_10, window_bounds = array<i64: 1, 128>}, {transform_indices = @transform_11, window_bounds = array<i64: 2, 128, 128>}, {transform_indices = @transform_12, window_bounds = array<i64: 2, 128, 128>}]} {
    %c0 = arith.constant 0 : index
    %c0_0 = arith.constant 0 : index
    %c0_1 = arith.constant 0 : index
    %0 = vector.load %arg1[%c0, %c0_0, %c0_1] : memref<2x128x128xf32, #tpu.memory_space<vmem>>, vector<2x128x128xf32>
    %c0_2 = arith.constant 0 : index
    %c0_3 = arith.constant 0 : index
    %c0_4 = arith.constant 0 : index
    %1 = vector.load %arg2[%c0_2, %c0_3, %c0_4] : memref<2x128x128xbf16, #tpu.memory_space<vmem>>, vector<2x128x128xbf16>
    %2 = arith.extf %1 : vector<2x128x128xbf16> to vector<2x128x128xf32>
    %c0_5 = arith.constant 0 : index
    %c0_6 = arith.constant 0 : index
    %c0_7 = arith.constant 0 : index
    %3 = vector.load %arg3[%c0_5, %c0_6, %c0_7] : memref<2x128x128xbf16, #tpu.memory_space<vmem>>, vector<2x128x128xbf16>
    %4 = arith.extf %3 : vector<2x128x128xbf16> to vector<2x128x128xf32>
    %c0_8 = arith.constant 0 : index
    %c0_9 = arith.constant 0 : index
    %5 = vector.load %arg4[%c0_8, %c0_9] : memref<1x128xf32, #tpu.memory_space<vmem>>, vector<1x128xf32>
    %c0_10 = arith.constant 0 : index
    %c0_11 = arith.constant 0 : index
    %6 = vector.load %arg5[%c0_10, %c0_11] : memref<128x1xf32, #tpu.memory_space<vmem>>, vector<128x1xf32>
    %c0_12 = arith.constant 0 : index
    %c0_13 = arith.constant 0 : index
    %7 = vector.load %arg6[%c0_12, %c0_13] : memref<1x128xf32, #tpu.memory_space<vmem>>, vector<1x128xf32>
    %8 = vector.shape_cast %5 : vector<1x128xf32> to vector<1x1x128xf32>
    %9 = vector.broadcast %8 : vector<1x1x128xf32> to vector<2x128x128xf32>
    %10 = arith.mulf %0, %9 : vector<2x128x128xf32>
    %cst = arith.constant dense<0.000000e+00> : vector<2x128xf32>
    %11 = vector.multi_reduction <add>, %10, %cst [2] : vector<2x128x128xf32> to vector<2x128xf32>
    %cst_14 = arith.constant 0.000000e+00 : f32
    %12 = vector.broadcast %cst_14 : f32 to vector<2x128xf32>
    %13 = arith.cmpf ogt, %11, %12 : vector<2x128xf32>
    %cst_15 = arith.constant 2.000000e-01 : f32
    %14 = vector.broadcast %cst_15 : f32 to vector<2x128xf32>
    %15 = arith.mulf %14, %11 : vector<2x128xf32>
    %16 = arith.select %13, %11, %15 : vector<2x128xi1>, vector<2x128xf32>
    %17 = vector.shape_cast %16 : vector<2x128xf32> to vector<2x1x128xf32>
    %cst_16 = arith.constant 0.000000e+00 : f32
    %18 = vector.broadcast %cst_16 : f32 to vector<2x128x128xf32>
    %19 = arith.cmpf ogt, %2, %18 : vector<2x128x128xf32>
    %cst_17 = arith.constant -9.000000e+15 : f32
    %20 = vector.shape_cast %17 : vector<2x1x128xf32> to vector<2x1x128xf32>
    %21 = vector.broadcast %20 : vector<2x1x128xf32> to vector<2x128x128xf32>
    %22 = vector.broadcast %cst_17 : f32 to vector<2x128x128xf32>
    %23 = arith.select %19, %21, %22 : vector<2x128x128xi1>, vector<2x128x128xf32>
    %cst_18 = arith.constant dense<0xFF800000> : vector<2x128xf32>
    %24 = vector.multi_reduction <maximumf>, %23, %cst_18 [2] : vector<2x128x128xf32> to vector<2x128xf32>
    %25 = vector.shape_cast %24 : vector<2x128xf32> to vector<2x128x1xf32>
    %26 = vector.broadcast %25 : vector<2x128x1xf32> to vector<2x128x128xf32>
    %27 = arith.subf %23, %26 : vector<2x128x128xf32>
    %28 = math.exp %27 : vector<2x128x128xf32>
    %cst_19 = arith.constant dense<0.000000e+00> : vector<2x128xf32>
    %29 = vector.multi_reduction <add>, %28, %cst_19 [2] : vector<2x128x128xf32> to vector<2x128xf32>
    %30 = vector.shape_cast %29 : vector<2x128xf32> to vector<2x128x1xf32>
    %31 = tpu.reciprocal %30 {approx = true} : vector<2x128x1xf32> -> vector<2x128x1xf32>
    %32 = vector.broadcast %31 : vector<2x128x1xf32> to vector<2x128x128xf32>
    %33 = arith.mulf %28, %32 : vector<2x128x128xf32>
    %34 = arith.truncf %33 : vector<2x128x128xf32> to vector<2x128x128xbf16>
    %35 = arith.truncf %0 : vector<2x128x128xf32> to vector<2x128x128xbf16>
    "tpu.trace_start"() <{level = 10 : i32, message = "ben,bnd->bed"}> : () -> ()
    %cst_20 = arith.constant dense<0.000000e+00> : vector<2x128x128xf32>
    %36 = tpu.matmul %34, %35, %cst_20 {dimension_numbers = #tpu.dot_dimension_numbers<[2], [1], [1], [2], [0, 0, 0, 1, 1, 2], [0], [0]>} : vector<2x128x128xbf16>, vector<2x128x128xbf16>, vector<2x128x128xf32> -> vector<2x128x128xf32>
    "tpu.trace_stop"() : () -> ()
    %37 = vector.shape_cast %0 : vector<2x128x128xf32> to vector<256x128xf32>
    %cst_21 = arith.constant dense<0.000000e+00> : vector<256x1xf32>
    %38 = tpu.matmul %37, %6, %cst_21 {dimension_numbers = #tpu.dot_dimension_numbers<[1], [0], [0], [1], [0, 0, 1, 1], [], []>} : vector<256x128xf32>, vector<128x1xf32>, vector<256x1xf32> -> vector<256x1xf32>
    %39 = vector.shape_cast %38 : vector<256x1xf32> to vector<2x128x1xf32>
    %40 = vector.shape_cast %7 : vector<1x128xf32> to vector<1x1x128xf32>
    %41 = vector.broadcast %40 : vector<1x1x128xf32> to vector<2x128x128xf32>
    %42 = arith.mulf %36, %41 : vector<2x128x128xf32>
    %cst_22 = arith.constant dense<0.000000e+00> : vector<2x128xf32>
    %43 = vector.multi_reduction <add>, %42, %cst_22 [2] : vector<2x128x128xf32> to vector<2x128xf32>
    %44 = vector.shape_cast %43 : vector<2x128xf32> to vector<2x1x128xf32>
    %45 = vector.broadcast %39 : vector<2x128x1xf32> to vector<2x128x128xf32>
    %46 = vector.broadcast %44 : vector<2x1x128xf32> to vector<2x128x128xf32>
    %47 = arith.addf %45, %46 : vector<2x128x128xf32>
    %cst_23 = arith.constant 0.000000e+00 : f32
    %48 = vector.broadcast %cst_23 : f32 to vector<2x128x128xf32>
    %49 = arith.cmpf ogt, %47, %48 : vector<2x128x128xf32>
    %cst_24 = arith.constant 2.000000e-01 : f32
    %50 = vector.broadcast %cst_24 : f32 to vector<2x128x128xf32>
    %51 = arith.mulf %50, %47 : vector<2x128x128xf32>
    %52 = arith.select %49, %47, %51 : vector<2x128x128xi1>, vector<2x128x128xf32>
    %cst_25 = arith.constant 0.000000e+00 : f32
    %53 = vector.broadcast %cst_25 : f32 to vector<2x128x128xf32>
    %54 = arith.cmpf ogt, %4, %53 : vector<2x128x128xf32>
    %cst_26 = arith.constant -9.000000e+15 : f32
    %55 = vector.broadcast %cst_26 : f32 to vector<2x128x128xf32>
    %56 = arith.select %54, %52, %55 : vector<2x128x128xi1>, vector<2x128x128xf32>
    %cst_27 = arith.constant dense<0xFF800000> : vector<2x128xf32>
    %57 = vector.multi_reduction <maximumf>, %56, %cst_27 [2] : vector<2x128x128xf32> to vector<2x128xf32>
    %58 = vector.shape_cast %57 : vector<2x128xf32> to vector<2x128x1xf32>
    %59 = vector.broadcast %58 : vector<2x128x1xf32> to vector<2x128x128xf32>
    %60 = arith.subf %56, %59 : vector<2x128x128xf32>
    %61 = math.exp %60 : vector<2x128x128xf32>
    %cst_28 = arith.constant dense<0.000000e+00> : vector<2x128xf32>
    %62 = vector.multi_reduction <add>, %61, %cst_28 [2] : vector<2x128x128xf32> to vector<2x128xf32>
    %63 = vector.shape_cast %62 : vector<2x128xf32> to vector<2x128x1xf32>
    %64 = tpu.reciprocal %63 {approx = true} : vector<2x128x1xf32> -> vector<2x128x1xf32>
    %65 = vector.broadcast %64 : vector<2x128x1xf32> to vector<2x128x128xf32>
    %66 = arith.mulf %61, %65 : vector<2x128x128xf32>
    %67 = arith.truncf %66 : vector<2x128x128xf32> to vector<2x128x128xbf16>
    %68 = arith.truncf %36 : vector<2x128x128xf32> to vector<2x128x128xbf16>
    "tpu.trace_start"() <{level = 10 : i32, message = "bne,bed->bnd"}> : () -> ()
    %cst_29 = arith.constant dense<0.000000e+00> : vector<2x128x128xf32>
    %69 = tpu.matmul %67, %68, %cst_29 {dimension_numbers = #tpu.dot_dimension_numbers<[2], [1], [1], [2], [0, 0, 0, 1, 1, 2], [0], [0]>} : vector<2x128x128xbf16>, vector<2x128x128xbf16>, vector<2x128x128xf32> -> vector<2x128x128xf32>
    %cst_30 = arith.constant 0.000000e+00 : f32
    "tpu.trace_stop"() : () -> ()
    %70 = vector.broadcast %cst_30 : f32 to vector<2x128x128xf32>
    %71 = arith.cmpf ogt, %69, %70 : vector<2x128x128xf32>
    %cst_31 = arith.constant 0.000000e+00 : f32
    %72 = vector.broadcast %cst_31 : f32 to vector<2x128x128xf32>
    %73 = arith.minimumf %69, %72 : vector<2x128x128xf32>
    %74 = math.exp %73 : vector<2x128x128xf32>
    %cst_32 = arith.constant 1.000000e+00 : f32
    %75 = vector.broadcast %cst_32 : f32 to vector<2x128x128xf32>
    %76 = arith.subf %74, %75 : vector<2x128x128xf32>
    %77 = arith.select %71, %69, %76 : vector<2x128x128xi1>, vector<2x128x128xf32>
    %78 = vector.shape_cast %77 : vector<2x128x128xf32> to vector<256x128xf32>
    %79 = arith.truncf %78 : vector<256x128xf32> to vector<256x128xbf16>
    %c0_33 = arith.constant 0 : index
    %c0_34 = arith.constant 0 : index
    %80 = vector.load %arg7[%c0_33, %c0_34] : memref<128x128xf32, #tpu.memory_space<vmem>>, vector<128x128xf32>
    %81 = arith.truncf %80 : vector<128x128xf32> to vector<128x128xbf16>
    %cst_35 = arith.constant dense<0.000000e+00> : vector<256x128xf32>
    %82 = tpu.matmul %79, %81, %cst_35 {dimension_numbers = #tpu.dot_dimension_numbers<[1], [0], [0], [1], [0, 0, 1, 1], [], []>} : vector<256x128xbf16>, vector<128x128xbf16>, vector<256x128xf32> -> vector<256x128xf32>
    %c0_36 = arith.constant 0 : index
    %c0_37 = arith.constant 0 : index
    %83 = vector.load %arg8[%c0_36, %c0_37] : memref<1x128xf32, #tpu.memory_space<vmem>>, vector<1x128xf32>
    %84 = vector.broadcast %83 : vector<1x128xf32> to vector<256x128xf32>
    %85 = arith.addf %82, %84 : vector<256x128xf32>
    %86 = vector.shape_cast %85 : vector<256x128xf32> to vector<2x128x128xf32>
    %c0_38 = arith.constant 0 : index
    %c0_39 = arith.constant 0 : index
    %87 = vector.load %arg9[%c0_38, %c0_39] : memref<1x128xf32, #tpu.memory_space<vmem>>, vector<1x128xf32>
    %c0_40 = arith.constant 0 : index
    %c0_41 = arith.constant 0 : index
    %88 = vector.load %arg10[%c0_40, %c0_41] : memref<128x1xf32, #tpu.memory_space<vmem>>, vector<128x1xf32>
    %c0_42 = arith.constant 0 : index
    %c0_43 = arith.constant 0 : index
    %89 = vector.load %arg11[%c0_42, %c0_43] : memref<1x128xf32, #tpu.memory_space<vmem>>, vector<1x128xf32>
    %90 = vector.shape_cast %87 : vector<1x128xf32> to vector<1x1x128xf32>
    %91 = vector.broadcast %90 : vector<1x1x128xf32> to vector<2x128x128xf32>
    %92 = arith.mulf %77, %91 : vector<2x128x128xf32>
    %cst_44 = arith.constant dense<0.000000e+00> : vector<2x128xf32>
    %93 = vector.multi_reduction <add>, %92, %cst_44 [2] : vector<2x128x128xf32> to vector<2x128xf32>
    %cst_45 = arith.constant 0.000000e+00 : f32
    %94 = vector.broadcast %cst_45 : f32 to vector<2x128xf32>
    %95 = arith.cmpf ogt, %93, %94 : vector<2x128xf32>
    %cst_46 = arith.constant 2.000000e-01 : f32
    %96 = vector.broadcast %cst_46 : f32 to vector<2x128xf32>
    %97 = arith.mulf %96, %93 : vector<2x128xf32>
    %98 = arith.select %95, %93, %97 : vector<2x128xi1>, vector<2x128xf32>
    %99 = vector.shape_cast %98 : vector<2x128xf32> to vector<2x1x128xf32>
    %cst_47 = arith.constant 0.000000e+00 : f32
    %100 = vector.broadcast %cst_47 : f32 to vector<2x128x128xf32>
    %101 = arith.cmpf ogt, %2, %100 : vector<2x128x128xf32>
    %cst_48 = arith.constant -9.000000e+15 : f32
    %102 = vector.shape_cast %99 : vector<2x1x128xf32> to vector<2x1x128xf32>
    %103 = vector.broadcast %102 : vector<2x1x128xf32> to vector<2x128x128xf32>
    %104 = vector.broadcast %cst_48 : f32 to vector<2x128x128xf32>
    %105 = arith.select %101, %103, %104 : vector<2x128x128xi1>, vector<2x128x128xf32>
    %cst_49 = arith.constant dense<0xFF800000> : vector<2x128xf32>
    %106 = vector.multi_reduction <maximumf>, %105, %cst_49 [2] : vector<2x128x128xf32> to vector<2x128xf32>
    %107 = vector.shape_cast %106 : vector<2x128xf32> to vector<2x128x1xf32>
    %108 = vector.broadcast %107 : vector<2x128x1xf32> to vector<2x128x128xf32>
    %109 = arith.subf %105, %108 : vector<2x128x128xf32>
    %110 = math.exp %109 : vector<2x128x128xf32>
    %cst_50 = arith.constant dense<0.000000e+00> : vector<2x128xf32>
    %111 = vector.multi_reduction <add>, %110, %cst_50 [2] : vector<2x128x128xf32> to vector<2x128xf32>
    %112 = vector.shape_cast %111 : vector<2x128xf32> to vector<2x128x1xf32>
    %113 = tpu.reciprocal %112 {approx = true} : vector<2x128x1xf32> -> vector<2x128x1xf32>
    %114 = vector.broadcast %113 : vector<2x128x1xf32> to vector<2x128x128xf32>
    %115 = arith.mulf %110, %114 : vector<2x128x128xf32>
    %116 = arith.truncf %115 : vector<2x128x128xf32> to vector<2x128x128xbf16>
    %117 = arith.truncf %86 : vector<2x128x128xf32> to vector<2x128x128xbf16>
    "tpu.trace_start"() <{level = 10 : i32, message = "ben,bnd->bed"}> : () -> ()
    %cst_51 = arith.constant dense<0.000000e+00> : vector<2x128x128xf32>
    %118 = tpu.matmul %116, %117, %cst_51 {dimension_numbers = #tpu.dot_dimension_numbers<[2], [1], [1], [2], [0, 0, 0, 1, 1, 2], [0], [0]>} : vector<2x128x128xbf16>, vector<2x128x128xbf16>, vector<2x128x128xf32> -> vector<2x128x128xf32>
    "tpu.trace_stop"() : () -> ()
    %119 = vector.shape_cast %77 : vector<2x128x128xf32> to vector<256x128xf32>
    %cst_52 = arith.constant dense<0.000000e+00> : vector<256x1xf32>
    %120 = tpu.matmul %119, %88, %cst_52 {dimension_numbers = #tpu.dot_dimension_numbers<[1], [0], [0], [1], [0, 0, 1, 1], [], []>} : vector<256x128xf32>, vector<128x1xf32>, vector<256x1xf32> -> vector<256x1xf32>
    %121 = vector.shape_cast %120 : vector<256x1xf32> to vector<2x128x1xf32>
    %122 = vector.shape_cast %89 : vector<1x128xf32> to vector<1x1x128xf32>
    %123 = vector.broadcast %122 : vector<1x1x128xf32> to vector<2x128x128xf32>
    %124 = arith.mulf %118, %123 : vector<2x128x128xf32>
    %cst_53 = arith.constant dense<0.000000e+00> : vector<2x128xf32>
    %125 = vector.multi_reduction <add>, %124, %cst_53 [2] : vector<2x128x128xf32> to vector<2x128xf32>
    %126 = vector.shape_cast %125 : vector<2x128xf32> to vector<2x1x128xf32>
    %127 = vector.broadcast %121 : vector<2x128x1xf32> to vector<2x128x128xf32>
    %128 = vector.broadcast %126 : vector<2x1x128xf32> to vector<2x128x128xf32>
    %129 = arith.addf %127, %128 : vector<2x128x128xf32>
    %cst_54 = arith.constant 0.000000e+00 : f32
    %130 = vector.broadcast %cst_54 : f32 to vector<2x128x128xf32>
    %131 = arith.cmpf ogt, %129, %130 : vector<2x128x128xf32>
    %cst_55 = arith.constant 2.000000e-01 : f32
    %132 = vector.broadcast %cst_55 : f32 to vector<2x128x128xf32>
    %133 = arith.mulf %132, %129 : vector<2x128x128xf32>
    %134 = arith.select %131, %129, %133 : vector<2x128x128xi1>, vector<2x128x128xf32>
    %cst_56 = arith.constant 0.000000e+00 : f32
    %135 = vector.broadcast %cst_56 : f32 to vector<2x128x128xf32>
    %136 = arith.cmpf ogt, %4, %135 : vector<2x128x128xf32>
    %cst_57 = arith.constant -9.000000e+15 : f32
    %137 = vector.broadcast %cst_57 : f32 to vector<2x128x128xf32>
    %138 = arith.select %136, %134, %137 : vector<2x128x128xi1>, vector<2x128x128xf32>
    %cst_58 = arith.constant dense<0xFF800000> : vector<2x128xf32>
    %139 = vector.multi_reduction <maximumf>, %138, %cst_58 [2] : vector<2x128x128xf32> to vector<2x128xf32>
    %140 = vector.shape_cast %139 : vector<2x128xf32> to vector<2x128x1xf32>
    %141 = vector.broadcast %140 : vector<2x128x1xf32> to vector<2x128x128xf32>
    %142 = arith.subf %138, %141 : vector<2x128x128xf32>
    %143 = math.exp %142 : vector<2x128x128xf32>
    %cst_59 = arith.constant dense<0.000000e+00> : vector<2x128xf32>
    %144 = vector.multi_reduction <add>, %143, %cst_59 [2] : vector<2x128x128xf32> to vector<2x128xf32>
    %145 = vector.shape_cast %144 : vector<2x128xf32> to vector<2x128x1xf32>
    %146 = tpu.reciprocal %145 {approx = true} : vector<2x128x1xf32> -> vector<2x128x1xf32>
    %147 = vector.broadcast %146 : vector<2x128x1xf32> to vector<2x128x128xf32>
    %148 = arith.mulf %143, %147 : vector<2x128x128xf32>
    %149 = arith.truncf %148 : vector<2x128x128xf32> to vector<2x128x128xbf16>
    %150 = arith.truncf %118 : vector<2x128x128xf32> to vector<2x128x128xbf16>
    "tpu.trace_start"() <{level = 10 : i32, message = "bne,bed->bnd"}> : () -> ()
    %cst_60 = arith.constant dense<0.000000e+00> : vector<2x128x128xf32>
    %151 = tpu.matmul %149, %150, %cst_60 {dimension_numbers = #tpu.dot_dimension_numbers<[2], [1], [1], [2], [0, 0, 0, 1, 1, 2], [0], [0]>} : vector<2x128x128xbf16>, vector<2x128x128xbf16>, vector<2x128x128xf32> -> vector<2x128x128xf32>
    "tpu.trace_stop"() : () -> ()
    %c0_61 = arith.constant 0 : index
    %c0_62 = arith.constant 0 : index
    %c0_63 = arith.constant 0 : index
    %152 = vector.load %arg12[%c0_61, %c0_62, %c0_63] : memref<2x128x128xf32, #tpu.memory_space<vmem>>, vector<2x128x128xf32>
    tpu.vector_store %arg12[%c0_61, %c0_62, %c0_63], %151 {strides = array<i32>} : memref<2x128x128xf32, #tpu.memory_space<vmem>>, vector<2x128x128xf32>,
    %c0_64 = arith.constant 0 : index
    %c0_65 = arith.constant 0 : index
    %c0_66 = arith.constant 0 : index
    %153 = vector.load %arg13[%c0_64, %c0_65, %c0_66] : memref<2x128x128xf32, #tpu.memory_space<vmem>>, vector<2x128x128xf32>
    tpu.vector_store %arg13[%c0_64, %c0_65, %c0_66], %148 {strides = array<i32>} : memref<2x128x128xf32, #tpu.memory_space<vmem>>, vector<2x128x128xf32>,
    return
  }
  func.func @transform_0(%arg0: i32) -> (i32, i32, i32) {
    %c0_i32 = arith.constant 0 : i32
    %c0_i32_0 = arith.constant 0 : i32
    %c0_i32_1 = arith.constant 0 : i32
    return %arg0, %c0_i32, %c0_i32_0 : i32, i32, i32
  }
  func.func @transform_1(%arg0: i32) -> (i32, i32, i32) {
    %c0_i32 = arith.constant 0 : i32
    %c0_i32_0 = arith.constant 0 : i32
    %c0_i32_1 = arith.constant 0 : i32
    return %arg0, %c0_i32, %c0_i32_0 : i32, i32, i32
  }
  func.func @transform_2(%arg0: i32) -> (i32, i32, i32) {
    %c0_i32 = arith.constant 0 : i32
    %c0_i32_0 = arith.constant 0 : i32
    %c0_i32_1 = arith.constant 0 : i32
    return %arg0, %c0_i32, %c0_i32_0 : i32, i32, i32
  }
  func.func @transform_3(%arg0: i32) -> (i32, i32) {
    %c0_i32 = arith.constant 0 : i32
    %c0_i32_0 = arith.constant 0 : i32
    %c0_i32_1 = arith.constant 0 : i32
    return %c0_i32, %c0_i32_0 : i32, i32
  }
  func.func @transform_4(%arg0: i32) -> (i32, i32) {
    %c0_i32 = arith.constant 0 : i32
    %c0_i32_0 = arith.constant 0 : i32
    %c0_i32_1 = arith.constant 0 : i32
    return %c0_i32, %c0_i32_0 : i32, i32
  }
  func.func @transform_5(%arg0: i32) -> (i32, i32) {
    %c0_i32 = arith.constant 0 : i32
    %c0_i32_0 = arith.constant 0 : i32
    %c0_i32_1 = arith.constant 0 : i32
    return %c0_i32, %c0_i32_0 : i32, i32
  }
  func.func @transform_6(%arg0: i32) -> (i32, i32) {
    %c0_i32 = arith.constant 0 : i32
    %c0_i32_0 = arith.constant 0 : i32
    %c0_i32_1 = arith.constant 0 : i32
    return %c0_i32, %c0_i32_0 : i32, i32
  }
  func.func @transform_7(%arg0: i32) -> (i32, i32) {
    %c0_i32 = arith.constant 0 : i32
    %c0_i32_0 = arith.constant 0 : i32
    %c0_i32_1 = arith.constant 0 : i32
    return %c0_i32, %c0_i32_0 : i32, i32
  }
  func.func @transform_8(%arg0: i32) -> (i32, i32) {
    %c0_i32 = arith.constant 0 : i32
    %c0_i32_0 = arith.constant 0 : i32
    %c0_i32_1 = arith.constant 0 : i32
    return %c0_i32, %c0_i32_0 : i32, i32
  }
  func.func @transform_9(%arg0: i32) -> (i32, i32) {
    %c0_i32 = arith.constant 0 : i32
    %c0_i32_0 = arith.constant 0 : i32
    %c0_i32_1 = arith.constant 0 : i32
    return %c0_i32, %c0_i32_0 : i32, i32
  }
  func.func @transform_10(%arg0: i32) -> (i32, i32) {
    %c0_i32 = arith.constant 0 : i32
    %c0_i32_0 = arith.constant 0 : i32
    %c0_i32_1 = arith.constant 0 : i32
    return %c0_i32, %c0_i32_0 : i32, i32
  }
  func.func @transform_11(%arg0: i32) -> (i32, i32, i32) {
    %c0_i32 = arith.constant 0 : i32
    %c0_i32_0 = arith.constant 0 : i32
    %c0_i32_1 = arith.constant 0 : i32
    return %arg0, %c0_i32, %c0_i32_0 : i32, i32, i32
  }
  func.func @transform_12(%arg0: i32) -> (i32, i32, i32) {
    %c0_i32 = arith.constant 0 : i32
    %c0_i32_0 = arith.constant 0 : i32
    %c0_i32_1 = arith.constant 0 : i32
    return %arg0, %c0_i32, %c0_i32_0 : i32, i32, i32
  }
}

</mosaic_0001>

<bundles_post_ra>
// kernel: tpu_custom_call.1
= control target key start
LH: loop header
LB: loop body
LE: loop exit
PB: predicated region body
PF: predicated region fallthrough
CT: control target
= control target key end

     0   :  { %18 = vsyncpa [#allocation3], 0  ;;  %s10651_s0 = inlined_call_operand.vmem [shape: f32[2,128,128], index: 0, kind: input, shape index: {}]   ;;  %s10652_s1 = inlined_call_operand.hbm [shape: bf16[2,128,128], index: 1, kind: input, shape index: {}]   ;;  %s10653_s2 = inlined_call_operand.hbm [shape: bf16[2,128,128], index: 2, kind: input, shape index: {}]   ;;  %s10654_s3 = inlined_call_operand.vmem [shape: f32[1,128], index: 3, kind: input, shape index: {}]   ;;  %s10655_s4 = inlined_call_operand.vmem [shape: f32[128,1], index: 4, kind: input, shape index: {}]   ;;  %s10656_s5 = inlined_call_operand.vmem [shape: f32[1,128], index: 5, kind: input, shape index: {}]   ;;  %s10657_s6 = inlined_call_operand.hbm [shape: f32[128,128], index: 6, kind: input, shape index: {}]   ;;  %s10658_s7 = inlined_call_operand.vmem [shape: f32[1,128], index: 7, kind: input, shape index: {}]   ;;  %s10659_s8 = inlined_call_operand.vmem [shape: f32[1,128], index: 8, kind: input, shape index: {}]   ;;  %s10660_s9 = inlined_call_operand.vmem [shape: f32[128,1], index: 9, kind: input, shape index: {}]   ;;  %s10661_s10 = inlined_call_operand.vmem [shape: f32[1,128], index: 10, kind: input, shape index: {}]   ;;  %s10662_s11 = inlined_call_operand.hbm [shape: f32[2,128,128], index: 11, kind: output, shape index: {0}]   ;;  %s10663_s12 = inlined_call_operand.hbm [shape: f32[2,128,128], index: 12, kind: output, shape index: {1}]  }
   0x1   :  { %19 = vsyncpa [#allocation6], 0 }
   0x2   :  { %20 = vsyncpa [#allocation4], 0 }
   0x3   :  { %21 = vsyncpa [#allocation10], 0  ;;  %s7215_s21 = smov [#allocation5]   ;;  %s7216_s23 = smov [#allocation2]  }
   0x4   :  { %s41_s22 = sshll.u32 %s7215_s21, 4  ;;  %s29_s24 = sshll.u32 %s7216_s23, 4  ;;  %s42_s22 = int_to_ptr.vmem [resolvable:$true] %s41_s22  ;;  %s7290_s24 = int_to_ptr.vmem [resolvable:$true] %s29_s24 }
   0x5   :  { %s7097_s27 = scalar_lea.hbm %s10653_s2, 2048 }
   0x6   :  { %p7098_p0 = scmp.ne.s32.totalorder %s10653_s2, %s7097_s27  ;;  %p7101_p1 = scmp.lt.u32.totalorder %s7097_s27, %s10653_s2 }
   0x8   :  { %p7103_p2 = pnand %p7101_p1, %p7098_p0 }
   0xa   :  { %7106 = shalt.err (!%p7103_p2)
}
   0xb   :  { %s7107_s14 = scalar_lea.vmem %s42_s22, 2048  ;;  %p7112_p4 = scmp.lt.s32.totalorder %s42_s22, %s42_s22 }
   0xc   :  { %p7108_p3 = scmp.ne.s32.totalorder %s42_s22, %s7107_s14  ;;  %p7113_p5 = scmp.lt.s32.totalorder %s7107_s14, %s7107_s14 }
   0xe   :  { %p7114_p6 = por %p7113_p5, %p7112_p4 }
  0x10   :  { %p7115_p7 = pnand %p7114_p6, %p7108_p3 }
  0x12   :  { %7118 = shalt.err (!%p7115_p7)
}
  0x13   :  { %s7217_s15 = smov 64   ;;  %s7218_s16 = smov 4  }
  0x14   :  { %47 = dma.hbm_to_vmem [thread:$0]  %s10653_s2, 2048, %s42_s22, [#allocation6], %s7217_s15, %s7217_s15, %s7218_s16  }
  0x15   :  { %s7119_s21 = scalar_lea.hbm %s10652_s1, 2048 }
  0x16   :  { %p7120_p8 = scmp.ne.s32.totalorder %s10652_s1, %s7119_s21  ;;  %p7123_p9 = scmp.lt.u32.totalorder %s7119_s21, %s10652_s1 }
  0x18   :  { %p7125_p10 = pnand %p7123_p9, %p7120_p8 }
  0x1a   :  { %7128 = shalt.err (!%p7125_p10)
}
  0x1b   :  { %s7129_s28 = scalar_lea.vmem %s7290_s24, 2048  ;;  %p7134_p12 = scmp.lt.s32.totalorder %s7290_s24, %s7290_s24 }
  0x1c   :  { %p7130_p11 = scmp.ne.s32.totalorder %s7290_s24, %s7129_s28  ;;  %p7135_p13 = scmp.lt.s32.totalorder %s7129_s28, %s7129_s28 }
  0x1e   :  { %p7136_p0 = por %p7135_p13, %p7134_p12 }
  0x20   :  { %p7137_p1 = pnand %p7136_p0, %p7130_p11 }
  0x22   :  { %7140 = shalt.err (!%p7137_p1)
}
  0x23   :  { %35 = dma.hbm_to_vmem [thread:$0]  %s10652_s1, 2048, %s7290_s24, [#allocation3], %s7217_s15, %s7217_s15, %s7218_s16  }
  0x24   :  { %s7219_s29 = smov [#allocation7]   ;;  %s7141_s17 = scalar_lea.hbm %s10657_s6, 2048 }
  0x25   :  { %s59_s30 = sshll.u32 %s7219_s29, 4  ;;  %p7142_p2 = scmp.ne.s32.totalorder %s10657_s6, %s7141_s17  ;;  %s60_s30 = int_to_ptr.vmem [resolvable:$true] %s59_s30 }
  0x26   :  { %p7145_p3 = scmp.lt.u32.totalorder %s7141_s17, %s10657_s6 }
  0x28   :  { %p7147_p4 = pnand %p7145_p3, %p7142_p2 }
  0x2a   :  { %7150 = shalt.err (!%p7147_p4)
}
  0x2b   :  { %s7151_s23 = scalar_lea.vmem %s60_s30, 2048  ;;  %p7156_p6 = scmp.lt.s32.totalorder %s60_s30, %s60_s30 }
  0x2c   :  { %p7152_p5 = scmp.ne.s32.totalorder %s60_s30, %s7151_s23  ;;  %p7157_p7 = scmp.lt.s32.totalorder %s7151_s23, %s7151_s23 }
  0x2e   :  { %p7158_p8 = por %p7157_p7, %p7156_p6 }
  0x30   :  { %p7159_p9 = pnand %p7158_p8, %p7152_p5 }
  0x32   :  { %7162 = shalt.err (!%p7159_p9)
}
  0x33   :  { %s7220_s1 = smov 128   ;;  %s7221_s24 = smov 8  }
  0x34   :  { %65 = dma.hbm_to_vmem [thread:$0]  %s10657_s6, 2048, %s60_s30, [#allocation6], %s7220_s1, %s7220_s1, %s7221_s24  }
  0x35   :  { %7207 = dma.done.wait [#allocation3], 2048  }
  0x36   :  { %7208 = vsyncadd [#allocation3], 4294965248 }
  0x37   :  { %7209 = dma.done.wait [#allocation6], 4096  }
  0x38   :  { %7210 = vsyncadd [#allocation6], 4294963200  ;;  %v7339_v0 = vld [vmem:[%s10651_s0 + $0x10] sm:$0xff]  ;;  %v7344_v1 = vld [vmem:[%s10654_s3] ss:$0 sm:$0xff]  ;;  %vm10671_vm2 = vcmask 130112  }
  0x39   :  { %v7349_v2 = vld [vmem:[%s10651_s0] sm:$0xff]  ;;  %v270_v3 = vmul.f32 %v7344_v1, %v7339_v0  ;;  %v7358_v5 = vld [vmem:[%s10651_s0 + $0x18] sm:$0xff]  ;;  %v7363_v6 = vld [vmem:[%s10651_s0 + $0x8] sm:$0xff]  ;;  %vm10674_vm5 = vcmask 195712   ;;  %vm10673_vm6 = vcmask 261312   ;;  %vm10676_vm7 = vcmask 326912  }
  0x3a   :  { %v268_v4 = vmul.f32 %v7344_v1, %v7349_v2  ;;  %v271_v7 = vmul.f32 %v7344_v1, %v7358_v5  ;;  %v269_v8 = vmul.f32 %v7344_v1, %v7363_v6  ;;  %v7372_v9 = vld [vmem:[%s10651_s0 + $0x28] sm:$0xff]  ;;  %v7377_v10 = vld [vmem:[%s10651_s0 + $0x20] sm:$0xff]  ;;  %v7386_v13 = vld [vmem:[%s10651_s0 + $0x38] sm:$0xff]  ;;  %vm10675_vm10 = vcmask 392512  }
  0x3b   :  { %304 = vadd.xlane.f32.xlu1 %v270_v3  ;;  %v273_v11 = vmul.f32 %v7344_v1, %v7372_v9  ;;  %v272_v12 = vmul.f32 %v7344_v1, %v7377_v10  ;;  %v7391_v14 = vld [vmem:[%s10651_s0 + $0x30] sm:$0xff]  ;;  %v275_v15 = vmul.f32 %v7344_v1, %v7386_v13  ;;  %v93_v17 = vld [vmem:[%s10651_s0 + $0x48] sm:$0xff]  ;;  %v92_v18 = vld [vmem:[%s10651_s0 + $0x40] sm:$0xff]  ;;  %vm10677_vm13 = vcmask 458112  }
  0x3c   :  { %300 = vadd.xlane.f32.xlu0 %v268_v4  ;;  %v274_v16 = vmul.f32 %v7344_v1, %v7391_v14  ;;  %v277_v19 = vmul.f32 %v7344_v1, %v93_v17  ;;  %v276_v20 = vmul.f32 %v7344_v1, %v92_v18  ;;  %v95_v21 = vld [vmem:[%s10651_s0 + $0x58] sm:$0xff]  ;;  %v94_v22 = vld [vmem:[%s10651_s0 + $0x50] sm:$0xff]  ;;  %v97_v25 = vld [vmem:[%s10651_s0 + $0x68] sm:$0xff]  ;;  %v524_v4 = vlaneseq }
  0x3d   :  { %v279_v23 = vmul.f32 %v7344_v1, %v95_v21  ;;  %v278_v24 = vmul.f32 %v7344_v1, %v94_v22  ;;  %v96_v26 = vld [vmem:[%s10651_s0 + $0x60] sm:$0xff]  ;;  %v281_v27 = vmul.f32 %v7344_v1, %v97_v25  ;;  %v99_v29 = vld [vmem:[%s10651_s0 + $0x78] sm:$0xff]  ;;  %v98_v30 = vld [vmem:[%s10651_s0 + $0x70] sm:$0xff]  ;;  %vm10678_vm14 = vcmask 523712  }
  0x3e   :  { %v280_v28 = vmul.f32 %v7344_v1, %v96_v26  ;;  %v283_v31 = vmul.f32 %v7344_v1, %v99_v29  ;;  %v282_v32 = vmul.f32 %v7344_v1, %v98_v30  ;;  %v101_v33 = vld [vmem:[%s10651_s0 + $0x88] sm:$0xff]  ;;  %v100_v34 = vld [vmem:[%s10651_s0 + $0x80] sm:$0xff]  ;;  %v103_v37 = vld [vmem:[%s10651_s0 + $0x98] sm:$0xff] }
  0x3f   :  { %306 = vadd.xlane.f32.xlu1 %v271_v7  ;;  %v285_v35 = vmul.f32 %v7344_v1, %v101_v33  ;;  %v284_v36 = vmul.f32 %v7344_v1, %v100_v34  ;;  %v102_v38 = vld [vmem:[%s10651_s0 + $0x90] sm:$0xff]  ;;  %v287_v39 = vmul.f32 %v7344_v1, %v103_v37  ;;  %v105_v41 = vld [vmem:[%s10651_s0 + $0xa8] sm:$0xff]  ;;  %v104_v42 = vld [vmem:[%s10651_s0 + $0xa0] sm:$0xff]  ;;  %v7493_v7 = vand.u32 127, %v524_v4 }
  0x40   :  { %302 = vadd.xlane.f32.xlu0 %v269_v8  ;;  %v286_v40 = vmul.f32 %v7344_v1, %v102_v38  ;;  %v289_v43 = vmul.f32 %v7344_v1, %v105_v41  ;;  %v288_v44 = vmul.f32 %v7344_v1, %v104_v42  ;;  %v107_v45 = vld [vmem:[%s10651_s0 + $0xb8] sm:$0xff]  ;;  %v106_v46 = vld [vmem:[%s10651_s0 + $0xb0] sm:$0xff]  ;;  %v109_v49 = vld [vmem:[%s10651_s0 + $0xc8] sm:$0xff]  ;;  %v7495_v8 = vshrl.u32 %v524_v4, 7 }
  0x41   :  { %v291_v47 = vmul.f32 %v7344_v1, %v107_v45  ;;  %v290_v48 = vmul.f32 %v7344_v1, %v106_v46  ;;  %v108_v50 = vld [vmem:[%s10651_s0 + $0xc0] sm:$0xff]  ;;  %v293_v51 = vmul.f32 %v7344_v1, %v109_v49  ;;  %v111_v53 = vld [vmem:[%s10651_s0 + $0xd8] sm:$0xff]  ;;  %v110_v54 = vld [vmem:[%s10651_s0 + $0xd0] sm:$0xff]  ;;  %v572_v29 = vadd.s32 4294967240, %v7493_v7 }
  0x42   :  { %v292_v52 = vmul.f32 %v7344_v1, %v108_v50  ;;  %v295_v55 = vmul.f32 %v7344_v1, %v111_v53  ;;  %v294_v56 = vmul.f32 %v7344_v1, %v110_v54  ;;  %v113_v57 = vld [vmem:[%s10651_s0 + $0xe8] sm:$0xff]  ;;  %v112_v58 = vld [vmem:[%s10651_s0 + $0xe0] sm:$0xff]  ;;  %v115_v61 = vld [vmem:[%s10651_s0 + $0xf8] sm:$0xff]  ;;  %v7507_v22 = vsub.s32 %v7493_v7, %v7495_v8 }
  0x43   :  { %310 = vadd.xlane.f32.xlu1 %v273_v11  ;;  %v297_v59 = vmul.f32 %v7344_v1, %v113_v57  ;;  %v296_v60 = vmul.f32 %v7344_v1, %v112_v58  ;;  %v114_v62 = vld [vmem:[%s10651_s0 + $0xf0] sm:$0xff]  ;;  %v299_v63 = vmul.f32 %v7344_v1, %v115_v61  ;;  %v537_v11 = vadd.s32 4294967280, %v7493_v7 }
  0x44   :  { %308 = vadd.xlane.f32.xlu0 %v272_v12  ;;  %v298_v3 = vmul.f32 %v7344_v1, %v114_v62  ;;  %v544_v12 = vadd.s32 4294967272, %v7493_v7  ;;  %v558_v1 = vadd.s32 4294967256, %v7493_v7  ;;  %10881 = vst [vmem:[#allocation16_spill] sm:$0xff] %v7507_v22  ;;  %v7527_v42 = vsub.s32 %v572_v29, %v7495_v8 }
  0x45   :  { %v7503_v21 = vsub.s32 %v537_v11, %v7495_v8  ;;  %v579_v57 = vadd.s32 4294967232, %v7493_v7  ;;  %v600_v62 = vadd.s32 4294967208, %v7493_v7  ;;  %v593_v4 = vadd.s32 4294967216, %v7493_v7 }
  0x46   :  { %10886 = vst [vmem:[#allocation21_spill] sm:$0xff] %v7527_v42 }
  0x47   :  { %314 = vadd.xlane.f32.xlu1 %v275_v15  ;;  %v530_v15 = vadd.s32 4294967288, %v7493_v7  ;;  %10880 = vst [vmem:[#allocation15_spill] sm:$0xff] %v7503_v21  ;;  %v7558_v29 = vsub.s32 %v593_v4, %v7495_v8 }
  0x48   :  { %312 = vadd.xlane.f32.xlu0 %v274_v16 }
  0x49   :  { %10891 = vst [vmem:[#allocation26_spill] sm:$0xff] %v7558_v29 }
  0x4b   :  { %318 = vadd.xlane.f32.xlu1 %v277_v19 }
  0x4c   :  { %316 = vadd.xlane.f32.xlu0 %v276_v20  ;;  %v551_v20 = vadd.s32 4294967264, %v7493_v7 }
  0x4e   :  { %v7520_v33 = vsub.s32 %v551_v20, %v7495_v8 }
  0x4f   :  { %322 = vadd.xlane.f32.xlu1 %v279_v23  ;;  %v7510_v23 = vsub.s32 %v544_v12, %v7495_v8 }
  0x50   :  { %320 = vadd.xlane.f32.xlu0 %v278_v24  ;;  %v7513_v24 = vsub.s32 %v530_v15, %v7495_v8  ;;  %10885 = vst [vmem:[#allocation20_spill] sm:$0xff] %v7520_v33 }
  0x51   :  { %10882 = vst [vmem:[#allocation17_spill] sm:$0xff] %v7510_v23 }
  0x52   :  { %10883 = vst [vmem:[#allocation18_spill] sm:$0xff] %v7513_v24 }
  0x53   :  { %326 = vadd.xlane.f32.xlu1 %v281_v27 }
  0x54   :  { %324 = vadd.xlane.f32.xlu0 %v280_v28 }
  0x57   :  { %330 = vadd.xlane.f32.xlu1 %v283_v31 }
  0x58   :  { %328 = vadd.xlane.f32.xlu0 %v282_v32  ;;  %v7517_v32 = vsub.s32 %v558_v1, %v7495_v8 }
  0x5a   :  { %10884 = vst [vmem:[#allocation19_spill] sm:$0xff] %v7517_v32 }
  0x5b   :  { %334 = vadd.xlane.f32.xlu1 %v285_v35 }
  0x5c   :  { %332 = vadd.xlane.f32.xlu0 %v284_v36  ;;  %v565_v36 = vadd.s32 4294967248, %v7493_v7 }
  0x5f   :  { %338 = vadd.xlane.f32.xlu1 %v287_v39 }
  0x60   :  { %336 = vadd.xlane.f32.xlu0 %v286_v40 }
  0x63   :  { %342 = vadd.xlane.f32.xlu1 %v289_v43 }
  0x64   :  { %340 = vadd.xlane.f32.xlu0 %v288_v44 }
  0x67   :  { %346 = vadd.xlane.f32.xlu1 %v291_v47  ;;  %v586_v47 = vadd.s32 4294967224, %v7493_v7 }
  0x68   :  { %344 = vadd.xlane.f32.xlu0 %v290_v48 }
  0x69   :  { %v7542_v61 = vsub.s32 %v586_v47, %v7495_v8 }
  0x6b   :  { %350 = vadd.xlane.f32.xlu1 %v293_v51  ;;  %v7534_v51 = vsub.s32 %v565_v36, %v7495_v8  ;;  %10888 = vst [vmem:[#allocation23_spill] sm:$0xff] %v7542_v61 }
  0x6c   :  { %348 = vadd.xlane.f32.xlu0 %v292_v52 }
  0x6d   :  { %10887 = vst [vmem:[#allocation22_spill] sm:$0xff] %v7534_v51 }
  0x6f   :  { %354 = vadd.xlane.f32.xlu1 %v295_v55 }
  0x70   :  { %352 = vadd.xlane.f32.xlu0 %v294_v56 }
  0x73   :  { %358 = vadd.xlane.f32.xlu1 %v297_v59 }
  0x74   :  { %356 = vadd.xlane.f32.xlu0 %v296_v60 }
  0x77   :  { %362 = vadd.xlane.f32.xlu1 %v299_v63 }
  0x78   :  { %360 = vadd.xlane.f32.xlu0 %v298_v3 }
  0xc8   :  { %v305_v16 = vpop.xlane.xlu1 %304 }
  0xc9   :  { %v301_v17 = vpop.xlane.xlu0 %300  ;;  %vm366_vm0 = vcmp.gt.f32.partialorder %v305_v16, 0.0  ;;  %v398_v18 = vmul.f32 0.2, %v305_v16 }
  0xca   :  { %vm364_vm1 = vcmp.gt.f32.partialorder %v301_v17, 0.0  ;;  %v396_v19 = vmul.f32 0.2, %v301_v17 }
  0xcb   :  { %v430_v25 = vsel %vm366_vm0, %v305_v16, %v398_v18 }
  0xcc   :  { %v428_v26 = vsel %vm364_vm1, %v301_v17, %v396_v19  ;;  %v307_v27 = vpop.xlane.xlu1 %306  ;;  %v541_v37 = vrot.slane %v430_v25, %v7503_v21  ;;  %v7550_v17 = vsub.s32 %v579_v57, %v7495_v8  ;;  %vm10672_vm1 = vcmask 589312  }
  0xcd   :  { %v303_v28 = vpop.xlane.xlu0 %302  ;;  %vm367_vm3 = vcmp.gt.f32.partialorder %v307_v27, 0.0  ;;  %v399_v30 = vmul.f32 0.2, %v307_v27  ;;  %v529_v38 = vrot.slane %v428_v26, %v7507_v22  ;;  %v7554_v25 = vsub.s32 %v600_v62, %v7495_v8 }
  0xce   :  { %vm365_vm4 = vcmp.gt.f32.partialorder %v303_v28, 0.0  ;;  %v397_v31 = vmul.f32 0.2, %v303_v28  ;;  %10889 = vst [vmem:[#allocation24_spill] sm:$0xff] %v7550_v17  ;;  %v614_v26 = vadd.s32 4294967192, %v7493_v7 }
  0xcf   :  { %v431_v34 = vsel %vm367_vm3, %v307_v27, %v399_v30  ;;  %10890 = vst [vmem:[#allocation25_spill] sm:$0xff] %v7554_v25  ;;  %vm10665_vm3 = vcmask 654912  }
  0xd0   :  { %v429_v35 = vsel %vm365_vm4, %v303_v28, %v397_v31  ;;  %v311_v40 = vpop.xlane.xlu1 %310  ;;  %v548_v45 = vrot.slane %v431_v34, %v7510_v23 }
  0xd1   :  { %v534_v39 = vrot.slane %v429_v35, %v7513_v24  ;;  %v309_v41 = vpop.xlane.xlu0 %308  ;;  %vm369_vm8 = vcmp.gt.f32.partialorder %v311_v40, 0.0  ;;  %v401_v43 = vmul.f32 0.2, %v311_v40 }
  0xd2   :  { %vm368_vm9 = vcmp.gt.f32.partialorder %v309_v41, 0.0  ;;  %v400_v44 = vmul.f32 0.2, %v309_v41 }
  0xd3   :  { %v536_v46 = vsel %vm10671_vm2, %v534_v39, %v529_v38  ;;  %v433_v49 = vsel %vm369_vm8, %v311_v40, %v401_v43  ;;  %v628_v43 = vadd.s32 4294967176, %v7493_v7 }
  0xd4   :  { %v543_v48 = vsel %vm10674_vm5, %v541_v37, %v536_v46  ;;  %v432_v50 = vsel %vm368_vm9, %v309_v41, %v400_v44  ;;  %v562_v52 = vrot.slane %v433_v49, %v7517_v32  ;;  %v315_v55 = vpop.xlane.xlu1 %314  ;;  %v607_v37 = vadd.s32 4294967200, %v7493_v7 }
  0xd5   :  { %v550_v53 = vsel %vm10673_vm6, %v548_v45, %v543_v48  ;;  %v555_v54 = vrot.slane %v432_v50, %v7520_v33  ;;  %v313_v56 = vpop.xlane.xlu0 %312  ;;  %vm371_vm11 = vcmp.gt.f32.partialorder %v315_v55, 0.0  ;;  %v403_v58 = vmul.f32 0.2, %v315_v55 }
  0xd6   :  { %vm370_vm12 = vcmp.gt.f32.partialorder %v313_v56, 0.0  ;;  %v402_v59 = vmul.f32 0.2, %v313_v56  ;;  %vm10664_vm9 = vcmask 720512   ;;  %v7566_v41 = vsub.s32 %v614_v26, %v7495_v8 }
  0xd7   :  { %v557_v60 = vsel %vm10676_vm7, %v555_v54, %v550_v53  ;;  %v435_v63 = vsel %vm371_vm11, %v315_v55, %v403_v58  ;;  %vm10667_vm11 = vcmask 786112   ;;  %v621_v46 = vadd.s32 4294967184, %v7493_v7  ;;  %v5544_v54 = vld [vmem:[#allocation2] sm:$0xff]  }
  0xd8   :  { %v434_v3 = vsel %vm370_vm12, %v313_v56, %v402_v59  ;;  %v576_v11 = vrot.slane %v435_v63, %v7527_v42  ;;  %v564_v12 = vsel %vm10675_vm10, %v562_v52, %v557_v60  ;;  %v319_v16 = vpop.xlane.xlu1 %318  ;;  %10892 = vst [vmem:[#allocation27_spill] sm:$0xff] %v7566_v41  ;;  %v7574_v52 = vsub.s32 %v607_v37, %v7495_v8  ;;  %v5671_v63 = vld [vmem:[#allocation2 + $0x8] sm:$0xff]  }
  0xd9   :  { %v569_v15 = vrot.slane %v434_v3, %v7534_v51  ;;  %v317_v18 = vpop.xlane.xlu0 %316  ;;  %vm373_vm15 = vcmp.gt.f32.partialorder %v319_v16, 0.0  ;;  %v405_v19 = vmul.f32 0.2, %v319_v16  ;;  %v7578_v7 = vsub.s32 %v628_v43, %v7495_v8 }
  0xda   :  { %vm372_vm0 = vcmp.gt.f32.partialorder %v317_v18, 0.0  ;;  %v404_v1 = vmul.f32 0.2, %v317_v18  ;;  %10893 = vst [vmem:[#allocation28_spill] sm:$0xff] %v7574_v52  ;;  %v7581_v60 = vsub.s32 %v621_v46, %v7495_v8  ;;  %v5546_v62 = vunpack.c.h.bf16 %v5544_v54 }
  0xdb   :  { %v571_v20 = vsel %vm10677_vm13, %v569_v15, %v564_v12  ;;  %v437_v27 = vsel %vm373_vm15, %v319_v16, %v405_v19  ;;  %10894 = vst [vmem:[#allocation29_spill] sm:$0xff] %v7578_v7  ;;  %v5545_v16 = vunpack.c.l.bf16 %v5544_v54  ;;  %v5550_v8 = vunpack.c.h.bf16 %v5671_v63 }
  0xdc   :  { %v436_v28 = vsel %vm372_vm0, %v317_v18, %v404_v1  ;;  %v590_v30 = vrot.slane %v437_v27, %v7542_v61  ;;  %v578_v31 = vsel %vm10678_vm14, %v576_v11, %v571_v20  ;;  %v323_v35 = vpop.xlane.xlu1 %322  ;;  %vm10666_vm0 = vcmask 851712   ;;  %10895 = vst [vmem:[#allocation30_spill] sm:$0xff] %v7581_v60 }
  0xdd   :  { %v583_v34 = vrot.slane %v436_v28, %v7550_v17  ;;  %v321_v36 = vpop.xlane.xlu0 %320  ;;  %vm375_vm4 = vcmp.gt.f32.partialorder %v323_v35, 0.0  ;;  %v407_v38 = vmul.f32 0.2, %v323_v35  ;;  %v10896_v27 = vmov 0 }
  0xde   :  { %vm374_vm8 = vcmp.gt.f32.partialorder %v321_v36, 0.0  ;;  %v406_v39 = vmul.f32 0.2, %v321_v36  ;;  %v5549_v28 = vunpack.c.l.bf16 %v5671_v63 }
  0xdf   :  { %v585_v40 = vsel %vm10672_vm1, %v583_v34, %v578_v31  ;;  %v439_v44 = vsel %vm375_vm4, %v323_v35, %v407_v38  ;;  %vm10668_vm4 = vcmask 917312   ;;  %v10899_v38 = vmov 0 }
  0xe0   :  { %v438_v45 = vsel %vm374_vm8, %v321_v36, %v406_v39  ;;  %v604_v47 = vrot.slane %v439_v44, %v7554_v25  ;;  %v592_v48 = vsel %vm10665_vm3, %v590_v30, %v585_v40  ;;  %v327_v50 = vpop.xlane.xlu1 %326  ;;  %vm7587_vm3 = vcmp.gt.f32.partialorder %v5546_v62, 0.0  ;;  %v5672_v30 = vld [vmem:[#allocation2 + $0x10] sm:$0xff]  }
  0xe1   :  { %v597_v49 = vrot.slane %v438_v45, %v7558_v29  ;;  %v325_v53 = vpop.xlane.xlu0 %324  ;;  %vm377_vm12 = vcmp.gt.f32.partialorder %v327_v50, 0.0  ;;  %v409_v55 = vmul.f32 0.2, %v327_v50  ;;  %v10897_v27 = vsel %vm7587_vm3, 4294967295, %v10896_v27 }
  0xe2   :  { %vm376_vm15 = vcmp.gt.f32.partialorder %v325_v53, 0.0  ;;  %v408_v56 = vmul.f32 0.2, %v325_v53  ;;  %10898 = vst [vmem:[#allocation31_spill] sm:$0xff] %v10897_v27  ;;  %v10902_v44 = vmov 0  ;;  %v5554_v45 = vunpack.c.h.bf16 %v5672_v30 }
  0xe3   :  { %v599_v57 = vsel %vm10664_vm9, %v597_v49, %v592_v48  ;;  %v441_v58 = vsel %vm377_vm12, %v327_v50, %v409_v55  ;;  %vm10670_vm12 = vcmask 982912   ;;  %v5553_v46 = vunpack.c.l.bf16 %v5672_v30 }
  0xe4   :  { %v440_v59 = vsel %vm376_vm15, %v325_v53, %v408_v56  ;;  %v618_v3 = vrot.slane %v441_v58, %v7566_v41  ;;  %v606_v4 = vsel %vm10667_vm11, %v604_v47, %v599_v57  ;;  %v331_v12 = vpop.xlane.xlu1 %330  ;;  %vm10669_vm15 = vcmask 1048512   ;;  %v5673_v53 = vld [vmem:[#allocation2 + $0x18] sm:$0xff]  }
  0xe5   :  { %v611_v11 = vrot.slane %v440_v59, %v7574_v52  ;;  %v329_v15 = vpop.xlane.xlu0 %328  ;;  %vm379_vm8 = vcmp.gt.f32.partialorder %v331_v12, 0.0  ;;  %v411_v18 = vmul.f32 0.2, %v331_v12  ;;  %vm7599_vm11 = vcmp.gt.f32.partialorder %v5550_v8, 0.0 }
  0xe6   :  { %vm378_vm9 = vcmp.gt.f32.partialorder %v329_v15, 0.0  ;;  %v410_v19 = vmul.f32 0.2, %v329_v15  ;;  %v10903_v44 = vsel %vm7599_vm11, 4294967295, %v10902_v44  ;;  %v10905_v50 = vmov 0 }
  0xe7   :  { %v613_v1 = vsel %vm10666_vm0, %v611_v11, %v606_v4  ;;  %v443_v20 = vsel %vm379_vm8, %v331_v12, %v411_v18  ;;  %vm7594_vm0 = vcmp.gt.f32.partialorder %v5545_v16, 0.0  ;;  %10904 = vst [vmem:[#allocation33_spill] sm:$0xff] %v10903_v44  ;;  %v5558_v4 = vunpack.c.h.bf16 %v5673_v53 }
  0xe8   :  { %v442_v26 = vsel %vm378_vm9, %v329_v15, %v410_v19  ;;  %v632_v31 = vrot.slane %v443_v20, %v7578_v7  ;;  %v620_v34 = vsel %vm10668_vm4, %v618_v3, %v613_v1  ;;  %v335_v36 = vpop.xlane.xlu1 %334  ;;  %v10900_v38 = vsel %vm7594_vm0, 4294967295, %v10899_v38  ;;  %v5674_v19 = vld [vmem:[#allocation2 + $0x20] sm:$0xff]  }
  0xe9   :  { %v625_v35 = vrot.slane %v442_v26, %v7581_v60  ;;  %v333_v37 = vpop.xlane.xlu0 %332  ;;  %10901 = vst [vmem:[#allocation32_spill] sm:$0xff] %v10900_v38  ;;  %vm381_vm8 = vcmp.gt.f32.partialorder %v335_v36, 0.0  ;;  %v413_v39 = vmul.f32 0.2, %v335_v36  ;;  %vm7606_vm4 = vcmp.gt.f32.partialorder %v5549_v28, 0.0 }
  0xea   :  { %vm380_vm9 = vcmp.gt.f32.partialorder %v333_v37, 0.0  ;;  %v412_v40 = vmul.f32 0.2, %v333_v37  ;;  %v10906_v50 = vsel %vm7606_vm4, 4294967295, %v10905_v50  ;;  %v10908_v3 = vmov 0 }
  0xeb   :  { %v627_v43 = vsel %vm10670_vm12, %v625_v35, %v620_v34  ;;  %v445_v48 = vsel %vm381_vm8, %v335_v36, %v413_v39  ;;  %10907 = vst [vmem:[#allocation34_spill] sm:$0xff] %v10906_v50  ;;  %v5557_v11 = vunpack.c.l.bf16 %v5673_v53  ;;  %vm7629_vm12 = vcmp.gt.f32.partialorder %v5553_v46, 0.0 }
  0xec   :  { %v7604_v47 = vsel %vm10669_vm15, %v632_v31, %v627_v43  ;;  %v444_v49 = vsel %vm380_vm9, %v333_v37, %v412_v40  ;;  %v642_v54 = vrot.slane %v445_v48, %v7513_v24  ;;  %v339_v56 = vpop.xlane.xlu1 %338  ;;  %vm7624_vm15 = vcmp.gt.f32.partialorder %v5554_v45, 0.0  ;;  %v5675_v48 = vld [vmem:[#allocation2 + $0x28] sm:$0xff]  }
  0xed   :  { %v638_v55 = vrot.slane %v444_v49, %v7507_v22  ;;  %v337_v57 = vpop.xlane.xlu0 %336  ;;  %v7615_v58 = vsel %vm7587_vm3, %v7604_v47, -9e+15  ;;  %v7620_v59 = vsel %vm7594_vm0, %v7604_v47, -9e+15  ;;  %vm383_vm8 = vcmp.gt.f32.partialorder %v339_v56, 0.0 }
  0xee   :  { %v415_v62 = vmul.f32 0.2, %v339_v56  ;;  %vm382_vm9 = vcmp.gt.f32.partialorder %v337_v57, 0.0  ;;  %v414_v63 = vmul.f32 0.2, %v337_v57  ;;  %768 = vmax.xlane.f32.xlu1 %v7615_v58  ;;  %766 = vmax.xlane.f32.xlu0 %v7620_v59  ;;  %v10909_v3 = vsel %vm7624_vm15, 4294967295, %v10908_v3 }
  0xef   :  { %10910 = vst [vmem:[#allocation35_spill] sm:$0xff] %v10909_v3  ;;  %v643_v12 = vsel %vm10671_vm2, %v642_v54, %v638_v55  ;;  %v10911_v18 = vmov 0  ;;  %v7638_v28 = vsel %vm7599_vm11, %v7604_v47, -9e+15  ;;  %v7643_v30 = vsel %vm7606_vm4, %v7604_v47, -9e+15 }
  0xf0   :  { %v447_v15 = vsel %vm383_vm8, %v339_v56, %v415_v62  ;;  %v446_v16 = vsel %vm382_vm9, %v337_v57, %v414_v63  ;;  %v10912_v18 = vsel %vm7629_vm12, 4294967295, %v10911_v18  ;;  %v343_v20 = vpop.xlane.xlu1 %342  ;;  %vm7648_vm2 = vcmp.gt.f32.partialorder %v5558_v4, 0.0  ;;  %v5685_v3 = vld [vmem:[#allocation2 + $0x78] sm:$0xff]  }
  0xf1   :  { %10913 = vst [vmem:[#allocation36_spill] sm:$0xff] %v10912_v18  ;;  %v652_v1 = vrot.slane %v447_v15, %v7510_v23  ;;  %v647_v8 = vrot.slane %v446_v16, %v7503_v21  ;;  %v341_v26 = vpop.xlane.xlu0 %340  ;;  %vm385_vm8 = vcmp.gt.f32.partialorder %v343_v20, 0.0  ;;  %v417_v31 = vmul.f32 0.2, %v343_v20 }
  0xf2   :  { %vm384_vm9 = vcmp.gt.f32.partialorder %v341_v26, 0.0  ;;  %v416_v34 = vmul.f32 0.2, %v341_v26  ;;  %772 = vmax.xlane.f32.xlu1 %v7638_v28  ;;  %770 = vmax.xlane.f32.xlu0 %v7643_v30  ;;  %v10914_v36 = vmov 0  ;;  %v5562_v37 = vunpack.c.h.bf16 %v5674_v19 }
  0xf3   :  { %v648_v35 = vsel %vm10674_vm5, %v647_v8, %v643_v12  ;;  %v10915_v36 = vsel %vm7648_vm2, 4294967295, %v10914_v36  ;;  %v5561_v39 = vunpack.c.l.bf16 %v5674_v19  ;;  %v449_v40 = vsel %vm385_vm8, %v343_v20, %v417_v31  ;;  %v5676_v20 = vld [vmem:[#allocation2 + $0x30] sm:$0xff]  }
  0xf4   :  { %10916 = vst [vmem:[#allocation37_spill] sm:$0xff] %v10915_v36  ;;  %v448_v43 = vsel %vm384_vm9, %v341_v26, %v416_v34  ;;  %v7655_v45 = vsel %vm7624_vm15, %v7604_v47, -9e+15  ;;  %vm7657_vm1 = vcmp.gt.f32.partialorder %v5557_v11, 0.0  ;;  %v10917_v46 = vmov 0  ;;  %v347_v55 = vpop.xlane.xlu1 %346 }
  0xf5   :  { %v10918_v46 = vsel %vm7657_vm1, 4294967295, %v10917_v46  ;;  %v662_v49 = vrot.slane %v449_v40, %v7517_v32  ;;  %v653_v53 = vsel %vm10673_vm6, %v652_v1, %v648_v35  ;;  %v657_v54 = vrot.slane %v448_v43, %v7520_v33  ;;  %v345_v56 = vpop.xlane.xlu0 %344  ;;  %v246_v32 = vld [vmem:[%s10655_s4 + $0x8] sm:$0xff] }
  0xf6   :  { %10919 = vst [vmem:[#allocation38_spill] sm:$0xff] %v10918_v46  ;;  %v7667_v57 = vsel %vm7629_vm12, %v7604_v47, -9e+15  ;;  %vm387_vm8 = vcmp.gt.f32.partialorder %v347_v55, 0.0  ;;  %v419_v62 = vmul.f32 0.2, %v347_v55  ;;  %776 = vmax.xlane.f32.xlu1 %v7655_v45  ;;  %v5566_v15 = vunpack.c.h.bf16 %v5675_v48 }
  0xf7   :  { %vm386_vm9 = vcmp.gt.f32.partialorder %v345_v56, 0.0  ;;  %v418_v63 = vmul.f32 0.2, %v345_v56  ;;  %774 = vmax.xlane.f32.xlu0 %v7667_v57  ;;  %v658_v4 = vsel %vm10676_vm7, %v657_v54, %v653_v53  ;;  %vm7672_vm6 = vcmp.gt.f32.partialorder %v5562_v37, 0.0 }
  0xf8   :  { %v10920_v11 = vmov 0  ;;  %vm7676_vm5 = vcmp.gt.f32.partialorder %v5561_v39, 0.0  ;;  %v10923_v12 = vmov 0  ;;  %v451_v16 = vsel %vm387_vm8, %v347_v55, %v419_v62  ;;  %v351_v35 = vpop.xlane.xlu1 %350 }
  0xf9   :  { %v10921_v11 = vsel %vm7672_vm6, 4294967295, %v10920_v11  ;;  %v10924_v12 = vsel %vm7676_vm5, 4294967295, %v10923_v12  ;;  %v450_v19 = vsel %vm386_vm9, %v345_v56, %v418_v63  ;;  %v7683_v1 = vsel %vm7648_vm2, %v7604_v47, -9e+15  ;;  %v349_v37 = vpop.xlane.xlu0 %348 }
  0xfa   :  { %10922 = vst [vmem:[#allocation39_spill] sm:$0xff] %v10921_v11  ;;  %10925 = vst [vmem:[#allocation40_spill] sm:$0xff] %v10924_v12  ;;  %v5565_v8 = vunpack.c.l.bf16 %v5675_v48  ;;  %v672_v26 = vrot.slane %v451_v16, %v7527_v42  ;;  %v663_v31 = vsel %vm10675_vm10, %v662_v49, %v658_v4  ;;  %v667_v34 = vrot.slane %v450_v19, %v7534_v51  ;;  %v5677_v4 = vld [vmem:[#allocation2 + $0x38] sm:$0xff]   ;;  %v5678_v11 = vld [vmem:[#allocation2 + $0x40] sm:$0xff]  }
  0xfb   :  { %v7691_v39 = vsel %vm7657_vm1, %v7604_v47, -9e+15  ;;  %vm389_vm8 = vcmp.gt.f32.partialorder %v351_v35, 0.0  ;;  %v421_v40 = vmul.f32 0.2, %v351_v35  ;;  %vm388_vm9 = vcmp.gt.f32.partialorder %v349_v37, 0.0  ;;  %780 = vmax.xlane.f32.xlu1 %v7683_v1 }
  0xfc   :  { %v420_v43 = vmul.f32 0.2, %v349_v37  ;;  %778 = vmax.xlane.f32.xlu0 %v7691_v39  ;;  %v668_v48 = vsel %vm10677_vm13, %v667_v34, %v663_v31  ;;  %vm7696_vm10 = vcmp.gt.f32.partialorder %v5566_v15, 0.0  ;;  %v10926_v49 = vmov 0  ;;  %v355_v31 = vpop.xlane.xlu1 %354 }
  0xfd   :  { %v10927_v49 = vsel %vm7696_vm10, 4294967295, %v10926_v49  ;;  %v5570_v53 = vunpack.c.h.bf16 %v5676_v20  ;;  %v5569_v54 = vunpack.c.l.bf16 %v5676_v20  ;;  %v453_v55 = vsel %vm389_vm8, %v351_v35, %v421_v40  ;;  %v353_v20 = vpop.xlane.xlu0 %352 }
  0xfe   :  { %10928 = vst [vmem:[#allocation41_spill] sm:$0xff] %v10927_v49  ;;  %v452_v56 = vsel %vm388_vm9, %v349_v37, %v420_v43  ;;  %v7703_v62 = vsel %vm7672_vm6, %v7604_v47, -9e+15  ;;  %vm7705_vm7 = vcmp.gt.f32.partialorder %v5565_v8, 0.0  ;;  %v10929_v63 = vmov 0 }
  0xff   :  { %v10930_v63 = vsel %vm7705_vm7, 4294967295, %v10929_v63  ;;  %v682_v16 = vrot.slane %v453_v55, %v7542_v61  ;;  %v673_v15 = vsel %vm10678_vm14, %v672_v26, %v668_v48  ;;  %v677_v19 = vrot.slane %v452_v56, %v7550_v17  ;;  %784 = vmax.xlane.f32.xlu1 %v7703_v62  ;;  %v8196_v17 = vld [vmem:[%s10651_s0 + $0xf8] sm:$0xff]  ;;  %v8201_v61 = vld [vmem:[%s10651_s0 + $0xf0] sm:$0xff] }
 0x100   :  { %10931 = vst [vmem:[#allocation42_spill] sm:$0xff] %v10930_v63  ;;  %v7715_v34 = vsel %vm7676_vm5, %v7604_v47, -9e+15  ;;  %vm391_vm8 = vcmp.gt.f32.partialorder %v355_v31, 0.0  ;;  %v423_v35 = vmul.f32 0.2, %v355_v31  ;;  %v5574_v40 = vunpack.c.h.bf16 %v5677_v4  ;;  %v359_v46 = vpop.xlane.xlu1 %358 }
 0x101   :  { %vm390_vm9 = vcmp.gt.f32.partialorder %v353_v20, 0.0  ;;  %v422_v8 = vmul.f32 0.2, %v353_v20  ;;  %782 = vmax.xlane.f32.xlu0 %v7715_v34  ;;  %vm10932_vm13 = vcmask 589312   ;;  %vm7720_vm14 = vcmp.gt.f32.partialorder %v5570_v53, 0.0  ;;  %11004 = vst [vmem:[#allocation67_spill] sm:$0xff] %v8196_v17 }
 0x102   :  { %v678_v37 = vsel %vm10932_vm13, %v677_v19, %v673_v15  ;;  %v10933_v26 = vmov 0  ;;  %v5573_v43 = vunpack.c.l.bf16 %v5677_v4  ;;  %v455_v48 = vsel %vm391_vm8, %v355_v31, %v423_v35  ;;  %v357_v4 = vpop.xlane.xlu0 %356  ;;  %11005 = vst [vmem:[#allocation68_spill] sm:$0xff] %v8201_v61 }
 0x103   :  { %v10934_v26 = vsel %vm7720_vm14, 4294967295, %v10933_v26  ;;  %v454_v55 = vsel %vm390_vm9, %v353_v20, %v422_v8  ;;  %v7727_v56 = vsel %vm7696_vm10, %v7604_v47, -9e+15  ;;  %vm7729_vm5 = vcmp.gt.f32.partialorder %v5569_v54, 0.0 }
 0x104   :  { %10935 = vst [vmem:[#allocation43_spill] sm:$0xff] %v10934_v26  ;;  %v10936_v12 = vmov 0  ;;  %v692_v15 = vrot.slane %v455_v48, %v7554_v25  ;;  %vm10939_vm13 = vcmask 654912   ;;  %v687_v19 = vrot.slane %v454_v55, %v7558_v29  ;;  %788 = vmax.xlane.f32.xlu1 %v7727_v56  ;;  %v8142_v25 = vld [vmem:[%s10651_s0 + $0xc8] sm:$0xff] }
 0x105   :  { %v10937_v12 = vsel %vm7729_vm5, 4294967295, %v10936_v12  ;;  %v683_v53 = vsel %vm10939_vm13, %v682_v16, %v678_v37  ;;  %v7739_v31 = vsel %vm7705_vm7, %v7604_v47, -9e+15  ;;  %vm393_vm8 = vcmp.gt.f32.partialorder %v359_v46, 0.0 }
 0x106   :  { %10938 = vst [vmem:[#allocation44_spill] sm:$0xff] %v10937_v12  ;;  %v425_v20 = vmul.f32 0.2, %v359_v46  ;;  %vm392_vm9 = vcmp.gt.f32.partialorder %v357_v4, 0.0  ;;  %v424_v54 = vmul.f32 0.2, %v357_v4  ;;  %786 = vmax.xlane.f32.xlu0 %v7739_v31  ;;  %v5578_v37 = vunpack.c.h.bf16 %v5678_v11 }
 0x107   :  { %vm10940_vm10 = vcmask 720512   ;;  %vm7744_vm13 = vcmp.gt.f32.partialorder %v5574_v40, 0.0  ;;  %v10941_v16 = vmov 0  ;;  %vm7748_vm6 = vcmp.gt.f32.partialorder %v5573_v43, 0.0  ;;  %v361_v43 = vpop.xlane.xlu0 %360 }
 0x108   :  { %v688_v35 = vsel %vm10940_vm10, %v687_v19, %v683_v53  ;;  %v10942_v16 = vsel %vm7744_vm13, 4294967295, %v10941_v16  ;;  %v10944_v8 = vmov 0  ;;  %v457_v48 = vsel %vm393_vm8, %v359_v46, %v425_v20  ;;  %v363_v19 = vpop.xlane.xlu1 %362 }
 0x109   :  { %10943 = vst [vmem:[#allocation45_spill] sm:$0xff] %v10942_v16  ;;  %v10945_v8 = vsel %vm7748_vm6, 4294967295, %v10944_v8  ;;  %v456_v55 = vsel %vm392_vm9, %v357_v4, %v424_v54  ;;  %v7755_v63 = vsel %vm7720_vm14, %v7604_v47, -9e+15  ;;  %v5577_v49 = vunpack.c.l.bf16 %v5678_v11  ;;  %v5684_v16 = vld [vmem:[#allocation2 + $0x70] sm:$0xff]  }
 0x10a   :  { %10946 = vst [vmem:[#allocation46_spill] sm:$0xff] %v10945_v8  ;;  %v702_v36 = vrot.slane %v457_v48, %v7566_v41  ;;  %vm10947_vm10 = vcmask 786112   ;;  %v697_v53 = vrot.slane %v456_v55, %v7574_v52  ;;  %v7763_v18 = vsel %vm7729_vm5, %v7604_v47, -9e+15  ;;  %792 = vmax.xlane.f32.xlu1 %v7755_v63  ;;  %v8122_v41 = vld [vmem:[%s10651_s0 + $0xb8] sm:$0xff] }
 0x10b   :  { %v693_v40 = vsel %vm10947_vm10, %v692_v15, %v688_v35  ;;  %vm395_vm8 = vcmp.gt.f32.partialorder %v363_v19, 0.0  ;;  %v427_v46 = vmul.f32 0.2, %v363_v19  ;;  %vm394_vm9 = vcmp.gt.f32.partialorder %v361_v43, 0.0  ;;  %790 = vmax.xlane.f32.xlu0 %v7763_v18  ;;  %v5679_v15 = vld [vmem:[#allocation2 + $0x48] sm:$0xff]  }
 0x10c   :  { %v426_v4 = vmul.f32 0.2, %v361_v43  ;;  %vm10948_vm14 = vcmask 851712   ;;  %vm7768_vm10 = vcmp.gt.f32.partialorder %v5578_v37, 0.0  ;;  %v10949_v35 = vmov 0 }
 0x10d   :  { %v698_v11 = vsel %vm10948_vm14, %v697_v53, %v693_v40  ;;  %v459_v20 = vsel %vm395_vm8, %v363_v19, %v427_v46  ;;  %v10950_v35 = vsel %vm7768_vm10, 4294967295, %v10949_v35  ;;  %v7777_v12 = vsel %vm7744_vm13, %v7604_v47, -9e+15 }
 0x10e   :  { %v458_v54 = vsel %vm394_vm9, %v361_v43, %v426_v4  ;;  %10951 = vst [vmem:[#allocation47_spill] sm:$0xff] %v10950_v35  ;;  %v712_v48 = vrot.slane %v459_v20, %v7578_v7  ;;  %v7782_v40 = vsel %vm7748_vm6, %v7604_v47, -9e+15  ;;  %vm10952_vm14 = vcmask 917312   ;;  %796 = vmax.xlane.f32.xlu1 %v7777_v12  ;;  %v5680_v4 = vld [vmem:[#allocation2 + $0x50] sm:$0xff]   ;;  %v5683_v35 = vld [vmem:[#allocation2 + $0x68] sm:$0xff]  }
 0x10f   :  { %v707_v55 = vrot.slane %v458_v54, %v7581_v60  ;;  %v703_v53 = vsel %vm10952_vm14, %v702_v36, %v698_v11  ;;  %794 = vmax.xlane.f32.xlu0 %v7782_v40  ;;  %vm7787_vm8 = vcmp.gt.f32.partialorder %v5577_v49, 0.0  ;;  %v10953_v37 = vmov 0  ;;  %v8102_v7 = vld [vmem:[%s10651_s0 + $0xa8] sm:$0xff] }
 0x110   :  { %v10954_v37 = vsel %vm7787_vm8, 4294967295, %v10953_v37  ;;  %v5582_v19 = vunpack.c.h.bf16 %v5679_v15  ;;  %v5581_v43 = vunpack.c.l.bf16 %v5679_v15  ;;  %vm10956_vm9 = vcmask 982912  }
 0x111   :  { %10955 = vst [vmem:[#allocation48_spill] sm:$0xff] %v10954_v37  ;;  %v708_v46 = vsel %vm10956_vm9, %v707_v55, %v703_v53  ;;  %vm10957_vm13 = vcmask 1048512   ;;  %v10958_v49 = vmov 0  ;;  %v10961_v11 = vmov 0 }
 0x112   :  { %v713_v20 = vsel %vm10957_vm13, %v712_v48, %v708_v46  ;;  %vm7803_vm14 = vcmp.gt.f32.partialorder %v5582_v19, 0.0  ;;  %vm7807_vm9 = vcmp.gt.f32.partialorder %v5581_v43, 0.0  ;;  %v5586_v15 = vunpack.c.h.bf16 %v5680_v4  ;;  %v5681_v48 = vld [vmem:[#allocation2 + $0x58] sm:$0xff]  }
 0x113   :  { %v7795_v47 = vsel %vm7768_vm10, %v713_v20, -9e+15  ;;  %v7799_v36 = vsel %vm7787_vm8, %v713_v20, -9e+15  ;;  %v10959_v49 = vsel %vm7803_vm14, 4294967295, %v10958_v49  ;;  %v10962_v11 = vsel %vm7807_vm9, 4294967295, %v10961_v11 }
 0x114   :  { %800 = vmax.xlane.f32.xlu1 %v7795_v47  ;;  %798 = vmax.xlane.f32.xlu0 %v7799_v36  ;;  %10960 = vst [vmem:[#allocation49_spill] sm:$0xff] %v10959_v49  ;;  %10963 = vst [vmem:[#allocation50_spill] sm:$0xff] %v10962_v11  ;;  %v5585_v54 = vunpack.c.l.bf16 %v5680_v4  ;;  %v7813_v55 = vsel %vm7803_vm14, %v713_v20, -9e+15  ;;  %v7817_v53 = vsel %vm7807_vm9, %v713_v20, -9e+15  ;;  %v5590_v46 = vunpack.c.h.bf16 %v5681_v48 }
 0x115   :  { %vm7821_vm13 = vcmp.gt.f32.partialorder %v5586_v15, 0.0  ;;  %v10964_v19 = vmov 0  ;;  %v10967_v43 = vmov 0  ;;  %v5589_v4 = vunpack.c.l.bf16 %v5681_v48  ;;  %v5682_v49 = vld [vmem:[#allocation2 + $0x60] sm:$0xff]  }
 0x116   :  { %v10965_v19 = vsel %vm7821_vm13, 4294967295, %v10964_v19  ;;  %vm7825_vm8 = vcmp.gt.f32.partialorder %v5585_v54, 0.0  ;;  %v7831_v11 = vsel %vm7821_vm13, %v713_v20, -9e+15  ;;  %vm7839_vm9 = vcmp.gt.f32.partialorder %v5590_v46, 0.0 }
 0x117   :  { %10966 = vst [vmem:[#allocation51_spill] sm:$0xff] %v10965_v19  ;;  %v10968_v43 = vsel %vm7825_vm8, 4294967295, %v10967_v43  ;;  %v7835_v37 = vsel %vm7825_vm8, %v713_v20, -9e+15  ;;  %v10970_v15 = vmov 0  ;;  %vm7843_vm14 = vcmp.gt.f32.partialorder %v5589_v4, 0.0 }
 0x118   :  { %804 = vmax.xlane.f32.xlu1 %v7813_v55  ;;  %802 = vmax.xlane.f32.xlu0 %v7817_v53  ;;  %10969 = vst [vmem:[#allocation52_spill] sm:$0xff] %v10968_v43  ;;  %v10971_v15 = vsel %vm7839_vm9, 4294967295, %v10970_v15  ;;  %v10973_v54 = vmov 0  ;;  %v5594_v48 = vunpack.c.h.bf16 %v5682_v49  ;;  %v5593_v19 = vunpack.c.l.bf16 %v5682_v49 }
 0x119   :  { %10972 = vst [vmem:[#allocation53_spill] sm:$0xff] %v10971_v15  ;;  %v10974_v54 = vsel %vm7843_vm14, 4294967295, %v10973_v54  ;;  %v7849_v43 = vsel %vm7839_vm9, %v713_v20, -9e+15  ;;  %v7853_v8 = vsel %vm7843_vm14, %v713_v20, -9e+15  ;;  %v5598_v49 = vunpack.c.h.bf16 %v5683_v35 }
 0x11a   :  { %10975 = vst [vmem:[#allocation54_spill] sm:$0xff] %v10974_v54  ;;  %vm7857_vm8 = vcmp.gt.f32.partialorder %v5594_v48, 0.0  ;;  %v10976_v46 = vmov 0  ;;  %vm7861_vm13 = vcmp.gt.f32.partialorder %v5593_v19, 0.0  ;;  %v10979_v4 = vmov 0 }
 0x11b   :  { %v10977_v46 = vsel %vm7857_vm8, 4294967295, %v10976_v46  ;;  %v10980_v4 = vsel %vm7861_vm13, 4294967295, %v10979_v4  ;;  %v5597_v15 = vunpack.c.l.bf16 %v5683_v35  ;;  %v7867_v54 = vsel %vm7857_vm8, %v713_v20, -9e+15 }
 0x11c   :  { %808 = vmax.xlane.f32.xlu1 %v7831_v11  ;;  %806 = vmax.xlane.f32.xlu0 %v7835_v37  ;;  %10978 = vst [vmem:[#allocation55_spill] sm:$0xff] %v10977_v46  ;;  %10981 = vst [vmem:[#allocation56_spill] sm:$0xff] %v10980_v4  ;;  %v7871_v26 = vsel %vm7861_vm13, %v713_v20, -9e+15  ;;  %vm7875_vm14 = vcmp.gt.f32.partialorder %v5598_v49, 0.0  ;;  %v10982_v19 = vmov 0  ;;  %v5602_v35 = vunpack.c.h.bf16 %v5684_v16 }
 0x11d   :  { %v10983_v19 = vsel %vm7875_vm14, 4294967295, %v10982_v19  ;;  %vm7879_vm9 = vcmp.gt.f32.partialorder %v5597_v15, 0.0  ;;  %v10985_v48 = vmov 0  ;;  %v5601_v46 = vunpack.c.l.bf16 %v5684_v16 }
 0x11e   :  { %10984 = vst [vmem:[#allocation57_spill] sm:$0xff] %v10983_v19  ;;  %v10986_v48 = vsel %vm7879_vm9, 4294967295, %v10985_v48  ;;  %v7885_v4 = vsel %vm7875_vm14, %v713_v20, -9e+15  ;;  %v7889_v50 = vsel %vm7879_vm9, %v713_v20, -9e+15  ;;  %v5606_v16 = vunpack.c.h.bf16 %v5685_v3 }
 0x11f   :  { %10987 = vst [vmem:[#allocation58_spill] sm:$0xff] %v10986_v48  ;;  %vm7893_vm13 = vcmp.gt.f32.partialorder %v5602_v35, 0.0  ;;  %v10988_v15 = vmov 0  ;;  %vm7897_vm8 = vcmp.gt.f32.partialorder %v5601_v46, 0.0  ;;  %v10991_v49 = vmov 0 }
 0x120   :  { %812 = vmax.xlane.f32.xlu1 %v7849_v43  ;;  %810 = vmax.xlane.f32.xlu0 %v7853_v8  ;;  %v10989_v15 = vsel %vm7893_vm13, 4294967295, %v10988_v15  ;;  %v10992_v49 = vsel %vm7897_vm8, 4294967295, %v10991_v49  ;;  %v5605_v19 = vunpack.c.l.bf16 %v5685_v3  ;;  %v7903_v44 = vsel %vm7893_vm13, %v713_v20, -9e+15 }
 0x121   :  { %10990 = vst [vmem:[#allocation59_spill] sm:$0xff] %v10989_v15  ;;  %10993 = vst [vmem:[#allocation60_spill] sm:$0xff] %v10992_v49  ;;  %v7907_v48 = vsel %vm7897_vm8, %v713_v20, -9e+15  ;;  %vm7911_vm9 = vcmp.gt.f32.partialorder %v5606_v16, 0.0  ;;  %v10994_v35 = vmov 0  ;;  %v1070_v16 = vpack.c.bf16 %v7363_v6, %v7349_v2 }
 0x122   :  { %v10995_v35 = vsel %vm7911_vm9, 4294967295, %v10994_v35  ;;  %vm7915_vm14 = vcmp.gt.f32.partialorder %v5605_v19, 0.0  ;;  %v10997_v46 = vmov 0  ;;  %v7921_v3 = vsel %vm7911_vm9, %v713_v20, -9e+15 }
 0x123   :  { %10996 = vst [vmem:[#allocation61_spill] sm:$0xff] %v10995_v35  ;;  %v10998_v46 = vsel %vm7915_vm14, 4294967295, %v10997_v46  ;;  %v7925_v49 = vsel %vm7915_vm14, %v713_v20, -9e+15  ;;  %v1071_v19 = vpack.c.bf16 %v7358_v5, %v7339_v0  ;;  %5949 = vmatprep.subr.bf16.mxu0 %v1070_v16  ;;  %v1072_v35 = vpack.c.bf16 %v7372_v9, %v7377_v10 }
 0x124   :  { %816 = vmax.xlane.f32.xlu1 %v7867_v54  ;;  %814 = vmax.xlane.f32.xlu0 %v7871_v26  ;;  %10999 = vst [vmem:[#allocation62_spill] sm:$0xff] %v10998_v46  ;;  %v1073_v20 = vpack.c.bf16 %v7386_v13, %v7391_v14  ;;  %v1085_v42 = vpack.c.bf16 %v8196_v17, %v8201_v61  ;;  %vm11014_vm14 = vcmask 130112   ;;  %vm11016_vm9 = vcmask 195712  }
 0x125   :  { %5950 = vmatpush3.bf16.msra.mxu0 %v1070_v16  ;;  %vm11019_vm8 = vcmask 261312   ;;  %vm11024_vm13 = vcmask 458112   ;;  %vm11042_vm10 = vcmask 1048512   ;;  %vm11087_vm7 = vcmask 851712  }
 0x126   :  { %5951 = vmatprep.subr.bf16.mxu0 %v1071_v19  ;;  %vm11088_vm1 = vcmask 917312  }
 0x128   :  { %820 = vmax.xlane.f32.xlu1 %v7885_v4  ;;  %818 = vmax.xlane.f32.xlu0 %v7889_v50 }
 0x129   :  { %5952 = vmatpush3.bf16.msra.mxu0 %v1071_v19 }
 0x12a   :  { %5953 = vmatprep.subr.bf16.mxu0 %v1072_v35 }
 0x12c   :  { %824 = vmax.xlane.f32.xlu1 %v7903_v44  ;;  %822 = vmax.xlane.f32.xlu0 %v7907_v48 }
 0x12d   :  { %5954 = vmatpush3.bf16.msra.mxu0 %v1072_v35 }
 0x12e   :  { %5955 = vmatprep.subr.bf16.mxu0 %v1073_v20 }
 0x130   :  { %828 = vmax.xlane.f32.xlu1 %v7921_v3  ;;  %826 = vmax.xlane.f32.xlu0 %v7925_v49 }
 0x131   :  { %5956 = vmatpush3.bf16.msra.mxu0 %v1073_v20 }
 0x17b   :  { %v769_v46 = vpop.xlane.xlu1 %768  ;;  %v767_v15 = vpop.xlane.xlu0 %766 }
 0x17c   :  { %v831_v2 = vsub.f32 %v7615_v58, %v769_v46  ;;  %v830_v0 = vsub.f32 %v7620_v59, %v767_v15 }
 0x17e   :  { %v864_v5 = vmul.f32 1.442695, %v831_v2  ;;  %v862_v6 = vmul.f32 1.442695, %v830_v0 }
 0x17f   :  { %v773_v16 = vpop.xlane.xlu1 %772  ;;  %v771_v38 = vpop.xlane.xlu0 %770 }
 0x180   :  { %6489 = vpow2.f32 %v864_v5  ;;  %v833_v9 = vsub.f32 %v7638_v28, %v773_v16  ;;  %v832_v10 = vsub.f32 %v7643_v30, %v771_v38 }
 0x181   :  { %6491 = vpow2.f32 %v862_v6 }
 0x182   :  { %v868_v13 = vmul.f32 1.442695, %v833_v9  ;;  %v866_v14 = vmul.f32 1.442695, %v832_v10 }
 0x183   :  { %v777_v35 = vpop.xlane.xlu1 %776 }
 0x184   :  { %v775_v19 = vpop.xlane.xlu0 %774  ;;  %6493 = vpow2.f32 %v868_v13  ;;  %v835_v20 = vsub.f32 %v7655_v45, %v777_v35 }
 0x185   :  { %v834_v58 = vsub.f32 %v7667_v57, %v775_v19  ;;  %6495 = vpow2.f32 %v866_v14 }
 0x186   :  { %v872_v59 = vmul.f32 1.442695, %v835_v20 }
 0x187   :  { %v870_v15 = vmul.f32 1.442695, %v834_v58 }
 0x188   :  { %v781_v46 = vpop.xlane.xlu1 %780  ;;  %6497 = vpow2.f32 %v872_v59 }
 0x189   :  { %v779_v2 = vpop.xlane.xlu0 %778  ;;  %v837_v28 = vsub.f32 %v7683_v1, %v781_v46  ;;  %6499 = vpow2.f32 %v870_v15 }
 0x18a   :  { %v836_v38 = vsub.f32 %v7691_v39, %v779_v2  ;;  %v7945_v30 = vpop.eup %6489 }
 0x18b   :  { %v876_v0 = vmul.f32 1.442695, %v837_v28  ;;  %v7947_v6 = vpop.eup %6491  ;;  %928 = vadd.xlane.f32.xlu1 %v7945_v30 }
 0x18c   :  { %v874_v5 = vmul.f32 1.442695, %v836_v38  ;;  %v785_v45 = vpop.xlane.xlu1 %784  ;;  %926 = vadd.xlane.f32.xlu0 %v7947_v6 }
 0x18d   :  { %6501 = vpow2.f32 %v876_v0  ;;  %v839_v16 = vsub.f32 %v7703_v62, %v785_v45 }
 0x18e   :  { %v783_v57 = vpop.xlane.xlu0 %782  ;;  %6503 = vpow2.f32 %v874_v5  ;;  %v7953_v39 = vpop.eup %6493 }
 0x18f   :  { %v838_v1 = vsub.f32 %v7715_v34, %v783_v57  ;;  %v880_v9 = vmul.f32 1.442695, %v839_v16  ;;  %v7955_v13 = vpop.eup %6495  ;;  %932 = vadd.xlane.f32.xlu1 %v7953_v39 }
 0x190   :  { %930 = vadd.xlane.f32.xlu0 %v7955_v13 }
 0x191   :  { %v878_v10 = vmul.f32 1.442695, %v838_v1  ;;  %v789_v14 = vpop.xlane.xlu1 %788  ;;  %6505 = vpow2.f32 %v880_v9  ;;  %v7982_v9 = vld [vmem:[%s10651_s0 + $0x48] sm:$0xff] }
 0x192   :  { %v841_v19 = vsub.f32 %v7727_v56, %v789_v14  ;;  %v7961_v34 = vpop.eup %6497 }
 0x193   :  { %v787_v35 = vpop.xlane.xlu0 %786  ;;  %6507 = vpow2.f32 %v878_v10  ;;  %v7963_v59 = vpop.eup %6499  ;;  %936 = vadd.xlane.f32.xlu1 %v7961_v34  ;;  %v7987_v10 = vld [vmem:[%s10651_s0 + $0x40] sm:$0xff] }
 0x194   :  { %v840_v62 = vsub.f32 %v7739_v31, %v787_v35  ;;  %v884_v20 = vmul.f32 1.442695, %v841_v19  ;;  %934 = vadd.xlane.f32.xlu0 %v7963_v59 }
 0x196   :  { %v882_v58 = vmul.f32 1.442695, %v840_v62  ;;  %6509 = vpow2.f32 %v884_v20 }
 0x197   :  { %v793_v15 = vpop.xlane.xlu1 %792  ;;  %v7969_v31 = vpop.eup %6501 }
 0x198   :  { %v791_v46 = vpop.xlane.xlu0 %790  ;;  %v843_v2 = vsub.f32 %v7755_v63, %v793_v15  ;;  %6511 = vpow2.f32 %v882_v58  ;;  %v7971_v0 = vpop.eup %6503  ;;  %940 = vadd.xlane.f32.xlu1 %v7969_v31 }
 0x199   :  { %v842_v56 = vsub.f32 %v7763_v18, %v791_v46  ;;  %938 = vadd.xlane.f32.xlu0 %v7971_v0  ;;  %v8002_v46 = vld [vmem:[%s10651_s0 + $0x58] sm:$0xff] }
 0x19a   :  { %v888_v28 = vmul.f32 1.442695, %v843_v2 }
 0x19b   :  { %v886_v38 = vmul.f32 1.442695, %v842_v56  ;;  %v797_v5 = vpop.xlane.xlu1 %796  ;;  %v7977_v18 = vpop.eup %6505 }
 0x19c   :  { %v795_v45 = vpop.xlane.xlu0 %794  ;;  %6513 = vpow2.f32 %v888_v28  ;;  %v845_v57 = vsub.f32 %v7777_v12, %v797_v5  ;;  %v1074_v12 = vpack.c.bf16 %v7982_v9, %v7987_v10  ;;  %944 = vadd.xlane.f32.xlu1 %v7977_v18 }
 0x19d   :  { %v844_v63 = vsub.f32 %v7782_v40, %v795_v45  ;;  %6515 = vpow2.f32 %v886_v38  ;;  %v7991_v14 = vpop.eup %6507 }
 0x19e   :  { %v892_v16 = vmul.f32 1.442695, %v845_v57  ;;  %942 = vadd.xlane.f32.xlu0 %v7991_v14  ;;  %5957 = vmatprep.subr.bf16.mxu0 %v1074_v12 }
 0x19f   :  { %v890_v1 = vmul.f32 1.442695, %v844_v63  ;;  %5958 = vmatpush3.bf16.msra.mxu0 %v1074_v12 }
 0x1a0   :  { %6517 = vpow2.f32 %v892_v16  ;;  %v7997_v20 = vpop.eup %6509  ;;  %v8022_v16 = vld [vmem:[%s10651_s0 + $0x68] sm:$0xff] }
 0x1a1   :  { %v801_v40 = vpop.xlane.xlu1 %800  ;;  %v799_v35 = vpop.xlane.xlu0 %798  ;;  %6519 = vpow2.f32 %v890_v1  ;;  %948 = vadd.xlane.f32.xlu1 %v7997_v20 }
 0x1a2   :  { %v847_v19 = vsub.f32 %v7795_v47, %v801_v40  ;;  %v846_v62 = vsub.f32 %v7799_v36, %v799_v35  ;;  %v8007_v47 = vld [vmem:[%s10651_s0 + $0x50] sm:$0xff]  ;;  %v8011_v2 = vpop.eup %6511 }
 0x1a3   :  { %v1075_v36 = vpack.c.bf16 %v8002_v46, %v8007_v47  ;;  %946 = vadd.xlane.f32.xlu0 %v8011_v2 }
 0x1a4   :  { %v896_v58 = vmul.f32 1.442695, %v847_v19  ;;  %v894_v15 = vmul.f32 1.442695, %v846_v62 }
 0x1a5   :  { %v805_v56 = vpop.xlane.xlu1 %804  ;;  %v803_v28 = vpop.xlane.xlu0 %802  ;;  %5959 = vmatprep.subr.bf16.mxu0 %v1075_v36 }
 0x1a6   :  { %6521 = vpow2.f32 %v896_v58  ;;  %v849_v38 = vsub.f32 %v7813_v55, %v805_v56  ;;  %v848_v5 = vsub.f32 %v7817_v53, %v803_v28  ;;  %5960 = vmatpush3.bf16.msra.mxu0 %v1075_v36  ;;  %v8017_v45 = vpop.eup %6513  ;;  %v8027_v55 = vld [vmem:[%s10651_s0 + $0x60] sm:$0xff]  ;;  %v8042_v36 = vld [vmem:[%s10651_s0 + $0x78] sm:$0xff] }
 0x1a7   :  { %6523 = vpow2.f32 %v894_v15  ;;  %v1076_v53 = vpack.c.bf16 %v8022_v16, %v8027_v55  ;;  %v8031_v1 = vpop.eup %6515  ;;  %952 = vadd.xlane.f32.xlu1 %v8017_v45 }
 0x1a8   :  { %v900_v57 = vmul.f32 1.442695, %v849_v38  ;;  %v898_v63 = vmul.f32 1.442695, %v848_v5  ;;  %950 = vadd.xlane.f32.xlu0 %v8031_v1 }
 0x1a9   :  { %v809_v12 = vpop.xlane.xlu1 %808  ;;  %v807_v40 = vpop.xlane.xlu0 %806  ;;  %5961 = vmatprep.subr.bf16.mxu0 %v1076_v53 }
 0x1aa   :  { %6525 = vpow2.f32 %v900_v57  ;;  %v851_v35 = vsub.f32 %v7831_v11, %v809_v12  ;;  %v850_v19 = vsub.f32 %v7835_v37, %v807_v40  ;;  %5962 = vmatpush3.bf16.msra.mxu0 %v1076_v53  ;;  %v8037_v62 = vpop.eup %6517  ;;  %v8047_v11 = vld [vmem:[%s10651_s0 + $0x70] sm:$0xff]  ;;  %v8062_v40 = vld [vmem:[%s10651_s0 + $0x88] sm:$0xff] }
 0x1ab   :  { %6527 = vpow2.f32 %v898_v63  ;;  %v1077_v37 = vpack.c.bf16 %v8042_v36, %v8047_v11  ;;  %v8051_v56 = vpop.eup %6519  ;;  %956 = vadd.xlane.f32.xlu1 %v8037_v62 }
 0x1ac   :  { %v904_v58 = vmul.f32 1.442695, %v851_v35  ;;  %v902_v15 = vmul.f32 1.442695, %v850_v19  ;;  %954 = vadd.xlane.f32.xlu0 %v8051_v56 }
 0x1ad   :  { %v813_v28 = vpop.xlane.xlu1 %812  ;;  %v811_v38 = vpop.xlane.xlu0 %810  ;;  %5963 = vmatprep.subr.bf16.mxu0 %v1077_v37 }
 0x1ae   :  { %6529 = vpow2.f32 %v904_v58  ;;  %v853_v5 = vsub.f32 %v7849_v43, %v813_v28  ;;  %v852_v57 = vsub.f32 %v7853_v8, %v811_v38  ;;  %5964 = vmatpush3.bf16.msra.mxu0 %v1077_v37  ;;  %v8067_v43 = vld [vmem:[%s10651_s0 + $0x80] sm:$0xff] }
 0x1af   :  { %6531 = vpow2.f32 %v902_v15  ;;  %v1078_v8 = vpack.c.bf16 %v8062_v40, %v8067_v43 }
 0x1b0   :  { %v8057_v63 = vpop.eup %6521  ;;  %v908_v53 = vmul.f32 1.442695, %v853_v5  ;;  %v906_v12 = vmul.f32 1.442695, %v852_v57  ;;  %v8082_v57 = vld [vmem:[%s10651_s0 + $0x98] sm:$0xff] }
 0x1b1   :  { %v8071_v35 = vpop.eup %6523  ;;  %960 = vadd.xlane.f32.xlu1 %v8057_v63  ;;  %v817_v19 = vpop.xlane.xlu1 %816  ;;  %5981 = vmatprep.subr.bf16.mxu1 %v1078_v8 }
 0x1b2   :  { %v815_v58 = vpop.xlane.xlu0 %814  ;;  %6533 = vpow2.f32 %v908_v53  ;;  %v855_v15 = vsub.f32 %v7867_v54, %v817_v19  ;;  %958 = vadd.xlane.f32.xlu0 %v8071_v35  ;;  %5982 = vmatpush3.bf16.msra.mxu1 %v1078_v8  ;;  %v8087_v54 = vld [vmem:[%s10651_s0 + $0x90] sm:$0xff] }
 0x1b3   :  { %v854_v37 = vsub.f32 %v7871_v26, %v815_v58  ;;  %6535 = vpow2.f32 %v906_v12  ;;  %v1079_v26 = vpack.c.bf16 %v8082_v57, %v8087_v54 }
 0x1b4   :  { %v8077_v28 = vpop.eup %6525  ;;  %v912_v38 = vmul.f32 1.442695, %v855_v15 }
 0x1b5   :  { %v910_v5 = vmul.f32 1.442695, %v854_v37  ;;  %v8091_v53 = vpop.eup %6527  ;;  %964 = vadd.xlane.f32.xlu1 %v8077_v28  ;;  %v821_v12 = vpop.xlane.xlu1 %820  ;;  %5983 = vmatprep.subr.bf16.mxu1 %v1079_v26 }
 0x1b6   :  { %v819_v8 = vpop.xlane.xlu0 %818  ;;  %6537 = vpow2.f32 %v912_v38  ;;  %v857_v19 = vsub.f32 %v7885_v4, %v821_v12  ;;  %962 = vadd.xlane.f32.xlu0 %v8091_v53  ;;  %5984 = vmatpush3.bf16.msra.mxu1 %v1079_v26  ;;  %v8107_v4 = vld [vmem:[%s10651_s0 + $0xa0] sm:$0xff] }
 0x1b7   :  { %v856_v58 = vsub.f32 %v7889_v50, %v819_v8  ;;  %6539 = vpow2.f32 %v910_v5  ;;  %v1080_v50 = vpack.c.bf16 %v8102_v7, %v8107_v4 }
 0x1b8   :  { %v8097_v15 = vpop.eup %6529  ;;  %v916_v37 = vmul.f32 1.442695, %v857_v19 }
 0x1b9   :  { %v914_v27 = vmul.f32 1.442695, %v856_v58  ;;  %v8111_v38 = vpop.eup %6531  ;;  %968 = vadd.xlane.f32.xlu1 %v8097_v15  ;;  %v825_v5 = vpop.xlane.xlu1 %824  ;;  %5985 = vmatprep.subr.bf16.mxu1 %v1080_v50 }
 0x1ba   :  { %v823_v26 = vpop.xlane.xlu0 %822  ;;  %6541 = vpow2.f32 %v916_v37  ;;  %v859_v12 = vsub.f32 %v7903_v44, %v825_v5  ;;  %966 = vadd.xlane.f32.xlu0 %v8111_v38  ;;  %5986 = vmatpush3.bf16.msra.mxu1 %v1080_v50  ;;  %v8127_v44 = vld [vmem:[%s10651_s0 + $0xb0] sm:$0xff] }
 0x1bb   :  { %v858_v8 = vsub.f32 %v7907_v48, %v823_v26  ;;  %6543 = vpow2.f32 %v914_v27  ;;  %v1081_v48 = vpack.c.bf16 %v8122_v41, %v8127_v44 }
 0x1bc   :  { %v8117_v19 = vpop.eup %6533  ;;  %v920_v58 = vmul.f32 1.442695, %v859_v12 }
 0x1bd   :  { %v918_v60 = vmul.f32 1.442695, %v858_v8  ;;  %v8131_v37 = vpop.eup %6535  ;;  %972 = vadd.xlane.f32.xlu1 %v8117_v19  ;;  %v829_v27 = vpop.xlane.xlu1 %828  ;;  %5987 = vmatprep.subr.bf16.mxu1 %v1081_v48 }
 0x1be   :  { %v827_v50 = vpop.xlane.xlu0 %826  ;;  %6545 = vpow2.f32 %v920_v58  ;;  %v861_v5 = vsub.f32 %v7921_v3, %v829_v27  ;;  %970 = vadd.xlane.f32.xlu0 %v8131_v37  ;;  %5988 = vmatpush3.bf16.msra.mxu1 %v1081_v48  ;;  %v8147_v3 = vld [vmem:[%s10651_s0 + $0xc0] sm:$0xff]  ;;  %v8160_v48 = vld [vmem:[%s10651_s0 + $0xd8] sm:$0xff]  ;;  %v8165_v27 = vld [vmem:[%s10651_s0 + $0xd0] sm:$0xff] }
 0x1bf   :  { %v860_v26 = vsub.f32 %v7925_v49, %v827_v50  ;;  %6547 = vpow2.f32 %v918_v60  ;;  %v1082_v49 = vpack.c.bf16 %v8142_v25, %v8147_v3  ;;  %11000 = vst [vmem:[#allocation63_spill] sm:$0xff] %v8160_v48  ;;  %11001 = vst [vmem:[#allocation64_spill] sm:$0xff] %v8165_v27  ;;  %v1083_v50 = vpack.c.bf16 %v8160_v48, %v8165_v27 }
 0x1c0   :  { %v8137_v12 = vpop.eup %6537  ;;  %v924_v8 = vmul.f32 1.442695, %v861_v5 }
 0x1c1   :  { %v922_v52 = vmul.f32 1.442695, %v860_v26  ;;  %v8151_v58 = vpop.eup %6539  ;;  %976 = vadd.xlane.f32.xlu1 %v8137_v12  ;;  %5989 = vmatprep.subr.bf16.mxu1 %v1082_v49  ;;  %v8178_v26 = vld [vmem:[%s10651_s0 + $0xe8] sm:$0xff] }
 0x1c2   :  { %6549 = vpow2.f32 %v924_v8  ;;  %974 = vadd.xlane.f32.xlu0 %v8151_v58  ;;  %5990 = vmatpush3.bf16.msra.mxu1 %v1082_v49  ;;  %11002 = vst [vmem:[#allocation65_spill] sm:$0xff] %v8178_v26  ;;  %v8183_v8 = vld [vmem:[%s10651_s0 + $0xe0] sm:$0xff] }
 0x1c3   :  { %6551 = vpow2.f32 %v922_v52  ;;  %5991 = vmatprep.subr.bf16.mxu1 %v1083_v50  ;;  %11003 = vst [vmem:[#allocation66_spill] sm:$0xff] %v8183_v8  ;;  %v1084_v49 = vpack.c.bf16 %v8178_v26, %v8183_v8 }
 0x1c4   :  { %v8155_v60 = vpop.eup %6541 }
 0x1c5   :  { %v8169_v5 = vpop.eup %6543  ;;  %980 = vadd.xlane.f32.xlu1 %v8155_v60 }
 0x1c6   :  { %978 = vadd.xlane.f32.xlu0 %v8169_v5  ;;  %5992 = vmatpush3.bf16.msra.mxu1 %v1083_v50 }
 0x1c7   :  { %5993 = vmatprep.subr.bf16.mxu1 %v1084_v49 }
 0x1c8   :  { %v8173_v52 = vpop.eup %6545 }
 0x1c9   :  { %v8187_v29 = vpop.eup %6547  ;;  %984 = vadd.xlane.f32.xlu1 %v8173_v52 }
 0x1ca   :  { %982 = vadd.xlane.f32.xlu0 %v8187_v29  ;;  %5994 = vmatpush3.bf16.msra.mxu1 %v1084_v49  ;;  %v245_v49 = vld [vmem:[%s10655_s4] sm:$0xff] }
 0x1cb   :  { %5995 = vmatprep.subr.bf16.mxu1 %v1085_v42  ;;  %v6413_v33 = vpack.c.bf16 %v246_v32, %v245_v49 }
 0x1cc   :  { %v8191_v50 = vpop.eup %6549 }
 0x1cd   :  { %v8205_v51 = vpop.eup %6551  ;;  %988 = vadd.xlane.f32.xlu1 %v8191_v50  ;;  %6414 = vmatprep.subr.bf16.mxu0 %v6413_v33 }
 0x1ce   :  { %986 = vadd.xlane.f32.xlu0 %v8205_v51  ;;  %5996 = vmatpush3.bf16.msra.mxu1 %v1085_v42 }
 0x218   :  { %v929_v23 = vpop.xlane.xlu1 %928 }
 0x219   :  { %6553 = vrcp.f32 %v929_v23  ;;  %v927_v21 = vpop.xlane.xlu0 %926 }
 0x21a   :  { %6555 = vrcp.f32 %v927_v21 }
 0x21c   :  { %v933_v22 = vpop.xlane.xlu1 %932 }
 0x21d   :  { %6557 = vrcp.f32 %v933_v22  ;;  %v931_v24 = vpop.xlane.xlu0 %930 }
 0x21e   :  { %6559 = vrcp.f32 %v931_v24 }
 0x220   :  { %v937_v17 = vpop.xlane.xlu1 %936 }
 0x221   :  { %6561 = vrcp.f32 %v937_v17  ;;  %v935_v42 = vpop.xlane.xlu0 %934  ;;  %v247_v17 = vld [vmem:[%s10655_s4 + $0x10] sm:$0xff] }
 0x222   :  { %6563 = vrcp.f32 %v935_v42  ;;  %v248_v42 = vld [vmem:[%s10655_s4 + $0x18] sm:$0xff] }
 0x223   :  { %v6554_v61 = vpop.eup %6553 }
 0x224   :  { %v6556_v26 = vpop.eup %6555  ;;  %v1023_v48 = vmul.f32 %v6554_v61, %v7945_v30 }
 0x225   :  { %v941_v8 = vpop.xlane.xlu1 %940  ;;  %v1022_v49 = vmul.f32 %v6556_v26, %v7947_v6  ;;  %v6417_v26 = vpack.c.bf16 %v248_v42, %v247_v17 }
 0x226   :  { %6565 = vrcp.f32 %v941_v8  ;;  %v939_v32 = vpop.xlane.xlu0 %938 }
 0x227   :  { %6567 = vrcp.f32 %v939_v32  ;;  %v6558_v23 = vpop.eup %6557  ;;  %v1054_v21 = vpack.c.bf16 %v1023_v48, %v1022_v49  ;;  %v249_v49 = vld [vmem:[%s10655_s4 + $0x20] sm:$0xff] }
 0x228   :  { %v6560_v27 = vpop.eup %6559  ;;  %v1025_v24 = vmul.f32 %v6558_v23, %v7953_v39  ;;  %v250_v23 = vld [vmem:[%s10655_s4 + $0x28] sm:$0xff] }
 0x229   :  { %v945_v22 = vpop.xlane.xlu1 %944  ;;  %5965 = vmatprep.mubr.bf16.mxu0 %v1054_v21  ;;  %v1024_v30 = vmul.f32 %v6560_v27, %v7955_v13 }
 0x22a   :  { %6569 = vrcp.f32 %v945_v22 }
 0x22b   :  { %v943_v61 = vpop.xlane.xlu0 %942  ;;  %v6562_v6 = vpop.eup %6561  ;;  %v1055_v48 = vpack.c.bf16 %v1025_v24, %v1024_v30  ;;  %v6421_v24 = vpack.c.bf16 %v250_v23, %v249_v49  ;;  %v252_v30 = vld [vmem:[%s10655_s4 + $0x38] sm:$0xff]  ;;  %v253_v49 = vld [vmem:[%s10655_s4 + $0x40] sm:$0xff]  ;;  %v254_v23 = vld [vmem:[%s10655_s4 + $0x48] sm:$0xff] }
 0x22c   :  { %6571 = vrcp.f32 %v943_v61  ;;  %v6564_v8 = vpop.eup %6563  ;;  %v1027_v39 = vmul.f32 %v6562_v6, %v7961_v34  ;;  %v251_v61 = vld [vmem:[%s10655_s4 + $0x30] sm:$0xff] }
 0x22d   :  { %5966 = vmatmul.mubr.bf16.vlgmr.msra.gmra.mrb[0].mxu0 %v1055_v48  ;;  %v1026_v13 = vmul.f32 %v6564_v8, %v7963_v59  ;;  %v6425_v8 = vpack.c.bf16 %v252_v30, %v251_v61 }
 0x22e   :  { %v949_v32 = vpop.xlane.xlu1 %948  ;;  %6416 = vmatpush3.bf16.msra.mxu0 %v6413_v33 }
 0x22f   :  { %6573 = vrcp.f32 %v949_v32  ;;  %v1056_v22 = vpack.c.bf16 %v1027_v39, %v1026_v13  ;;  %6418 = vmatprep.subr.bf16.mxu0 %v6417_v26 }
 0x230   :  { %v947_v21 = vpop.xlane.xlu0 %946  ;;  %v6566_v27 = vpop.eup %6565 }
 0x231   :  { %6575 = vrcp.f32 %v947_v21  ;;  %v6568_v34 = vpop.eup %6567  ;;  %v1029_v42 = vmul.f32 %v6566_v27, %v7969_v31  ;;  %5969 = vmatprep.mubr.bf16.mxu0 %v1056_v22  ;;  %v6429_v27 = vpack.c.bf16 %v254_v23, %v253_v49 }
 0x232   :  { %v1028_v33 = vmul.f32 %v6568_v34, %v7971_v0  ;;  %6420 = vmatpush3.bf16.msra.mxu0 %v6417_v26 }
 0x233   :  { %6422 = vmatprep.subr.bf16.mxu0 %v6421_v24 }
 0x234   :  { %v953_v17 = vpop.xlane.xlu1 %952  ;;  %v6570_v6 = vpop.eup %6569  ;;  %v1057_v48 = vpack.c.bf16 %v1029_v42, %v1028_v33  ;;  %v256_v42 = vld [vmem:[%s10655_s4 + $0x58] sm:$0xff] }
 0x235   :  { %6577 = vrcp.f32 %v953_v17  ;;  %v951_v59 = vpop.xlane.xlu0 %950  ;;  %v1031_v39 = vmul.f32 %v6570_v6, %v7977_v18  ;;  %v255_v17 = vld [vmem:[%s10655_s4 + $0x50] sm:$0xff] }
 0x236   :  { %6579 = vrcp.f32 %v951_v59  ;;  %v6572_v31 = vpop.eup %6571  ;;  %5970 = vmatmul.mubr.bf16.gmra.mrb[4].mxu0 %v1057_v48  ;;  %v6433_v59 = vpack.c.bf16 %v256_v42, %v255_v17  ;;  %v257_v48 = vld [vmem:[%s10655_s4 + $0x60] sm:$0xff] }
 0x237   :  { %v1030_v26 = vmul.f32 %v6572_v31, %v7991_v14  ;;  %6424 = vmatpush3.bf16.msra.mxu0 %v6421_v24  ;;  %v258_v31 = vld [vmem:[%s10655_s4 + $0x68] sm:$0xff] }
 0x238   :  { %v957_v32 = vpop.xlane.xlu1 %956  ;;  %6426 = vmatprep.subr.bf16.mxu0 %v6425_v8  ;;  %v6437_v49 = vpack.c.bf16 %v258_v31, %v257_v48 }
 0x239   :  { %6581 = vrcp.f32 %v957_v32  ;;  %v955_v0 = vpop.xlane.xlu0 %954  ;;  %v6574_v21 = vpop.eup %6573  ;;  %v1058_v13 = vpack.c.bf16 %v1031_v39, %v1030_v26  ;;  %v259_v26 = vld [vmem:[%s10655_s4 + $0x70] sm:$0xff] }
 0x23a   :  { %6583 = vrcp.f32 %v955_v0  ;;  %v1033_v34 = vmul.f32 %v6574_v21, %v7997_v20  ;;  %v260_v21 = vld [vmem:[%s10655_s4 + $0x78] sm:$0xff] }
 0x23b   :  { %v6576_v18 = vpop.eup %6575  ;;  %5973 = vmatprep.mubr.bf16.mxu0 %v1058_v13  ;;  %6428 = vmatpush3.bf16.msra.mxu0 %v6425_v8 }
 0x23c   :  { %v1032_v24 = vmul.f32 %v6576_v18, %v8011_v2  ;;  %6430 = vmatprep.subr.bf16.mxu0 %v6429_v27 }
 0x23e   :  { %v961_v22 = vpop.xlane.xlu1 %960  ;;  %v1059_v30 = vpack.c.bf16 %v1033_v34, %v1032_v24 }
 0x23f   :  { %6585 = vrcp.f32 %v961_v22  ;;  %v959_v14 = vpop.xlane.xlu0 %958  ;;  %v6578_v61 = vpop.eup %6577  ;;  %6432 = vmatpush3.bf16.msra.mxu0 %v6429_v27  ;;  %v6441_v22 = vpack.c.bf16 %v260_v21, %v259_v26  ;;  %v7092_v26 = vld [vmem:[%s10651_s0 + $0x18] sm:$0xff]  ;;  %v7093_v21 = vld [vmem:[%s10651_s0 + $0x20] sm:$0xff] }
 0x240   :  { %6587 = vrcp.f32 %v959_v14  ;;  %v6580_v20 = vpop.eup %6579  ;;  %v1035_v6 = vmul.f32 %v6578_v61, %v8017_v45  ;;  %5974 = vmatmul.mubr.bf16.gmra.mrb[8].mxu0 %v1059_v30  ;;  %6434 = vmatprep.subr.bf16.mxu0 %v6433_v59 }
 0x241   :  { %v1034_v8 = vmul.f32 %v6580_v20, %v8031_v1 }
 0x242   :  { %v965_v33 = vpop.xlane.xlu1 %964 }
 0x243   :  { %6589 = vrcp.f32 %v965_v33  ;;  %v963_v2 = vpop.xlane.xlu0 %962  ;;  %v6582_v32 = vpop.eup %6581  ;;  %v1060_v39 = vpack.c.bf16 %v1035_v6, %v1034_v8  ;;  %6436 = vmatpush3.bf16.msra.mxu0 %v6433_v59 }
 0x244   :  { %6591 = vrcp.f32 %v963_v2  ;;  %v6584_v45 = vpop.eup %6583  ;;  %v1037_v0 = vmul.f32 %v6582_v32, %v8037_v62  ;;  %6438 = vmatprep.subr.bf16.mxu0 %v6437_v49 }
 0x245   :  { %5977 = vmatprep.mubr.bf16.mxu0 %v1060_v39  ;;  %v1036_v13 = vmul.f32 %v6584_v45, %v8051_v56  ;;  %v7089_v56 = vld [vmem:[%s10651_s0] sm:$0xff] }
 0x246   :  { %v969_v23 = vpop.xlane.xlu1 %968 }
 0x247   :  { %6593 = vrcp.f32 %v969_v23  ;;  %v967_v1 = vpop.xlane.xlu0 %966  ;;  %v1061_v18 = vpack.c.bf16 %v1037_v0, %v1036_v13  ;;  %6440 = vmatpush3.bf16.msra.mxu0 %v6437_v49 }
 0x248   :  { %6595 = vrcp.f32 %v967_v1  ;;  %6442 = vmatprep.subr.bf16.mxu0 %v6441_v22 }
 0x249   :  { %v6586_v27 = vpop.eup %6585  ;;  %5978 = vmatmul.mubr.bf16.gmra.mrb[12].mxu0 %v1061_v18 }
 0x24a   :  { %v6588_v62 = vpop.eup %6587  ;;  %v973_v34 = vpop.xlane.xlu1 %972  ;;  %v1039_v17 = vmul.f32 %v6586_v27, %v8057_v63  ;;  %6045 = vmatprep.mubr.f32.mxu0 %v7089_v56 }
 0x24b   :  { %6597 = vrcp.f32 %v973_v34  ;;  %v971_v42 = vpop.xlane.xlu0 %970  ;;  %v1038_v14 = vmul.f32 %v6588_v62, %v8071_v35  ;;  %6444 = vmatpush3.bf16.msra.mxu0 %v6441_v22  ;;  %v7094_v62 = vld [vmem:[%s10651_s0 + $0x28] sm:$0xff]  ;;  %v7095_v34 = vld [vmem:[%s10651_s0 + $0x30] sm:$0xff] }
 0x24c   :  { %6599 = vrcp.f32 %v971_v42 }
 0x24d   :  { %v6590_v24 = vpop.eup %6589  ;;  %v1062_v61 = vpack.c.bf16 %v1039_v17, %v1038_v14 }
 0x24e   :  { %v6592_v30 = vpop.eup %6591  ;;  %v977_v59 = vpop.xlane.xlu1 %976  ;;  %v1041_v20 = vmul.f32 %v6590_v24, %v8077_v28  ;;  %v7090_v28 = vld [vmem:[%s10651_s0 + $0x8] sm:$0xff] }
 0x24f   :  { %6601 = vrcp.f32 %v977_v59  ;;  %5997 = vmatprep.mubr.bf16.mxu1 %v1062_v61  ;;  %v975_v63 = vpop.xlane.xlu0 %974  ;;  %v1040_v33 = vmul.f32 %v6592_v30, %v8091_v53  ;;  %v7091_v53 = vld [vmem:[%s10651_s0 + $0x10] sm:$0xff] }
 0x250   :  { %6603 = vrcp.f32 %v975_v63 }
 0x251   :  { %v6594_v35 = vpop.eup %6593  ;;  %v1063_v6 = vpack.c.bf16 %v1041_v20, %v1040_v33  ;;  %6046 = vmatmul.mubr.f32.vlgmr.msra.gmra.mrb[16].mxu0 %v7090_v28 }
 0x252   :  { %v6596_v48 = vpop.eup %6595  ;;  %v981_v31 = vpop.xlane.xlu1 %980  ;;  %v1043_v2 = vmul.f32 %v6594_v35, %v8097_v15  ;;  %6048 = vmatprep.mubr.f32.mxu0 %v7091_v53 }
 0x253   :  { %6605 = vrcp.f32 %v981_v31  ;;  %5998 = vmatmul.mubr.bf16.vlgmr.msra.gmra.mrb[0].mxu1 %v1063_v6  ;;  %v979_v8 = vpop.xlane.xlu0 %978  ;;  %v1042_v32 = vmul.f32 %v6596_v48, %v8111_v38 }
 0x254   :  { %6607 = vrcp.f32 %v979_v8 }
 0x255   :  { %v6598_v39 = vpop.eup %6597  ;;  %v1064_v49 = vpack.c.bf16 %v1043_v2, %v1042_v32  ;;  %6049 = vmatmul.mubr.f32.gmra.mrb[18].mxu0 %v7092_v26 }
 0x256   :  { %v6600_v45 = vpop.eup %6599  ;;  %v985_v15 = vpop.xlane.xlu1 %984  ;;  %v1045_v23 = vmul.f32 %v6598_v39, %v8117_v19  ;;  %6051 = vmatprep.mubr.f32.mxu0 %v7093_v21 }
 0x257   :  { %6609 = vrcp.f32 %v985_v15  ;;  %6001 = vmatprep.mubr.bf16.mxu1 %v1064_v49  ;;  %v983_v38 = vpop.xlane.xlu0 %982  ;;  %v1044_v0 = vmul.f32 %v6600_v45, %v8131_v37 }
 0x258   :  { %6611 = vrcp.f32 %v983_v38 }
 0x259   :  { %v6602_v1 = vpop.eup %6601  ;;  %v1065_v13 = vpack.c.bf16 %v1045_v23, %v1044_v0  ;;  %6052 = vmatmul.mubr.f32.gmra.mrb[20].mxu0 %v7094_v62 }
 0x25a   :  { %v6604_v27 = vpop.eup %6603  ;;  %v989_v19 = vpop.xlane.xlu1 %988  ;;  %v1047_v18 = vmul.f32 %v6602_v1, %v8137_v12  ;;  %6054 = vmatprep.mubr.f32.mxu0 %v7095_v34 }
 0x25b   :  { %6613 = vrcp.f32 %v989_v19  ;;  %6002 = vmatmul.mubr.bf16.gmra.mrb[4].mxu1 %v1065_v13  ;;  %v987_v37 = vpop.xlane.xlu0 %986  ;;  %v1046_v22 = vmul.f32 %v6604_v27, %v8151_v58  ;;  %v7096_v58 = vld [vmem:[%s10651_s0 + $0x38] sm:$0xff] }
 0x25c   :  { %6615 = vrcp.f32 %v987_v37 }
 0x25d   :  { %v6606_v17 = vpop.eup %6605  ;;  %v1066_v42 = vpack.c.bf16 %v1047_v18, %v1046_v22  ;;  %6055 = vmatmul.mubr.f32.gmra.mrb[22].mxu0 %v7096_v58 }
 0x25e   :  { %v6608_v14 = vpop.eup %6607  ;;  %v1049_v12 = vmul.f32 %v6606_v17, %v8155_v60  ;;  %6057 = vmatprep.mubr.f32.mxu0 %v7987_v10 }
 0x25f   :  { %6005 = vmatprep.mubr.bf16.mxu1 %v1066_v42  ;;  %v1048_v56 = vmul.f32 %v6608_v14, %v8169_v5 }
 0x261   :  { %v6610_v24 = vpop.eup %6609  ;;  %v1067_v61 = vpack.c.bf16 %v1049_v12, %v1048_v56  ;;  %6058 = vmatmul.mubr.f32.gmra.mrb[24].mxu0 %v7982_v9  ;;  %v11008_v9 = vld [vmem:[#allocation66_spill] sm:$0xff] }
 0x262   :  { %v6612_v30 = vpop.eup %6611  ;;  %v1051_v59 = vmul.f32 %v6610_v24, %v8173_v52  ;;  %6060 = vmatprep.mubr.f32.mxu0 %v8007_v47  ;;  %v11010_v47 = vld [vmem:[#allocation68_spill] sm:$0xff] }
 0x263   :  { %6006 = vmatmul.mubr.bf16.gmra.mrb[8].mxu1 %v1067_v61  ;;  %v1050_v20 = vmul.f32 %v6612_v30, %v8187_v29  ;;  %v11007_v29 = vld [vmem:[#allocation63_spill] sm:$0xff] }
 0x265   :  { %v6614_v60 = vpop.eup %6613  ;;  %v1068_v5 = vpack.c.bf16 %v1051_v59, %v1050_v20  ;;  %6061 = vmatmul.mubr.f32.gmra.mrb[26].mxu0 %v8002_v46  ;;  %v11009_v46 = vld [vmem:[#allocation65_spill] sm:$0xff] }
 0x266   :  { %v6616_v63 = vpop.eup %6615  ;;  %v1053_v33 = vmul.f32 %v6614_v60, %v8191_v50  ;;  %6063 = vmatprep.mubr.f32.mxu0 %v8027_v55 }
 0x267   :  { %6009 = vmatprep.mubr.bf16.mxu1 %v1068_v5  ;;  %v1052_v10 = vmul.f32 %v6616_v63, %v8205_v51  ;;  %v11006_v51 = vld [vmem:[#allocation64_spill] sm:$0xff] }
 0x269   :  { %v1069_v52 = vpack.c.bf16 %v1053_v33, %v1052_v10  ;;  %6064 = vmatmul.mubr.f32.gmra.mrb[28].mxu0 %v8022_v16  ;;  %v11011_v16 = vld [vmem:[#allocation67_spill] sm:$0xff] }
 0x26a   :  { %6066 = vmatprep.mubr.f32.mxu0 %v8047_v11 }
 0x26b   :  { %6010 = vmatmul.mubr.bf16.gmra.mrb[12].mxu1 %v1069_v52 }
 0x26d   :  { %6067 = vmatmul.mubr.f32.gmra.mrb[30].mxu0 %v8042_v36 }
 0x26e   :  { %6069 = vmatprep.mubr.f32.mxu0 %v8067_v43 }
 0x271   :  { %6070 = vmatmul.mubr.f32.gmra.mrb[32].mxu0 %v8062_v40 }
 0x272   :  { %6072 = vmatprep.mubr.f32.mxu0 %v8087_v54 }
 0x275   :  { %6073 = vmatmul.mubr.f32.gmra.mrb[34].mxu0 %v8082_v57 }
 0x276   :  { %6075 = vmatprep.mubr.f32.mxu0 %v8107_v4 }
 0x279   :  { %6076 = vmatmul.mubr.f32.gmra.mrb[36].mxu0 %v8102_v7  ;;  %v7222_v7 = vmov 0  }
 0x27a   :  { %6078 = vmatprep.mubr.f32.mxu0 %v8127_v44  ;;  %6488 = vset.pattern.permute.xlu0 %v7222_v7 }
 0x27b   :  { %6487 = vset.pattern.permute.xlu1 %v7222_v7 }
 0x27d   :  { %6079 = vmatmul.mubr.f32.gmra.mrb[38].mxu0 %v8122_v41  ;;  %v8340_v41 = vld [vmem:[%s10656_s5] ss:$0 sm:$0xff] }
 0x27e   :  { %6081 = vmatprep.mubr.f32.mxu0 %v8147_v3 }
 0x281   :  { %6082 = vmatmul.mubr.f32.gmra.mrb[40].mxu0 %v8142_v25 }
 0x282   :  { %6084 = vmatprep.mubr.f32.mxu0 %v11006_v51 }
 0x285   :  { %6085 = vmatmul.mubr.f32.gmra.mrb[42].mxu0 %v11007_v29 }
 0x286   :  { %6087 = vmatprep.mubr.f32.mxu0 %v11008_v9 }
 0x289   :  { %6088 = vmatmul.mubr.f32.gmra.mrb[44].mxu0 %v11009_v46 }
 0x28a   :  { %6090 = vmatprep.mubr.f32.mxu0 %v11010_v47 }
 0x28d   :  { %6091 = vmatmul.mubr.f32.gmra.mrb[46].mxu0 %v11011_v16 }
 0x300   :  { %v5967_v25 = vpop.f32.mrb[0].mxu0 }
 0x301   :  { %v1120_v55 = vpop.f32.mrb[1].mxu0  ;;  %v1513_v36 = vmul.f32 %v5967_v25, %v8340_v41 }
 0x302   :  { %v8343_v11 = vpop.f32.mrb[2].mxu0  ;;  %v1511_v54 = vmul.f32 %v8340_v41, %v1120_v55 }
 0x303   :  { %v2468_v40 = vpack.c.bf16 %v8343_v11, %v5967_v25  ;;  %1547 = vadd.xlane.f32.xlu0 %v1513_v36  ;;  %v8346_v43 = vpop.f32.mrb[3].mxu0  ;;  %v1514_v59 = vmul.f32 %v8343_v11, %v8340_v41 }
 0x304   :  { %v2467_v57 = vpack.c.bf16 %v8346_v43, %v1120_v55  ;;  %v1512_v9 = vmul.f32 %v8340_v41, %v8346_v43 }
 0x306   :  { %6093 = vmatprep.subr.bf16.mxu1 %v2467_v57 }
 0x307   :  { %1543 = vadd.xlane.f32.xlu0 %v1511_v54  ;;  %6094 = vmatpush3.bf16.msra.mxu1 %v2467_v57 }
 0x308   :  { %6095 = vmatprep.subr.bf16.mxu1 %v2468_v40 }
 0x309   :  { %v8350_v4 = vpop.f32.mrb[4].mxu0 }
 0x30a   :  { %v8352_v44 = vpop.f32.mrb[5].mxu0  ;;  %v1517_v63 = vmul.f32 %v8350_v4, %v8340_v41 }
 0x30b   :  { %v8354_v3 = vpop.f32.mrb[6].mxu0  ;;  %6096 = vmatpush3.bf16.msra.mxu1 %v2468_v40  ;;  %v1515_v47 = vmul.f32 %v8340_v41, %v8352_v44 }
 0x30c   :  { %v2470_v50 = vpack.c.bf16 %v8354_v3, %v8350_v4  ;;  %v1139_v35 = vpop.f32.mrb[7].mxu0 }
 0x30d   :  { %v8359_v6 = vmul.f32 %v8340_v41, %v1139_v35  ;;  %v2469_v48 = vpack.c.bf16 %v1139_v35, %v8352_v44 }
 0x30f   :  { %6097 = vmatprep.subr.bf16.mxu1 %v2469_v48 }
 0x310   :  { %6098 = vmatpush3.bf16.msra.mxu1 %v2469_v48 }
 0x311   :  { %6099 = vmatprep.subr.bf16.mxu1 %v2470_v50 }
 0x313   :  { %v8362_v31 = vpop.f32.mrb[8].mxu0 }
 0x314   :  { %v8364_v2 = vpop.f32.mrb[9].mxu0  ;;  %6100 = vmatpush3.bf16.msra.mxu1 %v2470_v50  ;;  %v1521_v57 = vmul.f32 %v8362_v31, %v8340_v41 }
 0x315   :  { %v5976_v8 = vpop.f32.mrb[10].mxu0 }
 0x316   :  { %v8367_v32 = vmul.f32 %v5976_v8, %v8340_v41  ;;  %v2472_v28 = vpack.c.bf16 %v5976_v8, %v8362_v31  ;;  %v1155_v53 = vpop.f32.mrb[11].mxu0  ;;  %v1518_v31 = vmul.f32 %v8354_v3, %v8340_v41 }
 0x317   :  { %v8371_v39 = vmul.f32 %v8340_v41, %v1155_v53  ;;  %v2471_v49 = vpack.c.bf16 %v1155_v53, %v8364_v2 }
 0x319   :  { %6101 = vmatprep.subr.bf16.mxu1 %v2471_v49 }
 0x31a   :  { %6102 = vmatpush3.bf16.msra.mxu1 %v2471_v49 }
 0x31b   :  { %6103 = vmatprep.subr.bf16.mxu1 %v2472_v28 }
 0x31c   :  { %v8374_v45 = vpop.f32.mrb[12].mxu0 }
 0x31d   :  { %v1168_v15 = vpop.f32.mrb[13].mxu0 }
 0x31e   :  { %v8377_v23 = vmul.f32 %v8340_v41, %v1168_v15  ;;  %v5980_v38 = vpop.f32.mrb[14].mxu0  ;;  %6104 = vmatpush3.bf16.msra.mxu1 %v2472_v28  ;;  %v1519_v28 = vmul.f32 %v8340_v41, %v8364_v2 }
 0x31f   :  { %v8380_v0 = vmul.f32 %v5980_v38, %v8340_v41  ;;  %v2474_v26 = vpack.c.bf16 %v5980_v38, %v8374_v45  ;;  %v1171_v21 = vpop.f32.mrb[15].mxu0 }
 0x320   :  { %v8384_v1 = vmul.f32 %v8340_v41, %v1171_v21  ;;  %v2473_v13 = vpack.c.bf16 %v1171_v21, %v1168_v15 }
 0x322   :  { %6105 = vmatprep.subr.bf16.mxu1 %v2473_v13 }
 0x323   :  { %6106 = vmatpush3.bf16.msra.mxu1 %v2473_v13 }
 0x324   :  { %6107 = vmatprep.subr.bf16.mxu1 %v2474_v26  ;;  %v8386_v19 = vpop.f32.mrb[16].mxu0 }
 0x325   :  { %v8389_v22 = vpop.f32.mrb[17].mxu0 }
 0x326   :  { %v5999_v27 = vpop.f32.mrb[0].mxu1 }
 0x327   :  { %v1217_v18 = vpop.f32.mrb[1].mxu1  ;;  %v1529_v37 = vmul.f32 %v5999_v27, %v8340_v41  ;;  %6108 = vmatpush3.bf16.msra.mxu1 %v2474_v26 }
 0x328   :  { %v6000_v62 = vpop.f32.mrb[2].mxu1  ;;  %v8396_v12 = vpop.f32.mrb[18].mxu0  ;;  %v1527_v56 = vmul.f32 %v8340_v41, %v1217_v18 }
 0x329   :  { %v1530_v34 = vmul.f32 %v6000_v62, %v8340_v41  ;;  %v8392_v17 = vpack.c.bf16 %v6000_v62, %v5999_v27  ;;  %1579 = vadd.xlane.f32.xlu1 %v1529_v37  ;;  %v1220_v42 = vpop.f32.mrb[3].mxu1  ;;  %v8399_v58 = vpop.f32.mrb[19].mxu0 }
 0x32a   :  { %v8394_v14 = vpack.c.bf16 %v1220_v42, %v1217_v18  ;;  %v1528_v24 = vmul.f32 %v8340_v41, %v1220_v42 }
 0x32b   :  { %1581 = vadd.xlane.f32.xlu0 %v1530_v34 }
 0x32c   :  { %6125 = vmatprep.subr.bf16.mxu1 %v8394_v14  ;;  %v8403_v30 = vpop.f32.mrb[20].mxu0 }
 0x32d   :  { %1575 = vadd.xlane.f32.xlu1 %v1527_v56  ;;  %v8407_v60 = vpop.f32.mrb[21].mxu0 }
 0x32e   :  { %v6003_v61 = vpop.f32.mrb[4].mxu1 }
 0x32f   :  { %1577 = vadd.xlane.f32.xlu0 %v1528_v24  ;;  %v1233_v20 = vpop.f32.mrb[5].mxu1  ;;  %v1533_v25 = vmul.f32 %v6003_v61, %v8340_v41  ;;  %v1525_v24 = vmul.f32 %v8374_v45, %v8340_v41 }
 0x330   :  { %v6004_v5 = vpop.f32.mrb[6].mxu1  ;;  %v8416_v29 = vpop.f32.mrb[22].mxu0  ;;  %v1531_v48 = vmul.f32 %v8340_v41, %v1233_v20 }
 0x331   :  { %v8411_v33 = vpack.c.bf16 %v6004_v5, %v6003_v61  ;;  %1549 = vadd.xlane.f32.xlu1 %v1514_v59  ;;  %v1236_v10 = vpop.f32.mrb[7].mxu1  ;;  %v8420_v46 = vpop.f32.mrb[23].mxu0  ;;  %v1534_v42 = vmul.f32 %v6004_v5, %v8340_v41 }
 0x332   :  { %v1532_v52 = vmul.f32 %v8340_v41, %v1236_v10  ;;  %v8414_v51 = vpack.c.bf16 %v1236_v10, %v1233_v20 }
 0x333   :  { %1555 = vadd.xlane.f32.xlu0 %v1517_v63 }
 0x334   :  { %v8424_v7 = vpop.f32.mrb[24].mxu0 }
 0x335   :  { %1545 = vadd.xlane.f32.xlu1 %v1512_v9  ;;  %v8428_v11 = vpop.f32.mrb[25].mxu0 }
 0x336   :  { %v6007_v16 = vpop.f32.mrb[8].mxu1 }
 0x337   :  { %v1537_v55 = vmul.f32 %v6007_v16, %v8340_v41  ;;  %1551 = vadd.xlane.f32.xlu0 %v1515_v47  ;;  %v1249_v36 = vpop.f32.mrb[9].mxu1 }
 0x338   :  { %v1535_v40 = vmul.f32 %v8340_v41, %v1249_v36  ;;  %v6008_v43 = vpop.f32.mrb[10].mxu1  ;;  %v6062_v35 = vpop.f32.mrb[26].mxu0 }
 0x339   :  { %v8433_v54 = vpack.c.bf16 %v6008_v43, %v6007_v16  ;;  %1587 = vadd.xlane.f32.xlu1 %v1533_v25  ;;  %v1252_v4 = vpop.f32.mrb[11].mxu1  ;;  %v1396_v8 = vpop.f32.mrb[27].mxu0  ;;  %v1538_v27 = vmul.f32 %v6008_v43, %v8340_v41 }
 0x33a   :  { %v1536_v44 = vmul.f32 %v8340_v41, %v1252_v4  ;;  %v8436_v50 = vpack.c.bf16 %v1252_v4, %v1249_v36 }
 0x33b   :  { %1563 = vadd.xlane.f32.xlu0 %v1521_v57  ;;  %v11012_v57 = vld [vmem:[#allocation18_spill] sm:$0xff] }
 0x33c   :  { %v8441_v49 = vpop.f32.mrb[28].mxu0 }
 0x33d   :  { %1583 = vadd.xlane.f32.xlu1 %v1531_v48  ;;  %v1406_v26 = vpop.f32.mrb[29].mxu0 }
 0x33e   :  { %v6011_v53 = vpop.f32.mrb[12].mxu1 }
 0x33f   :  { %v1541_v15 = vmul.f32 %v6011_v53, %v8340_v41  ;;  %1559 = vadd.xlane.f32.xlu0 %v1519_v28  ;;  %v1265_v38 = vpop.f32.mrb[13].mxu1 }
 0x340   :  { %v1539_v21 = vmul.f32 %v8340_v41, %v1265_v38  ;;  %v6012_v13 = vpop.f32.mrb[14].mxu1  ;;  %v6068_v3 = vpop.f32.mrb[30].mxu0 }
 0x341   :  { %v1542_v18 = vmul.f32 %v6012_v13, %v8340_v41  ;;  %v8449_v2 = vpack.c.bf16 %v6012_v13, %v6011_v53  ;;  %1557 = vadd.xlane.f32.xlu1 %v1518_v31  ;;  %v1268_v37 = vpop.f32.mrb[15].mxu1  ;;  %v8455_v56 = vpop.f32.mrb[31].mxu0  ;;  %v11015_v53 = vld [vmem:[#allocation15_spill] sm:$0xff] }
 0x342   :  { %v1540_v62 = vmul.f32 %v8340_v41, %v1268_v37  ;;  %v8452_v34 = vpack.c.bf16 %v1268_v37, %v1265_v38  ;;  %v11017_v38 = vld [vmem:[#allocation17_spill] sm:$0xff]  ;;  %v11020_v37 = vld [vmem:[#allocation19_spill] sm:$0xff] }
 0x343   :  { %1597 = vadd.xlane.f32.xlu0 %v1538_v27 }
 0x344   :  { %v6071_v61 = vpop.f32.mrb[32].mxu0 }
 0x345   :  { %1589 = vadd.xlane.f32.xlu1 %v1534_v42  ;;  %v8459_v59 = vpop.f32.mrb[33].mxu0 }
 0x347   :  { %1571 = vadd.xlane.f32.xlu0 %v1525_v24  ;;  %v11023_v24 = vld [vmem:[#allocation22_spill] sm:$0xff] }
 0x348   :  { %v6074_v20 = vpop.f32.mrb[34].mxu0 }
 0x349   :  { %1553 = vadd.xlane.f32.xlu1 %v8359_v6  ;;  %v8462_v63 = vpop.f32.mrb[35].mxu0 }
 0x34b   :  { %1603 = vadd.xlane.f32.xlu0 %v1541_v15 }
 0x34c   :  { %v6077_v10 = vpop.f32.mrb[36].mxu0 }
 0x34d   :  { %1585 = vadd.xlane.f32.xlu1 %v1532_v52  ;;  %v1446_v5 = vpop.f32.mrb[37].mxu0 }
 0x34f   :  { %1567 = vadd.xlane.f32.xlu0 %v8377_v23 }
 0x350   :  { %v6080_v9 = vpop.f32.mrb[38].mxu0 }
 0x351   :  { %1595 = vadd.xlane.f32.xlu1 %v1537_v55  ;;  %v8465_v47 = vpop.f32.mrb[39].mxu0 }
 0x354   :  { %v6083_v41 = vpop.f32.mrb[40].mxu0 }
 0x355   :  { %1591 = vadd.xlane.f32.xlu1 %v1535_v40  ;;  %v8467_v45 = vpop.f32.mrb[41].mxu0 }
 0x358   :  { %v6086_v6 = vpop.f32.mrb[42].mxu0 }
 0x359   :  { %1565 = vadd.xlane.f32.xlu1 %v8367_v32  ;;  %v8470_v16 = vpop.f32.mrb[43].mxu0 }
 0x35c   :  { %v6089_v52 = vpop.f32.mrb[44].mxu0 }
 0x35d   :  { %1561 = vadd.xlane.f32.xlu1 %v8371_v39  ;;  %v8473_v25 = vpop.f32.mrb[45].mxu0 }
 0x360   :  { %v6092_v23 = vpop.f32.mrb[46].mxu0 }
 0x361   :  { %1593 = vadd.xlane.f32.xlu1 %v1536_v44  ;;  %v8476_v55 = vpop.f32.mrb[47].mxu0  ;;  %v11013_v44 = vld [vmem:[#allocation16_spill] sm:$0xff] }
 0x365   :  { %1609 = vperm.xlu0 %6488, %v8389_v22   ;;  %1599 = vadd.xlane.f32.xlu1 %v1539_v21  ;;  %v11018_v21 = vld [vmem:[#allocation20_spill] sm:$0xff] }
 0x369   :  { %1634 = vperm.xlu0 %6488, %v8403_v30   ;;  %1573 = vadd.xlane.f32.xlu1 %v8380_v0 }
 0x36d   :  { %1644 = vperm.xlu0 %6488, %v8416_v29   ;;  %1569 = vadd.xlane.f32.xlu1 %v8384_v1 }
 0x371   :  { %1639 = vperm.xlu0 %6488, %v8420_v46   ;;  %1601 = vadd.xlane.f32.xlu1 %v1540_v62 }
 0x375   :  { %1649 = vperm.xlu0 %6488, %v8428_v11  }
 0x379   :  { %1664 = vperm.xlu0 %6488, %v6062_v35  }
 0x37d   :  { %1659 = vperm.xlu0 %6488, %v1396_v8  }
 0x381   :  { %1669 = vperm.xlu0 %6488, %v1406_v26  }
 0x382   :  { %1614 = vperm.xlu1 %6487, %v8386_v19  }
 0x385   :  { %1684 = vperm.xlu0 %6488, %v6068_v3  }
 0x386   :  { %1624 = vperm.xlu1 %6487, %v8396_v12  }
 0x389   :  { %1694 = vperm.xlu0 %6488, %v6071_v61  }
 0x38a   :  { %1619 = vperm.xlu1 %6487, %v8399_v58  }
 0x38d   :  { %1704 = vperm.xlu0 %6488, %v6074_v20  }
 0x390   :  { %v1548_v39 = vpop.xlane.xlu0 %1547 }
 0x391   :  { %1714 = vperm.xlu0 %6488, %v6077_v10   ;;  %v11025_v10 = vld [vmem:[#allocation21_spill] sm:$0xff] }
 0x394   :  { %v1544_v1 = vpop.xlane.xlu0 %1543 }
 0x395   :  { %1724 = vperm.xlu0 %6488, %v6080_v9   ;;  %v1802_v35 = vrot.slane %v1544_v1, %v11013_v44 }
 0x399   :  { %1734 = vperm.xlu0 %6488, %v6083_v41   ;;  %v11027_v41 = vld [vmem:[#allocation23_spill] sm:$0xff] }
 0x39d   :  { %1744 = vperm.xlu0 %6488, %v6086_v6   ;;  %v11028_v6 = vld [vmem:[#allocation24_spill] sm:$0xff] }
 0x3a1   :  { %1754 = vperm.xlu0 %6488, %v6089_v52  }
 0x3a5   :  { %1764 = vperm.xlu0 %6488, %v6092_v23  }
 0x3ae   :  { %1605 = vadd.xlane.f32.xlu1 %v1542_v18 }
 0x3b6   :  { %v8487_v32 = vpop.xlane.xlu1 %1579 }
 0x3b8   :  { %v8492_v22 = vpop.xlane.xlu0 %1581 }
 0x3ba   :  { %v8489_v0 = vpop.xlane.xlu1 %1575 }
 0x3bc   :  { %v8497_v30 = vpop.xlane.xlu0 %1577 }
 0x3be   :  { %v1550_v19 = vpop.xlane.xlu1 %1549 }
 0x3bf   :  { %1629 = vperm.xlu1 %6487, %v8407_v60   ;;  %v1816_v26 = vrot.slane %v1550_v19, %v11017_v38 }
 0x3c0   :  { %v1556_v46 = vpop.xlane.xlu0 %1555 }
 0x3c1   :  { %v1831_v61 = vrot.slane %v1556_v46, %v11023_v24 }
 0x3c2   :  { %v1546_v12 = vpop.xlane.xlu1 %1545 }
 0x3c3   :  { %1654 = vperm.xlu1 %6487, %v8424_v7   ;;  %v1806_v4 = vrot.slane %v1546_v12, %v11012_v57 }
 0x3c4   :  { %v1552_v11 = vpop.xlane.xlu0 %1551 }
 0x3c5   :  { %v1807_v8 = vsel %vm11014_vm14, %v1806_v4, %v1802_v35  ;;  %v1821_v13 = vrot.slane %v1552_v11, %v11018_v21  ;;  %vm11021_vm14 = vcmask 326912   ;;  %v11035_v4 = vld [vmem:[#allocation28_spill] sm:$0xff] }
 0x3c6   :  { %v8495_v58 = vpop.xlane.xlu1 %1587 }
 0x3c7   :  { %1674 = vperm.xlu1 %6487, %v8441_v49   ;;  %v1811_v49 = vrot.slane %v1548_v39, %v11015_v53  ;;  %v11031_v39 = vld [vmem:[#allocation26_spill] sm:$0xff] }
 0x3c8   :  { %v1564_v40 = vpop.xlane.xlu0 %1563 }
 0x3c9   :  { %v1812_v31 = vsel %vm11016_vm9, %v1811_v49, %v1807_v8  ;;  %vm11022_vm9 = vcmask 392512   ;;  %v1851_v1 = vrot.slane %v1564_v40, %v11031_v39  ;;  %v11040_v40 = vld [vmem:[#allocation29_spill] sm:$0xff] }
 0x3ca   :  { %v8500_v29 = vpop.xlane.xlu1 %1583  ;;  %v1817_v27 = vsel %vm11019_vm8, %v1816_v26, %v1812_v31  ;;  %vm11026_vm8 = vcmask 523712   ;;  %v11037_v31 = vld [vmem:[#allocation30_spill] sm:$0xff] }
 0x3cb   :  { %1679 = vperm.xlu1 %6487, %v8455_v56   ;;  %v1822_v42 = vsel %vm11021_vm14, %v1821_v13, %v1817_v27  ;;  %vm11029_vm14 = vcmask 589312  }
 0x3cc   :  { %v1560_v28 = vpop.xlane.xlu0 %1559 }
 0x3ce   :  { %v1558_v36 = vpop.xlane.xlu1 %1557 }
 0x3cf   :  { %1689 = vperm.xlu1 %6487, %v8459_v59  }
 0x3d0   :  { %v8524_v18 = vpop.xlane.xlu0 %1597 }
 0x3d2   :  { %v8504_v60 = vpop.xlane.xlu1 %1589 }
 0x3d3   :  { %1699 = vperm.xlu1 %6487, %v8462_v63  }
 0x3d4   :  { %v1572_v20 = vpop.xlane.xlu0 %1571 }
 0x3d5   :  { %v1871_v26 = vrot.slane %v1572_v20, %v11037_v31 }
 0x3d6   :  { %v1554_v7 = vpop.xlane.xlu1 %1553 }
 0x3d7   :  { %1709 = vperm.xlu1 %6487, %v1446_v5   ;;  %v1826_v62 = vrot.slane %v1554_v7, %v11020_v37  ;;  %v1836_v5 = vrot.slane %v1558_v36, %v11025_v10  ;;  %v11033_v36 = vld [vmem:[#allocation25_spill] sm:$0xff] }
 0x3d8   :  { %v8539_v52 = vpop.xlane.xlu0 %1603 }
 0x3d9   :  { %v1827_v56 = vsel %vm11022_vm9, %v1826_v62, %v1822_v42  ;;  %vm11030_vm9 = vcmask 654912  }
 0x3da   :  { %v8507_v43 = vpop.xlane.xlu1 %1585  ;;  %v1832_v63 = vsel %vm11024_vm13, %v1831_v61, %v1827_v56  ;;  %vm11032_vm13 = vcmask 720512   ;;  %v5608_v61 = vld [vmem:[#allocation5] sm:$0xff]  }
 0x3db   :  { %1719 = vperm.xlu1 %6487, %v8465_v47   ;;  %v1837_v47 = vsel %vm11026_vm8, %v1836_v5, %v1832_v63  ;;  %vm11034_vm8 = vcmask 786112  }
 0x3dc   :  { %v1568_v46 = vpop.xlane.xlu0 %1567 }
 0x3dd   :  { %v1861_v35 = vrot.slane %v1568_v46, %v11035_v4  ;;  %v5686_v46 = vld [vmem:[#allocation5 + $0x8] sm:$0xff]  }
 0x3de   :  { %v8512_v48 = vpop.xlane.xlu1 %1595 }
 0x3df   :  { %1729 = vperm.xlu1 %6487, %v8467_v45  }
 0x3e2   :  { %v8518_v15 = vpop.xlane.xlu1 %1591 }
 0x3e3   :  { %1739 = vperm.xlu1 %6487, %v8470_v16   ;;  %v1841_v16 = vrot.slane %v1560_v28, %v11028_v6  ;;  %v11036_v28 = vld [vmem:[#allocation27_spill] sm:$0xff] }
 0x3e4   :  { %v1610_v63 = vpop.permute.xlu0 %1609 }
 0x3e6   :  { %v1566_v3 = vpop.xlane.xlu1 %1565 }
 0x3e7   :  { %1749 = vperm.xlu1 %6487, %v8473_v25   ;;  %v1842_v25 = vsel %vm11029_vm14, %v1841_v16, %v1837_v47  ;;  %v1856_v11 = vrot.slane %v1566_v3, %v11033_v36  ;;  %vm11038_vm14 = vcmask 851712   ;;  %v11043_v16 = vmov 0 }
 0x3ea   :  { %v1562_v59 = vpop.xlane.xlu1 %1561 }
 0x3eb   :  { %1759 = vperm.xlu1 %6487, %v8476_v55   ;;  %v1846_v45 = vrot.slane %v1562_v59, %v11027_v41  ;;  %v5610_v59 = vunpack.c.h.bf16 %v5608_v61 }
 0x3ed   :  { %v1847_v55 = vsel %vm11030_vm9, %v1846_v45, %v1842_v25  ;;  %vm11039_vm9 = vcmask 917312  }
 0x3ee   :  { %v8534_v9 = vpop.xlane.xlu1 %1593  ;;  %v1852_v19 = vsel %vm11032_vm13, %v1851_v1, %v1847_v55  ;;  %vm11041_vm13 = vcmask 982912   ;;  %v5609_v55 = vunpack.c.l.bf16 %v5608_v61 }
 0x3ef   :  { %v1857_v7 = vsel %vm11034_vm8, %v1856_v11, %v1852_v19  ;;  %v1635_v11 = vpop.permute.xlu0 %1634 }
 0x3f0   :  { %v1862_v13 = vsel %vm11038_vm14, %v1861_v35, %v1857_v7  ;;  %vm8563_vm14 = vcmp.gt.f32.partialorder %v5610_v59, 0.0  ;;  %v5613_v35 = vunpack.c.l.bf16 %v5686_v46 }
 0x3f1   :  { %v11044_v16 = vsel %vm8563_vm14, 4294967295, %v11043_v16 }
 0x3f2   :  { %v8542_v23 = vpop.xlane.xlu1 %1599  ;;  %11045 = vst [vmem:[#allocation64_spill] sm:$0xff] %v11044_v16 }
 0x3f6   :  { %v1574_v12 = vpop.xlane.xlu1 %1573 }
 0x3f7   :  { %v1876_v62 = vrot.slane %v1574_v12, %v11040_v40 }
 0x3fa   :  { %v1570_v8 = vpop.xlane.xlu1 %1569 }
 0x3fb   :  { %v1866_v49 = vrot.slane %v1570_v8, %v11036_v28 }
 0x3fd   :  { %v1867_v27 = vsel %vm11039_vm9, %v1866_v49, %v1862_v13  ;;  %vm8573_vm9 = vcmp.gt.f32.partialorder %v5609_v55, 0.0  ;;  %v11046_v49 = vmov 0 }
 0x3fe   :  { %v1872_v42 = vsel %vm11041_vm13, %v1871_v26, %v1867_v27  ;;  %v8556_v56 = vpop.xlane.xlu1 %1601  ;;  %v11047_v49 = vsel %vm8573_vm9, 4294967295, %v11046_v49  ;;  %v5614_v26 = vunpack.c.h.bf16 %v5686_v46 }
 0x3ff   :  { %v8559_v3 = vsel %vm11042_vm10, %v1876_v62, %v1872_v42  ;;  %11048 = vst [vmem:[#allocation63_spill] sm:$0xff] %v11047_v49  ;;  %v8578_v42 = vld [vmem:[#allocation5 + $0x10] sm:$0xff]  }
 0x400   :  { %v1971_v20 = vadd.f32 %v8559_v3, %v1610_v63  ;;  %v1976_v61 = vadd.f32 %v8559_v3, %v1635_v11  ;;  %v11049_v63 = vmov 0  ;;  %vm8589_vm6 = vcmp.gt.f32.partialorder %v5614_v26, 0.0  ;;  %v5688_v11 = vld [vmem:[#allocation5 + $0x18] sm:$0xff]  }
 0x401   :  { %v5622_v26 = vunpack.c.h.bf16 %v5688_v11 }
 0x402   :  { %v1615_v5 = vpop.permute.xlu1 %1614  ;;  %v2035_v12 = vmul.f32 0.2, %v1971_v20  ;;  %vm2003_vm10 = vcmp.gt.f32.partialorder %v1971_v20, 0.0 }
 0x403   :  { %v1972_v47 = vadd.f32 %v8559_v3, %v1615_v5  ;;  %v1645_v5 = vpop.permute.xlu0 %1644 }
 0x404   :  { %v2067_v62 = vsel %vm2003_vm10, %v1971_v20, %v2035_v12  ;;  %v5618_v20 = vunpack.c.h.bf16 %v8578_v42  ;;  %v1978_v12 = vadd.f32 %v8559_v3, %v1645_v5  ;;  %vm2008_vm10 = vcmp.gt.f32.partialorder %v1976_v61, 0.0 }
 0x405   :  { %v2036_v45 = vmul.f32 0.2, %v1972_v47  ;;  %vm2004_vm8 = vcmp.gt.f32.partialorder %v1972_v47, 0.0 }
 0x406   :  { %v1625_v25 = vpop.permute.xlu1 %1624 }
 0x407   :  { %v1974_v1 = vadd.f32 %v8559_v3, %v1625_v25  ;;  %v2068_v19 = vsel %vm2004_vm8, %v1972_v47, %v2036_v45  ;;  %v8587_v47 = vsel %vm8573_vm9, %v2067_v62, -9e+15  ;;  %v11052_v45 = vmov 0  ;;  %v1640_v5 = vpop.permute.xlu0 %1639 }
 0x408   :  { %v8570_v7 = vsel %vm8563_vm14, %v2068_v19, -9e+15  ;;  %vm8581_vm14 = vcmp.gt.f32.partialorder %v5613_v35, 0.0  ;;  %v11053_v45 = vsel %vm8589_vm6, 4294967295, %v11052_v45  ;;  %v2040_v19 = vmul.f32 0.2, %v1976_v61 }
 0x409   :  { %2165 = vmax.xlane.f32.xlu0 %v8570_v7  ;;  %v2038_v13 = vmul.f32 0.2, %v1974_v1  ;;  %vm2006_vm13 = vcmp.gt.f32.partialorder %v1974_v1, 0.0  ;;  %v11050_v63 = vsel %vm8581_vm14, 4294967295, %v11049_v63  ;;  %11054 = vst [vmem:[#allocation65_spill] sm:$0xff] %v11053_v45  ;;  %v11078_v45 = vmov 0 }
 0x40a   :  { %v1620_v8 = vpop.permute.xlu1 %1619  ;;  %11051 = vst [vmem:[#allocation66_spill] sm:$0xff] %v11050_v63 }
 0x40b   :  { %v1973_v27 = vadd.f32 %v8559_v3, %v1620_v8  ;;  %v2070_v55 = vsel %vm2006_vm13, %v1974_v1, %v2038_v13  ;;  %v2072_v8 = vsel %vm2008_vm10, %v1976_v61, %v2040_v19  ;;  %v11055_v1 = vmov 0 }
 0x40c   :  { %v8603_v35 = vsel %vm8589_vm6, %v2070_v55, -9e+15  ;;  %v2042_v13 = vmul.f32 0.2, %v1978_v12  ;;  %vm2010_vm13 = vcmp.gt.f32.partialorder %v1978_v12, 0.0  ;;  %v1881_v19 = vrot.slane %v8489_v0, %v11013_v44 }
 0x40d   :  { %v2037_v59 = vmul.f32 0.2, %v1973_v27  ;;  %vm2005_vm8 = vcmp.gt.f32.partialorder %v1973_v27, 0.0  ;;  %vm11061_vm10 = vcmask 130112  }
 0x40e   :  { %v2074_v62 = vsel %vm2010_vm13, %v1978_v12, %v2042_v13  ;;  %vm11062_vm13 = vcmask 195712   ;;  %v1900_v13 = vrot.slane %v8500_v29, %v11018_v21  ;;  %v1920_v29 = vrot.slane %v8518_v15, %v11028_v6 }
 0x40f   :  { %2163 = vmax.xlane.f32.xlu1 %v8587_v47  ;;  %v2069_v25 = vsel %vm2005_vm8, %v1973_v27, %v2037_v59  ;;  %vm8606_vm8 = vcmp.gt.f32.partialorder %v5618_v20, 0.0  ;;  %v11058_v59 = vmov 0  ;;  %v1650_v20 = vpop.permute.xlu0 %1649  ;;  %v5621_v15 = vunpack.c.l.bf16 %v5688_v11 }
 0x410   :  { %v8598_v46 = vsel %vm8581_vm14, %v2069_v25, -9e+15  ;;  %v11056_v1 = vsel %vm8606_vm8, 4294967295, %v11055_v1  ;;  %v8612_v27 = vsel %vm8606_vm8, %v2072_v8, -9e+15  ;;  %vm8615_vm14 = vcmp.gt.f32.partialorder %v5622_v26, 0.0 }
 0x411   :  { %2167 = vmax.xlane.f32.xlu0 %v8598_v46  ;;  %11057 = vst [vmem:[#allocation68_spill] sm:$0xff] %v11056_v1  ;;  %v11059_v59 = vsel %vm8615_vm14, 4294967295, %v11058_v59  ;;  %v8621_v61 = vsel %vm8615_vm14, %v2074_v62, -9e+15  ;;  %v1885_v25 = vrot.slane %v8497_v30, %v11012_v57  ;;  %v1890_v8 = vrot.slane %v8487_v32, %v11015_v53 }
 0x412   :  { %11060 = vst [vmem:[#allocation67_spill] sm:$0xff] %v11059_v59  ;;  %v1895_v59 = vrot.slane %v8492_v22, %v11017_v38  ;;  %v1905_v30 = vrot.slane %v8507_v43, %v11020_v37  ;;  %vm11063_vm14 = vcmask 261312   ;;  %vm11064_vm8 = vcmask 326912  }
 0x413   :  { %2169 = vmax.xlane.f32.xlu1 %v8603_v35  ;;  %v1665_v55 = vpop.permute.xlu0 %1664  ;;  %v1886_v12 = vsel %vm11061_vm10, %v1885_v25, %v1881_v19  ;;  %vm11065_vm10 = vcmask 392512   ;;  %v1910_v32 = vrot.slane %v8495_v58, %v11023_v24  ;;  %v1915_v22 = vrot.slane %v8504_v60, %v11025_v10 }
 0x414   :  { %v1891_v26 = vsel %vm11062_vm13, %v1890_v8, %v1886_v12  ;;  %vm11066_vm13 = vcmask 458112   ;;  %v1925_v43 = vrot.slane %v8534_v9, %v11027_v41  ;;  %v5617_v60 = vunpack.c.l.bf16 %v8578_v42 }
 0x415   :  { %v1896_v1 = vsel %vm11063_vm14, %v1895_v59, %v1891_v26  ;;  %vm11067_vm14 = vcmask 523712   ;;  %v1940_v11 = vrot.slane %v8542_v23, %v11035_v4  ;;  %v11071_v42 = vmov 0 }
 0x416   :  { %v1901_v0 = vsel %vm11064_vm8, %v1900_v13, %v1896_v1  ;;  %vm11068_vm8 = vcmask 589312   ;;  %v1930_v13 = vrot.slane %v8512_v48, %v11031_v39 }
 0x417   :  { %2173 = vmax.xlane.f32.xlu1 %v8612_v27  ;;  %v1660_v62 = vpop.permute.xlu0 %1659  ;;  %v1906_v25 = vsel %vm11065_vm10, %v1905_v30, %v1901_v0  ;;  %vm11069_vm10 = vcmask 654912   ;;  %v5689_v30 = vld [vmem:[#allocation5 + $0x20] sm:$0xff]   ;;  %v8657_v0 = vld [vmem:[#allocation5 + $0x28] sm:$0xff]  }
 0x418   :  { %v1911_v12 = vsel %vm11066_vm13, %v1910_v32, %v1906_v25  ;;  %vm11070_vm13 = vcmask 720512   ;;  %v1977_v32 = vadd.f32 %v8559_v3, %v1640_v5  ;;  %v5630_v48 = vunpack.c.h.bf16 %v8657_v0 }
 0x419   :  { %v1916_v59 = vsel %vm11067_vm14, %v1915_v22, %v1911_v12  ;;  %v1935_v12 = vrot.slane %v8524_v18, %v11033_v36  ;;  %v5626_v22 = vunpack.c.h.bf16 %v5689_v30  ;;  %vm8670_vm14 = vcmp.gt.f32.partialorder %v5621_v15, 0.0  ;;  %v5698_v36 = vld [vmem:[#allocation5 + $0x68] sm:$0xff]  }
 0x41a   :  { %v1921_v1 = vsel %vm11068_vm8, %v1920_v29, %v1916_v59  ;;  %v11072_v42 = vsel %vm8670_vm14, 4294967295, %v11071_v42  ;;  %vm11074_vm8 = vcmask 786112   ;;  %v1945_v18 = vrot.slane %v8556_v56, %v11036_v28 }
 0x41b   :  { %2177 = vmax.xlane.f32.xlu1 %v8621_v61  ;;  %v1670_v19 = vpop.permute.xlu0 %1669  ;;  %v1926_v26 = vsel %vm11069_vm10, %v1925_v43, %v1921_v1  ;;  %v5625_v43 = vunpack.c.l.bf16 %v5689_v30  ;;  %11073 = vst [vmem:[#allocation69_spill] sm:$0xff] %v11072_v42  ;;  %v5629_v1 = vunpack.c.l.bf16 %v8657_v0  ;;  %vm8678_vm10 = vcmp.gt.f32.partialorder %v5617_v60, 0.0  ;;  %v5696_v42 = vld [vmem:[#allocation5 + $0x58] sm:$0xff]  }
 0x41c   :  { %v1931_v9 = vsel %vm11070_vm13, %v1930_v13, %v1926_v26  ;;  %v11075_v26 = vmov 0  ;;  %v1979_v13 = vadd.f32 %v8559_v3, %v1650_v20  ;;  %v2041_v30 = vmul.f32 0.2, %v1977_v32 }
 0x41d   :  { %v1936_v5 = vsel %vm11074_vm8, %v1935_v12, %v1931_v9  ;;  %v11076_v26 = vsel %vm8678_vm10, 4294967295, %v11075_v26  ;;  %v1982_v15 = vadd.f32 %v8559_v3, %v1665_v55  ;;  %vm8684_vm6 = vcmp.gt.f32.partialorder %v5626_v22, 0.0  ;;  %v5691_v22 = vld [vmem:[#allocation5 + $0x30] sm:$0xff]  }
 0x41e   :  { %11077 = vst [vmem:[#allocation70_spill] sm:$0xff] %v11076_v26  ;;  %v11079_v45 = vsel %vm8684_vm6, 4294967295, %v11078_v45  ;;  %vm2009_vm8 = vcmp.gt.f32.partialorder %v1977_v32, 0.0  ;;  %vm8688_vm9 = vcmp.gt.f32.partialorder %v5625_v43, 0.0  ;;  %v11081_v0 = vmov 0 }
 0x41f   :  { %v1685_v8 = vpop.permute.xlu0 %1684  ;;  %11080 = vst [vmem:[#allocation71_spill] sm:$0xff] %v11079_v45  ;;  %v11082_v0 = vsel %vm8688_vm9, 4294967295, %v11081_v0  ;;  %vm8692_vm5 = vcmp.gt.f32.partialorder %v5630_v48, 0.0  ;;  %v11084_v56 = vmov 0  ;;  %v1941_v20 = vsel %vm11087_vm7, %v1940_v11, %v1936_v5  ;;  %v5693_v45 = vld [vmem:[#allocation5 + $0x40] sm:$0xff]  }
 0x420   :  { %11083 = vst [vmem:[#allocation72_spill] sm:$0xff] %v11082_v0  ;;  %v11085_v56 = vsel %vm8692_vm5, 4294967295, %v11084_v56  ;;  %v1981_v60 = vadd.f32 %v8559_v3, %v1660_v62  ;;  %v1946_v63 = vsel %vm11088_vm1, %v1945_v18, %v1941_v20  ;;  %v2043_v48 = vmul.f32 0.2, %v1979_v13 }
 0x421   :  { %11086 = vst [vmem:[#allocation73_spill] sm:$0xff] %v11085_v56  ;;  %v5634_v49 = vunpack.c.h.bf16 %v5691_v22  ;;  %v2073_v62 = vsel %vm2009_vm8, %v1977_v32, %v2041_v30  ;;  %v2046_v11 = vmul.f32 0.2, %v1982_v15  ;;  %v1950_v5 = vrot.slane %v8539_v52, %v11037_v31 }
 0x422   :  { %vm2011_vm1 = vcmp.gt.f32.partialorder %v1979_v13, 0.0  ;;  %v1986_v26 = vadd.f32 %v8559_v3, %v1685_v8  ;;  %v8722_v52 = vsel %vm8670_vm14, %v2073_v62, -9e+15  ;;  %vm2013_vm8 = vcmp.gt.f32.partialorder %v1981_v60, 0.0 }
 0x423   :  { %v8661_v25 = vpop.permute.xlu0 %1694  ;;  %vm8733_vm14 = vcmp.gt.f32.partialorder %v5634_v49, 0.0 }
 0x427   :  { %v8698_v9 = vpop.permute.xlu0 %1704 }
 0x43b   :  { %v8653_v58 = vpop.xlane.xlu1 %1605 }
 0x43f   :  { %v1630_v29 = vpop.permute.xlu1 %1629 }
 0x440   :  { %v1975_v59 = vadd.f32 %v8559_v3, %v1630_v29 }
 0x442   :  { %v2039_v23 = vmul.f32 0.2, %v1975_v59  ;;  %vm2007_vm13 = vcmp.gt.f32.partialorder %v1975_v59, 0.0 }
 0x443   :  { %v1655_v29 = vpop.permute.xlu1 %1654 }
 0x444   :  { %v1980_v55 = vadd.f32 %v8559_v3, %v1655_v29  ;;  %v2071_v12 = vsel %vm2007_vm13, %v1975_v59, %v2039_v23  ;;  %v1955_v59 = vrot.slane %v8653_v58, %v11040_v40  ;;  %vm2014_vm13 = vcmp.gt.f32.partialorder %v1982_v15, 0.0  ;;  %v5692_v58 = vld [vmem:[#allocation5 + $0x38] sm:$0xff]   ;;  %v1715_v40 = vpop.permute.xlu0 %1714 }
 0x445   :  { %v8704_v43 = vsel %vm8678_vm10, %v2071_v12, -9e+15  ;;  %v2045_v23 = vmul.f32 0.2, %v1981_v60  ;;  %v1983_v29 = vadd.f32 %v8559_v3, %v1670_v19  ;;  %vm11089_vm10 = vcmask 982912  }
 0x446   :  { %v2044_v16 = vmul.f32 0.2, %v1980_v55  ;;  %2171 = vmax.xlane.f32.xlu0 %v8704_v43  ;;  %vm2012_vm7 = vcmp.gt.f32.partialorder %v1980_v55, 0.0  ;;  %v1951_v32 = vsel %vm11089_vm10, %v1950_v5, %v1946_v63  ;;  %v2078_v19 = vsel %vm2014_vm13, %v1982_v15, %v2046_v11 }
 0x447   :  { %v1675_v18 = vpop.permute.xlu1 %1674  ;;  %v2047_v62 = vmul.f32 0.2, %v1983_v29  ;;  %v11094_v5 = vmov 0  ;;  %vm2018_vm13 = vcmp.gt.f32.partialorder %v1986_v26, 0.0 }
 0x448   :  { %v1984_v20 = vadd.f32 %v8559_v3, %v1675_v18  ;;  %v2076_v12 = vsel %vm2012_vm7, %v1980_v55, %v2044_v16  ;;  %v2075_v16 = vsel %vm2011_vm1, %v1979_v13, %v2043_v48  ;;  %vm11090_vm7 = vcmask 1048512  }
 0x449   :  { %v8718_v30 = vsel %vm8684_vm6, %v2076_v12, -9e+15  ;;  %v8727_v63 = vsel %vm11090_vm7, %v1955_v59, %v1951_v32  ;;  %vm8729_vm6 = vcmp.gt.f32.partialorder %v5629_v1, 0.0  ;;  %v11091_v55 = vmov 0  ;;  %v1725_v32 = vpop.permute.xlu0 %1724 }
 0x44a   :  { %v2048_v31 = vmul.f32 0.2, %v1984_v20  ;;  %2181 = vmax.xlane.f32.xlu1 %v8718_v30  ;;  %2175 = vmax.xlane.f32.xlu0 %v8722_v52  ;;  %vm2016_vm10 = vcmp.gt.f32.partialorder %v1984_v20, 0.0  ;;  %v11092_v55 = vsel %vm8729_vm6, 4294967295, %v11091_v55  ;;  %v11095_v5 = vsel %vm8733_vm14, 4294967295, %v11094_v5 }
 0x44b   :  { %v1680_v8 = vpop.permute.xlu1 %1679  ;;  %11093 = vst [vmem:[#allocation74_spill] sm:$0xff] %v11092_v55  ;;  %11096 = vst [vmem:[#allocation75_spill] sm:$0xff] %v11095_v5  ;;  %v5633_v18 = vunpack.c.l.bf16 %v5691_v22  ;;  %v5638_v12 = vunpack.c.h.bf16 %v5692_v58  ;;  %v2050_v13 = vmul.f32 0.2, %v1986_v26  ;;  %v8739_v15 = vsel %vm8688_vm9, %v2075_v16, -9e+15 }
 0x44c   :  { %v8743_v48 = vsel %vm8692_vm5, %v2078_v19, -9e+15  ;;  %v2077_v1 = vsel %vm2013_vm8, %v1981_v60, %v2045_v23  ;;  %v1985_v11 = vadd.f32 %v8559_v3, %v1680_v8  ;;  %v2080_v49 = vsel %vm2016_vm10, %v1984_v20, %v2048_v31  ;;  %v5694_v19 = vld [vmem:[#allocation5 + $0x48] sm:$0xff]  }
 0x44d   :  { %vm2015_vm1 = vcmp.gt.f32.partialorder %v1983_v29, 0.0  ;;  %v1988_v22 = vadd.f32 %v8727_v63, %v8661_v25  ;;  %vm8750_vm7 = vcmp.gt.f32.partialorder %v5633_v18, 0.0  ;;  %v11097_v16 = vmov 0  ;;  %v1735_v55 = vpop.permute.xlu0 %1734 }
 0x44e   :  { %2179 = vmax.xlane.f32.xlu0 %v8739_v15  ;;  %2185 = vmax.xlane.f32.xlu1 %v8743_v48  ;;  %v11098_v16 = vsel %vm8750_vm7, 4294967295, %v11097_v16  ;;  %vm8754_vm5 = vcmp.gt.f32.partialorder %v5638_v12, 0.0  ;;  %v11100_v60 = vmov 0  ;;  %v5637_v3 = vunpack.c.l.bf16 %v5692_v58 }
 0x44f   :  { %v1690_v59 = vpop.permute.xlu1 %1689  ;;  %11099 = vst [vmem:[#allocation76_spill] sm:$0xff] %v11098_v16  ;;  %v11101_v60 = vsel %vm8754_vm5, 4294967295, %v11100_v60  ;;  %v5642_v23 = vunpack.c.h.bf16 %v5693_v45  ;;  %v8760_v31 = vsel %vm8733_vm14, %v2080_v49, -9e+15  ;;  %v8764_v25 = vsel %vm8729_vm6, %v2077_v1, -9e+15 }
 0x450   :  { %11102 = vst [vmem:[#allocation77_spill] sm:$0xff] %v11101_v60  ;;  %v2079_v20 = vsel %vm2015_vm1, %v1983_v29, %v2047_v62  ;;  %v1990_v8 = vadd.f32 %v8727_v63, %v8698_v9  ;;  %v2049_v18 = vmul.f32 0.2, %v1985_v11  ;;  %v1987_v12 = vadd.f32 %v8727_v63, %v1690_v59  ;;  %v5695_v59 = vld [vmem:[#allocation5 + $0x50] sm:$0xff]  }
 0x451   :  { %v2082_v58 = vsel %vm2018_vm13, %v1986_v26, %v2050_v13  ;;  %v2052_v5 = vmul.f32 0.2, %v1988_v22  ;;  %vm2017_vm8 = vcmp.gt.f32.partialorder %v1985_v11, 0.0  ;;  %vm2020_vm10 = vcmp.gt.f32.partialorder %v1988_v22, 0.0 }
 0x452   :  { %2189 = vmax.xlane.f32.xlu1 %v8760_v31  ;;  %2183 = vmax.xlane.f32.xlu0 %v8764_v25  ;;  %vm8771_vm14 = vcmp.gt.f32.partialorder %v5637_v3, 0.0  ;;  %v11103_v1 = vmov 0  ;;  %vm8775_vm1 = vcmp.gt.f32.partialorder %v5642_v23, 0.0  ;;  %v11106_v29 = vmov 0 }
 0x453   :  { %v1700_v49 = vpop.permute.xlu1 %1699  ;;  %v11104_v1 = vsel %vm8771_vm14, 4294967295, %v11103_v1  ;;  %v11107_v29 = vsel %vm8775_vm1, 4294967295, %v11106_v29  ;;  %v5641_v9 = vunpack.c.l.bf16 %v5693_v45  ;;  %v5646_v62 = vunpack.c.h.bf16 %v5694_v19 }
 0x454   :  { %11105 = vst [vmem:[#allocation78_spill] sm:$0xff] %v11104_v1  ;;  %11108 = vst [vmem:[#allocation79_spill] sm:$0xff] %v11107_v29  ;;  %v8781_v56 = vsel %vm8750_vm7, %v2079_v20, -9e+15  ;;  %v8785_v26 = vsel %vm8754_vm5, %v2082_v58, -9e+15  ;;  %v1992_v3 = vadd.f32 %v8727_v63, %v1715_v40  ;;  %v1989_v23 = vadd.f32 %v8727_v63, %v1700_v49 }
 0x455   :  { %v2054_v13 = vmul.f32 0.2, %v1990_v8  ;;  %v2051_v0 = vmul.f32 0.2, %v1987_v12  ;;  %v2081_v45 = vsel %vm2017_vm8, %v1985_v11, %v2049_v18  ;;  %v2084_v20 = vsel %vm2020_vm10, %v1988_v22, %v2052_v5  ;;  %v5697_v29 = vld [vmem:[#allocation5 + $0x60] sm:$0xff]  }
 0x456   :  { %2187 = vmax.xlane.f32.xlu0 %v8781_v56  ;;  %2193 = vmax.xlane.f32.xlu1 %v8785_v26  ;;  %vm2019_vm13 = vcmp.gt.f32.partialorder %v1987_v12, 0.0  ;;  %vm2022_vm7 = vcmp.gt.f32.partialorder %v1990_v8, 0.0  ;;  %v5650_v58 = vunpack.c.h.bf16 %v5695_v59  ;;  %vm8793_vm5 = vcmp.gt.f32.partialorder %v5641_v9, 0.0 }
 0x457   :  { %v1710_v16 = vpop.permute.xlu1 %1709  ;;  %v11109_v60 = vmov 0  ;;  %vm8797_vm6 = vcmp.gt.f32.partialorder %v5646_v62, 0.0  ;;  %v11112_v40 = vmov 0  ;;  %v5645_v49 = vunpack.c.l.bf16 %v5694_v19 }
 0x458   :  { %v11110_v60 = vsel %vm8793_vm5, 4294967295, %v11109_v60  ;;  %v11113_v40 = vsel %vm8797_vm6, 4294967295, %v11112_v40  ;;  %v1994_v28 = vadd.f32 %v8727_v63, %v1725_v32  ;;  %v8804_v11 = vsel %vm8771_vm14, %v2081_v45, -9e+15  ;;  %v1745_v45 = vpop.permute.xlu0 %1744 }
 0x459   :  { %11111 = vst [vmem:[#allocation80_spill] sm:$0xff] %v11110_v60  ;;  %11114 = vst [vmem:[#allocation81_spill] sm:$0xff] %v11113_v40  ;;  %v8808_v5 = vsel %vm8775_vm1, %v2084_v20, -9e+15  ;;  %v2056_v22 = vmul.f32 0.2, %v1992_v3  ;;  %v1991_v9 = vadd.f32 %v8727_v63, %v1710_v16  ;;  %v2083_v19 = vsel %vm2019_vm13, %v1987_v12, %v2051_v0 }
 0x45a   :  { %v2053_v18 = vmul.f32 0.2, %v1989_v23  ;;  %2191 = vmax.xlane.f32.xlu0 %v8804_v11  ;;  %2197 = vmax.xlane.f32.xlu1 %v8808_v5  ;;  %v2086_v62 = vsel %vm2022_vm7, %v1990_v8, %v2054_v13  ;;  %vm2021_vm8 = vcmp.gt.f32.partialorder %v1989_v23, 0.0  ;;  %vm2024_vm10 = vcmp.gt.f32.partialorder %v1992_v3, 0.0 }
 0x45b   :  { %v1720_v4 = vpop.permute.xlu1 %1719  ;;  %v5654_v32 = vunpack.c.h.bf16 %v5696_v42  ;;  %vm8813_vm14 = vcmp.gt.f32.partialorder %v5645_v49, 0.0  ;;  %v11115_v1 = vmov 0  ;;  %vm8817_vm1 = vcmp.gt.f32.partialorder %v5650_v58, 0.0 }
 0x45c   :  { %v11116_v1 = vsel %vm8813_vm14, 4294967295, %v11115_v1  ;;  %v11118_v20 = vmov 0  ;;  %v5649_v16 = vunpack.c.l.bf16 %v5695_v59  ;;  %v8823_v0 = vsel %vm8793_vm5, %v2083_v19, -9e+15 }
 0x45d   :  { %11117 = vst [vmem:[#allocation82_spill] sm:$0xff] %v11116_v1  ;;  %v11119_v20 = vsel %vm8817_vm1, 4294967295, %v11118_v20  ;;  %v8827_v8 = vsel %vm8797_vm6, %v2086_v62, -9e+15  ;;  %v2058_v12 = vmul.f32 0.2, %v1994_v28  ;;  %v1996_v13 = vadd.f32 %v8727_v63, %v1735_v55 }
 0x45e   :  { %11120 = vst [vmem:[#allocation83_spill] sm:$0xff] %v11119_v20  ;;  %v2055_v49 = vmul.f32 0.2, %v1991_v9  ;;  %v1993_v58 = vadd.f32 %v8727_v63, %v1720_v4  ;;  %2195 = vmax.xlane.f32.xlu0 %v8823_v0  ;;  %2201 = vmax.xlane.f32.xlu1 %v8827_v8  ;;  %v2085_v59 = vsel %vm2021_vm8, %v1989_v23, %v2053_v18  ;;  %vm2023_vm7 = vcmp.gt.f32.partialorder %v1991_v9, 0.0  ;;  %v1755_v18 = vpop.permute.xlu0 %1754 }
 0x45f   :  { %v2088_v60 = vsel %vm2024_vm10, %v1992_v3, %v2056_v22  ;;  %v1730_v19 = vpop.permute.xlu1 %1729  ;;  %vm8835_vm13 = vcmp.gt.f32.partialorder %v5649_v16, 0.0  ;;  %v11121_v40 = vmov 0  ;;  %vm8839_vm9 = vcmp.gt.f32.partialorder %v5654_v32, 0.0 }
 0x460   :  { %v11122_v40 = vsel %vm8835_vm13, 4294967295, %v11121_v40  ;;  %v11124_v62 = vmov 0  ;;  %v5653_v55 = vunpack.c.l.bf16 %v5696_v42  ;;  %v5658_v4 = vunpack.c.h.bf16 %v5697_v29 }
 0x461   :  { %11123 = vst [vmem:[#allocation84_spill] sm:$0xff] %v11122_v40  ;;  %v11125_v62 = vsel %vm8839_vm9, 4294967295, %v11124_v62  ;;  %v8845_v39 = vsel %vm8813_vm14, %v2085_v59, -9e+15  ;;  %v8849_v3 = vsel %vm8817_vm1, %v2088_v60, -9e+15  ;;  %v1998_v22 = vadd.f32 %v8727_v63, %v1745_v45 }
 0x462   :  { %11126 = vst [vmem:[#allocation85_spill] sm:$0xff] %v11125_v62  ;;  %vm11127_vm8 = vcmp.gt.f32.partialorder %v1994_v28, 0.0  ;;  %v2057_v32 = vmul.f32 0.2, %v1993_v58  ;;  %v1995_v16 = vadd.f32 %v8727_v63, %v1730_v19  ;;  %2199 = vmax.xlane.f32.xlu0 %v8845_v39  ;;  %2205 = vmax.xlane.f32.xlu1 %v8849_v3  ;;  %v2087_v42 = vsel %vm2023_vm7, %v1991_v9, %v2055_v49  ;;  %v5700_v40 = vld [vmem:[#allocation5 + $0x78] sm:$0xff]  }
 0x463   :  { %v2090_v23 = vsel %vm11127_vm8, %v1994_v28, %v2058_v12  ;;  %v2060_v1 = vmul.f32 0.2, %v1996_v13  ;;  %v1740_v59 = vpop.permute.xlu1 %1739  ;;  %vm2025_vm10 = vcmp.gt.f32.partialorder %v1993_v58, 0.0  ;;  %vm2028_vm14 = vcmp.gt.f32.partialorder %v1996_v13, 0.0  ;;  %v5699_v12 = vld [vmem:[#allocation5 + $0x70] sm:$0xff]  }
 0x464   :  { %v5662_v20 = vunpack.c.h.bf16 %v5698_v36  ;;  %vm8856_vm1 = vcmp.gt.f32.partialorder %v5653_v55, 0.0  ;;  %v11128_v60 = vmov 0  ;;  %vm8860_vm8 = vcmp.gt.f32.partialorder %v5658_v4, 0.0 }
 0x465   :  { %v11129_v60 = vsel %vm8856_vm1, 4294967295, %v11128_v60  ;;  %v11131_v28 = vmov 0  ;;  %v5657_v45 = vunpack.c.l.bf16 %v5697_v29  ;;  %v2000_v19 = vadd.f32 %v8727_v63, %v1755_v18 }
 0x466   :  { %11130 = vst [vmem:[#allocation86_spill] sm:$0xff] %v11129_v60  ;;  %v11132_v28 = vsel %vm8860_vm8, 4294967295, %v11131_v28  ;;  %v8867_v9 = vsel %vm8835_vm13, %v2087_v42, -9e+15  ;;  %v8871_v49 = vsel %vm8839_vm9, %v2090_v23, -9e+15  ;;  %v1997_v6 = vadd.f32 %v8727_v63, %v1740_v59  ;;  %v1765_v42 = vpop.permute.xlu0 %1764 }
 0x467   :  { %11133 = vst [vmem:[#allocation87_spill] sm:$0xff] %v11132_v28  ;;  %v2062_v55 = vmul.f32 0.2, %v1998_v22  ;;  %v2059_v41 = vmul.f32 0.2, %v1995_v16  ;;  %2203 = vmax.xlane.f32.xlu0 %v8867_v9  ;;  %2209 = vmax.xlane.f32.xlu1 %v8871_v49  ;;  %v2089_v29 = vsel %vm2025_vm10, %v1993_v58, %v2057_v32  ;;  %v2092_v4 = vsel %vm2028_vm14, %v1996_v13, %v2060_v1  ;;  %v1750_v10 = vpop.permute.xlu1 %1749 }
 0x468   :  { %vm2027_vm7 = vcmp.gt.f32.partialorder %v1995_v16, 0.0  ;;  %vm2030_vm6 = vcmp.gt.f32.partialorder %v1998_v22, 0.0  ;;  %vm8876_vm5 = vcmp.gt.f32.partialorder %v5662_v20, 0.0  ;;  %v11134_v18 = vmov 0 }
 0x469   :  { %v11135_v18 = vsel %vm8876_vm5, 4294967295, %v11134_v18  ;;  %vm8880_vm9 = vcmp.gt.f32.partialorder %v5657_v45, 0.0  ;;  %v11137_v23 = vmov 0  ;;  %v5661_v62 = vunpack.c.l.bf16 %v5698_v36 }
 0x46a   :  { %11136 = vst [vmem:[#allocation88_spill] sm:$0xff] %v11135_v18  ;;  %v11138_v23 = vsel %vm8880_vm9, 4294967295, %v11137_v23  ;;  %v5666_v59 = vunpack.c.h.bf16 %v5699_v12  ;;  %v8886_v58 = vsel %vm8856_vm1, %v2089_v29, -9e+15  ;;  %v8890_v1 = vsel %vm8860_vm8, %v2092_v4, -9e+15 }
 0x46b   :  { %11139 = vst [vmem:[#allocation89_spill] sm:$0xff] %v11138_v23  ;;  %v2064_v20 = vmul.f32 0.2, %v2000_v19  ;;  %v2002_v13 = vadd.f32 %v8727_v63, %v1765_v42  ;;  %v2061_v32 = vmul.f32 0.2, %v1997_v6  ;;  %v1999_v45 = vadd.f32 %v8727_v63, %v1750_v10  ;;  %2207 = vmax.xlane.f32.xlu0 %v8886_v58  ;;  %2213 = vmax.xlane.f32.xlu1 %v8890_v1  ;;  %v1760_v29 = vpop.permute.xlu1 %1759 }
 0x46c   :  { %v2091_v36 = vsel %vm2027_vm7, %v1995_v16, %v2059_v41  ;;  %v2094_v60 = vsel %vm2030_vm6, %v1998_v22, %v2062_v55  ;;  %vm2029_vm14 = vcmp.gt.f32.partialorder %v1997_v6, 0.0  ;;  %vm8898_vm10 = vcmp.gt.f32.partialorder %v5661_v62, 0.0 }
 0x46d   :  { %v11140_v28 = vmov 0  ;;  %vm8902_vm13 = vcmp.gt.f32.partialorder %v5666_v59, 0.0  ;;  %v11143_v4 = vmov 0  ;;  %v5670_v42 = vunpack.c.h.bf16 %v5700_v40 }
 0x46e   :  { %v11141_v28 = vsel %vm8898_vm10, 4294967295, %v11140_v28  ;;  %v11144_v4 = vsel %vm8902_vm13, 4294967295, %v11143_v4  ;;  %v8908_v10 = vsel %vm8880_vm9, %v2091_v36, -9e+15  ;;  %v8912_v41 = vsel %vm8876_vm5, %v2094_v60, -9e+15 }
 0x46f   :  { %11142 = vst [vmem:[#allocation90_spill] sm:$0xff] %v11141_v28  ;;  %11145 = vst [vmem:[#allocation91_spill] sm:$0xff] %v11144_v4  ;;  %vm11146_vm6 = vcmp.gt.f32.partialorder %v2000_v19, 0.0  ;;  %v5665_v16 = vunpack.c.l.bf16 %v5699_v12  ;;  %v2063_v62 = vmul.f32 0.2, %v1999_v45  ;;  %v2001_v55 = vadd.f32 %v8727_v63, %v1760_v29  ;;  %2211 = vmax.xlane.f32.xlu0 %v8908_v10  ;;  %2217 = vmax.xlane.f32.xlu1 %v8912_v41 }
 0x470   :  { %v2096_v22 = vsel %vm11146_vm6, %v2000_v19, %v2064_v20  ;;  %v2093_v59 = vsel %vm2029_vm14, %v1997_v6, %v2061_v32  ;;  %v2066_v24 = vmul.f32 0.2, %v2002_v13  ;;  %vm2031_vm7 = vcmp.gt.f32.partialorder %v1999_v45, 0.0 }
 0x471   :  { %vm2034_vm8 = vcmp.gt.f32.partialorder %v2002_v13, 0.0  ;;  %v8920_v36 = vsel %vm8898_vm10, %v2093_v59, -9e+15  ;;  %v8924_v60 = vsel %vm8902_vm13, %v2096_v22, -9e+15  ;;  %vm8926_vm6 = vcmp.gt.f32.partialorder %v5665_v16, 0.0 }
 0x472   :  { %v11147_v12 = vmov 0  ;;  %vm8930_vm5 = vcmp.gt.f32.partialorder %v5670_v42, 0.0  ;;  %v11150_v63 = vmov 0  ;;  %v2065_v6 = vmul.f32 0.2, %v2001_v55 }
 0x473   :  { %v11148_v12 = vsel %vm8926_vm6, 4294967295, %v11147_v12  ;;  %v11151_v63 = vsel %vm8930_vm5, 4294967295, %v11150_v63  ;;  %2215 = vmax.xlane.f32.xlu0 %v8920_v36  ;;  %2221 = vmax.xlane.f32.xlu1 %v8924_v60  ;;  %v2095_v19 = vsel %vm2031_vm7, %v1999_v45, %v2063_v62  ;;  %v2098_v20 = vsel %vm2034_vm8, %v2002_v13, %v2066_v24 }
 0x474   :  { %11149 = vst [vmem:[#allocation92_spill] sm:$0xff] %v11148_v12  ;;  %11152 = vst [vmem:[#allocation93_spill] sm:$0xff] %v11151_v63  ;;  %v5669_v32 = vunpack.c.l.bf16 %v5700_v40  ;;  %vm2033_vm14 = vcmp.gt.f32.partialorder %v2001_v55, 0.0  ;;  %v8938_v29 = vsel %vm8926_vm6, %v2095_v19, -9e+15  ;;  %v11153_v16 = vmov 0 }
 0x475   :  { %v8942_v22 = vsel %vm8930_vm5, %v2098_v20, -9e+15  ;;  %v2097_v42 = vsel %vm2033_vm14, %v2001_v55, %v2065_v6  ;;  %vm11156_vm5 = vcmask 130112  }
 0x476   :  { %vm8946_vm13 = vcmp.gt.f32.partialorder %v5669_v32, 0.0 }
 0x477   :  { %2219 = vmax.xlane.f32.xlu0 %v8938_v29  ;;  %2225 = vmax.xlane.f32.xlu1 %v8942_v22  ;;  %v11154_v16 = vsel %vm8946_vm13, 4294967295, %v11153_v16  ;;  %v8952_v24 = vsel %vm8946_vm13, %v2097_v42, -9e+15 }
 0x478   :  { %11155 = vst [vmem:[#allocation94_spill] sm:$0xff] %v11154_v16 }
 0x47b   :  { %2223 = vmax.xlane.f32.xlu0 %v8952_v24 }
 0x496   :  { %v2166_v40 = vpop.xlane.xlu0 %2165 }
 0x497   :  { %v2228_v13 = vsub.f32 %v8570_v7, %v2166_v40 }
 0x499   :  { %v2261_v45 = vmul.f32 1.442695, %v2228_v13 }
 0x49b   :  { %6617 = vpow2.f32 %v2261_v45 }
 0x49c   :  { %v2164_v62 = vpop.xlane.xlu1 %2163 }
 0x49d   :  { %v2227_v59 = vsub.f32 %v8587_v47, %v2164_v62 }
 0x49e   :  { %v2168_v19 = vpop.xlane.xlu0 %2167 }
 0x49f   :  { %v2259_v55 = vmul.f32 1.442695, %v2227_v59  ;;  %v2229_v6 = vsub.f32 %v8598_v46, %v2168_v19 }
 0x4a0   :  { %v2170_v20 = vpop.xlane.xlu1 %2169 }
 0x4a1   :  { %6619 = vpow2.f32 %v2259_v55  ;;  %v2263_v32 = vmul.f32 1.442695, %v2229_v6  ;;  %v2230_v42 = vsub.f32 %v8603_v35, %v2170_v20 }
 0x4a3   :  { %v2265_v16 = vmul.f32 1.442695, %v2230_v42  ;;  %6621 = vpow2.f32 %v2263_v32 }
 0x4a4   :  { %v2174_v63 = vpop.xlane.xlu1 %2173 }
 0x4a5   :  { %v8959_v12 = vpop.eup %6617  ;;  %6623 = vpow2.f32 %v2265_v16  ;;  %v2232_v7 = vsub.f32 %v8612_v27, %v2174_v63 }
 0x4a6   :  { %2325 = vadd.xlane.f32.xlu1 %v8959_v12 }
 0x4a7   :  { %v2269_v47 = vmul.f32 1.442695, %v2232_v7 }
 0x4a8   :  { %v2178_v40 = vpop.xlane.xlu1 %2177 }
 0x4a9   :  { %6625 = vpow2.f32 %v2269_v47  ;;  %v2234_v46 = vsub.f32 %v8621_v61, %v2178_v40 }
 0x4ab   :  { %v8964_v13 = vpop.eup %6619  ;;  %v2273_v45 = vmul.f32 1.442695, %v2234_v46 }
 0x4ac   :  { %2323 = vadd.xlane.f32.xlu0 %v8964_v13 }
 0x4ad   :  { %6627 = vpow2.f32 %v2273_v45  ;;  %v8967_v35 = vpop.eup %6621 }
 0x4af   :  { %v8969_v62 = vpop.eup %6623 }
 0x4b0   :  { %2329 = vadd.xlane.f32.xlu1 %v8969_v62  ;;  %2327 = vadd.xlane.f32.xlu0 %v8967_v35 }
 0x4b3   :  { %v8973_v27 = vpop.eup %6625 }
 0x4b4   :  { %2333 = vadd.xlane.f32.xlu1 %v8973_v27 }
 0x4b7   :  { %v8976_v63 = vpop.eup %6627 }
 0x4b8   :  { %2337 = vadd.xlane.f32.xlu1 %v8976_v63 }
 0x4d3   :  { %v2172_v61 = vpop.xlane.xlu0 %2171 }
 0x4d4   :  { %v2231_v16 = vsub.f32 %v8704_v43, %v2172_v61 }
 0x4d6   :  { %v2267_v59 = vmul.f32 1.442695, %v2231_v16 }
 0x4d7   :  { %v2182_v19 = vpop.xlane.xlu1 %2181  ;;  %v2176_v55 = vpop.xlane.xlu0 %2175 }
 0x4d8   :  { %6629 = vpow2.f32 %v2267_v59  ;;  %v2236_v6 = vsub.f32 %v8718_v30, %v2182_v19  ;;  %v2233_v20 = vsub.f32 %v8722_v52, %v2176_v55 }
 0x4da   :  { %v2277_v32 = vmul.f32 1.442695, %v2236_v6  ;;  %v2271_v42 = vmul.f32 1.442695, %v2233_v20 }
 0x4db   :  { %v2186_v7 = vpop.xlane.xlu1 %2185  ;;  %v2180_v47 = vpop.xlane.xlu0 %2179 }
 0x4dc   :  { %6631 = vpow2.f32 %v2277_v32  ;;  %v2238_v40 = vsub.f32 %v8743_v48, %v2186_v7  ;;  %v2235_v46 = vsub.f32 %v8739_v15, %v2180_v47 }
 0x4dd   :  { %6633 = vpow2.f32 %v2271_v42 }
 0x4de   :  { %v2281_v45 = vmul.f32 1.442695, %v2238_v40  ;;  %v2275_v43 = vmul.f32 1.442695, %v2235_v46 }
 0x4df   :  { %v2190_v61 = vpop.xlane.xlu1 %2189  ;;  %v2184_v16 = vpop.xlane.xlu0 %2183 }
 0x4e0   :  { %6635 = vpow2.f32 %v2281_v45  ;;  %v2240_v59 = vsub.f32 %v8760_v31, %v2190_v61  ;;  %v2237_v30 = vsub.f32 %v8764_v25, %v2184_v16 }
 0x4e1   :  { %6637 = vpow2.f32 %v2275_v43 }
 0x4e2   :  { %v8986_v52 = vpop.eup %6629  ;;  %v2285_v19 = vmul.f32 1.442695, %v2240_v59  ;;  %v2279_v55 = vmul.f32 1.442695, %v2237_v30 }
 0x4e3   :  { %v2194_v6 = vpop.xlane.xlu1 %2193  ;;  %2331 = vadd.xlane.f32.xlu0 %v8986_v52  ;;  %v2188_v48 = vpop.xlane.xlu0 %2187 }
 0x4e4   :  { %6639 = vpow2.f32 %v2285_v19  ;;  %v2242_v15 = vsub.f32 %v8785_v26, %v2194_v6  ;;  %v2239_v20 = vsub.f32 %v8781_v56, %v2188_v48 }
 0x4e5   :  { %6641 = vpow2.f32 %v2279_v55 }
 0x4e6   :  { %v8991_v32 = vpop.eup %6631  ;;  %v2289_v31 = vmul.f32 1.442695, %v2242_v15  ;;  %v2283_v42 = vmul.f32 1.442695, %v2239_v20 }
 0x4e7   :  { %v8993_v25 = vpop.eup %6633  ;;  %v2198_v7 = vpop.xlane.xlu1 %2197  ;;  %2341 = vadd.xlane.f32.xlu1 %v8991_v32 }
 0x4e8   :  { %v2192_v47 = vpop.xlane.xlu0 %2191  ;;  %6643 = vpow2.f32 %v2289_v31  ;;  %v2244_v40 = vsub.f32 %v8808_v5, %v2198_v7  ;;  %2335 = vadd.xlane.f32.xlu0 %v8993_v25 }
 0x4e9   :  { %v2241_v26 = vsub.f32 %v8804_v11, %v2192_v47  ;;  %6645 = vpow2.f32 %v2283_v42 }
 0x4ea   :  { %v8999_v56 = vpop.eup %6635  ;;  %v2293_v46 = vmul.f32 1.442695, %v2244_v40 }
 0x4eb   :  { %v2287_v45 = vmul.f32 1.442695, %v2241_v26  ;;  %v9001_v43 = vpop.eup %6637  ;;  %v2202_v61 = vpop.xlane.xlu1 %2201  ;;  %2345 = vadd.xlane.f32.xlu1 %v8999_v56 }
 0x4ec   :  { %v2196_v16 = vpop.xlane.xlu0 %2195  ;;  %6647 = vpow2.f32 %v2293_v46  ;;  %v2246_v59 = vsub.f32 %v8827_v8, %v2202_v61  ;;  %2339 = vadd.xlane.f32.xlu0 %v9001_v43 }
 0x4ed   :  { %v2243_v5 = vsub.f32 %v8823_v0, %v2196_v16  ;;  %6649 = vpow2.f32 %v2287_v45 }
 0x4ee   :  { %v9007_v11 = vpop.eup %6639  ;;  %v2297_v30 = vmul.f32 1.442695, %v2246_v59 }
 0x4ef   :  { %v2291_v19 = vmul.f32 1.442695, %v2243_v5  ;;  %v9009_v55 = vpop.eup %6641  ;;  %v2206_v6 = vpop.xlane.xlu1 %2205  ;;  %2349 = vadd.xlane.f32.xlu1 %v9007_v11 }
 0x4f0   :  { %v2200_v48 = vpop.xlane.xlu0 %2199  ;;  %6651 = vpow2.f32 %v2297_v30  ;;  %v2248_v15 = vsub.f32 %v8849_v3, %v2206_v6  ;;  %2343 = vadd.xlane.f32.xlu0 %v9009_v55 }
 0x4f1   :  { %v2245_v8 = vsub.f32 %v8845_v39, %v2200_v48  ;;  %6653 = vpow2.f32 %v2291_v19 }
 0x4f2   :  { %v9015_v0 = vpop.eup %6643  ;;  %v2301_v20 = vmul.f32 1.442695, %v2248_v15 }
 0x4f3   :  { %v2295_v31 = vmul.f32 1.442695, %v2245_v8  ;;  %v9017_v42 = vpop.eup %6645  ;;  %2353 = vadd.xlane.f32.xlu1 %v9015_v0 }
 0x4f4   :  { %v2210_v7 = vpop.xlane.xlu1 %2209  ;;  %v2204_v47 = vpop.xlane.xlu0 %2203  ;;  %6655 = vpow2.f32 %v2301_v20  ;;  %2347 = vadd.xlane.f32.xlu0 %v9017_v42 }
 0x4f5   :  { %v2250_v40 = vsub.f32 %v8871_v49, %v2210_v7  ;;  %v2247_v3 = vsub.f32 %v8867_v9, %v2204_v47  ;;  %6657 = vpow2.f32 %v2295_v31 }
 0x4f6   :  { %v9023_v39 = vpop.eup %6647 }
 0x4f7   :  { %v2305_v26 = vmul.f32 1.442695, %v2250_v40  ;;  %v2299_v46 = vmul.f32 1.442695, %v2247_v3  ;;  %v9025_v45 = vpop.eup %6649  ;;  %2357 = vadd.xlane.f32.xlu1 %v9023_v39 }
 0x4f8   :  { %v2214_v61 = vpop.xlane.xlu1 %2213  ;;  %v2208_v16 = vpop.xlane.xlu0 %2207  ;;  %2351 = vadd.xlane.f32.xlu0 %v9025_v45 }
 0x4f9   :  { %6659 = vpow2.f32 %v2305_v26  ;;  %v2252_v59 = vsub.f32 %v8890_v1, %v2214_v61  ;;  %v2249_v49 = vsub.f32 %v8886_v58, %v2208_v16 }
 0x4fa   :  { %6661 = vpow2.f32 %v2299_v46  ;;  %v9031_v9 = vpop.eup %6651 }
 0x4fb   :  { %v2309_v5 = vmul.f32 1.442695, %v2252_v59  ;;  %v2303_v30 = vmul.f32 1.442695, %v2249_v49  ;;  %v9033_v19 = vpop.eup %6653  ;;  %2361 = vadd.xlane.f32.xlu1 %v9031_v9 }
 0x4fc   :  { %v2218_v6 = vpop.xlane.xlu1 %2217  ;;  %v2212_v48 = vpop.xlane.xlu0 %2211  ;;  %2355 = vadd.xlane.f32.xlu0 %v9033_v19 }
 0x4fd   :  { %6663 = vpow2.f32 %v2309_v5  ;;  %v2254_v15 = vsub.f32 %v8912_v41, %v2218_v6  ;;  %v2251_v1 = vsub.f32 %v8908_v10, %v2212_v48 }
 0x4fe   :  { %6665 = vpow2.f32 %v2303_v30  ;;  %v9039_v58 = vpop.eup %6655 }
 0x4ff   :  { %v2313_v8 = vmul.f32 1.442695, %v2254_v15  ;;  %v2307_v20 = vmul.f32 1.442695, %v2251_v1  ;;  %v9041_v31 = vpop.eup %6657  ;;  %2365 = vadd.xlane.f32.xlu1 %v9039_v58 }
 0x500   :  { %v2222_v7 = vpop.xlane.xlu1 %2221  ;;  %v2216_v47 = vpop.xlane.xlu0 %2215  ;;  %2359 = vadd.xlane.f32.xlu0 %v9041_v31 }
 0x501   :  { %6667 = vpow2.f32 %v2313_v8  ;;  %v2256_v40 = vsub.f32 %v8924_v60, %v2222_v7  ;;  %v2253_v41 = vsub.f32 %v8920_v36, %v2216_v47 }
 0x502   :  { %6669 = vpow2.f32 %v2307_v20 }
 0x503   :  { %v9047_v10 = vpop.eup %6659  ;;  %v2317_v3 = vmul.f32 1.442695, %v2256_v40  ;;  %v2311_v26 = vmul.f32 1.442695, %v2253_v41  ;;  %v2885_v40 = vld [vmem:[#allocation7] sm:$0xff]  ;;  %v2886_v41 = vld [vmem:[#allocation7 + $0x8] sm:$0xff] }
 0x504   :  { %v9049_v46 = vpop.eup %6661  ;;  %v2226_v61 = vpop.xlane.xlu1 %2225  ;;  %2369 = vadd.xlane.f32.xlu1 %v9047_v10 }
 0x505   :  { %v2220_v16 = vpop.xlane.xlu0 %2219  ;;  %6671 = vpow2.f32 %v2317_v3  ;;  %v2258_v59 = vsub.f32 %v8942_v22, %v2226_v61  ;;  %2363 = vadd.xlane.f32.xlu0 %v9049_v46  ;;  %v2887_v3 = vld [vmem:[#allocation7 + $0x10] sm:$0xff]  ;;  %v2888_v61 = vld [vmem:[#allocation7 + $0x18] sm:$0xff] }
 0x506   :  { %v2255_v60 = vsub.f32 %v8938_v29, %v2220_v16  ;;  %6673 = vpow2.f32 %v2311_v26  ;;  %v2901_v26 = vpack.c.bf16 %v2886_v41, %v2885_v40  ;;  %v2902_v16 = vpack.c.bf16 %v2888_v61, %v2887_v3 }
 0x507   :  { %v9055_v36 = vpop.eup %6663  ;;  %v2321_v49 = vmul.f32 1.442695, %v2258_v59 }
 0x508   :  { %v2315_v5 = vmul.f32 1.442695, %v2255_v60  ;;  %v9057_v30 = vpop.eup %6665  ;;  %2373 = vadd.xlane.f32.xlu1 %v9055_v36  ;;  %6157 = vmatprep.subr.bf16.mxu0 %v2901_v26 }
 0x509   :  { %v2224_v6 = vpop.xlane.xlu0 %2223  ;;  %6675 = vpow2.f32 %v2321_v49  ;;  %2367 = vadd.xlane.f32.xlu0 %v9057_v30  ;;  %6158 = vmatpush3.bf16.msra.mxu0 %v2901_v26 }
 0x50a   :  { %v2257_v48 = vsub.f32 %v8952_v24, %v2224_v6  ;;  %6677 = vpow2.f32 %v2315_v5  ;;  %6159 = vmatprep.subr.bf16.mxu0 %v2902_v16 }
 0x50b   :  { %v9062_v22 = vpop.eup %6667 }
 0x50c   :  { %v2319_v15 = vmul.f32 1.442695, %v2257_v48  ;;  %v9064_v29 = vpop.eup %6669  ;;  %2377 = vadd.xlane.f32.xlu1 %v9062_v22 }
 0x50d   :  { %2371 = vadd.xlane.f32.xlu0 %v9064_v29  ;;  %6160 = vmatpush3.bf16.msra.mxu0 %v2902_v16 }
 0x50e   :  { %6679 = vpow2.f32 %v2319_v15 }
 0x50f   :  { %v9068_v1 = vpop.eup %6671 }
 0x510   :  { %v9070_v8 = vpop.eup %6673  ;;  %2381 = vadd.xlane.f32.xlu1 %v9068_v1 }
 0x511   :  { %2375 = vadd.xlane.f32.xlu0 %v9070_v8 }
 0x513   :  { %v9074_v24 = vpop.eup %6675 }
 0x514   :  { %v9076_v20 = vpop.eup %6677  ;;  %2385 = vadd.xlane.f32.xlu1 %v9074_v24 }
 0x515   :  { %2379 = vadd.xlane.f32.xlu0 %v9076_v20 }
 0x518   :  { %v9080_v7 = vpop.eup %6679 }
 0x519   :  { %2383 = vadd.xlane.f32.xlu0 %v9080_v7 }
 0x533   :  { %v2326_v47 = vpop.xlane.xlu1 %2325 }
 0x534   :  { %6681 = vrcp.f32 %v2326_v47 }
 0x539   :  { %v2324_v59 = vpop.xlane.xlu0 %2323 }
 0x53a   :  { %6683 = vrcp.f32 %v2324_v59 }
 0x53d   :  { %v2330_v60 = vpop.xlane.xlu1 %2329  ;;  %v2328_v49 = vpop.xlane.xlu0 %2327 }
 0x53e   :  { %6685 = vrcp.f32 %v2330_v60  ;;  %v6682_v5 = vpop.eup %6681 }
 0x53f   :  { %6687 = vrcp.f32 %v2328_v49  ;;  %v2420_v15 = vmul.f32 %v6682_v5, %v8959_v12 }
 0x544   :  { %v6684_v6 = vpop.eup %6683 }
 0x545   :  { %v2419_v48 = vmul.f32 %v6684_v6, %v8964_v13 }
 0x547   :  { %v2451_v40 = vpack.c.bf16 %v2420_v15, %v2419_v48 }
 0x548   :  { %v6686_v41 = vpop.eup %6685 }
 0x549   :  { %v6688_v3 = vpop.eup %6687  ;;  %v2422_v47 = vmul.f32 %v6686_v41, %v8969_v62  ;;  %6109 = vmatprep.mubr.bf16.mxu1 %v2451_v40 }
 0x54a   :  { %v2421_v26 = vmul.f32 %v6688_v3, %v8967_v35 }
 0x54c   :  { %v2452_v61 = vpack.c.bf16 %v2422_v47, %v2421_v26 }
 0x54e   :  { %6110 = vmatmul.mubr.bf16.vlgmr.msra.gmra.mrb[16].mxu1 %v2452_v61 }
 0x54f   :  { %6126 = vmatpush3.bf16.msra.mxu1 %v8394_v14 }
 0x550   :  { %6127 = vmatprep.subr.bf16.mxu1 %v8392_v17 }
 0x553   :  { %6128 = vmatpush3.bf16.msra.mxu1 %v8392_v17  ;;  %v2334_v17 = vpop.xlane.xlu1 %2333 }
 0x554   :  { %6129 = vmatprep.subr.bf16.mxu1 %v8414_v51  ;;  %6689 = vrcp.f32 %v2334_v17 }
 0x557   :  { %6130 = vmatpush3.bf16.msra.mxu1 %v8414_v51  ;;  %v2338_v14 = vpop.xlane.xlu1 %2337 }
 0x558   :  { %6131 = vmatprep.subr.bf16.mxu1 %v8411_v33 }
 0x55b   :  { %6132 = vmatpush3.bf16.msra.mxu1 %v8411_v33 }
 0x55c   :  { %6133 = vmatprep.subr.bf16.mxu1 %v8436_v50 }
 0x55f   :  { %6134 = vmatpush3.bf16.msra.mxu1 %v8436_v50 }
 0x560   :  { %6135 = vmatprep.subr.bf16.mxu1 %v8433_v54 }
 0x563   :  { %6136 = vmatpush3.bf16.msra.mxu1 %v8433_v54  ;;  %v6690_v54 = vpop.eup %6689 }
 0x564   :  { %6137 = vmatprep.subr.bf16.mxu1 %v8452_v34 }
 0x567   :  { %6138 = vmatpush3.bf16.msra.mxu1 %v8452_v34 }
 0x568   :  { %6139 = vmatprep.subr.bf16.mxu1 %v8449_v2 }
 0x56b   :  { %6140 = vmatpush3.bf16.msra.mxu1 %v8449_v2  ;;  %v2424_v2 = vmul.f32 %v6690_v54, %v8973_v27 }
 0x570   :  { %v2332_v33 = vpop.xlane.xlu0 %2331 }
 0x571   :  { %6691 = vrcp.f32 %v2332_v33 }
 0x572   :  { %6693 = vrcp.f32 %v2338_v14 }
 0x574   :  { %v2342_v51 = vpop.xlane.xlu1 %2341 }
 0x575   :  { %v2336_v50 = vpop.xlane.xlu0 %2335 }
 0x576   :  { %6695 = vrcp.f32 %v2336_v50 }
 0x577   :  { %6697 = vrcp.f32 %v2342_v51 }
 0x578   :  { %v2346_v12 = vpop.xlane.xlu1 %2345 }
 0x579   :  { %v2340_v13 = vpop.xlane.xlu0 %2339 }
 0x57a   :  { %6699 = vrcp.f32 %v2340_v13 }
 0x57b   :  { %v6692_v35 = vpop.eup %6691  ;;  %6701 = vrcp.f32 %v2346_v12 }
 0x57c   :  { %v2350_v34 = vpop.xlane.xlu1 %2349  ;;  %v2423_v62 = vmul.f32 %v6692_v35, %v8986_v52  ;;  %v6694_v59 = vpop.eup %6693 }
 0x57d   :  { %v2344_v16 = vpop.xlane.xlu0 %2343  ;;  %v2426_v15 = vmul.f32 %v6694_v59, %v8976_v63 }
 0x57e   :  { %6703 = vrcp.f32 %v2344_v16  ;;  %v2453_v60 = vpack.c.bf16 %v2424_v2, %v2423_v62 }
 0x57f   :  { %6705 = vrcp.f32 %v2350_v34 }
 0x580   :  { %v6696_v49 = vpop.eup %6695  ;;  %v2354_v5 = vpop.xlane.xlu1 %2353  ;;  %6113 = vmatprep.mubr.bf16.mxu1 %v2453_v60 }
 0x581   :  { %v2348_v6 = vpop.xlane.xlu0 %2347  ;;  %v2425_v48 = vmul.f32 %v6696_v49, %v8993_v25  ;;  %v6698_v40 = vpop.eup %6697 }
 0x582   :  { %6707 = vrcp.f32 %v2348_v6  ;;  %v2428_v26 = vmul.f32 %v6698_v40, %v8991_v32 }
 0x583   :  { %v2454_v41 = vpack.c.bf16 %v2426_v15, %v2425_v48  ;;  %6709 = vrcp.f32 %v2354_v5 }
 0x584   :  { %v6700_v3 = vpop.eup %6699  ;;  %v2358_v52 = vpop.xlane.xlu1 %2357 }
 0x585   :  { %6114 = vmatmul.mubr.bf16.gmra.mrb[20].mxu1 %v2454_v41  ;;  %v2352_v27 = vpop.xlane.xlu0 %2351  ;;  %v2427_v47 = vmul.f32 %v6700_v3, %v9001_v43  ;;  %v6702_v61 = vpop.eup %6701 }
 0x586   :  { %6711 = vrcp.f32 %v2352_v27  ;;  %v2430_v51 = vmul.f32 %v6702_v61, %v8999_v56 }
 0x587   :  { %v2455_v17 = vpack.c.bf16 %v2428_v26, %v2427_v47  ;;  %6713 = vrcp.f32 %v2358_v52 }
 0x588   :  { %v6704_v14 = vpop.eup %6703  ;;  %v2362_v25 = vpop.xlane.xlu1 %2361 }
 0x589   :  { %6117 = vmatprep.mubr.bf16.mxu1 %v2455_v17  ;;  %v2356_v63 = vpop.xlane.xlu0 %2355  ;;  %v2429_v33 = vmul.f32 %v6704_v14, %v9009_v55  ;;  %v6706_v50 = vpop.eup %6705 }
 0x58a   :  { %6715 = vrcp.f32 %v2356_v63  ;;  %v2432_v35 = vmul.f32 %v6706_v50, %v9007_v11 }
 0x58b   :  { %v2456_v12 = vpack.c.bf16 %v2430_v51, %v2429_v33  ;;  %6717 = vrcp.f32 %v2362_v25 }
 0x58c   :  { %v6708_v54 = vpop.eup %6707  ;;  %v2366_v43 = vpop.xlane.xlu1 %2365 }
 0x58d   :  { %6118 = vmatmul.mubr.bf16.gmra.mrb[24].mxu1 %v2456_v12  ;;  %v2360_v32 = vpop.xlane.xlu0 %2359  ;;  %v2431_v13 = vmul.f32 %v6708_v54, %v9017_v42  ;;  %v6710_v34 = vpop.eup %6709 }
 0x58e   :  { %6719 = vrcp.f32 %v2360_v32  ;;  %v2434_v59 = vmul.f32 %v6710_v34, %v9015_v0  ;;  %v2889_v34 = vld [vmem:[#allocation7 + $0x20] sm:$0xff] }
 0x58f   :  { %v2457_v62 = vpack.c.bf16 %v2432_v35, %v2431_v13  ;;  %6721 = vrcp.f32 %v2366_v43 }
 0x590   :  { %v6712_v2 = vpop.eup %6711 }
 0x591   :  { %v2370_v55 = vpop.xlane.xlu1 %2369  ;;  %6121 = vmatprep.mubr.bf16.mxu1 %v2457_v62  ;;  %v2433_v16 = vmul.f32 %v6712_v2, %v9025_v45  ;;  %v6714_v60 = vpop.eup %6713  ;;  %v2890_v62 = vld [vmem:[#allocation7 + $0x28] sm:$0xff] }
 0x592   :  { %v2364_v56 = vpop.xlane.xlu0 %2363  ;;  %v2436_v48 = vmul.f32 %v6714_v60, %v9023_v39  ;;  %v2903_v2 = vpack.c.bf16 %v2890_v62, %v2889_v34 }
 0x593   :  { %6723 = vrcp.f32 %v2364_v56  ;;  %v2458_v49 = vpack.c.bf16 %v2434_v59, %v2433_v16  ;;  %v2892_v59 = vld [vmem:[#allocation7 + $0x38] sm:$0xff] }
 0x594   :  { %v6716_v5 = vpop.eup %6715  ;;  %6725 = vrcp.f32 %v2370_v55  ;;  %6161 = vmatprep.subr.bf16.mxu0 %v2903_v2 }
 0x595   :  { %v2374_v42 = vpop.xlane.xlu1 %2373  ;;  %6122 = vmatmul.mubr.bf16.gmra.mrb[28].mxu1 %v2458_v49  ;;  %v2435_v6 = vmul.f32 %v6716_v5, %v9033_v19  ;;  %v6718_v15 = vpop.eup %6717  ;;  %6162 = vmatpush3.bf16.msra.mxu0 %v2903_v2 }
 0x596   :  { %v2368_v11 = vpop.xlane.xlu0 %2367  ;;  %v2438_v0 = vmul.f32 %v6718_v15, %v9031_v9 }
 0x597   :  { %6727 = vrcp.f32 %v2368_v11  ;;  %v2459_v40 = vpack.c.bf16 %v2436_v48, %v2435_v6  ;;  %v2894_v11 = vld [vmem:[#allocation7 + $0x48] sm:$0xff] }
 0x598   :  { %v6720_v41 = vpop.eup %6719  ;;  %6729 = vrcp.f32 %v2374_v42 }
 0x599   :  { %v2378_v45 = vpop.xlane.xlu1 %2377  ;;  %v2437_v3 = vmul.f32 %v6720_v41, %v9041_v31  ;;  %6141 = vmatprep.mubr.bf16.mxu1 %v2459_v40  ;;  %v6722_v27 = vpop.eup %6721  ;;  %v2896_v41 = vld [vmem:[#allocation7 + $0x58] sm:$0xff] }
 0x59a   :  { %v2372_v52 = vpop.xlane.xlu0 %2371  ;;  %v2440_v17 = vmul.f32 %v6722_v27, %v9039_v58  ;;  %v2900_v27 = vld [vmem:[#allocation7 + $0x78] sm:$0xff] }
 0x59b   :  { %6731 = vrcp.f32 %v2372_v52  ;;  %v2460_v47 = vpack.c.bf16 %v2438_v0, %v2437_v3  ;;  %v2898_v0 = vld [vmem:[#allocation7 + $0x68] sm:$0xff]  ;;  %v2899_v3 = vld [vmem:[#allocation7 + $0x70] sm:$0xff] }
 0x59c   :  { %6733 = vrcp.f32 %v2378_v45  ;;  %v2897_v45 = vld [vmem:[#allocation7 + $0x60] sm:$0xff] }
 0x59d   :  { %v6724_v26 = vpop.eup %6723  ;;  %v2382_v19 = vpop.xlane.xlu1 %2381  ;;  %6142 = vmatmul.mubr.bf16.vlgmr.msra.gmra.mrb[32].mxu1 %v2460_v47  ;;  %v2907_v52 = vpack.c.bf16 %v2898_v0, %v2897_v45  ;;  %v2908_v47 = vpack.c.bf16 %v2900_v27, %v2899_v3  ;;  %v3090_v0 = vld [vmem:[%s10660_s9 + $0x60] sm:$0xff]  ;;  %v3091_v3 = vld [vmem:[%s10660_s9 + $0x68] sm:$0xff]  ;;  %v3092_v27 = vld [vmem:[%s10660_s9 + $0x70] sm:$0xff] }
 0x59e   :  { %v2376_v39 = vpop.xlane.xlu0 %2375  ;;  %v2439_v61 = vmul.f32 %v6724_v26, %v9049_v46  ;;  %v6726_v14 = vpop.eup %6725 }
 0x59f   :  { %6735 = vrcp.f32 %v2376_v39  ;;  %v2442_v51 = vmul.f32 %v6726_v14, %v9047_v10 }
 0x5a0   :  { %v2461_v25 = vpack.c.bf16 %v2440_v17, %v2439_v61  ;;  %6737 = vrcp.f32 %v2382_v19 }
 0x5a1   :  { %v6728_v9 = vpop.eup %6727  ;;  %v2386_v31 = vpop.xlane.xlu1 %2385 }
 0x5a2   :  { %6145 = vmatprep.mubr.bf16.mxu1 %v2461_v25  ;;  %v2380_v63 = vpop.xlane.xlu0 %2379  ;;  %v2441_v33 = vmul.f32 %v6728_v9, %v9057_v30  ;;  %v6730_v50 = vpop.eup %6729 }
 0x5a3   :  { %6739 = vrcp.f32 %v2380_v63  ;;  %v2444_v43 = vmul.f32 %v6730_v50, %v9055_v36 }
 0x5a4   :  { %v2462_v12 = vpack.c.bf16 %v2442_v51, %v2441_v33  ;;  %6741 = vrcp.f32 %v2386_v31 }
 0x5a5   :  { %v6732_v54 = vpop.eup %6731 }
 0x5a6   :  { %6146 = vmatmul.mubr.bf16.gmra.mrb[36].mxu1 %v2462_v12  ;;  %v2384_v46 = vpop.xlane.xlu0 %2383  ;;  %v2443_v58 = vmul.f32 %v6732_v54, %v9064_v29  ;;  %v6734_v32 = vpop.eup %6733  ;;  %v2891_v29 = vld [vmem:[#allocation7 + $0x30] sm:$0xff] }
 0x5a7   :  { %6743 = vrcp.f32 %v2384_v46  ;;  %v2446_v30 = vmul.f32 %v6734_v32, %v9062_v22  ;;  %v2904_v49 = vpack.c.bf16 %v2892_v59, %v2891_v29  ;;  %v2893_v22 = vld [vmem:[#allocation7 + $0x40] sm:$0xff] }
 0x5a8   :  { %v2463_v13 = vpack.c.bf16 %v2444_v43, %v2443_v58  ;;  %v2905_v15 = vpack.c.bf16 %v2894_v11, %v2893_v22  ;;  %v9139_v58 = vld [vmem:[%s10659_s8] ss:$0 sm:$0xff]  ;;  %v3084_v11 = vld [vmem:[%s10660_s9 + $0x30] sm:$0xff] }
 0x5a9   :  { %v6736_v35 = vpop.eup %6735  ;;  %6163 = vmatprep.subr.bf16.mxu0 %v2904_v49 }
 0x5aa   :  { %6149 = vmatprep.mubr.bf16.mxu1 %v2463_v13  ;;  %v2445_v10 = vmul.f32 %v6736_v35, %v9070_v8  ;;  %v6738_v55 = vpop.eup %6737  ;;  %6164 = vmatpush3.bf16.msra.mxu0 %v2904_v49 }
 0x5ab   :  { %v2448_v60 = vmul.f32 %v6738_v55, %v9068_v1  ;;  %6165 = vmatprep.subr.bf16.mxu0 %v2905_v15  ;;  %v3080_v55 = vld [vmem:[%s10660_s9 + $0x10] sm:$0xff] }
 0x5ac   :  { %v2464_v56 = vpack.c.bf16 %v2446_v30, %v2445_v10 }
 0x5ad   :  { %v6740_v16 = vpop.eup %6739 }
 0x5ae   :  { %6150 = vmatmul.mubr.bf16.gmra.mrb[40].mxu1 %v2464_v56  ;;  %v2447_v36 = vmul.f32 %v6740_v16, %v9076_v20  ;;  %v6742_v5 = vpop.eup %6741  ;;  %6166 = vmatpush3.bf16.msra.mxu0 %v2905_v15  ;;  %v2895_v20 = vld [vmem:[#allocation7 + $0x50] sm:$0xff]  ;;  %v3081_v56 = vld [vmem:[%s10660_s9 + $0x18] sm:$0xff]  ;;  %v3086_v15 = vld [vmem:[%s10660_s9 + $0x40] sm:$0xff] }
 0x5af   :  { %v2450_v48 = vmul.f32 %v6742_v5, %v9074_v24  ;;  %v2906_v1 = vpack.c.bf16 %v2896_v41, %v2895_v20  ;;  %v3078_v24 = vld [vmem:[%s10660_s9] sm:$0xff]  ;;  %v6449_v49 = vpack.c.bf16 %v3081_v56, %v3080_v55  ;;  %v3088_v41 = vld [vmem:[%s10660_s9 + $0x50] sm:$0xff] }
 0x5b0   :  { %v2465_v42 = vpack.c.bf16 %v2448_v60, %v2447_v36  ;;  %v3082_v5 = vld [vmem:[%s10660_s9 + $0x20] sm:$0xff] }
 0x5b1   :  { %v6744_v8 = vpop.eup %6743  ;;  %6167 = vmatprep.subr.bf16.mxu0 %v2906_v1 }
 0x5b2   :  { %6153 = vmatprep.mubr.bf16.mxu1 %v2465_v42  ;;  %v2449_v6 = vmul.f32 %v6744_v8, %v9080_v7  ;;  %6168 = vmatpush3.bf16.msra.mxu0 %v2906_v1  ;;  %v3079_v7 = vld [vmem:[%s10660_s9 + $0x8] sm:$0xff]  ;;  %v3089_v1 = vld [vmem:[%s10660_s9 + $0x58] sm:$0xff] }
 0x5b3   :  { %6169 = vmatprep.subr.bf16.mxu0 %v2907_v52  ;;  %v6445_v26 = vpack.c.bf16 %v3079_v7, %v3078_v24  ;;  %v3083_v42 = vld [vmem:[%s10660_s9 + $0x28] sm:$0xff]  ;;  %v6465_v45 = vpack.c.bf16 %v3089_v1, %v3088_v41 }
 0x5b4   :  { %v2466_v40 = vpack.c.bf16 %v2450_v48, %v2449_v6  ;;  %v6453_v22 = vpack.c.bf16 %v3083_v42, %v3082_v5  ;;  %v3085_v6 = vld [vmem:[%s10660_s9 + $0x38] sm:$0xff] }
 0x5b5   :  { %v6457_v48 = vpack.c.bf16 %v3085_v6, %v3084_v11 }
 0x5b6   :  { %6154 = vmatmul.mubr.bf16.gmra.mrb[44].mxu1 %v2466_v40  ;;  %6170 = vmatpush3.bf16.msra.mxu0 %v2907_v52  ;;  %v3087_v40 = vld [vmem:[%s10660_s9 + $0x48] sm:$0xff]  ;;  %v6469_v52 = vpack.c.bf16 %v3091_v3, %v3090_v0 }
 0x5b7   :  { %6171 = vmatprep.subr.bf16.mxu0 %v2908_v47  ;;  %v6461_v20 = vpack.c.bf16 %v3087_v40, %v3086_v15 }
 0x5ba   :  { %6172 = vmatpush3.bf16.msra.mxu0 %v2908_v47  ;;  %v3093_v47 = vld [vmem:[%s10660_s9 + $0x78] sm:$0xff] }
 0x5bb   :  { %6446 = vmatprep.subr.bf16.mxu0 %v6445_v26  ;;  %v6473_v24 = vpack.c.bf16 %v3093_v47, %v3092_v27 }
 0x621   :  { %v6111_v19 = vpop.f32.mrb[16].mxu1 }
 0x622   :  { %v2711_v39 = vmin.f32 %v6111_v19, 0.0  ;;  %v2517_v61 = vpop.f32.mrb[17].mxu1  ;;  %vm2679_vm8 = vcmp.gt.f32.partialorder %v6111_v19, 0.0 }
 0x623   :  { %v2709_v17 = vmin.f32 %v2517_v61, 0.0  ;;  %v6112_v14 = vpop.f32.mrb[18].mxu1  ;;  %vm2677_vm7 = vcmp.gt.f32.partialorder %v2517_v61, 0.0 }
 0x624   :  { %v2745_v25 = vmul.f32 1.442695, %v2711_v39  ;;  %v2712_v9 = vmin.f32 %v6112_v14, 0.0  ;;  %v2520_v31 = vpop.f32.mrb[19].mxu1  ;;  %vm2680_vm14 = vcmp.gt.f32.partialorder %v6112_v14, 0.0 }
 0x625   :  { %v2741_v63 = vmul.f32 1.442695, %v2709_v17  ;;  %v2710_v33 = vmin.f32 %v2520_v31, 0.0  ;;  %vm2678_vm13 = vcmp.gt.f32.partialorder %v2520_v31, 0.0 }
 0x626   :  { %6745 = vpow2.f32 %v2745_v25  ;;  %v2747_v51 = vmul.f32 1.442695, %v2712_v9 }
 0x627   :  { %6747 = vpow2.f32 %v2741_v63  ;;  %v2743_v50 = vmul.f32 1.442695, %v2710_v33 }
 0x628   :  { %6749 = vpow2.f32 %v2747_v51 }
 0x629   :  { %6751 = vpow2.f32 %v2743_v50 }
 0x630   :  { %v6746_v12 = vpop.eup %6745 }
 0x631   :  { %v6748_v54 = vpop.eup %6747  ;;  %v5510_v46 = vadd.f32 -1.0, %v6746_v12 }
 0x632   :  { %v6750_v43 = vpop.eup %6749  ;;  %v5508_v32 = vadd.f32 -1.0, %v6748_v54 }
 0x633   :  { %v6752_v13 = vpop.eup %6751  ;;  %v9141_v35 = vsel %vm2679_vm8, %v6111_v19, %v5510_v46  ;;  %v5511_v34 = vadd.f32 -1.0, %v6750_v43 }
 0x634   :  { %v5509_v62 = vadd.f32 -1.0, %v6752_v13  ;;  %v3103_v10 = vmul.f32 %v9139_v58, %v9141_v35  ;;  %v9145_v30 = vsel %vm2677_vm7, %v2517_v61, %v5508_v32 }
 0x635   :  { %v9147_v2 = vsel %vm2680_vm14, %v6112_v14, %v5511_v34  ;;  %v3101_v60 = vmul.f32 %v9139_v58, %v9145_v30 }
 0x636   :  { %v9155_v16 = vsel %vm2678_vm13, %v2520_v31, %v5509_v62  ;;  %3137 = vadd.xlane.f32.xlu0 %v3103_v10  ;;  %v3104_v29 = vmul.f32 %v9139_v58, %v9147_v2  ;;  %v2870_v36 = vpack.c.bf16 %v9147_v2, %v9141_v35 }
 0x637   :  { %v2869_v59 = vpack.c.bf16 %v9155_v16, %v9145_v30  ;;  %v3102_v8 = vmul.f32 %v9139_v58, %v9155_v16 }
 0x638   :  { %3139 = vadd.xlane.f32.xlu1 %v3104_v29 }
 0x639   :  { %6173 = vmatprep.mubr.bf16.mxu0 %v2869_v59 }
 0x63a   :  { %3133 = vadd.xlane.f32.xlu0 %v3101_v60  ;;  %6174 = vmatmul.mubr.bf16.vlgmr.msra.gmra.mrb[48].mxu0 %v2870_v36 }
 0x63b   :  { %6448 = vmatpush3.bf16.msra.mxu0 %v6445_v26 }
 0x63c   :  { %3135 = vadd.xlane.f32.xlu1 %v3102_v8  ;;  %6450 = vmatprep.subr.bf16.mxu0 %v6449_v49 }
 0x63f   :  { %6452 = vmatpush3.bf16.msra.mxu0 %v6449_v49 }
 0x640   :  { %6454 = vmatprep.subr.bf16.mxu0 %v6453_v22 }
 0x643   :  { %6456 = vmatpush3.bf16.msra.mxu0 %v6453_v22 }
 0x644   :  { %6458 = vmatprep.subr.bf16.mxu0 %v6457_v48 }
 0x647   :  { %6460 = vmatpush3.bf16.msra.mxu0 %v6457_v48 }
 0x648   :  { %6462 = vmatprep.subr.bf16.mxu0 %v6461_v20 }
 0x64b   :  { %6464 = vmatpush3.bf16.msra.mxu0 %v6461_v20 }
 0x64c   :  { %6466 = vmatprep.subr.bf16.mxu0 %v6465_v45 }
 0x64f   :  { %6468 = vmatpush3.bf16.msra.mxu0 %v6465_v45 }
 0x650   :  { %6470 = vmatprep.subr.bf16.mxu0 %v6469_v52 }
 0x653   :  { %6472 = vmatpush3.bf16.msra.mxu0 %v6469_v52 }
 0x654   :  { %6474 = vmatprep.subr.bf16.mxu0 %v6473_v24 }
 0x657   :  { %6476 = vmatpush3.bf16.msra.mxu0 %v6473_v24 }
 0x658   :  { %v6115_v7 = vpop.f32.mrb[20].mxu1 }
 0x659   :  { %v2715_v26 = vmin.f32 %v6115_v7, 0.0  ;;  %v2533_v19 = vpop.f32.mrb[21].mxu1  ;;  %vm2683_vm13 = vcmp.gt.f32.partialorder %v6115_v7, 0.0 }
 0x65a   :  { %v2713_v39 = vmin.f32 %v2533_v19, 0.0  ;;  %v6116_v61 = vpop.f32.mrb[22].mxu1  ;;  %vm2681_vm8 = vcmp.gt.f32.partialorder %v2533_v19, 0.0 }
 0x65b   :  { %v2753_v17 = vmul.f32 1.442695, %v2715_v26  ;;  %v2716_v14 = vmin.f32 %v6116_v61, 0.0  ;;  %v2536_v25 = vpop.f32.mrb[23].mxu1  ;;  %vm2684_vm7 = vcmp.gt.f32.partialorder %v6116_v61, 0.0 }
 0x65c   :  { %v2749_v9 = vmul.f32 1.442695, %v2713_v39  ;;  %v2714_v31 = vmin.f32 %v2536_v25, 0.0  ;;  %vm2682_vm14 = vcmp.gt.f32.partialorder %v2536_v25, 0.0 }
 0x65d   :  { %6753 = vpow2.f32 %v2753_v17  ;;  %v2755_v63 = vmul.f32 1.442695, %v2716_v14 }
 0x65e   :  { %6755 = vpow2.f32 %v2749_v9  ;;  %v2751_v33 = vmul.f32 1.442695, %v2714_v31 }
 0x65f   :  { %6757 = vpow2.f32 %v2755_v63 }
 0x660   :  { %6759 = vpow2.f32 %v2751_v33  ;;  %v9203_v51 = vpop.f32.mrb[24].mxu1 }
 0x661   :  { %v2719_v50 = vmin.f32 %v9203_v51, 0.0  ;;  %v9206_v12 = vpop.f32.mrb[25].mxu1 }
 0x662   :  { %v2717_v54 = vmin.f32 %v9206_v12, 0.0  ;;  %v9209_v46 = vpop.f32.mrb[26].mxu1 }
 0x663   :  { %v2761_v43 = vmul.f32 1.442695, %v2719_v50  ;;  %v2720_v32 = vmin.f32 %v9209_v46, 0.0  ;;  %v9212_v13 = vpop.f32.mrb[27].mxu1 }
 0x664   :  { %v2757_v34 = vmul.f32 1.442695, %v2717_v54  ;;  %v2718_v62 = vmin.f32 %v9212_v13, 0.0 }
 0x665   :  { %6761 = vpow2.f32 %v2761_v43  ;;  %v2763_v10 = vmul.f32 1.442695, %v2720_v32 }
 0x666   :  { %6763 = vpow2.f32 %v2757_v34  ;;  %v2759_v55 = vmul.f32 1.442695, %v2718_v62 }
 0x667   :  { %v6754_v56 = vpop.eup %6753  ;;  %6765 = vpow2.f32 %v2763_v10 }
 0x668   :  { %v6756_v29 = vpop.eup %6755  ;;  %v5514_v59 = vadd.f32 -1.0, %v6754_v56  ;;  %6767 = vpow2.f32 %v2759_v55  ;;  %v9215_v36 = vpop.f32.mrb[28].mxu1 }
 0x669   :  { %v6758_v60 = vpop.eup %6757  ;;  %v5512_v49 = vadd.f32 -1.0, %v6756_v29  ;;  %v2723_v5 = vmin.f32 %v9215_v36, 0.0  ;;  %v9218_v42 = vpop.f32.mrb[29].mxu1 }
 0x66a   :  { %v6760_v8 = vpop.eup %6759  ;;  %v9220_v22 = vsel %vm2683_vm13, %v6115_v7, %v5514_v59  ;;  %v5515_v11 = vadd.f32 -1.0, %v6758_v60  ;;  %v2721_v6 = vmin.f32 %v9218_v42, 0.0  ;;  %v9223_v48 = vpop.f32.mrb[30].mxu1  ;;  %vm2687_vm13 = vcmp.gt.f32.partialorder %v9203_v51, 0.0 }
 0x66b   :  { %v5513_v15 = vadd.f32 -1.0, %v6760_v8  ;;  %v2769_v40 = vmul.f32 1.442695, %v2723_v5  ;;  %v9225_v20 = vpop.f32.mrb[31].mxu1  ;;  %v9227_v41 = vsel %vm2681_vm8, %v2533_v19, %v5512_v49  ;;  %v2724_v0 = vmin.f32 %v9223_v48, 0.0 }
 0x66c   :  { %v9229_v1 = vsel %vm2684_vm7, %v6116_v61, %v5515_v11  ;;  %v2765_v45 = vmul.f32 1.442695, %v2721_v6  ;;  %v2722_v52 = vmin.f32 %v9225_v20, 0.0  ;;  %v3107_v27 = vmul.f32 %v9139_v58, %v9220_v22 }
 0x66d   :  { %v9232_v3 = vsel %vm2682_vm14, %v2536_v25, %v5513_v15  ;;  %6769 = vpow2.f32 %v2769_v40  ;;  %v2771_v47 = vmul.f32 1.442695, %v2724_v0  ;;  %v3108_v24 = vmul.f32 %v9139_v58, %v9229_v1 }
 0x66e   :  { %6771 = vpow2.f32 %v2765_v45  ;;  %v2871_v7 = vpack.c.bf16 %v9232_v3, %v9227_v41  ;;  %v2767_v19 = vmul.f32 1.442695, %v2722_v52  ;;  %3145 = vadd.xlane.f32.xlu0 %v3107_v27  ;;  %v2872_v39 = vpack.c.bf16 %v9229_v1, %v9220_v22 }
 0x66f   :  { %v6762_v26 = vpop.eup %6761  ;;  %vm2685_vm8 = vcmp.gt.f32.partialorder %v9206_v12, 0.0  ;;  %6773 = vpow2.f32 %v2771_v47  ;;  %3147 = vadd.xlane.f32.xlu1 %v3108_v24  ;;  %v3105_v63 = vmul.f32 %v9139_v58, %v9227_v41  ;;  %v3106_v62 = vmul.f32 %v9139_v58, %v9232_v3 }
 0x670   :  { %v6764_v61 = vpop.eup %6763  ;;  %v5518_v17 = vadd.f32 -1.0, %v6762_v26  ;;  %v9245_v14 = vpop.f32.mrb[32].mxu1  ;;  %6177 = vmatprep.mubr.bf16.mxu0 %v2871_v7  ;;  %6775 = vpow2.f32 %v2767_v19  ;;  %vm2688_vm7 = vcmp.gt.f32.partialorder %v9209_v46, 0.0  ;;  %vm2686_vm14 = vcmp.gt.f32.partialorder %v9212_v13, 0.0 }
 0x671   :  { %v6766_v25 = vpop.eup %6765  ;;  %v5516_v9 = vadd.f32 -1.0, %v6764_v61  ;;  %v2727_v31 = vmin.f32 %v9245_v14, 0.0  ;;  %v9250_v33 = vpop.f32.mrb[33].mxu1  ;;  %6178 = vmatmul.mubr.bf16.gmra.mrb[52].mxu0 %v2872_v39 }
 0x672   :  { %v6768_v50 = vpop.eup %6767  ;;  %v9253_v54 = vsel %vm2687_vm13, %v9203_v51, %v5518_v17  ;;  %v5519_v43 = vadd.f32 -1.0, %v6766_v25  ;;  %v2725_v32 = vmin.f32 %v9250_v33, 0.0  ;;  %v9256_v34 = vpop.f32.mrb[34].mxu1  ;;  %3141 = vadd.xlane.f32.xlu0 %v3105_v63  ;;  %vm2691_vm13 = vcmp.gt.f32.partialorder %v9215_v36, 0.0 }
 0x673   :  { %v5517_v10 = vadd.f32 -1.0, %v6768_v50  ;;  %v2777_v55 = vmul.f32 1.442695, %v2727_v31  ;;  %v9262_v56 = vpop.f32.mrb[35].mxu1  ;;  %v9267_v51 = vsel %vm2685_vm8, %v9206_v12, %v5516_v9  ;;  %v2728_v60 = vmin.f32 %v9256_v34, 0.0  ;;  %3143 = vadd.xlane.f32.xlu1 %v3106_v62 }
 0x674   :  { %v9270_v29 = vsel %vm2688_vm7, %v9209_v46, %v5519_v43  ;;  %v2773_v59 = vmul.f32 1.442695, %v2725_v32  ;;  %v2726_v5 = vmin.f32 %v9262_v56, 0.0  ;;  %v3111_v8 = vmul.f32 %v9139_v58, %v9253_v54 }
 0x675   :  { %v9274_v49 = vsel %vm2686_vm14, %v9212_v13, %v5517_v10  ;;  %6777 = vpow2.f32 %v2777_v55  ;;  %v2779_v11 = vmul.f32 1.442695, %v2728_v60  ;;  %v3112_v12 = vmul.f32 %v9139_v58, %v9270_v29 }
 0x676   :  { %6779 = vpow2.f32 %v2773_v59  ;;  %v2873_v46 = vpack.c.bf16 %v9274_v49, %v9267_v51  ;;  %v2775_v15 = vmul.f32 1.442695, %v2726_v5  ;;  %3153 = vadd.xlane.f32.xlu0 %v3111_v8  ;;  %v2874_v13 = vpack.c.bf16 %v9270_v29, %v9253_v54 }
 0x677   :  { %v6770_v6 = vpop.eup %6769  ;;  %6781 = vpow2.f32 %v2779_v11  ;;  %3155 = vadd.xlane.f32.xlu1 %v3112_v12  ;;  %v3109_v27 = vmul.f32 %v9139_v58, %v9267_v51  ;;  %vm2689_vm8 = vcmp.gt.f32.partialorder %v9218_v42, 0.0  ;;  %v3110_v39 = vmul.f32 %v9139_v58, %v9274_v49 }
 0x678   :  { %v6772_v40 = vpop.eup %6771  ;;  %6181 = vmatprep.mubr.bf16.mxu0 %v2873_v46  ;;  %6783 = vpow2.f32 %v2775_v15  ;;  %v5522_v7 = vadd.f32 -1.0, %v6770_v6  ;;  %vm2692_vm7 = vcmp.gt.f32.partialorder %v9223_v48, 0.0  ;;  %vm2690_vm14 = vcmp.gt.f32.partialorder %v9225_v20, 0.0 }
 0x679   :  { %v9286_v45 = vpop.f32.mrb[36].mxu1  ;;  %v5520_v0 = vadd.f32 -1.0, %v6772_v40  ;;  %6182 = vmatmul.mubr.bf16.gmra.mrb[56].mxu0 %v2874_v13  ;;  %v6774_v24 = vpop.eup %6773 }
 0x67a   :  { %v2731_v52 = vmin.f32 %v9286_v45, 0.0  ;;  %v9291_v47 = vpop.f32.mrb[37].mxu1  ;;  %v6776_v61 = vpop.eup %6775  ;;  %v5523_v25 = vadd.f32 -1.0, %v6774_v24  ;;  %3149 = vadd.xlane.f32.xlu0 %v3109_v27  ;;  %v9316_v10 = vsel %vm2691_vm13, %v9215_v36, %v5522_v7  ;;  %vm2693_vm13 = vcmp.gt.f32.partialorder %v9250_v33, 0.0 }
 0x67b   :  { %v2729_v26 = vmin.f32 %v9291_v47, 0.0  ;;  %v9295_v19 = vpop.f32.mrb[38].mxu1  ;;  %v9300_v17 = vsel %vm2689_vm8, %v9218_v42, %v5520_v0  ;;  %v5521_v63 = vadd.f32 -1.0, %v6776_v61  ;;  %3151 = vadd.xlane.f32.xlu1 %v3110_v39  ;;  %vm2695_vm8 = vcmp.gt.f32.partialorder %v9245_v14, 0.0 }
 0x67c   :  { %v2785_v9 = vmul.f32 1.442695, %v2731_v52  ;;  %v9303_v31 = vpop.f32.mrb[39].mxu1  ;;  %v2732_v43 = vmin.f32 %v9295_v19, 0.0  ;;  %v9308_v32 = vsel %vm2692_vm7, %v9223_v48, %v5523_v25  ;;  %v3113_v62 = vmul.f32 %v9139_v58, %v9300_v17 }
 0x67d   :  { %v2781_v50 = vmul.f32 1.442695, %v2729_v26  ;;  %v2730_v42 = vmin.f32 %v9303_v31, 0.0  ;;  %v9319_v55 = vsel %vm2690_vm14, %v9225_v20, %v5521_v63  ;;  %v2876_v20 = vpack.c.bf16 %v9308_v32, %v9316_v10 }
 0x67e   :  { %6785 = vpow2.f32 %v2785_v9  ;;  %v2787_v59 = vmul.f32 1.442695, %v2732_v43  ;;  %3157 = vadd.xlane.f32.xlu0 %v3113_v62  ;;  %v3114_v48 = vmul.f32 %v9139_v58, %v9319_v55  ;;  %v2875_v8 = vpack.c.bf16 %v9319_v55, %v9300_v17 }
 0x67f   :  { %6787 = vpow2.f32 %v2781_v50  ;;  %v6778_v60 = vpop.eup %6777  ;;  %v2783_v5 = vmul.f32 1.442695, %v2730_v42  ;;  %v3115_v13 = vmul.f32 %v9139_v58, %v9316_v10  ;;  %vm2696_vm7 = vcmp.gt.f32.partialorder %v9256_v34, 0.0 }
 0x680   :  { %v6780_v11 = vpop.eup %6779  ;;  %v5526_v12 = vadd.f32 -1.0, %v6778_v60  ;;  %6789 = vpow2.f32 %v2787_v59  ;;  %3159 = vadd.xlane.f32.xlu1 %v3114_v48  ;;  %6185 = vmatprep.mubr.bf16.mxu0 %v2875_v8  ;;  %vm2694_vm14 = vcmp.gt.f32.partialorder %v9262_v56, 0.0 }
 0x681   :  { %v9326_v36 = vpop.f32.mrb[40].mxu1  ;;  %v5524_v46 = vadd.f32 -1.0, %v6780_v11  ;;  %6791 = vpow2.f32 %v2783_v5  ;;  %v6782_v40 = vpop.eup %6781  ;;  %6186 = vmatmul.mubr.bf16.gmra.mrb[60].mxu0 %v2876_v20 }
 0x682   :  { %v2735_v6 = vmin.f32 %v9326_v36, 0.0  ;;  %v9331_v15 = vpop.f32.mrb[41].mxu1  ;;  %v9336_v0 = vsel %vm2695_vm8, %v9245_v14, %v5526_v12  ;;  %v6784_v24 = vpop.eup %6783  ;;  %v5527_v7 = vadd.f32 -1.0, %v6782_v40  ;;  %3161 = vadd.xlane.f32.xlu0 %v3115_v13  ;;  %v3116_v14 = vmul.f32 %v9139_v58, %v9308_v32 }
 0x683   :  { %v2733_v52 = vmin.f32 %v9331_v15, 0.0  ;;  %v9341_v27 = vpop.f32.mrb[42].mxu1  ;;  %v9349_v61 = vsel %vm2693_vm13, %v9250_v33, %v5524_v46  ;;  %v5525_v25 = vadd.f32 -1.0, %v6784_v24  ;;  %v3119_v42 = vmul.f32 %v9139_v58, %v9336_v0 }
 0x684   :  { %v2793_v26 = vmul.f32 1.442695, %v2735_v6  ;;  %v9344_v39 = vpop.f32.mrb[43].mxu1  ;;  %v2736_v63 = vmin.f32 %v9341_v27, 0.0  ;;  %v9353_v50 = vsel %vm2696_vm7, %v9256_v34, %v5527_v7  ;;  %3163 = vadd.xlane.f32.xlu1 %v3116_v14  ;;  %vm2699_vm8 = vcmp.gt.f32.partialorder %v9286_v45, 0.0 }
 0x685   :  { %v2789_v9 = vmul.f32 1.442695, %v2733_v52  ;;  %v2734_v43 = vmin.f32 %v9344_v39, 0.0  ;;  %v9359_v62 = vsel %vm2694_vm14, %v9262_v56, %v5525_v25  ;;  %v3120_v59 = vmul.f32 %v9139_v58, %v9353_v50 }
 0x686   :  { %6793 = vpow2.f32 %v2793_v26  ;;  %v2795_v33 = vmul.f32 1.442695, %v2736_v63  ;;  %3169 = vadd.xlane.f32.xlu0 %v3119_v42  ;;  %v2877_v34 = vpack.c.bf16 %v9359_v62, %v9349_v61  ;;  %v2878_v56 = vpack.c.bf16 %v9353_v50, %v9336_v0 }
 0x687   :  { %6795 = vpow2.f32 %v2789_v9  ;;  %v2791_v5 = vmul.f32 1.442695, %v2734_v43  ;;  %v3117_v6 = vmul.f32 %v9139_v58, %v9349_v61  ;;  %vm2697_vm13 = vcmp.gt.f32.partialorder %v9291_v47, 0.0 }
 0x688   :  { %v6786_v60 = vpop.eup %6785  ;;  %6797 = vpow2.f32 %v2795_v33  ;;  %3171 = vadd.xlane.f32.xlu1 %v3120_v59  ;;  %6189 = vmatprep.mubr.bf16.mxu0 %v2877_v34  ;;  %vm2700_vm7 = vcmp.gt.f32.partialorder %v9295_v19, 0.0  ;;  %vm2698_vm14 = vcmp.gt.f32.partialorder %v9303_v31, 0.0 }
 0x689   :  { %v6788_v48 = vpop.eup %6787  ;;  %v5530_v8 = vadd.f32 -1.0, %v6786_v60  ;;  %v9366_v11 = vpop.f32.mrb[44].mxu1  ;;  %6799 = vpow2.f32 %v2791_v5  ;;  %6190 = vmatmul.mubr.bf16.gmra.mrb[64].mxu0 %v2878_v56 }
 0x68a   :  { %v5528_v12 = vadd.f32 -1.0, %v6788_v48  ;;  %v2739_v20 = vmin.f32 %v9366_v11, 0.0  ;;  %v9371_v46 = vpop.f32.mrb[45].mxu1  ;;  %v6790_v13 = vpop.eup %6789  ;;  %3165 = vadd.xlane.f32.xlu0 %v3117_v6 }
 0x68b   :  { %v9376_v40 = vsel %vm2699_vm8, %v9286_v45, %v5530_v8  ;;  %v2737_v52 = vmin.f32 %v9371_v46, 0.0  ;;  %v9381_v24 = vpop.f32.mrb[46].mxu1  ;;  %v6792_v7 = vpop.eup %6791  ;;  %v5531_v26 = vadd.f32 -1.0, %v6790_v13  ;;  %v3118_v45 = vmul.f32 %v9139_v58, %v9359_v62 }
 0x68c   :  { %v2801_v14 = vmul.f32 1.442695, %v2739_v20  ;;  %v9384_v25 = vpop.f32.mrb[47].mxu1  ;;  %v9389_v9 = vsel %vm2697_vm13, %v9291_v47, %v5528_v12  ;;  %v5529_v63 = vadd.f32 -1.0, %v6792_v7  ;;  %v2740_v42 = vmin.f32 %v9381_v24, 0.0 }
 0x68d   :  { %v2797_v43 = vmul.f32 1.442695, %v2737_v52  ;;  %v9393_v33 = vsel %vm2700_vm7, %v9295_v19, %v5531_v26  ;;  %v2738_v59 = vmin.f32 %v9384_v25, 0.0  ;;  %3167 = vadd.xlane.f32.xlu1 %v3118_v45  ;;  %v3123_v60 = vmul.f32 %v9139_v58, %v9376_v40 }
 0x68e   :  { %6801 = vpow2.f32 %v2801_v14  ;;  %v9399_v5 = vsel %vm2698_vm14, %v9303_v31, %v5529_v63  ;;  %v2803_v47 = vmul.f32 1.442695, %v2740_v42  ;;  %v3124_v34 = vmul.f32 %v9139_v58, %v9393_v33 }
 0x68f   :  { %6803 = vpow2.f32 %v2797_v43  ;;  %v2799_v8 = vmul.f32 1.442695, %v2738_v59  ;;  %3177 = vadd.xlane.f32.xlu0 %v3123_v60  ;;  %v2879_v19 = vpack.c.bf16 %v9399_v5, %v9389_v9  ;;  %v2880_v20 = vpack.c.bf16 %v9393_v33, %v9376_v40 }
 0x690   :  { %v6794_v48 = vpop.eup %6793  ;;  %6805 = vpow2.f32 %v2803_v47  ;;  %vm2703_vm8 = vcmp.gt.f32.partialorder %v9326_v36, 0.0  ;;  %v3121_v31 = vmul.f32 %v9139_v58, %v9389_v9  ;;  %v3122_v14 = vmul.f32 %v9139_v58, %v9399_v5 }
 0x691   :  { %v6796_v56 = vpop.eup %6795  ;;  %v5534_v12 = vadd.f32 -1.0, %v6794_v48  ;;  %6807 = vpow2.f32 %v2799_v8  ;;  %3179 = vadd.xlane.f32.xlu1 %v3124_v34  ;;  %6193 = vmatprep.mubr.bf16.mxu0 %v2879_v19  ;;  %vm2704_vm13 = vcmp.gt.f32.partialorder %v9341_v27, 0.0  ;;  %vm2701_vm7 = vcmp.gt.f32.partialorder %v9331_v15, 0.0 }
 0x692   :  { %v6798_v6 = vpop.eup %6797  ;;  %v5532_v52 = vadd.f32 -1.0, %v6796_v56  ;;  %6194 = vmatmul.mubr.bf16.gmra.mrb[68].mxu0 %v2880_v20  ;;  %vm2702_vm14 = vcmp.gt.f32.partialorder %v9344_v39, 0.0 }
 0x693   :  { %v9411_v13 = vsel %vm2703_vm8, %v9326_v36, %v5534_v12  ;;  %v6800_v7 = vpop.eup %6799  ;;  %v5535_v26 = vadd.f32 -1.0, %v6798_v6  ;;  %3173 = vadd.xlane.f32.xlu0 %v3121_v31  ;;  %vm2705_vm8 = vcmp.gt.f32.partialorder %v9371_v46, 0.0 }
 0x694   :  { %v3127_v45 = vmul.f32 %v9139_v58, %v9411_v13  ;;  %v5533_v63 = vadd.f32 -1.0, %v6800_v7  ;;  %v9424_v36 = vsel %vm2701_vm7, %v9331_v15, %v5532_v52  ;;  %vm2707_vm7 = vcmp.gt.f32.partialorder %v9366_v11, 0.0 }
 0x695   :  { %v9420_v43 = vsel %vm2704_vm13, %v9341_v27, %v5535_v26  ;;  %3175 = vadd.xlane.f32.xlu1 %v3122_v14  ;;  %v3125_v15 = vmul.f32 %v9139_v58, %v9424_v36  ;;  %vm2708_vm13 = vcmp.gt.f32.partialorder %v9381_v24, 0.0 }
 0x696   :  { %v9427_v42 = vsel %vm2702_vm14, %v9344_v39, %v5533_v63  ;;  %v3128_v59 = vmul.f32 %v9139_v58, %v9420_v43  ;;  %v2882_v27 = vpack.c.bf16 %v9420_v43, %v9411_v13  ;;  %vm2706_vm14 = vcmp.gt.f32.partialorder %v9384_v25, 0.0 }
 0x697   :  { %3185 = vadd.xlane.f32.xlu0 %v3127_v45  ;;  %v2881_v47 = vpack.c.bf16 %v9427_v42, %v9424_v36  ;;  %v3126_v20 = vmul.f32 %v9139_v58, %v9427_v42 }
 0x698   :  { %v6802_v60 = vpop.eup %6801 }
 0x699   :  { %v6804_v34 = vpop.eup %6803  ;;  %3187 = vadd.xlane.f32.xlu1 %v3128_v59  ;;  %6197 = vmatprep.mubr.bf16.mxu0 %v2881_v47  ;;  %v5538_v8 = vadd.f32 -1.0, %v6802_v60 }
 0x69a   :  { %v5536_v48 = vadd.f32 -1.0, %v6804_v34  ;;  %v6806_v39 = vpop.eup %6805  ;;  %6198 = vmatmul.mubr.bf16.gmra.mrb[72].mxu0 %v2882_v27 }
 0x69b   :  { %v6808_v19 = vpop.eup %6807  ;;  %v5539_v12 = vadd.f32 -1.0, %v6806_v39  ;;  %3181 = vadd.xlane.f32.xlu0 %v3125_v15  ;;  %v2867_v7 = vsel %vm2707_vm7, %v9366_v11, %v5538_v8  ;;  %v11161_v39 = vld [vmem:[#allocation22_spill] sm:$0xff] }
 0x69c   :  { %v2865_v56 = vsel %vm2705_vm8, %v9371_v46, %v5536_v48  ;;  %v5537_v31 = vadd.f32 -1.0, %v6808_v19  ;;  %v3131_v63 = vmul.f32 %v9139_v58, %v2867_v7 }
 0x69d   :  { %v3129_v6 = vmul.f32 %v9139_v58, %v2865_v56  ;;  %v2868_v52 = vsel %vm2708_vm13, %v9381_v24, %v5539_v12  ;;  %3183 = vadd.xlane.f32.xlu1 %v3126_v20 }
 0x69e   :  { %v2866_v46 = vsel %vm2706_vm14, %v9384_v25, %v5537_v31  ;;  %v2884_v45 = vpack.c.bf16 %v2868_v52, %v2867_v7  ;;  %v3132_v24 = vmul.f32 %v9139_v58, %v2868_v52 }
 0x69f   :  { %3189 = vadd.xlane.f32.xlu0 %v3129_v6  ;;  %v3130_v26 = vmul.f32 %v9139_v58, %v2866_v46  ;;  %v2883_v14 = vpack.c.bf16 %v2866_v46, %v2865_v56 }
 0x6a1   :  { %3191 = vadd.xlane.f32.xlu1 %v3130_v26  ;;  %6201 = vmatprep.mubr.bf16.mxu0 %v2883_v14 }
 0x6a2   :  { %6202 = vmatmul.mubr.bf16.gmra.mrb[76].mxu0 %v2884_v45  ;;  %v9496_v45 = vld [vmem:[%s10658_s7] ss:$0 sm:$0xff] }
 0x6a3   :  { %3193 = vadd.xlane.f32.xlu0 %v3131_v63  ;;  %6301 = vmatprep.mubr.f32.mxu0 %v9145_v30  ;;  %v11164_v63 = vld [vmem:[#allocation24_spill] sm:$0xff] }
 0x6a5   :  { %3195 = vadd.xlane.f32.xlu1 %v3132_v24 }
 0x6aa   :  { %6302 = vmatmul.mubr.f32.vlgmr.msra.gmra.mrb[80].mxu0 %v9155_v16 }
 0x6ab   :  { %6304 = vmatprep.mubr.f32.mxu0 %v9141_v35 }
 0x6ae   :  { %6305 = vmatmul.mubr.f32.gmra.mrb[82].mxu0 %v9147_v2 }
 0x6af   :  { %6307 = vmatprep.mubr.f32.mxu0 %v9227_v41 }
 0x6b2   :  { %6308 = vmatmul.mubr.f32.gmra.mrb[84].mxu0 %v9232_v3 }
 0x6b3   :  { %6310 = vmatprep.mubr.f32.mxu0 %v9220_v22 }
 0x6b6   :  { %6311 = vmatmul.mubr.f32.gmra.mrb[86].mxu0 %v9229_v1 }
 0x6b7   :  { %6313 = vmatprep.mubr.f32.mxu0 %v9267_v51 }
 0x6ba   :  { %6314 = vmatmul.mubr.f32.gmra.mrb[88].mxu0 %v9274_v49 }
 0x6bb   :  { %6316 = vmatprep.mubr.f32.mxu0 %v9253_v54 }
 0x6be   :  { %6317 = vmatmul.mubr.f32.gmra.mrb[90].mxu0 %v9270_v29 }
 0x6bf   :  { %6319 = vmatprep.mubr.f32.mxu0 %v9300_v17 }
 0x6c2   :  { %6320 = vmatmul.mubr.f32.gmra.mrb[92].mxu0 %v9319_v55 }
 0x6c3   :  { %6322 = vmatprep.mubr.f32.mxu0 %v9316_v10  ;;  %v3138_v35 = vpop.xlane.xlu0 %3137 }
 0x6c4   :  { %v3231_v1 = vmul.f32 0.2, %v3138_v35  ;;  %vm3199_vm7 = vcmp.gt.f32.partialorder %v3138_v35, 0.0 }
 0x6c5   :  { %v3140_v58 = vpop.xlane.xlu1 %3139 }
 0x6c6   :  { %6323 = vmatmul.mubr.f32.gmra.mrb[94].mxu0 %v9308_v32  ;;  %v3232_v51 = vmul.f32 0.2, %v3140_v58  ;;  %v3263_v49 = vsel %vm3199_vm7, %v3138_v35, %v3231_v1  ;;  %vm3200_vm14 = vcmp.gt.f32.partialorder %v3140_v58, 0.0  ;;  %vm11158_vm7 = vcmask 261312   ;;  %v11167_v1 = vld [vmem:[#allocation26_spill] sm:$0xff] }
 0x6c7   :  { %6325 = vmatprep.mubr.f32.mxu0 %v9349_v61  ;;  %v3134_v2 = vpop.xlane.xlu0 %3133  ;;  %v3337_v55 = vrot.slane %v3263_v49, %v11015_v53 }
 0x6c8   :  { %v3229_v22 = vmul.f32 0.2, %v3134_v2  ;;  %vm3197_vm13 = vcmp.gt.f32.partialorder %v3134_v2, 0.0 }
 0x6c9   :  { %v3136_v30 = vpop.xlane.xlu1 %3135 }
 0x6ca   :  { %6326 = vmatmul.mubr.f32.gmra.mrb[96].mxu0 %v9359_v62  ;;  %v3230_v16 = vmul.f32 0.2, %v3136_v30  ;;  %vm3198_vm8 = vcmp.gt.f32.partialorder %v3136_v30, 0.0  ;;  %v3261_v3 = vsel %vm3197_vm13, %v3134_v2, %v3229_v22  ;;  %vm11157_vm13 = vcmask 195712   ;;  %v11166_v2 = vld [vmem:[#allocation23_spill] sm:$0xff] }
 0x6cb   :  { %6328 = vmatprep.mubr.f32.mxu0 %v9336_v0  ;;  %v3328_v17 = vrot.slane %v3261_v3, %v11013_v44  ;;  %v3264_v0 = vsel %vm3200_vm14, %v3140_v58, %v3232_v51  ;;  %vm11159_vm14 = vcmask 326912  }
 0x6cc   :  { %v3262_v41 = vsel %vm3198_vm8, %v3136_v30, %v3230_v16 }
 0x6cd   :  { %v3332_v54 = vrot.slane %v3262_v41, %v11012_v57 }
 0x6ce   :  { %6329 = vmatmul.mubr.f32.gmra.mrb[98].mxu0 %v9353_v50 }
 0x6cf   :  { %6331 = vmatprep.mubr.f32.mxu0 %v9389_v9  ;;  %v3333_v10 = vsel %vm11156_vm5, %v3332_v54, %v3328_v17  ;;  %v3342_v9 = vrot.slane %v3264_v0, %v11017_v38  ;;  %v11168_v54 = vld [vmem:[#allocation25_spill] sm:$0xff] }
 0x6d2   :  { %6332 = vmatmul.mubr.f32.gmra.mrb[100].mxu0 %v9399_v5 }
 0x6d3   :  { %6334 = vmatprep.mubr.f32.mxu0 %v9376_v40  ;;  %v3338_v40 = vsel %vm11157_vm13, %v3337_v55, %v3333_v10  ;;  %vm11160_vm13 = vcmask 392512  }
 0x6d4   :  { %v3343_v59 = vsel %vm11158_vm7, %v3342_v9, %v3338_v40 }
 0x6d6   :  { %6335 = vmatmul.mubr.f32.gmra.mrb[102].mxu0 %v9393_v33 }
 0x6d7   :  { %6337 = vmatprep.mubr.f32.mxu0 %v9424_v36 }
 0x6da   :  { %6338 = vmatmul.mubr.f32.gmra.mrb[104].mxu0 %v9427_v42 }
 0x6db   :  { %6340 = vmatprep.mubr.f32.mxu0 %v9411_v13 }
 0x6de   :  { %6341 = vmatmul.mubr.f32.gmra.mrb[106].mxu0 %v9420_v43 }
 0x6df   :  { %6343 = vmatprep.mubr.f32.mxu0 %v2865_v56 }
 0x6e2   :  { %6344 = vmatmul.mubr.f32.gmra.mrb[108].mxu0 %v2866_v46 }
 0x6e3   :  { %6346 = vmatprep.mubr.f32.mxu0 %v2867_v7 }
 0x6e6   :  { %6347 = vmatmul.mubr.f32.gmra.mrb[110].mxu0 %v2868_v52  ;;  %v11163_v52 = vld [vmem:[#allocation21_spill] sm:$0xff] }
 0x6fb   :  { %v3146_v29 = vpop.xlane.xlu0 %3145 }
 0x6fc   :  { %v3148_v32 = vpop.xlane.xlu1 %3147  ;;  %v3235_v50 = vmul.f32 0.2, %v3146_v29  ;;  %vm3203_vm6 = vcmp.gt.f32.partialorder %v3146_v29, 0.0 }
 0x6fd   :  { %v3236_v5 = vmul.f32 0.2, %v3148_v32  ;;  %vm3204_vm5 = vcmp.gt.f32.partialorder %v3148_v32, 0.0 }
 0x6fe   :  { %v3267_v42 = vsel %vm3203_vm6, %v3146_v29, %v3235_v50  ;;  %vm11162_vm6 = vcmask 458112  }
 0x6ff   :  { %v3142_v61 = vpop.xlane.xlu0 %3141  ;;  %v3357_v8 = vrot.slane %v3267_v42, %v11161_v39  ;;  %v3268_v19 = vsel %vm3204_vm5, %v3148_v32, %v3236_v5  ;;  %vm11165_vm5 = vcmask 523712   ;;  %v11175_v42 = vld [vmem:[#allocation27_spill] sm:$0xff] }
 0x700   :  { %vm3201_vm8 = vcmp.gt.f32.partialorder %v3142_v61, 0.0  ;;  %v3233_v62 = vmul.f32 0.2, %v3142_v61  ;;  %v3144_v11 = vpop.xlane.xlu1 %3143  ;;  %v3362_v7 = vrot.slane %v3268_v19, %v11163_v52 }
 0x701   :  { %vm3202_vm10 = vcmp.gt.f32.partialorder %v3144_v11, 0.0  ;;  %v3234_v25 = vmul.f32 0.2, %v3144_v11 }
 0x702   :  { %v3265_v33 = vsel %vm3201_vm8, %v3142_v61, %v3233_v62  ;;  %v11172_v62 = vld [vmem:[#allocation28_spill] sm:$0xff] }
 0x703   :  { %v3347_v13 = vrot.slane %v3265_v33, %v11018_v21  ;;  %v3266_v43 = vsel %vm3202_vm10, %v3144_v11, %v3234_v25  ;;  %v3154_v36 = vpop.xlane.xlu0 %3153 }
 0x704   :  { %v3352_v60 = vrot.slane %v3266_v43, %v11020_v37  ;;  %v3156_v47 = vpop.xlane.xlu1 %3155  ;;  %v3239_v48 = vmul.f32 0.2, %v3154_v36  ;;  %vm3207_vm8 = vcmp.gt.f32.partialorder %v3154_v36, 0.0 }
 0x705   :  { %v3348_v34 = vsel %vm11159_vm14, %v3347_v13, %v3343_v59  ;;  %v3240_v15 = vmul.f32 0.2, %v3156_v47  ;;  %vm3208_vm9 = vcmp.gt.f32.partialorder %v3156_v47, 0.0 }
 0x706   :  { %v3353_v27 = vsel %vm11160_vm13, %v3352_v60, %v3348_v34  ;;  %v3271_v46 = vsel %vm3207_vm8, %v3154_v36, %v3239_v48  ;;  %vm11170_vm13 = vcmask 654912  }
 0x707   :  { %v3150_v56 = vpop.xlane.xlu0 %3149  ;;  %v3358_v31 = vsel %vm11162_vm6, %v3357_v8, %v3353_v27  ;;  %v3272_v26 = vsel %vm3208_vm9, %v3156_v47, %v3240_v15  ;;  %v3377_v3 = vrot.slane %v3271_v46, %v11167_v1  ;;  %vm11169_vm9 = vcmask 589312   ;;  %v11177_v8 = vld [vmem:[#allocation30_spill] sm:$0xff] }
 0x708   :  { %vm3205_vm10 = vcmp.gt.f32.partialorder %v3150_v56, 0.0  ;;  %v3237_v12 = vmul.f32 0.2, %v3150_v56  ;;  %v3152_v20 = vpop.xlane.xlu1 %3151  ;;  %v3363_v30 = vsel %vm11165_vm5, %v3362_v7, %v3358_v31  ;;  %v3382_v51 = vrot.slane %v3272_v26, %v11168_v54 }
 0x709   :  { %vm3206_vm7 = vcmp.gt.f32.partialorder %v3152_v20, 0.0  ;;  %v3238_v6 = vmul.f32 0.2, %v3152_v20  ;;  %vm11173_vm6 = vcmask 786112   ;;  %vm11174_vm5 = vcmask 851712  }
 0x70a   :  { %v3269_v14 = vsel %vm3205_vm10, %v3150_v56, %v3237_v12  ;;  %vm11171_vm10 = vcmask 720512  }
 0x70b   :  { %v3367_v24 = vrot.slane %v3269_v14, %v11164_v63  ;;  %v3270_v58 = vsel %vm3206_vm7, %v3152_v20, %v3238_v6  ;;  %v3158_v35 = vpop.xlane.xlu0 %3157  ;;  %v11179_v6 = vld [vmem:[#allocation29_spill] sm:$0xff] }
 0x70c   :  { %v3372_v16 = vrot.slane %v3270_v58, %v11166_v2  ;;  %vm3209_vm14 = vcmp.gt.f32.partialorder %v3158_v35, 0.0  ;;  %v3241_v22 = vmul.f32 0.2, %v3158_v35 }
 0x70d   :  { %v6175_v41 = vpop.f32.mrb[48].mxu0  ;;  %v3368_v29 = vsel %vm11169_vm9, %v3367_v24, %v3363_v30  ;;  %v3160_v17 = vpop.xlane.xlu1 %3159  ;;  %vm11176_vm9 = vcmask 917312  }
 0x70e   :  { %v2959_v49 = vadd.f32 %v6175_v41, %v9496_v45  ;;  %v2950_v32 = vpop.f32.mrb[49].mxu0  ;;  %v3373_v10 = vsel %vm11170_vm13, %v3372_v16, %v3368_v29  ;;  %v3273_v55 = vsel %vm3209_vm14, %v3158_v35, %v3241_v22  ;;  %vm3210_vm8 = vcmp.gt.f32.partialorder %v3160_v17, 0.0  ;;  %v11192_v22 = vld [vmem:[#allocation38_spill] sm:$0xff] }
 0x70f   :  { %v3242_v0 = vmul.f32 0.2, %v3160_v17  ;;  %v6176_v61 = vpop.f32.mrb[50].mxu0  ;;  %v3378_v50 = vsel %vm11171_vm10, %v3377_v3, %v3373_v10  ;;  %v3387_v11 = vrot.slane %v3273_v55, %v11172_v62  ;;  %v2951_v40 = vadd.f32 %v9496_v45, %v2950_v32  ;;  %v3162_v9 = vpop.xlane.xlu0 %3161 }
 0x710   :  { %v2962_v25 = vadd.f32 %v6176_v61, %v9496_v45  ;;  %v2953_v33 = vpop.f32.mrb[51].mxu0  ;;  %v3383_v5 = vsel %vm11173_vm6, %v3382_v51, %v3378_v50  ;;  %vm3211_vm7 = vcmp.gt.f32.partialorder %v3162_v9, 0.0  ;;  %v3243_v43 = vmul.f32 0.2, %v3162_v9 }
 0x711   :  { %v3274_v13 = vsel %vm3210_vm8, %v3160_v17, %v3242_v0  ;;  %v3388_v36 = vsel %vm11174_vm5, %v3387_v11, %v3383_v5  ;;  %v2954_v47 = vadd.f32 %v9496_v45, %v2953_v33  ;;  %v3164_v34 = vpop.xlane.xlu1 %3163  ;;  %vm11178_vm13 = vcmask 982912  }
 0x712   :  { %v3392_v59 = vrot.slane %v3274_v13, %v11175_v42  ;;  %v3834_v60 = vpack.c.bf16 %v2962_v25, %v2959_v49  ;;  %v3275_v27 = vsel %vm3211_vm7, %v3162_v9, %v3243_v43  ;;  %vm3212_vm14 = vcmp.gt.f32.partialorder %v3164_v34, 0.0 }
 0x713   :  { %v3244_v48 = vmul.f32 0.2, %v3164_v34  ;;  %v3397_v19 = vrot.slane %v3275_v27, %v11177_v8  ;;  %v3833_v56 = vpack.c.bf16 %v2954_v47, %v2951_v40  ;;  %v3170_v12 = vpop.xlane.xlu0 %3169  ;;  %vm11180_vm8 = vcmask 1048512  }
 0x714   :  { %v3393_v15 = vsel %vm11176_vm9, %v3392_v59, %v3388_v36  ;;  %v3247_v14 = vmul.f32 0.2, %v3170_v12  ;;  %vm3215_vm6 = vcmp.gt.f32.partialorder %v3170_v12, 0.0  ;;  %vm11189_vm9 = vcmask 261312  }
 0x715   :  { %v3276_v20 = vsel %vm3212_vm14, %v3164_v34, %v3244_v48  ;;  %v3398_v31 = vsel %vm11178_vm13, %v3397_v19, %v3393_v15  ;;  %6205 = vmatprep.subr.bf16.mxu1 %v3833_v56  ;;  %v3172_v46 = vpop.xlane.xlu1 %3171  ;;  %vm11187_vm14 = vcmask 195712   ;;  %vm11193_vm13 = vnez %v11192_v22 }
 0x716   :  { %v3402_v7 = vrot.slane %v3276_v20, %v11179_v6  ;;  %6206 = vmatpush3.bf16.msra.mxu1 %v3833_v56  ;;  %v3248_v29 = vmul.f32 0.2, %v3172_v46  ;;  %v3279_v17 = vsel %vm3215_vm6, %v3170_v12, %v3247_v14 }
 0x717   :  { %6207 = vmatprep.subr.bf16.mxu1 %v3834_v60  ;;  %v3166_v24 = vpop.xlane.xlu0 %3165  ;;  %v3416_v25 = vrot.slane %v3279_v17, %v11015_v53 }
 0x718   :  { %v9519_v26 = vsel %vm11180_vm8, %v3402_v7, %v3398_v31  ;;  %vm3213_vm10 = vcmp.gt.f32.partialorder %v3166_v24, 0.0  ;;  %v3245_v58 = vmul.f32 0.2, %v3166_v24  ;;  %vm11196_vm8 = vcmask 392512  }
 0x719   :  { %v9524_v30 = vsel %vm7587_vm3, %v9519_v26, -9e+15  ;;  %v9530_v41 = vsel %vm7594_vm0, %v9519_v26, -9e+15  ;;  %vm3216_vm3 = vcmp.gt.f32.partialorder %v3172_v46, 0.0  ;;  %vm11185_vm0 = vcmask 130112  }
 0x71a   :  { %v3168_v16 = vpop.xlane.xlu1 %3167  ;;  %3531 = vmax.xlane.f32.xlu1 %v9524_v30  ;;  %v3277_v3 = vsel %vm3213_vm10, %v3166_v24, %v3245_v58  ;;  %3529 = vmax.xlane.f32.xlu0 %v9530_v41  ;;  %v9536_v55 = vsel %vm7599_vm11, %v9519_v26, -9e+15  ;;  %v9544_v40 = vsel %vm7606_vm4, %v9519_v26, -9e+15  ;;  %v3280_v9 = vsel %vm3216_vm3, %v3172_v46, %v3248_v29  ;;  %v11194_v29 = vld [vmem:[#allocation39_spill] sm:$0xff] }
 0x71b   :  { %vm3214_vm7 = vcmp.gt.f32.partialorder %v3168_v16, 0.0  ;;  %v3246_v51 = vmul.f32 0.2, %v3168_v16  ;;  %6208 = vmatpush3.bf16.msra.mxu1 %v3834_v60  ;;  %v3407_v0 = vrot.slane %v3277_v3, %v11013_v44  ;;  %v9552_v59 = vsel %vm7624_vm15, %v9519_v26, -9e+15 }
 0x71c   :  { %v3178_v49 = vpop.xlane.xlu0 %3177  ;;  %v9559_v27 = vsel %vm7629_vm12, %v9519_v26, -9e+15  ;;  %v3421_v48 = vrot.slane %v3280_v9, %v11017_v38  ;;  %v9568_v24 = vsel %vm7648_vm2, %v9519_v26, -9e+15  ;;  %vm11191_vm12 = vcmask 326912  }
 0x71d   :  { %v3278_v32 = vsel %vm3214_vm7, %v3168_v16, %v3246_v51  ;;  %v3251_v5 = vmul.f32 0.2, %v3178_v49  ;;  %vm3219_vm11 = vcmp.gt.f32.partialorder %v3178_v49, 0.0  ;;  %v9576_v3 = vsel %vm11193_vm13, %v9519_v26, -9e+15 }
 0x71e   :  { %v3411_v61 = vrot.slane %v3278_v32, %v11012_v57  ;;  %v3180_v50 = vpop.xlane.xlu1 %3179  ;;  %3535 = vmax.xlane.f32.xlu1 %v9536_v55  ;;  %3533 = vmax.xlane.f32.xlu0 %v9544_v40  ;;  %vm11195_vm2 = vnez %v11194_v29  ;;  %vm11197_vm3 = vcmask 458112   ;;  %vm11206_vm13 = vcmask 654912  }
 0x71f   :  { %v3283_v56 = vsel %vm3219_vm11, %v3178_v49, %v3251_v5  ;;  %v3252_v12 = vmul.f32 0.2, %v3180_v50  ;;  %vm3220_vm15 = vcmp.gt.f32.partialorder %v3180_v50, 0.0  ;;  %v9583_v49 = vsel %vm11195_vm2, %v9519_v26, -9e+15 }
 0x720   :  { %v3412_v33 = vsel %vm11185_vm0, %v3411_v61, %v3407_v0  ;;  %v3174_v13 = vpop.xlane.xlu0 %3173  ;;  %v3436_v51 = vrot.slane %v3283_v56, %v11161_v39 }
 0x721   :  { %vm3217_vm5 = vcmp.gt.f32.partialorder %v3174_v13, 0.0  ;;  %v3249_v43 = vmul.f32 0.2, %v3174_v13  ;;  %v3417_v60 = vsel %vm11187_vm14, %v3416_v25, %v3412_v33  ;;  %v3284_v17 = vsel %vm3220_vm15, %v3180_v50, %v3252_v12  ;;  %v11198_v33 = vld [vmem:[#allocation40_spill] sm:$0xff] }
 0x722   :  { %v3176_v47 = vpop.xlane.xlu1 %3175  ;;  %3539 = vmax.xlane.f32.xlu1 %v9552_v59  ;;  %3537 = vmax.xlane.f32.xlu0 %v9559_v27  ;;  %v3422_v7 = vsel %vm11189_vm9, %v3421_v48, %v3417_v60  ;;  %vm11199_vm0 = vnez %v11198_v33  ;;  %v3441_v50 = vrot.slane %v3284_v17, %v11163_v52  ;;  %v11200_v48 = vld [vmem:[#allocation41_spill] sm:$0xff]  ;;  %vm11202_vm14 = vcmask 523712  }
 0x723   :  { %v3281_v15 = vsel %vm3217_vm5, %v3174_v13, %v3249_v43  ;;  %vm3218_vm4 = vcmp.gt.f32.partialorder %v3176_v47, 0.0  ;;  %v3250_v19 = vmul.f32 0.2, %v3176_v47  ;;  %v9591_v5 = vsel %vm11199_vm0, %v9519_v26, -9e+15 }
 0x724   :  { %v3426_v20 = vrot.slane %v3281_v15, %v11018_v21  ;;  %v3186_v31 = vpop.xlane.xlu0 %3185  ;;  %vm11201_vm5 = vnez %v11200_v48  ;;  %vm11203_vm15 = vcmask 589312  }
 0x725   :  { %v3282_v46 = vsel %vm3218_vm4, %v3176_v47, %v3250_v19  ;;  %v3255_v10 = vmul.f32 0.2, %v3186_v31  ;;  %vm3223_vm10 = vcmp.gt.f32.partialorder %v3186_v31, 0.0  ;;  %v9599_v15 = vsel %vm11201_vm5, %v9519_v26, -9e+15 }
 0x726   :  { %v3427_v58 = vsel %vm11191_vm12, %v3426_v20, %v3422_v7  ;;  %v3431_v35 = vrot.slane %v3282_v46, %v11020_v37  ;;  %v3188_v16 = vpop.xlane.xlu1 %3187  ;;  %3543 = vmax.xlane.f32.xlu1 %v9568_v24  ;;  %3541 = vmax.xlane.f32.xlu0 %v9576_v3 }
 0x727   :  { %v3256_v0 = vmul.f32 0.2, %v3188_v16  ;;  %vm3224_vm6 = vcmp.gt.f32.partialorder %v3188_v16, 0.0  ;;  %v3287_v36 = vsel %vm3223_vm10, %v3186_v31, %v3255_v10  ;;  %v11204_v31 = vld [vmem:[#allocation42_spill] sm:$0xff] }
 0x728   :  { %v3432_v32 = vsel %vm11196_vm8, %v3431_v35, %v3427_v58  ;;  %v3182_v61 = vpop.xlane.xlu0 %3181  ;;  %vm11205_vm9 = vnez %v11204_v31  ;;  %v3456_v58 = vrot.slane %v3287_v36, %v11167_v1  ;;  %vm11209_vm8 = vcmask 720512  }
 0x729   :  { %vm3221_vm7 = vcmp.gt.f32.partialorder %v3182_v61, 0.0  ;;  %v3253_v11 = vmul.f32 0.2, %v3182_v61  ;;  %v3437_v25 = vsel %vm11197_vm3, %v3436_v51, %v3432_v32  ;;  %v3288_v60 = vsel %vm3224_vm6, %v3188_v16, %v3256_v0  ;;  %v11207_v32 = vld [vmem:[#allocation43_spill] sm:$0xff] }
 0x72a   :  { %v3184_v9 = vpop.xlane.xlu1 %3183  ;;  %3547 = vmax.xlane.f32.xlu1 %v9583_v49  ;;  %3545 = vmax.xlane.f32.xlu0 %v9591_v5  ;;  %v3442_v19 = vsel %vm11202_vm14, %v3441_v50, %v3437_v25  ;;  %v9608_v14 = vsel %vm11205_vm9, %v9519_v26, -9e+15  ;;  %v3461_v22 = vrot.slane %v3288_v60, %v11168_v54  ;;  %vm11208_vm2 = vnez %v11207_v32  ;;  %v11211_v50 = vld [vmem:[#allocation44_spill] sm:$0xff]  ;;  %v11229_v32 = vld [vmem:[#allocation51_spill] sm:$0xff] }
 0x72b   :  { %v3285_v13 = vsel %vm3221_vm7, %v3182_v61, %v3253_v11  ;;  %vm3222_vm11 = vcmp.gt.f32.partialorder %v3184_v9, 0.0  ;;  %v3254_v43 = vmul.f32 0.2, %v3184_v9  ;;  %v9618_v10 = vsel %vm11208_vm2, %v9519_v26, -9e+15 }
 0x72c   :  { %v3446_v47 = vrot.slane %v3285_v13, %v11164_v63  ;;  %v3190_v34 = vpop.xlane.xlu0 %3189  ;;  %vm11210_vm6 = vcmask 786112   ;;  %vm11212_vm7 = vnez %v11211_v50  ;;  %vm11213_vm3 = vcmask 851712  }
 0x72d   :  { %v3286_v56 = vsel %vm3222_vm11, %v3184_v9, %v3254_v43  ;;  %vm3225_vm4 = vcmp.gt.f32.partialorder %v3190_v34, 0.0  ;;  %v3257_v12 = vmul.f32 0.2, %v3190_v34  ;;  %v9627_v13 = vsel %vm11212_vm7, %v9519_v26, -9e+15 }
 0x72e   :  { %v3447_v20 = vsel %vm11203_vm15, %v3446_v47, %v3442_v19  ;;  %v3451_v7 = vrot.slane %v3286_v56, %v11166_v2  ;;  %v3192_v46 = vpop.xlane.xlu1 %3191  ;;  %3551 = vmax.xlane.f32.xlu1 %v9599_v15  ;;  %3549 = vmax.xlane.f32.xlu0 %v9608_v14  ;;  %vm11214_vm11 = vcmask 917312   ;;  %v11215_v19 = vld [vmem:[#allocation45_spill] sm:$0xff]  ;;  %vm11217_vm14 = vcmask 982912  }
 0x72f   :  { %v3289_v35 = vsel %vm3225_vm4, %v3190_v34, %v3257_v12  ;;  %vm3226_vm12 = vcmp.gt.f32.partialorder %v3192_v46, 0.0  ;;  %v3258_v16 = vmul.f32 0.2, %v3192_v46  ;;  %vm11216_vm5 = vnez %v11215_v19 }
 0x730   :  { %v3452_v51 = vsel %vm11206_vm13, %v3451_v7, %v3447_v20  ;;  %v3466_v29 = vrot.slane %v3289_v35, %v11172_v62  ;;  %v3194_v17 = vpop.xlane.xlu0 %3193  ;;  %v9636_v56 = vsel %vm11216_vm5, %v9519_v26, -9e+15  ;;  %v11218_v7 = vld [vmem:[#allocation46_spill] sm:$0xff]  ;;  %vm11220_vm15 = vcmask 1048512  }
 0x731   :  { %v3457_v0 = vsel %vm11209_vm8, %v3456_v58, %v3452_v51  ;;  %v3290_v61 = vsel %vm3226_vm12, %v3192_v46, %v3258_v16  ;;  %vm3227_vm10 = vcmp.gt.f32.partialorder %v3194_v17, 0.0  ;;  %v3259_v11 = vmul.f32 0.2, %v3194_v17  ;;  %v11221_v58 = vld [vmem:[#allocation47_spill] sm:$0xff]  ;;  %v11223_v16 = vld [vmem:[#allocation48_spill] sm:$0xff]  ;;  %v11225_v51 = vld [vmem:[#allocation49_spill] sm:$0xff] }
 0x732   :  { %v3462_v25 = vsel %vm11210_vm6, %v3461_v22, %v3457_v0  ;;  %v3471_v9 = vrot.slane %v3290_v61, %v11175_v42  ;;  %v3196_v33 = vpop.xlane.xlu1 %3195  ;;  %3555 = vmax.xlane.f32.xlu1 %v9618_v10  ;;  %3553 = vmax.xlane.f32.xlu0 %v9627_v13  ;;  %vm11219_vm4 = vnez %v11218_v7  ;;  %vm11222_vm9 = vnez %v11221_v58  ;;  %v11231_v61 = vld [vmem:[#allocation52_spill] sm:$0xff]  ;;  %v11237_v7 = vld [vmem:[#allocation55_spill] sm:$0xff] }
 0x733   :  { %v3467_v43 = vsel %vm11213_vm3, %v3466_v29, %v3462_v25  ;;  %v3291_v36 = vsel %vm3227_vm10, %v3194_v17, %v3259_v11  ;;  %vm3228_vm0 = vcmp.gt.f32.partialorder %v3196_v33, 0.0  ;;  %v3260_v60 = vmul.f32 0.2, %v3196_v33  ;;  %v11227_v29 = vld [vmem:[#allocation50_spill] sm:$0xff] }
 0x734   :  { %v3472_v47 = vsel %vm11214_vm11, %v3471_v9, %v3467_v43  ;;  %v3476_v34 = vrot.slane %v3291_v36, %v11177_v8  ;;  %v9644_v46 = vsel %vm11219_vm4, %v9519_v26, -9e+15  ;;  %vm11224_vm12 = vnez %v11223_v16  ;;  %v11235_v43 = vld [vmem:[#allocation54_spill] sm:$0xff] }
 0x735   :  { %v3292_v48 = vsel %vm3228_vm0, %v3196_v33, %v3260_v60  ;;  %vm11226_vm13 = vnez %v11225_v51  ;;  %vm11228_vm2 = vnez %v11227_v29  ;;  %vm11230_vm8 = vnez %v11229_v32  ;;  %v11233_v33 = vld [vmem:[#allocation53_spill] sm:$0xff]  ;;  %v11239_v51 = vld [vmem:[#allocation56_spill] sm:$0xff] }
 0x736   :  { %v3477_v12 = vsel %vm11217_vm14, %v3476_v34, %v3472_v47  ;;  %v3481_v20 = vrot.slane %v3292_v48, %v11179_v6  ;;  %3559 = vmax.xlane.f32.xlu1 %v9636_v56  ;;  %3557 = vmax.xlane.f32.xlu0 %v9644_v46  ;;  %vm11232_vm10 = vnez %v11231_v61  ;;  %vm11234_vm6 = vnez %v11233_v33  ;;  %v11243_v33 = vld [vmem:[#allocation58_spill] sm:$0xff] }
 0x737   :  { %vm11236_vm7 = vnez %v11235_v43  ;;  %vm11238_vm3 = vnez %v11237_v7  ;;  %vm11240_vm0 = vnez %v11239_v51  ;;  %vm11244_vm5 = vnez %v11243_v33  ;;  %v11247_v33 = vld [vmem:[#allocation60_spill] sm:$0xff] }
 0x738   :  { %v3482_v31 = vsel %vm11220_vm15, %v3481_v20, %v3477_v12  ;;  %vm11248_vm4 = vnez %v11247_v33 }
 0x739   :  { %v9650_v35 = vsel %vm11222_vm9, %v3482_v31, -9e+15  ;;  %v9654_v22 = vsel %vm11224_vm12, %v3482_v31, -9e+15  ;;  %v9660_v26 = vsel %vm11226_vm13, %v3482_v31, -9e+15 }
 0x73a   :  { %3563 = vmax.xlane.f32.xlu1 %v9650_v35  ;;  %3561 = vmax.xlane.f32.xlu0 %v9654_v22  ;;  %v9665_v17 = vsel %vm11228_vm2, %v3482_v31, -9e+15  ;;  %v9670_v0 = vsel %vm11230_vm8, %v3482_v31, -9e+15  ;;  %v9675_v11 = vsel %vm11232_vm10, %v3482_v31, -9e+15 }
 0x73b   :  { %v9680_v50 = vsel %vm11234_vm6, %v3482_v31, -9e+15  ;;  %v9685_v36 = vsel %vm11236_vm7, %v3482_v31, -9e+15  ;;  %v9694_v58 = vsel %vm11238_vm3, %v3482_v31, -9e+15 }
 0x73c   :  { %v9699_v29 = vsel %vm11240_vm0, %v3482_v31, -9e+15  ;;  %v9709_v43 = vsel %vm11244_vm5, %v3482_v31, -9e+15  ;;  %vm11293_vm12 = vcmask 130112   ;;  %vm11294_vm13 = vcmask 195712  }
 0x73d   :  { %vm11297_vm2 = vcmask 261312   ;;  %vm11298_vm8 = vcmask 326912   ;;  %vm11301_vm10 = vcmask 392512   ;;  %vm11302_vm6 = vcmask 458112  }
 0x73e   :  { %3567 = vmax.xlane.f32.xlu1 %v9660_v26  ;;  %3565 = vmax.xlane.f32.xlu0 %v9665_v17  ;;  %vm11305_vm7 = vcmask 523712   ;;  %vm11306_vm3 = vcmask 589312   ;;  %vm11309_vm0 = vcmask 654912   ;;  %vm11313_vm5 = vcmask 786112  }
 0x742   :  { %3571 = vmax.xlane.f32.xlu1 %v9670_v0  ;;  %3569 = vmax.xlane.f32.xlu0 %v9675_v11 }
 0x744   :  { %v6179_v25 = vpop.f32.mrb[52].mxu0 }
 0x745   :  { %v2966_v9 = vpop.f32.mrb[53].mxu0  ;;  %v2975_v47 = vadd.f32 %v6179_v25, %v9496_v45  ;;  %v11241_v25 = vld [vmem:[#allocation57_spill] sm:$0xff] }
 0x746   :  { %3575 = vmax.xlane.f32.xlu1 %v9680_v50  ;;  %v6180_v60 = vpop.f32.mrb[54].mxu0  ;;  %3573 = vmax.xlane.f32.xlu0 %v9685_v36  ;;  %v2967_v19 = vadd.f32 %v9496_v45, %v2966_v9  ;;  %vm11242_vm11 = vnez %v11241_v25 }
 0x747   :  { %v2978_v34 = vadd.f32 %v6180_v60, %v9496_v45  ;;  %v2969_v48 = vpop.f32.mrb[55].mxu0  ;;  %v9704_v9 = vsel %vm11242_vm11, %v3482_v31, -9e+15  ;;  %vm11310_vm11 = vcmask 720512  }
 0x748   :  { %v2970_v12 = vadd.f32 %v9496_v45, %v2969_v48 }
 0x749   :  { %v3836_v20 = vpack.c.bf16 %v2978_v34, %v2975_v47 }
 0x74a   :  { %v3835_v16 = vpack.c.bf16 %v2970_v12, %v2967_v19  ;;  %3579 = vmax.xlane.f32.xlu1 %v9694_v58  ;;  %3577 = vmax.xlane.f32.xlu0 %v9699_v29 }
 0x74c   :  { %v6183_v32 = vpop.f32.mrb[56].mxu0  ;;  %6209 = vmatprep.subr.bf16.mxu1 %v3835_v16 }
 0x74d   :  { %v2982_v61 = vpop.f32.mrb[57].mxu0  ;;  %6210 = vmatpush3.bf16.msra.mxu1 %v3835_v16  ;;  %v2991_v47 = vadd.f32 %v6183_v32, %v9496_v45  ;;  %v11245_v16 = vld [vmem:[#allocation59_spill] sm:$0xff]  ;;  %v9723_v32 = vsel %vm11248_vm4, %v3482_v31, -9e+15  ;;  %vm11318_vm4 = vcmask 917312  }
 0x74e   :  { %3583 = vmax.xlane.f32.xlu1 %v9704_v9  ;;  %v6184_v60 = vpop.f32.mrb[58].mxu0  ;;  %6211 = vmatprep.subr.bf16.mxu1 %v3836_v20  ;;  %v2983_v19 = vadd.f32 %v9496_v45, %v2982_v61  ;;  %vm11246_vm14 = vnez %v11245_v16  ;;  %v11249_v61 = vld [vmem:[#allocation61_spill] sm:$0xff] }
 0x74f   :  { %3581 = vmax.xlane.f32.xlu0 %v9709_v43  ;;  %v2994_v34 = vadd.f32 %v6184_v60, %v9496_v45  ;;  %v2985_v48 = vpop.f32.mrb[59].mxu0  ;;  %v9718_v51 = vsel %vm11246_vm14, %v3482_v31, -9e+15  ;;  %vm11250_vm15 = vnez %v11249_v61  ;;  %vm11314_vm14 = vcmask 851712  }
 0x750   :  { %v2986_v12 = vadd.f32 %v9496_v45, %v2985_v48 }
 0x751   :  { %v3838_v7 = vpack.c.bf16 %v2994_v34, %v2991_v47  ;;  %6212 = vmatpush3.bf16.msra.mxu1 %v3836_v20  ;;  %v9728_v47 = vsel %vm11250_vm15, %v3482_v31, -9e+15  ;;  %v11251_v34 = vld [vmem:[#allocation62_spill] sm:$0xff]  ;;  %vm11319_vm15 = vcmask 982912  }
 0x752   :  { %v3837_v25 = vpack.c.bf16 %v2986_v12, %v2983_v19  ;;  %3587 = vmax.xlane.f32.xlu1 %v9718_v51  ;;  %vm11252_vm9 = vnez %v11251_v34 }
 0x753   :  { %3585 = vmax.xlane.f32.xlu0 %v9723_v32  ;;  %v9733_v48 = vsel %vm11252_vm9, %v3482_v31, -9e+15  ;;  %vm11320_vm9 = vcmask 1048512  }
 0x754   :  { %6213 = vmatprep.subr.bf16.mxu1 %v3837_v25  ;;  %v6187_v60 = vpop.f32.mrb[60].mxu0 }
 0x755   :  { %6214 = vmatpush3.bf16.msra.mxu1 %v3837_v25  ;;  %v2998_v20 = vpop.f32.mrb[61].mxu0  ;;  %v3007_v12 = vadd.f32 %v6187_v60, %v9496_v45 }
 0x756   :  { %3591 = vmax.xlane.f32.xlu1 %v9728_v47  ;;  %6215 = vmatprep.subr.bf16.mxu1 %v3838_v7  ;;  %v6188_v19 = vpop.f32.mrb[62].mxu0  ;;  %v2999_v33 = vadd.f32 %v9496_v45, %v2998_v20 }
 0x757   :  { %3589 = vmax.xlane.f32.xlu0 %v9733_v48  ;;  %v3010_v16 = vadd.f32 %v6188_v19, %v9496_v45  ;;  %v3001_v25 = vpop.f32.mrb[63].mxu0 }
 0x758   :  { %v3002_v61 = vadd.f32 %v9496_v45, %v3001_v25 }
 0x759   :  { %6216 = vmatpush3.bf16.msra.mxu1 %v3838_v7  ;;  %v3840_v4 = vpack.c.bf16 %v3010_v16, %v3007_v12 }
 0x75a   :  { %v3839_v28 = vpack.c.bf16 %v3002_v61, %v2999_v33 }
 0x75c   :  { %v6191_v18 = vpop.f32.mrb[64].mxu0  ;;  %6217 = vmatprep.subr.bf16.mxu1 %v3839_v28 }
 0x75d   :  { %v3014_v31 = vpop.f32.mrb[65].mxu0  ;;  %6218 = vmatpush3.bf16.msra.mxu1 %v3839_v28  ;;  %v3023_v23 = vadd.f32 %v6191_v18, %v9496_v45 }
 0x75e   :  { %v6192_v34 = vpop.f32.mrb[66].mxu0  ;;  %6219 = vmatprep.subr.bf16.mxu1 %v3840_v4  ;;  %v3015_v19 = vadd.f32 %v9496_v45, %v3014_v31 }
 0x75f   :  { %v3026_v60 = vadd.f32 %v6192_v34, %v9496_v45  ;;  %v3017_v6 = vpop.f32.mrb[67].mxu0 }
 0x760   :  { %v3018_v20 = vadd.f32 %v9496_v45, %v3017_v6 }
 0x761   :  { %v9744_v8 = vpack.c.bf16 %v3026_v60, %v3023_v23  ;;  %6220 = vmatpush3.bf16.msra.mxu1 %v3840_v4 }
 0x762   :  { %v9746_v7 = vpack.c.bf16 %v3018_v20, %v3015_v19 }
 0x763   :  { %11253 = vst [vmem:[#allocation31_spill] sm:$0xff] %v9744_v8 }
 0x764   :  { %11254 = vst [vmem:[#allocation32_spill] sm:$0xff] %v9746_v7  ;;  %6237 = vmatprep.subr.bf16.mxu1 %v9746_v7 }
 0x765   :  { %v6195_v12 = vpop.f32.mrb[68].mxu0 }
 0x766   :  { %v3030_v28 = vpop.f32.mrb[69].mxu0  ;;  %v3039_v25 = vadd.f32 %v6195_v12, %v9496_v45 }
 0x767   :  { %v6196_v16 = vpop.f32.mrb[70].mxu0  ;;  %v3031_v61 = vadd.f32 %v9496_v45, %v3030_v28 }
 0x768   :  { %v3042_v18 = vadd.f32 %v6196_v16, %v9496_v45  ;;  %v3033_v33 = vpop.f32.mrb[71].mxu0 }
 0x769   :  { %v3034_v31 = vadd.f32 %v9496_v45, %v3033_v33 }
 0x76a   :  { %v9753_v6 = vpack.c.bf16 %v3042_v18, %v3039_v25 }
 0x76b   :  { %v9755_v23 = vpack.c.bf16 %v3034_v31, %v3031_v61 }
 0x76c   :  { %11255 = vst [vmem:[#allocation33_spill] sm:$0xff] %v9753_v6 }
 0x76d   :  { %11256 = vst [vmem:[#allocation34_spill] sm:$0xff] %v9755_v23  ;;  %v6199_v4 = vpop.f32.mrb[72].mxu0 }
 0x76e   :  { %v3046_v34 = vpop.f32.mrb[73].mxu0  ;;  %v3055_v19 = vadd.f32 %v6199_v4, %v9496_v45 }
 0x76f   :  { %v6200_v60 = vpop.f32.mrb[74].mxu0  ;;  %v3047_v12 = vadd.f32 %v9496_v45, %v3046_v34 }
 0x770   :  { %v3058_v20 = vadd.f32 %v6200_v60, %v9496_v45  ;;  %v3049_v42 = vpop.f32.mrb[75].mxu0 }
 0x771   :  { %v3050_v16 = vadd.f32 %v9496_v45, %v3049_v42 }
 0x772   :  { %v9761_v62 = vpack.c.bf16 %v3058_v20, %v3055_v19 }
 0x773   :  { %v9763_v28 = vpack.c.bf16 %v3050_v16, %v3047_v12 }
 0x774   :  { %11257 = vst [vmem:[#allocation35_spill] sm:$0xff] %v9761_v62 }
 0x775   :  { %11258 = vst [vmem:[#allocation36_spill] sm:$0xff] %v9763_v28  ;;  %v6203_v25 = vpop.f32.mrb[76].mxu0 }
 0x776   :  { %v3062_v18 = vpop.f32.mrb[77].mxu0  ;;  %v3071_v61 = vadd.f32 %v6203_v25, %v9496_v45 }
 0x777   :  { %v6204_v33 = vpop.f32.mrb[78].mxu0  ;;  %v3063_v4 = vadd.f32 %v9496_v45, %v3062_v18 }
 0x778   :  { %v3074_v31 = vadd.f32 %v6204_v33, %v9496_v45  ;;  %v3065_v54 = vpop.f32.mrb[79].mxu0 }
 0x779   :  { %v3066_v60 = vadd.f32 %v9496_v45, %v3065_v54 }
 0x77a   :  { %v9769_v1 = vpack.c.bf16 %v3074_v31, %v3071_v61 }
 0x77b   :  { %v9771_v34 = vpack.c.bf16 %v3066_v60, %v3063_v4 }
 0x77c   :  { %11259 = vst [vmem:[#allocation37_spill] sm:$0xff] %v9769_v1 }
 0x77d   :  { %11260 = vst [vmem:[#allocation38_spill] sm:$0xff] %v9771_v34  ;;  %v9773_v42 = vpop.f32.mrb[80].mxu0 }
 0x77e   :  { %v9775_v19 = vpop.f32.mrb[81].mxu0 }
 0x781   :  { %v9777_v20 = vpop.f32.mrb[82].mxu0 }
 0x782   :  { %v9779_v12 = vpop.f32.mrb[83].mxu0 }
 0x785   :  { %v9781_v16 = vpop.f32.mrb[84].mxu0 }
 0x786   :  { %v9783_v25 = vpop.f32.mrb[85].mxu0 }
 0x789   :  { %v9785_v33 = vpop.f32.mrb[86].mxu0 }
 0x78a   :  { %v9787_v18 = vpop.f32.mrb[87].mxu0 }
 0x78d   :  { %v9789_v45 = vpop.f32.mrb[88].mxu0 }
 0x78e   :  { %v9791_v54 = vpop.f32.mrb[89].mxu0 }
 0x791   :  { %v9793_v61 = vpop.f32.mrb[90].mxu0 }
 0x792   :  { %v9795_v31 = vpop.f32.mrb[91].mxu0 }
 0x795   :  { %v9797_v4 = vpop.f32.mrb[92].mxu0 }
 0x796   :  { %v9799_v60 = vpop.f32.mrb[93].mxu0 }
 0x799   :  { %v9801_v2 = vpop.f32.mrb[94].mxu0 }
 0x79a   :  { %v9803_v63 = vpop.f32.mrb[95].mxu0 }
 0x79d   :  { %v9805_v52 = vpop.f32.mrb[96].mxu0 }
 0x79e   :  { %11261 = vst [vmem:[#allocation39_spill] sm:$0xff] %v9805_v52  ;;  %v9807_v39 = vpop.f32.mrb[97].mxu0 }
 0x7a1   :  { %v9809_v37 = vpop.f32.mrb[98].mxu0 }
 0x7a2   :  { %11262 = vst [vmem:[#allocation40_spill] sm:$0xff] %v9809_v37  ;;  %v9811_v21 = vpop.f32.mrb[99].mxu0 }
 0x7a5   :  { %v9813_v38 = vpop.f32.mrb[100].mxu0 }
 0x7a6   :  { %11263 = vst [vmem:[#allocation41_spill] sm:$0xff] %v9813_v38  ;;  %v9815_v53 = vpop.f32.mrb[101].mxu0 }
 0x7a7   :  { %v3532_v57 = vpop.xlane.xlu1 %3531  ;;  %v3530_v1 = vpop.xlane.xlu0 %3529 }
 0x7a8   :  { %v3594_v44 = vsub.f32 %v9524_v30, %v3532_v57  ;;  %v3593_v34 = vsub.f32 %v9530_v41, %v3530_v1 }
 0x7a9   :  { %v9819_v62 = vpop.f32.mrb[102].mxu0 }
 0x7aa   :  { %11264 = vst [vmem:[#allocation42_spill] sm:$0xff] %v9819_v62  ;;  %v3627_v28 = vmul.f32 1.442695, %v3594_v44  ;;  %v9821_v6 = vpop.f32.mrb[103].mxu0  ;;  %v3625_v23 = vmul.f32 1.442695, %v3593_v34 }
 0x7ab   :  { %v3536_v8 = vpop.xlane.xlu1 %3535  ;;  %v3534_v37 = vpop.xlane.xlu0 %3533 }
 0x7ac   :  { %6809 = vpow2.f32 %v3627_v28  ;;  %v3596_v7 = vsub.f32 %v9536_v55, %v3536_v8  ;;  %v3595_v38 = vsub.f32 %v9544_v40, %v3534_v37 }
 0x7ad   :  { %6811 = vpow2.f32 %v3625_v23  ;;  %v9825_v52 = vpop.f32.mrb[104].mxu0 }
 0x7ae   :  { %v3631_v57 = vmul.f32 1.442695, %v3596_v7  ;;  %v9827_v30 = vpop.f32.mrb[105].mxu0  ;;  %v3629_v1 = vmul.f32 1.442695, %v3595_v38 }
 0x7af   :  { %v3540_v41 = vpop.xlane.xlu1 %3539  ;;  %v3538_v62 = vpop.xlane.xlu0 %3537 }
 0x7b0   :  { %6813 = vpow2.f32 %v3631_v57  ;;  %v3598_v44 = vsub.f32 %v9552_v59, %v3540_v41  ;;  %v3597_v28 = vsub.f32 %v9559_v27, %v3538_v62 }
 0x7b1   :  { %6815 = vpow2.f32 %v3629_v1  ;;  %v9831_v34 = vpop.f32.mrb[106].mxu0 }
 0x7b2   :  { %v3635_v8 = vmul.f32 1.442695, %v3598_v44  ;;  %v9833_v55 = vpop.f32.mrb[107].mxu0  ;;  %v3633_v37 = vmul.f32 1.442695, %v3597_v28 }
 0x7b3   :  { %v3544_v40 = vpop.xlane.xlu1 %3543  ;;  %v3542_v23 = vpop.xlane.xlu0 %3541 }
 0x7b4   :  { %6817 = vpow2.f32 %v3635_v8  ;;  %v3600_v7 = vsub.f32 %v9568_v24, %v3544_v40  ;;  %v3599_v38 = vsub.f32 %v9576_v3, %v3542_v23 }
 0x7b5   :  { %6819 = vpow2.f32 %v3633_v37  ;;  %v9837_v57 = vpop.f32.mrb[108].mxu0 }
 0x7b6   :  { %v9839_v59 = vpop.eup %6809  ;;  %v3639_v1 = vmul.f32 1.442695, %v3600_v7  ;;  %v9841_v62 = vpop.f32.mrb[109].mxu0  ;;  %v3637_v41 = vmul.f32 1.442695, %v3599_v38 }
 0x7b7   :  { %11265 = vst [vmem:[#allocation43_spill] sm:$0xff] %v9839_v59  ;;  %v9843_v27 = vpop.eup %6811  ;;  %v3548_v44 = vpop.xlane.xlu1 %3547  ;;  %3691 = vadd.xlane.f32.xlu1 %v9839_v59 }
 0x7b8   :  { %6821 = vpow2.f32 %v3639_v1  ;;  %v3602_v24 = vsub.f32 %v9583_v49, %v3548_v44  ;;  %3689 = vadd.xlane.f32.xlu0 %v9843_v27  ;;  %v3546_v28 = vpop.xlane.xlu0 %3545 }
 0x7b9   :  { %6823 = vpow2.f32 %v3637_v41  ;;  %v3601_v3 = vsub.f32 %v9591_v5, %v3546_v28  ;;  %v9849_v8 = vpop.f32.mrb[110].mxu0 }
 0x7ba   :  { %v9851_v37 = vpop.eup %6813  ;;  %v3643_v40 = vmul.f32 1.442695, %v3602_v24  ;;  %v9853_v7 = vpop.f32.mrb[111].mxu0 }
 0x7bb   :  { %11266 = vst [vmem:[#allocation44_spill] sm:$0xff] %v9853_v7  ;;  %v9855_v23 = vpop.eup %6815  ;;  %v3641_v38 = vmul.f32 1.442695, %v3601_v3  ;;  %v3552_v59 = vpop.xlane.xlu1 %3551  ;;  %3695 = vadd.xlane.f32.xlu1 %v9851_v37 }
 0x7bc   :  { %6825 = vpow2.f32 %v3643_v40  ;;  %v3604_v49 = vsub.f32 %v9599_v15, %v3552_v59  ;;  %3693 = vadd.xlane.f32.xlu0 %v9855_v23  ;;  %v3550_v1 = vpop.xlane.xlu0 %3549 }
 0x7bd   :  { %6827 = vpow2.f32 %v3641_v38  ;;  %v3603_v5 = vsub.f32 %v9608_v14, %v3550_v1 }
 0x7be   :  { %v9861_v41 = vpop.eup %6817  ;;  %v3647_v44 = vmul.f32 1.442695, %v3604_v49 }
 0x7bf   :  { %v9863_v24 = vpop.eup %6819  ;;  %v3645_v28 = vmul.f32 1.442695, %v3603_v5  ;;  %v3556_v7 = vpop.xlane.xlu1 %3555  ;;  %3699 = vadd.xlane.f32.xlu1 %v9861_v41 }
 0x7c0   :  { %6829 = vpow2.f32 %v3647_v44  ;;  %v3606_v3 = vsub.f32 %v9618_v10, %v3556_v7  ;;  %3697 = vadd.xlane.f32.xlu0 %v9863_v24  ;;  %v3554_v15 = vpop.xlane.xlu0 %3553 }
 0x7c1   :  { %6831 = vpow2.f32 %v3645_v28  ;;  %v3605_v59 = vsub.f32 %v9627_v13, %v3554_v15 }
 0x7c2   :  { %v9869_v40 = vpop.eup %6821  ;;  %v3651_v14 = vmul.f32 1.442695, %v3606_v3 }
 0x7c3   :  { %v9871_v38 = vpop.eup %6823  ;;  %v3649_v49 = vmul.f32 1.442695, %v3605_v59  ;;  %v3560_v1 = vpop.xlane.xlu1 %3559  ;;  %3703 = vadd.xlane.f32.xlu1 %v9869_v40 }
 0x7c4   :  { %6833 = vpow2.f32 %v3651_v14  ;;  %v3608_v5 = vsub.f32 %v9636_v56, %v3560_v1  ;;  %3701 = vadd.xlane.f32.xlu0 %v9871_v38  ;;  %v3558_v10 = vpop.xlane.xlu0 %3557 }
 0x7c5   :  { %6835 = vpow2.f32 %v3649_v49  ;;  %v3607_v7 = vsub.f32 %v9644_v46, %v3558_v10 }
 0x7c6   :  { %v9877_v44 = vpop.eup %6825  ;;  %v3655_v13 = vmul.f32 1.442695, %v3608_v5 }
 0x7c7   :  { %v9879_v28 = vpop.eup %6827  ;;  %v3653_v3 = vmul.f32 1.442695, %v3607_v7  ;;  %3707 = vadd.xlane.f32.xlu1 %v9877_v44  ;;  %v3564_v15 = vpop.xlane.xlu1 %3563 }
 0x7c8   :  { %6837 = vpow2.f32 %v3655_v13  ;;  %v3610_v59 = vsub.f32 %v9650_v35, %v3564_v15  ;;  %3705 = vadd.xlane.f32.xlu0 %v9879_v28  ;;  %v3562_v56 = vpop.xlane.xlu0 %3561 }
 0x7c9   :  { %6839 = vpow2.f32 %v3653_v3  ;;  %v3609_v14 = vsub.f32 %v9654_v22, %v3562_v56 }
 0x7ca   :  { %v9885_v49 = vpop.eup %6829  ;;  %v3659_v46 = vmul.f32 1.442695, %v3610_v59 }
 0x7cb   :  { %v9887_v1 = vpop.eup %6831  ;;  %v3657_v5 = vmul.f32 1.442695, %v3609_v14  ;;  %3711 = vadd.xlane.f32.xlu1 %v9885_v49  ;;  %v3568_v10 = vpop.xlane.xlu1 %3567 }
 0x7cc   :  { %6841 = vpow2.f32 %v3659_v46  ;;  %v3612_v7 = vsub.f32 %v9660_v26, %v3568_v10  ;;  %3709 = vadd.xlane.f32.xlu0 %v9887_v1  ;;  %v3566_v35 = vpop.xlane.xlu0 %3565 }
 0x7cd   :  { %6843 = vpow2.f32 %v3657_v5  ;;  %v3611_v13 = vsub.f32 %v9665_v17, %v3566_v35 }
 0x7ce   :  { %v9893_v3 = vpop.eup %6833  ;;  %v3663_v22 = vmul.f32 1.442695, %v3612_v7 }
 0x7cf   :  { %v9895_v15 = vpop.eup %6835  ;;  %v3661_v59 = vmul.f32 1.442695, %v3611_v13  ;;  %3715 = vadd.xlane.f32.xlu1 %v9893_v3  ;;  %v3572_v56 = vpop.xlane.xlu1 %3571 }
 0x7d0   :  { %6845 = vpow2.f32 %v3663_v22  ;;  %v3614_v14 = vsub.f32 %v9670_v0, %v3572_v56  ;;  %3713 = vadd.xlane.f32.xlu0 %v9895_v15  ;;  %v3570_v26 = vpop.xlane.xlu0 %3569 }
 0x7d1   :  { %6847 = vpow2.f32 %v3661_v59  ;;  %v3613_v46 = vsub.f32 %v9675_v11, %v3570_v26 }
 0x7d2   :  { %v9901_v5 = vpop.eup %6837  ;;  %v3667_v17 = vmul.f32 1.442695, %v3614_v14 }
 0x7d3   :  { %v9903_v10 = vpop.eup %6839  ;;  %v3665_v7 = vmul.f32 1.442695, %v3613_v46  ;;  %3719 = vadd.xlane.f32.xlu1 %v9901_v5  ;;  %v3576_v35 = vpop.xlane.xlu1 %3575 }
 0x7d4   :  { %6849 = vpow2.f32 %v3667_v17  ;;  %v3616_v13 = vsub.f32 %v9680_v50, %v3576_v35  ;;  %3717 = vadd.xlane.f32.xlu0 %v9903_v10  ;;  %v3574_v0 = vpop.xlane.xlu0 %3573 }
 0x7d5   :  { %6851 = vpow2.f32 %v3665_v7  ;;  %v3615_v22 = vsub.f32 %v9685_v36, %v3574_v0 }
 0x7d6   :  { %v9909_v59 = vpop.eup %6841  ;;  %v3671_v11 = vmul.f32 1.442695, %v3616_v13 }
 0x7d7   :  { %v9911_v56 = vpop.eup %6843  ;;  %v3669_v14 = vmul.f32 1.442695, %v3615_v22  ;;  %3723 = vadd.xlane.f32.xlu1 %v9909_v59  ;;  %v3580_v26 = vpop.xlane.xlu1 %3579 }
 0x7d8   :  { %6853 = vpow2.f32 %v3671_v11  ;;  %v3618_v46 = vsub.f32 %v9694_v58, %v3580_v26  ;;  %3721 = vadd.xlane.f32.xlu0 %v9911_v56  ;;  %v3578_v50 = vpop.xlane.xlu0 %3577 }
 0x7d9   :  { %6855 = vpow2.f32 %v3669_v14  ;;  %v3617_v17 = vsub.f32 %v9699_v29, %v3578_v50 }
 0x7da   :  { %v9917_v7 = vpop.eup %6845  ;;  %v3675_v36 = vmul.f32 1.442695, %v3618_v46 }
 0x7db   :  { %v9919_v35 = vpop.eup %6847  ;;  %v3673_v13 = vmul.f32 1.442695, %v3617_v17  ;;  %3727 = vadd.xlane.f32.xlu1 %v9917_v7  ;;  %v3584_v0 = vpop.xlane.xlu1 %3583 }
 0x7dc   :  { %6857 = vpow2.f32 %v3675_v36  ;;  %v3620_v22 = vsub.f32 %v9704_v9, %v3584_v0  ;;  %3725 = vadd.xlane.f32.xlu0 %v9919_v35  ;;  %v3582_v58 = vpop.xlane.xlu0 %3581 }
 0x7dd   :  { %6859 = vpow2.f32 %v3673_v13  ;;  %v3619_v11 = vsub.f32 %v9709_v43, %v3582_v58 }
 0x7de   :  { %v9925_v14 = vpop.eup %6849  ;;  %v3679_v29 = vmul.f32 1.442695, %v3620_v22 }
 0x7df   :  { %v9927_v26 = vpop.eup %6851  ;;  %v3677_v46 = vmul.f32 1.442695, %v3619_v11  ;;  %3731 = vadd.xlane.f32.xlu1 %v9925_v14  ;;  %v3588_v50 = vpop.xlane.xlu1 %3587 }
 0x7e0   :  { %6861 = vpow2.f32 %v3679_v29  ;;  %v3622_v17 = vsub.f32 %v9718_v51, %v3588_v50  ;;  %3729 = vadd.xlane.f32.xlu0 %v9927_v26  ;;  %v3586_v9 = vpop.xlane.xlu0 %3585 }
 0x7e1   :  { %6863 = vpow2.f32 %v3677_v46  ;;  %v3621_v36 = vsub.f32 %v9723_v32, %v3586_v9 }
 0x7e2   :  { %v9933_v13 = vpop.eup %6853  ;;  %v3683_v43 = vmul.f32 1.442695, %v3622_v17 }
 0x7e3   :  { %v9935_v0 = vpop.eup %6855  ;;  %v3681_v22 = vmul.f32 1.442695, %v3621_v36  ;;  %3735 = vadd.xlane.f32.xlu1 %v9933_v13  ;;  %v3592_v58 = vpop.xlane.xlu1 %3591 }
 0x7e4   :  { %6865 = vpow2.f32 %v3683_v43  ;;  %v3624_v11 = vsub.f32 %v9728_v47, %v3592_v58  ;;  %3733 = vadd.xlane.f32.xlu0 %v9935_v0  ;;  %v3590_v51 = vpop.xlane.xlu0 %3589 }
 0x7e5   :  { %6867 = vpow2.f32 %v3681_v22  ;;  %v3623_v29 = vsub.f32 %v9733_v48, %v3590_v51 }
 0x7e6   :  { %v9941_v46 = vpop.eup %6857  ;;  %v3687_v32 = vmul.f32 1.442695, %v3624_v11 }
 0x7e7   :  { %v9943_v50 = vpop.eup %6859  ;;  %v3685_v17 = vmul.f32 1.442695, %v3623_v29  ;;  %3739 = vadd.xlane.f32.xlu1 %v9941_v46 }
 0x7e8   :  { %6869 = vpow2.f32 %v3687_v32  ;;  %3737 = vadd.xlane.f32.xlu0 %v9943_v50  ;;  %v11272_v32 = vld [vmem:[#allocation32_spill] sm:$0xff] }
 0x7e9   :  { %6871 = vpow2.f32 %v3685_v17 }
 0x7ea   :  { %v9947_v9 = vpop.eup %6861 }
 0x7eb   :  { %v9949_v47 = vpop.eup %6863  ;;  %3743 = vadd.xlane.f32.xlu1 %v9947_v9 }
 0x7ec   :  { %3741 = vadd.xlane.f32.xlu0 %v9949_v47 }
 0x7ee   :  { %v9953_v48 = vpop.eup %6865 }
 0x7ef   :  { %v9955_v36 = vpop.eup %6867  ;;  %3747 = vadd.xlane.f32.xlu1 %v9953_v48 }
 0x7f0   :  { %3745 = vadd.xlane.f32.xlu0 %v9955_v36 }
 0x7f2   :  { %v9959_v43 = vpop.eup %6869 }
 0x7f3   :  { %v9961_v22 = vpop.eup %6871  ;;  %3751 = vadd.xlane.f32.xlu1 %v9959_v43 }
 0x7f4   :  { %3749 = vadd.xlane.f32.xlu0 %v9961_v22 }
 0x804   :  { %4377 = vperm.xlu1 %6487, %v9773_v42  }
 0x808   :  { %4382 = vperm.xlu1 %6487, %v9779_v12  }
 0x80a   :  { %4372 = vperm.xlu0 %6488, %v9775_v19  }
 0x80c   :  { %4397 = vperm.xlu1 %6487, %v9781_v16  }
 0x80e   :  { %4387 = vperm.xlu0 %6488, %v9777_v20  }
 0x810   :  { %4417 = vperm.xlu1 %6487, %v9789_v45  }
 0x812   :  { %4392 = vperm.xlu0 %6488, %v9783_v25  }
 0x814   :  { %4437 = vperm.xlu1 %6487, %v9797_v4  }
 0x816   :  { %4402 = vperm.xlu0 %6488, %v9787_v18  }
 0x818   :  { %4442 = vperm.xlu1 %6487, %v9803_v63   ;;  %v11269_v63 = vld [vmem:[#allocation41_spill] sm:$0xff] }
 0x81a   :  { %4407 = vperm.xlu0 %6488, %v9785_v33  }
 0x81c   :  { %4452 = vperm.xlu1 %6487, %v9807_v39   ;;  %v11267_v39 = vld [vmem:[#allocation39_spill] sm:$0xff] }
 0x81e   :  { %4412 = vperm.xlu0 %6488, %v9791_v54  }
 0x820   :  { %4462 = vperm.xlu1 %6487, %v9811_v21   ;;  %v11268_v21 = vld [vmem:[#allocation40_spill] sm:$0xff] }
 0x822   :  { %4422 = vperm.xlu0 %6488, %v9795_v31  }
 0x824   :  { %4472 = vperm.xlu1 %6487, %v9815_v53   ;;  %v11270_v53 = vld [vmem:[#allocation42_spill] sm:$0xff] }
 0x826   :  { %4427 = vperm.xlu0 %6488, %v9793_v61  }
 0x828   :  { %4482 = vperm.xlu1 %6487, %v9821_v6  }
 0x82a   :  { %4432 = vperm.xlu0 %6488, %v9799_v60  }
 0x82c   :  { %4492 = vperm.xlu1 %6487, %v9827_v30  }
 0x82e   :  { %4447 = vperm.xlu0 %6488, %v9801_v2  }
 0x830   :  { %4502 = vperm.xlu1 %6487, %v9833_v55  }
 0x832   :  { %4457 = vperm.xlu0 %6488, %v11267_v39  }
 0x834   :  { %4512 = vperm.xlu1 %6487, %v9841_v62  }
 0x836   :  { %4467 = vperm.xlu0 %6488, %v11268_v21  }
 0x83a   :  { %4477 = vperm.xlu0 %6488, %v11269_v63  }
 0x83e   :  { %4487 = vperm.xlu0 %6488, %v11270_v53  }
 0x842   :  { %4497 = vperm.xlu0 %6488, %v9825_v52   ;;  %v11271_v52 = vld [vmem:[#allocation43_spill] sm:$0xff] }
 0x844   :  { %v3692_v6 = vpop.xlane.xlu1 %3691 }
 0x845   :  { %6873 = vrcp.f32 %v3692_v6  ;;  %v3690_v42 = vpop.xlane.xlu0 %3689  ;;  %v11274_v6 = vld [vmem:[#allocation34_spill] sm:$0xff] }
 0x846   :  { %6875 = vrcp.f32 %v3690_v42  ;;  %4507 = vperm.xlu0 %6488, %v9831_v34  }
 0x848   :  { %v3696_v2 = vpop.xlane.xlu1 %3695 }
 0x849   :  { %6877 = vrcp.f32 %v3696_v2  ;;  %v3694_v19 = vpop.xlane.xlu0 %3693 }
 0x84a   :  { %6879 = vrcp.f32 %v3694_v19  ;;  %4517 = vperm.xlu0 %6488, %v9837_v57  }
 0x84c   :  { %v3700_v20 = vpop.xlane.xlu1 %3699 }
 0x84d   :  { %6881 = vrcp.f32 %v3700_v20  ;;  %v3698_v12 = vpop.xlane.xlu0 %3697 }
 0x84e   :  { %6883 = vrcp.f32 %v3698_v12 }
 0x84f   :  { %v6874_v16 = vpop.eup %6873 }
 0x850   :  { %v6876_v25 = vpop.eup %6875  ;;  %v3704_v33 = vpop.xlane.xlu1 %3703  ;;  %v3786_v18 = vmul.f32 %v6874_v16, %v11271_v52  ;;  %v11275_v16 = vld [vmem:[#allocation33_spill] sm:$0xff] }
 0x851   :  { %6885 = vrcp.f32 %v3704_v33  ;;  %v3702_v45 = vpop.xlane.xlu0 %3701  ;;  %v3785_v54 = vmul.f32 %v6876_v25, %v9843_v27 }
 0x852   :  { %6887 = vrcp.f32 %v3702_v45 }
 0x853   :  { %v6878_v61 = vpop.eup %6877  ;;  %v3817_v31 = vpack.c.bf16 %v3786_v18, %v3785_v54  ;;  %v11276_v54 = vld [vmem:[#allocation36_spill] sm:$0xff] }
 0x854   :  { %v6880_v4 = vpop.eup %6879  ;;  %v3788_v60 = vmul.f32 %v6878_v61, %v9851_v37  ;;  %v3708_v30 = vpop.xlane.xlu1 %3707 }
 0x855   :  { %v3787_v34 = vmul.f32 %v6880_v4, %v9855_v23  ;;  %6889 = vrcp.f32 %v3708_v30  ;;  %6221 = vmatprep.mubr.bf16.mxu1 %v3817_v31  ;;  %v3706_v55 = vpop.xlane.xlu0 %3705  ;;  %v11273_v23 = vld [vmem:[#allocation31_spill] sm:$0xff] }
 0x856   :  { %6891 = vrcp.f32 %v3706_v55 }
 0x857   :  { %v6882_v57 = vpop.eup %6881  ;;  %v3818_v62 = vpack.c.bf16 %v3788_v60, %v3787_v34  ;;  %v11277_v34 = vld [vmem:[#allocation35_spill] sm:$0xff] }
 0x858   :  { %v6884_v58 = vpop.eup %6883  ;;  %v3712_v11 = vpop.xlane.xlu1 %3711  ;;  %v3790_v51 = vmul.f32 %v6882_v57, %v9861_v41 }
 0x859   :  { %6893 = vrcp.f32 %v3712_v11  ;;  %6222 = vmatmul.mubr.bf16.vlgmr.msra.gmra.mrb[48].mxu1 %v3818_v62  ;;  %v3710_v27 = vpop.xlane.xlu0 %3709  ;;  %v3789_v29 = vmul.f32 %v6884_v58, %v9863_v24 }
 0x85a   :  { %6238 = vmatpush3.bf16.msra.mxu1 %v11272_v32  ;;  %6895 = vrcp.f32 %v3710_v27 }
 0x85b   :  { %v6886_v37 = vpop.eup %6885  ;;  %6239 = vmatprep.subr.bf16.mxu1 %v11273_v23  ;;  %v3819_v17 = vpack.c.bf16 %v3790_v51, %v3789_v29  ;;  %v11278_v51 = vld [vmem:[#allocation38_spill] sm:$0xff] }
 0x85c   :  { %v6888_v39 = vpop.eup %6887  ;;  %v3716_v21 = vpop.xlane.xlu1 %3715  ;;  %v3792_v63 = vmul.f32 %v6886_v37, %v9869_v40 }
 0x85d   :  { %6897 = vrcp.f32 %v3716_v21  ;;  %6225 = vmatprep.mubr.bf16.mxu1 %v3819_v17  ;;  %v3714_v53 = vpop.xlane.xlu0 %3713  ;;  %v3791_v41 = vmul.f32 %v6888_v39, %v9871_v38  ;;  %v11279_v17 = vld [vmem:[#allocation37_spill] sm:$0xff] }
 0x85e   :  { %6240 = vmatpush3.bf16.msra.mxu1 %v11273_v23  ;;  %6899 = vrcp.f32 %v3714_v53 }
 0x85f   :  { %v6890_v24 = vpop.eup %6889  ;;  %6241 = vmatprep.subr.bf16.mxu1 %v11274_v6  ;;  %v3820_v42 = vpack.c.bf16 %v3792_v63, %v3791_v41 }
 0x860   :  { %v6892_v2 = vpop.eup %6891  ;;  %v3720_v19 = vpop.xlane.xlu1 %3719  ;;  %v3794_v20 = vmul.f32 %v6890_v24, %v9877_v44 }
 0x861   :  { %6901 = vrcp.f32 %v3720_v19  ;;  %6226 = vmatmul.mubr.bf16.gmra.mrb[52].mxu1 %v3820_v42  ;;  %v3718_v12 = vpop.xlane.xlu0 %3717  ;;  %v3793_v40 = vmul.f32 %v6892_v2, %v9879_v28 }
 0x862   :  { %6242 = vmatpush3.bf16.msra.mxu1 %v11274_v6  ;;  %6903 = vrcp.f32 %v3718_v12 }
 0x863   :  { %v6894_v38 = vpop.eup %6893  ;;  %6243 = vmatprep.subr.bf16.mxu1 %v11275_v16  ;;  %v3821_v25 = vpack.c.bf16 %v3794_v20, %v3793_v40 }
 0x864   :  { %v6896_v33 = vpop.eup %6895  ;;  %v3724_v52 = vpop.xlane.xlu1 %3723  ;;  %v3796_v18 = vmul.f32 %v6894_v38, %v9885_v49 }
 0x865   :  { %6905 = vrcp.f32 %v3724_v52  ;;  %6229 = vmatprep.mubr.bf16.mxu1 %v3821_v25  ;;  %v3722_v45 = vpop.xlane.xlu0 %3721  ;;  %v3795_v44 = vmul.f32 %v6896_v33, %v9887_v1 }
 0x866   :  { %6244 = vmatpush3.bf16.msra.mxu1 %v11275_v16  ;;  %6907 = vrcp.f32 %v3722_v45 }
 0x867   :  { %v6898_v28 = vpop.eup %6897  ;;  %6245 = vmatprep.subr.bf16.mxu1 %v11276_v54  ;;  %v3822_v61 = vpack.c.bf16 %v3796_v18, %v3795_v44 }
 0x868   :  { %v6900_v31 = vpop.eup %6899  ;;  %v3728_v4 = vpop.xlane.xlu1 %3727  ;;  %v3798_v60 = vmul.f32 %v6898_v28, %v9893_v3 }
 0x869   :  { %6909 = vrcp.f32 %v3728_v4  ;;  %6230 = vmatmul.mubr.bf16.gmra.mrb[56].mxu1 %v3822_v61  ;;  %v3726_v30 = vpop.xlane.xlu0 %3725  ;;  %v3797_v49 = vmul.f32 %v6900_v31, %v9895_v15 }
 0x86a   :  { %6246 = vmatpush3.bf16.msra.mxu1 %v11276_v54  ;;  %6911 = vrcp.f32 %v3726_v30 }
 0x86b   :  { %v6902_v1 = vpop.eup %6901  ;;  %6247 = vmatprep.subr.bf16.mxu1 %v11277_v34  ;;  %v3823_v55 = vpack.c.bf16 %v3798_v60, %v3797_v49 }
 0x86c   :  { %v6904_v57 = vpop.eup %6903  ;;  %v3732_v62 = vpop.xlane.xlu1 %3731  ;;  %v3800_v58 = vmul.f32 %v6902_v1, %v9901_v5 }
 0x86d   :  { %6913 = vrcp.f32 %v3732_v62  ;;  %6233 = vmatprep.mubr.bf16.mxu1 %v3823_v55  ;;  %v3730_v11 = vpop.xlane.xlu0 %3729  ;;  %v3799_v3 = vmul.f32 %v6904_v57, %v9903_v10 }
 0x86e   :  { %6248 = vmatpush3.bf16.msra.mxu1 %v11277_v34  ;;  %6915 = vrcp.f32 %v3730_v11 }
 0x86f   :  { %v6906_v15 = vpop.eup %6905  ;;  %6249 = vmatprep.subr.bf16.mxu1 %v11278_v51  ;;  %v3824_v27 = vpack.c.bf16 %v3800_v58, %v3799_v3 }
 0x870   :  { %v6908_v29 = vpop.eup %6907  ;;  %v3736_v32 = vpop.xlane.xlu1 %3735  ;;  %v3802_v37 = vmul.f32 %v6906_v15, %v9909_v59 }
 0x871   :  { %6917 = vrcp.f32 %v3736_v32  ;;  %6234 = vmatmul.mubr.bf16.gmra.mrb[60].mxu1 %v3824_v27  ;;  %v3734_v23 = vpop.xlane.xlu0 %3733  ;;  %v3801_v5 = vmul.f32 %v6908_v29, %v9911_v56 }
 0x872   :  { %6250 = vmatpush3.bf16.msra.mxu1 %v11278_v51  ;;  %6919 = vrcp.f32 %v3734_v23 }
 0x873   :  { %v6910_v10 = vpop.eup %6909  ;;  %6251 = vmatprep.subr.bf16.mxu1 %v11279_v17  ;;  %v3825_v39 = vpack.c.bf16 %v3802_v37, %v3801_v5 }
 0x874   :  { %v6912_v21 = vpop.eup %6911  ;;  %v3804_v63 = vmul.f32 %v6910_v10, %v9917_v7  ;;  %v3740_v53 = vpop.xlane.xlu1 %3739 }
 0x875   :  { %v3803_v41 = vmul.f32 %v6912_v21, %v9919_v35  ;;  %6921 = vrcp.f32 %v3740_v53  ;;  %6253 = vmatprep.mubr.bf16.mxu1 %v3825_v39  ;;  %v3738_v59 = vpop.xlane.xlu0 %3737 }
 0x876   :  { %6252 = vmatpush3.bf16.msra.mxu1 %v11279_v17  ;;  %6923 = vrcp.f32 %v3738_v59 }
 0x877   :  { %v6914_v56 = vpop.eup %6913  ;;  %v3826_v24 = vpack.c.bf16 %v3804_v63, %v3803_v41 }
 0x878   :  { %v6916_v6 = vpop.eup %6915  ;;  %v3744_v42 = vpop.xlane.xlu1 %3743  ;;  %v3806_v2 = vmul.f32 %v6914_v56, %v9925_v14 }
 0x879   :  { %6925 = vrcp.f32 %v3744_v42  ;;  %6254 = vmatmul.mubr.bf16.vlgmr.msra.gmra.mrb[64].mxu1 %v3826_v24  ;;  %v3742_v19 = vpop.xlane.xlu0 %3741  ;;  %v3805_v7 = vmul.f32 %v6916_v6, %v9927_v26 }
 0x87a   :  { %6927 = vrcp.f32 %v3742_v19 }
 0x87b   :  { %v6918_v20 = vpop.eup %6917  ;;  %v3827_v35 = vpack.c.bf16 %v3806_v2, %v3805_v7 }
 0x87c   :  { %v6920_v12 = vpop.eup %6919  ;;  %v3748_v40 = vpop.xlane.xlu1 %3747  ;;  %v3808_v38 = vmul.f32 %v6918_v20, %v9933_v13 }
 0x87d   :  { %6929 = vrcp.f32 %v3748_v40  ;;  %6257 = vmatprep.mubr.bf16.mxu1 %v3827_v35  ;;  %v3746_v16 = vpop.xlane.xlu0 %3745  ;;  %v3807_v25 = vmul.f32 %v6920_v12, %v9935_v0 }
 0x87e   :  { %6931 = vrcp.f32 %v3746_v16 }
 0x87f   :  { %v6922_v33 = vpop.eup %6921  ;;  %v3828_v14 = vpack.c.bf16 %v3808_v38, %v3807_v25 }
 0x880   :  { %v6924_v52 = vpop.eup %6923  ;;  %v3752_v18 = vpop.xlane.xlu1 %3751  ;;  %v3810_v45 = vmul.f32 %v6922_v33, %v9941_v46 }
 0x881   :  { %6933 = vrcp.f32 %v3752_v18  ;;  %6258 = vmatmul.mubr.bf16.gmra.mrb[68].mxu1 %v3828_v14  ;;  %v3750_v26 = vpop.xlane.xlu0 %3749  ;;  %v3809_v44 = vmul.f32 %v6924_v52, %v9943_v50 }
 0x882   :  { %6935 = vrcp.f32 %v3750_v26 }
 0x883   :  { %v6926_v28 = vpop.eup %6925  ;;  %v3829_v13 = vpack.c.bf16 %v3810_v45, %v3809_v44 }
 0x884   :  { %v6928_v54 = vpop.eup %6927  ;;  %v3812_v61 = vmul.f32 %v6926_v28, %v9947_v9 }
 0x885   :  { %6261 = vmatprep.mubr.bf16.mxu1 %v3829_v13  ;;  %v3811_v0 = vmul.f32 %v6928_v54, %v9949_v47  ;;  %v10045_v47 = vld [vmem:[%s10661_s10] ss:$0 sm:$0xff]  ;;  %s7223_s10 = smov [#allocation9]  }
 0x886   :  { %s5489_s14 = sshll.u32 %s7223_s10, 4  ;;  %s5490_s14 = int_to_ptr.vmem [resolvable:$true] %s5489_s14 }
 0x887   :  { %v6930_v31 = vpop.eup %6929  ;;  %v3830_v4 = vpack.c.bf16 %v3812_v61, %v3811_v0  ;;  %s7163_s17 = scalar_lea.vmem %s5490_s14, 4096  ;;  %p7168_p11 = scmp.lt.s32.totalorder %s5490_s14, %s5490_s14 }
 0x888   :  { %v6932_v60 = vpop.eup %6931  ;;  %v3814_v30 = vmul.f32 %v6930_v31, %v9953_v48  ;;  %p7164_p10 = scmp.ne.s32.totalorder %s5490_s14, %s7163_s17  ;;  %p7169_p12 = scmp.lt.s32.totalorder %s7163_s17, %s7163_s17 }
 0x889   :  { %6262 = vmatmul.mubr.bf16.gmra.mrb[72].mxu1 %v3830_v4  ;;  %v3813_v46 = vmul.f32 %v6932_v60, %v9955_v36 }
 0x88a   :  { %p7170_p13 = por %p7169_p12, %p7168_p11 }
 0x88b   :  { %v6934_v49 = vpop.eup %6933  ;;  %v3831_v1 = vpack.c.bf16 %v3814_v30, %v3813_v46 }
 0x88c   :  { %v6936_v50 = vpop.eup %6935  ;;  %v3816_v34 = vmul.f32 %v6934_v49, %v9959_v43  ;;  %p7171_p0 = pnand %p7170_p13, %p7164_p10 }
 0x88d   :  { %6265 = vmatprep.mubr.bf16.mxu1 %v3831_v1  ;;  %v3815_v55 = vmul.f32 %v6936_v50, %v9961_v22  ;;  %v10076_v1 = vpop.permute.xlu0 %4372 }
 0x88f   :  { %v3832_v9 = vpack.c.bf16 %v3816_v34, %v3815_v55 }
 0x891   :  { %6266 = vmatmul.mubr.bf16.gmra.mrb[76].mxu1 %v3832_v9 }
 0x92c   :  { %v6223_v57 = vpop.f32.mrb[48].mxu1 }
 0x92d   :  { %v4276_v48 = vmul.f32 %v6223_v57, %v10045_v47  ;;  %v3883_v62 = vpop.f32.mrb[49].mxu1 }
 0x92e   :  { %v6224_v36 = vpop.f32.mrb[50].mxu1  ;;  %v4274_v22 = vmul.f32 %v10045_v47, %v3883_v62 }
 0x92f   :  { %v4277_v58 = vmul.f32 %v6224_v36, %v10045_v47  ;;  %v5199_v11 = vpack.c.bf16 %v6224_v36, %v6223_v57  ;;  %4310 = vadd.xlane.f32.xlu0 %v4276_v48  ;;  %v3886_v43 = vpop.f32.mrb[51].mxu1  ;;  %v10081_v57 = vpop.permute.xlu0 %4387 }
 0x930   :  { %v5198_v3 = vpack.c.bf16 %v3886_v43, %v3883_v62  ;;  %v4275_v15 = vmul.f32 %v10045_v47, %v3886_v43 }
 0x931   :  { %4312 = vadd.xlane.f32.xlu1 %v4277_v58 }
 0x932   :  { %6349 = vmatprep.subr.bf16.mxu1 %v5198_v3 }
 0x933   :  { %4306 = vadd.xlane.f32.xlu0 %v4274_v22  ;;  %6350 = vmatpush3.bf16.msra.mxu1 %v5198_v3 }
 0x934   :  { %v6227_v51 = vpop.f32.mrb[52].mxu1  ;;  %6351 = vmatprep.subr.bf16.mxu1 %v5199_v11 }
 0x935   :  { %v4280_v27 = vmul.f32 %v6227_v51, %v10045_v47  ;;  %4308 = vadd.xlane.f32.xlu1 %v4275_v15  ;;  %v3899_v29 = vpop.f32.mrb[53].mxu1  ;;  %v10091_v15 = vpop.permute.xlu0 %4392 }
 0x936   :  { %v6228_v32 = vpop.f32.mrb[54].mxu1  ;;  %v4278_v17 = vmul.f32 %v10045_v47, %v3899_v29 }
 0x937   :  { %v4281_v37 = vmul.f32 %v6228_v32, %v10045_v47  ;;  %v5201_v23 = vpack.c.bf16 %v6228_v32, %v6227_v51  ;;  %4318 = vadd.xlane.f32.xlu0 %v4280_v27  ;;  %v3902_v5 = vpop.f32.mrb[55].mxu1  ;;  %6352 = vmatpush3.bf16.msra.mxu1 %v5199_v11 }
 0x938   :  { %v5200_v10 = vpack.c.bf16 %v3902_v5, %v3899_v29  ;;  %v4279_v39 = vmul.f32 %v10045_v47, %v3902_v5 }
 0x939   :  { %4320 = vadd.xlane.f32.xlu1 %v4281_v37 }
 0x93a   :  { %6353 = vmatprep.subr.bf16.mxu1 %v5200_v10 }
 0x93b   :  { %4314 = vadd.xlane.f32.xlu0 %v4278_v17  ;;  %6354 = vmatpush3.bf16.msra.mxu1 %v5200_v10 }
 0x93c   :  { %v6231_v21 = vpop.f32.mrb[56].mxu1  ;;  %6355 = vmatprep.subr.bf16.mxu1 %v5201_v23 }
 0x93d   :  { %v4284_v63 = vmul.f32 %v6231_v21, %v10045_v47  ;;  %4316 = vadd.xlane.f32.xlu1 %v4279_v39  ;;  %v3915_v53 = vpop.f32.mrb[57].mxu1 }
 0x93e   :  { %v6232_v41 = vpop.f32.mrb[58].mxu1  ;;  %v4282_v42 = vmul.f32 %v10045_v47, %v3915_v53 }
 0x93f   :  { %v4285_v59 = vmul.f32 %v6232_v41, %v10045_v47  ;;  %v5203_v56 = vpack.c.bf16 %v6232_v41, %v6231_v21  ;;  %4326 = vadd.xlane.f32.xlu0 %v4284_v63  ;;  %v3918_v24 = vpop.f32.mrb[59].mxu1  ;;  %6356 = vmatpush3.bf16.msra.mxu1 %v5201_v23  ;;  %v10101_v21 = vpop.permute.xlu0 %4402 }
 0x940   :  { %v5202_v6 = vpack.c.bf16 %v3918_v24, %v3915_v53  ;;  %v4283_v2 = vmul.f32 %v10045_v47, %v3918_v24  ;;  %v10106_v41 = vpop.permute.xlu1 %4377 }
 0x941   :  { %4328 = vadd.xlane.f32.xlu1 %v4285_v59 }
 0x942   :  { %6357 = vmatprep.subr.bf16.mxu1 %v5202_v6 }
 0x943   :  { %4322 = vadd.xlane.f32.xlu0 %v4282_v42  ;;  %6358 = vmatpush3.bf16.msra.mxu1 %v5202_v6  ;;  %v10104_v53 = vpop.permute.xlu0 %4407 }
 0x944   :  { %v6235_v19 = vpop.f32.mrb[60].mxu1  ;;  %6359 = vmatprep.subr.bf16.mxu1 %v5203_v56 }
 0x945   :  { %v4288_v7 = vmul.f32 %v6235_v19, %v10045_v47  ;;  %4324 = vadd.xlane.f32.xlu1 %v4283_v2  ;;  %v3931_v20 = vpop.f32.mrb[61].mxu1  ;;  %v11288_v2 = vld [vmem:[#allocation44_spill] sm:$0xff] }
 0x946   :  { %v6236_v35 = vpop.f32.mrb[62].mxu1  ;;  %v4286_v25 = vmul.f32 %v10045_v47, %v3931_v20 }
 0x947   :  { %v4289_v12 = vmul.f32 %v6236_v35, %v10045_v47  ;;  %v5205_v40 = vpack.c.bf16 %v6236_v35, %v6235_v19  ;;  %4334 = vadd.xlane.f32.xlu0 %v4288_v7  ;;  %v3934_v38 = vpop.f32.mrb[63].mxu1  ;;  %6360 = vmatpush3.bf16.msra.mxu1 %v5203_v56  ;;  %v10108_v59 = vpop.permute.xlu0 %4412 }
 0x948   :  { %v5204_v16 = vpack.c.bf16 %v3934_v38, %v3931_v20  ;;  %v4287_v33 = vmul.f32 %v10045_v47, %v3934_v38  ;;  %v10110_v56 = vpop.permute.xlu1 %4382 }
 0x949   :  { %4336 = vadd.xlane.f32.xlu1 %v4289_v12 }
 0x94a   :  { %6361 = vmatprep.subr.bf16.mxu1 %v5204_v16 }
 0x94b   :  { %4330 = vadd.xlane.f32.xlu0 %v4286_v25  ;;  %6362 = vmatpush3.bf16.msra.mxu1 %v5204_v16  ;;  %v10112_v24 = vpop.permute.xlu0 %4422 }
 0x94c   :  { %v6255_v14 = vpop.f32.mrb[64].mxu1  ;;  %6363 = vmatprep.subr.bf16.mxu1 %v5205_v40  ;;  %v10114_v6 = vpop.permute.xlu1 %4397 }
 0x94d   :  { %4332 = vadd.xlane.f32.xlu1 %v4287_v33  ;;  %v3980_v52 = vpop.f32.mrb[65].mxu1  ;;  %v4292_v45 = vmul.f32 %v6255_v14, %v10045_v47 }
 0x94e   :  { %v6256_v18 = vpop.f32.mrb[66].mxu1  ;;  %v4290_v54 = vmul.f32 %v10045_v47, %v3980_v52 }
 0x94f   :  { %v4293_v26 = vmul.f32 %v6256_v18, %v10045_v47  ;;  %v10065_v44 = vpack.c.bf16 %v6256_v18, %v6255_v14  ;;  %v3983_v28 = vpop.f32.mrb[67].mxu1  ;;  %6364 = vmatpush3.bf16.msra.mxu1 %v5205_v40  ;;  %v10117_v42 = vpop.permute.xlu0 %4427 }
 0x950   :  { %v10067_v13 = vpack.c.bf16 %v3983_v28, %v3980_v52  ;;  %v4291_v61 = vmul.f32 %v10045_v47, %v3983_v28 }
 0x951   :  { %11280 = vst [vmem:[#allocation45_spill] sm:$0xff] %v10065_v44  ;;  %4342 = vadd.xlane.f32.xlu1 %v4292_v45  ;;  %4344 = vadd.xlane.f32.xlu0 %v4293_v26 }
 0x952   :  { %11281 = vst [vmem:[#allocation46_spill] sm:$0xff] %v10067_v13  ;;  %6381 = vmatprep.subr.bf16.mxu1 %v10067_v13 }
 0x953   :  { %v10122_v19 = vpop.permute.xlu0 %4432 }
 0x954   :  { %v6259_v0 = vpop.f32.mrb[68].mxu1 }
 0x955   :  { %4338 = vadd.xlane.f32.xlu1 %v4290_v54  ;;  %4340 = vadd.xlane.f32.xlu0 %v4291_v61  ;;  %v3996_v31 = vpop.f32.mrb[69].mxu1  ;;  %v4296_v30 = vmul.f32 %v6259_v0, %v10045_v47 }
 0x956   :  { %v4294_v4 = vmul.f32 %v10045_v47, %v3996_v31  ;;  %v6260_v60 = vpop.f32.mrb[70].mxu1 }
 0x957   :  { %v10074_v46 = vpack.c.bf16 %v6260_v60, %v6259_v0  ;;  %v3999_v49 = vpop.f32.mrb[71].mxu1  ;;  %v4297_v34 = vmul.f32 %v6260_v60, %v10045_v47  ;;  %v10126_v20 = vpop.permute.xlu0 %4447  ;;  %v11290_v60 = vld [vmem:[#allocation16_spill] sm:$0xff] }
 0x958   :  { %v10078_v50 = vpack.c.bf16 %v3999_v49, %v3996_v31  ;;  %v4295_v36 = vmul.f32 %v10045_v47, %v3999_v49  ;;  %v11291_v49 = vld [vmem:[#allocation18_spill] sm:$0xff] }
 0x959   :  { %11282 = vst [vmem:[#allocation47_spill] sm:$0xff] %v10074_v46  ;;  %4350 = vadd.xlane.f32.xlu0 %v4296_v30  ;;  %4346 = vadd.xlane.f32.xlu1 %v4294_v4  ;;  %v11316_v46 = vld [vmem:[#allocation30_spill] sm:$0xff] }
 0x95a   :  { %11283 = vst [vmem:[#allocation48_spill] sm:$0xff] %v10078_v50 }
 0x95b   :  { %v10130_v12 = vpop.permute.xlu0 %4457 }
 0x95c   :  { %v6263_v55 = vpop.f32.mrb[72].mxu1 }
 0x95d   :  { %4352 = vadd.xlane.f32.xlu1 %v4297_v34  ;;  %v4012_v9 = vpop.f32.mrb[73].mxu1  ;;  %v4300_v22 = vmul.f32 %v6263_v55, %v10045_v47 }
 0x95e   :  { %v4298_v48 = vmul.f32 %v10045_v47, %v4012_v9  ;;  %v6264_v62 = vpop.f32.mrb[74].mxu1 }
 0x95f   :  { %v10085_v58 = vpack.c.bf16 %v6264_v62, %v6263_v55  ;;  %v4015_v11 = vpop.f32.mrb[75].mxu1  ;;  %v4301_v3 = vmul.f32 %v6264_v62, %v10045_v47  ;;  %v10134_v38 = vpop.permute.xlu0 %4467 }
 0x960   :  { %v10087_v43 = vpack.c.bf16 %v4015_v11, %v4012_v9  ;;  %4354 = vadd.xlane.f32.xlu0 %v4298_v48  ;;  %v4299_v37 = vmul.f32 %v10045_v47, %v4015_v11  ;;  %v11292_v9 = vld [vmem:[#allocation15_spill] sm:$0xff] }
 0x961   :  { %11284 = vst [vmem:[#allocation49_spill] sm:$0xff] %v10085_v58  ;;  %4348 = vadd.xlane.f32.xlu1 %v4295_v36 }
 0x962   :  { %11285 = vst [vmem:[#allocation50_spill] sm:$0xff] %v10087_v43  ;;  %v11312_v43 = vld [vmem:[#allocation28_spill] sm:$0xff] }
 0x963   :  { %v10138_v16 = vpop.permute.xlu0 %4477 }
 0x964   :  { %4360 = vadd.xlane.f32.xlu0 %v4301_v3  ;;  %v6267_v51 = vpop.f32.mrb[76].mxu1  ;;  %v11295_v3 = vld [vmem:[#allocation17_spill] sm:$0xff] }
 0x965   :  { %v4304_v27 = vmul.f32 %v6267_v51, %v10045_v47  ;;  %4358 = vadd.xlane.f32.xlu1 %v4300_v22  ;;  %v4028_v29 = vpop.f32.mrb[77].mxu1 }
 0x966   :  { %v6268_v32 = vpop.f32.mrb[78].mxu1  ;;  %v4302_v63 = vmul.f32 %v10045_v47, %v4028_v29 }
 0x967   :  { %v4305_v23 = vmul.f32 %v6268_v32, %v10045_v47  ;;  %v10096_v5 = vpack.c.bf16 %v6268_v32, %v6267_v51  ;;  %v4031_v10 = vpop.f32.mrb[79].mxu1  ;;  %v10142_v33 = vpop.permute.xlu0 %4487 }
 0x968   :  { %v4303_v17 = vmul.f32 %v10045_v47, %v4031_v10  ;;  %v10099_v39 = vpack.c.bf16 %v4031_v10, %v4028_v29  ;;  %4366 = vadd.xlane.f32.xlu0 %v4304_v27  ;;  %v10119_v47 = vpop.permute.xlu1 %4417  ;;  %v11296_v27 = vld [vmem:[#allocation20_spill] sm:$0xff]  ;;  %v11299_v10 = vld [vmem:[#allocation19_spill] sm:$0xff] }
 0x969   :  { %11286 = vst [vmem:[#allocation51_spill] sm:$0xff] %v10096_v5  ;;  %4356 = vadd.xlane.f32.xlu1 %v4299_v37 }
 0x96a   :  { %11287 = vst [vmem:[#allocation52_spill] sm:$0xff] %v10099_v39  ;;  %v11308_v39 = vld [vmem:[#allocation26_spill] sm:$0xff] }
 0x96b   :  { %v10146_v52 = vpop.permute.xlu0 %4497 }
 0x96c   :  { %v10124_v7 = vpop.permute.xlu1 %4437 }
 0x96d   :  { %4362 = vadd.xlane.f32.xlu1 %v4302_v63 }
 0x96f   :  { %v10150_v45 = vpop.permute.xlu0 %4507 }
 0x970   :  { %v10128_v35 = vpop.permute.xlu1 %4442 }
 0x971   :  { %4368 = vadd.xlane.f32.xlu1 %v4305_v23 }
 0x973   :  { %v10154_v28 = vpop.permute.xlu0 %4517 }
 0x974   :  { %v10132_v40 = vpop.permute.xlu1 %4452 }
 0x975   :  { %4364 = vadd.xlane.f32.xlu1 %v4303_v17 }
 0x97e   :  { %4527 = vperm.xlu0 %6488, %v9849_v8   ;;  %v10136_v8 = vpop.permute.xlu1 %4462 }
 0x982   :  { %v10140_v25 = vpop.permute.xlu1 %4472 }
 0x986   :  { %4522 = vperm.xlu1 %6487, %v11288_v2   ;;  %v10144_v14 = vpop.permute.xlu1 %4482  ;;  %v11300_v2 = vld [vmem:[#allocation22_spill] sm:$0xff] }
 0x98a   :  { %v10148_v18 = vpop.permute.xlu1 %4492 }
 0x98e   :  { %v10152_v26 = vpop.permute.xlu1 %4502 }
 0x992   :  { %v10156_v54 = vpop.permute.xlu1 %4512 }
 0x993   :  { %11289 = vst [vmem:[#allocation53_spill] sm:$0xff] %v10156_v54 }
 0x9bc   :  { %v4311_v61 = vpop.xlane.xlu0 %4310 }
 0x9bd   :  { %v4574_v48 = vrot.slane %v4311_v61, %v11292_v9 }
 0x9be   :  { %v4313_v0 = vpop.xlane.xlu1 %4312 }
 0x9bf   :  { %v4579_v22 = vrot.slane %v4313_v0, %v11295_v3 }
 0x9c0   :  { %v4307_v31 = vpop.xlane.xlu0 %4306 }
 0x9c1   :  { %v4565_v30 = vrot.slane %v4307_v31, %v11290_v60 }
 0x9c2   :  { %v4309_v4 = vpop.xlane.xlu1 %4308 }
 0x9c3   :  { %v4569_v34 = vrot.slane %v4309_v4, %v11291_v49 }
 0x9c4   :  { %v4319_v55 = vpop.xlane.xlu0 %4318 }
 0x9c5   :  { %v4570_v62 = vsel %vm11293_vm12, %v4569_v34, %v4565_v30  ;;  %v4594_v61 = vrot.slane %v4319_v55, %v11300_v2  ;;  %v11303_v34 = vld [vmem:[#allocation21_spill] sm:$0xff] }
 0x9c6   :  { %v4321_v36 = vpop.xlane.xlu1 %4320  ;;  %v4575_v11 = vsel %vm11294_vm13, %v4574_v48, %v4570_v62  ;;  %v11304_v62 = vld [vmem:[#allocation24_spill] sm:$0xff] }
 0x9c7   :  { %v4580_v32 = vsel %vm11297_vm2, %v4579_v22, %v4575_v11  ;;  %v4599_v0 = vrot.slane %v4321_v36, %v11303_v34 }
 0x9c8   :  { %v4315_v51 = vpop.xlane.xlu0 %4314 }
 0x9c9   :  { %v4584_v29 = vrot.slane %v4315_v51, %v11296_v27 }
 0x9ca   :  { %v4317_v37 = vpop.xlane.xlu1 %4316 }
 0x9cb   :  { %v4585_v23 = vsel %vm11298_vm8, %v4584_v29, %v4580_v32  ;;  %v4589_v17 = vrot.slane %v4317_v37, %v11299_v10  ;;  %v11307_v32 = vld [vmem:[#allocation23_spill] sm:$0xff] }
 0x9cc   :  { %v4327_v63 = vpop.xlane.xlu0 %4326 }
 0x9cd   :  { %v4590_v31 = vsel %vm11301_vm10, %v4589_v17, %v4585_v23  ;;  %v4614_v55 = vrot.slane %v4327_v63, %v11308_v39  ;;  %v11317_v63 = vld [vmem:[#allocation29_spill] sm:$0xff]  ;;  %vm11321_vm10 = vcmask 130112  }
 0x9ce   :  { %v4329_v4 = vpop.xlane.xlu1 %4328  ;;  %v4595_v30 = vsel %vm11302_vm6, %v4594_v61, %v4590_v31  ;;  %v11311_v31 = vld [vmem:[#allocation25_spill] sm:$0xff] }
 0x9cf   :  { %v4600_v11 = vsel %vm11305_vm7, %v4599_v0, %v4595_v30  ;;  %v4619_v36 = vrot.slane %v4329_v4, %v11311_v31 }
 0x9d0   :  { %v4323_v48 = vpop.xlane.xlu0 %4322 }
 0x9d1   :  { %v4604_v51 = vrot.slane %v4323_v48, %v11304_v62 }
 0x9d2   :  { %v4325_v22 = vpop.xlane.xlu1 %4324 }
 0x9d3   :  { %v4605_v29 = vsel %vm11306_vm3, %v4604_v51, %v4600_v11  ;;  %v4609_v37 = vrot.slane %v4325_v22, %v11307_v32  ;;  %v11315_v11 = vld [vmem:[#allocation27_spill] sm:$0xff] }
 0x9d4   :  { %v4335_v5 = vpop.xlane.xlu0 %4334 }
 0x9d5   :  { %v4610_v23 = vsel %vm11309_vm0, %v4609_v37, %v4605_v29  ;;  %v4634_v50 = vrot.slane %v4335_v5, %v11316_v46 }
 0x9d6   :  { %v4337_v17 = vpop.xlane.xlu1 %4336  ;;  %v4615_v61 = vsel %vm11310_vm11, %v4614_v55, %v4610_v23 }
 0x9d7   :  { %v4620_v30 = vsel %vm11313_vm5, %v4619_v36, %v4615_v61  ;;  %v4639_v44 = vrot.slane %v4337_v17, %v11317_v63  ;;  %vm11330_vm5 = vcmask 195712  }
 0x9d8   :  { %v4331_v58 = vpop.xlane.xlu0 %4330 }
 0x9d9   :  { %v4624_v48 = vrot.slane %v4331_v58, %v11312_v43 }
 0x9da   :  { %v4333_v0 = vpop.xlane.xlu1 %4332 }
 0x9db   :  { %v4625_v51 = vsel %vm11314_vm14, %v4624_v48, %v4620_v30  ;;  %v4629_v22 = vrot.slane %v4333_v0, %v11315_v11 }
 0x9dd   :  { %v4630_v29 = vsel %vm11318_vm4, %v4629_v22, %v4625_v51 }
 0x9de   :  { %v4635_v37 = vsel %vm11319_vm15, %v4634_v50, %v4630_v29  ;;  %v4343_v55 = vpop.xlane.xlu1 %4342  ;;  %v4345_v4 = vpop.xlane.xlu0 %4344  ;;  %v11322_v29 = vld [vmem:[#allocation64_spill] sm:$0xff] }
 0x9df   :  { %v10189_v23 = vsel %vm11320_vm9, %v4639_v44, %v4635_v37  ;;  %vm11323_vm6 = vnez %v11322_v29  ;;  %v11324_v37 = vld [vmem:[#allocation63_spill] sm:$0xff]  ;;  %vm11331_vm9 = vcmask 261312  }
 0x9e0   :  { %v4735_v58 = vadd.f32 %v10189_v23, %v10106_v41  ;;  %v4734_v61 = vadd.f32 %v10189_v23, %v10076_v1  ;;  %v4736_v5 = vadd.f32 %v10189_v23, %v10110_v56  ;;  %v4737_v17 = vadd.f32 %v10189_v23, %v10081_v57 }
 0x9e1   :  { %v4738_v50 = vadd.f32 %v10189_v23, %v10091_v15  ;;  %v4739_v36 = vadd.f32 %v10189_v23, %v10114_v6  ;;  %v4740_v44 = vadd.f32 %v10189_v23, %v10101_v21  ;;  %v4741_v41 = vadd.f32 %v10189_v23, %v10104_v53 }
 0x9e2   :  { %v4339_v48 = vpop.xlane.xlu1 %4338  ;;  %v4341_v1 = vpop.xlane.xlu0 %4340  ;;  %vm4767_vm12 = vcmp.gt.f32.partialorder %v4735_v58, 0.0  ;;  %v4799_v30 = vmul.f32 0.2, %v4735_v58  ;;  %vm4766_vm13 = vcmp.gt.f32.partialorder %v4734_v61, 0.0  ;;  %v4798_v56 = vmul.f32 0.2, %v4734_v61 }
 0x9e3   :  { %v4644_v57 = vrot.slane %v4339_v48, %v11290_v60  ;;  %v4648_v0 = vrot.slane %v4341_v1, %v11291_v49  ;;  %vm4768_vm2 = vcmp.gt.f32.partialorder %v4736_v5, 0.0  ;;  %v4800_v15 = vmul.f32 0.2, %v4736_v5  ;;  %v11328_v1 = vld [vmem:[#allocation65_spill] sm:$0xff] }
 0x9e4   :  { %v4831_v51 = vsel %vm4767_vm12, %v4735_v58, %v4799_v30  ;;  %v4830_v6 = vsel %vm4766_vm13, %v4734_v61, %v4798_v56  ;;  %vm4769_vm8 = vcmp.gt.f32.partialorder %v4737_v17, 0.0  ;;  %v4801_v22 = vmul.f32 0.2, %v4737_v17  ;;  %v11326_v61 = vld [vmem:[#allocation66_spill] sm:$0xff] }
 0x9e5   :  { %v4649_v21 = vsel %vm11321_vm10, %v4648_v0, %v4644_v57  ;;  %v10212_v53 = vsel %vm11323_vm6, %v4831_v51, -9e+15  ;;  %vm11325_vm7 = vnez %v11324_v37  ;;  %v4832_v54 = vsel %vm4768_vm2, %v4736_v5, %v4800_v15 }
 0x9e6   :  { %v10216_v13 = vsel %vm11325_vm7, %v4830_v6, -9e+15  ;;  %v4653_v60 = vrot.slane %v4343_v55, %v11292_v9  ;;  %v4347_v49 = vpop.xlane.xlu1 %4346  ;;  %4896 = vmax.xlane.f32.xlu0 %v10212_v53  ;;  %v4833_v58 = vsel %vm4769_vm8, %v4737_v17, %v4801_v22  ;;  %vm11327_vm3 = vnez %v11326_v61 }
 0x9e7   :  { %4894 = vmax.xlane.f32.xlu1 %v10216_v13  ;;  %v10223_v48 = vsel %vm11327_vm3, %v4832_v54, -9e+15  ;;  %vm11329_vm0 = vnez %v11328_v1  ;;  %vm4770_vm11 = vcmp.gt.f32.partialorder %v4738_v50, 0.0  ;;  %v4802_v5 = vmul.f32 0.2, %v4738_v50  ;;  %v11337_v1 = vld [vmem:[#allocation69_spill] sm:$0xff] }
 0x9e8   :  { %v10227_v30 = vsel %vm11329_vm0, %v4833_v58, -9e+15  ;;  %v4654_v56 = vsel %vm11330_vm5, %v4653_v60, %v4649_v21  ;;  %vm4771_vm14 = vcmp.gt.f32.partialorder %v4739_v36, 0.0  ;;  %v4803_v9 = vmul.f32 0.2, %v4739_v36  ;;  %v11332_v21 = vld [vmem:[#allocation70_spill] sm:$0xff]  ;;  %v4351_v60 = vpop.xlane.xlu0 %4350 }
 0x9e9   :  { %v4658_v55 = vrot.slane %v4345_v4, %v11295_v3  ;;  %vm4772_vm4 = vcmp.gt.f32.partialorder %v4740_v44, 0.0  ;;  %v4804_v57 = vmul.f32 0.2, %v4740_v44  ;;  %v4805_v0 = vmul.f32 0.2, %v4741_v41  ;;  %v11334_v4 = vld [vmem:[#allocation68_spill] sm:$0xff] }
 0x9ea   :  { %v4353_v17 = vpop.xlane.xlu1 %4352  ;;  %4898 = vmax.xlane.f32.xlu0 %v10223_v48  ;;  %v4834_v54 = vsel %vm4770_vm11, %v4738_v50, %v4802_v5  ;;  %v4835_v15 = vsel %vm4771_vm14, %v4739_v36, %v4803_v9  ;;  %vm4773_vm15 = vcmp.gt.f32.partialorder %v4741_v41, 0.0  ;;  %v4742_v51 = vadd.f32 %v10189_v23, %v10108_v59 }
 0x9eb   :  { %4900 = vmax.xlane.f32.xlu1 %v10227_v30  ;;  %v4659_v6 = vsel %vm11331_vm9, %v4658_v55, %v4654_v56  ;;  %v4663_v22 = vrot.slane %v4347_v49, %v11296_v27  ;;  %vm11333_vm12 = vnez %v11332_v21  ;;  %vm11335_vm13 = vnez %v11334_v4  ;;  %v11339_v56 = vld [vmem:[#allocation67_spill] sm:$0xff] }
 0x9ec   :  { %v10239_v3 = vsel %vm11333_vm12, %v4834_v54, -9e+15  ;;  %v10243_v29 = vsel %vm11335_vm13, %v4835_v15, -9e+15  ;;  %v4836_v37 = vsel %vm4772_vm4, %v4740_v44, %v4804_v57  ;;  %v4837_v50 = vsel %vm4773_vm15, %v4741_v41, %v4805_v0  ;;  %v11346_v4 = vld [vmem:[#allocation71_spill] sm:$0xff] }
 0x9ed   :  { %v4806_v36 = vmul.f32 0.2, %v4742_v51  ;;  %v4743_v58 = vadd.f32 %v10189_v23, %v10119_v47  ;;  %v4744_v59 = vadd.f32 %v10189_v23, %v10112_v24  ;;  %vm4774_vm2 = vcmp.gt.f32.partialorder %v4742_v51, 0.0 }
 0x9ee   :  { %v4349_v61 = vpop.xlane.xlu1 %4348  ;;  %4902 = vmax.xlane.f32.xlu0 %v10239_v3  ;;  %v4745_v27 = vadd.f32 %v10189_v23, %v10117_v42  ;;  %vm11336_vm10 = vcmask 326912   ;;  %v4673_v47 = vrot.slane %v4351_v60, %v11300_v2  ;;  %vm11338_vm6 = vnez %v11337_v1 }
 0x9ef   :  { %4904 = vmax.xlane.f32.xlu1 %v10243_v29  ;;  %v4668_v44 = vrot.slane %v4349_v61, %v11299_v10  ;;  %vm4775_vm8 = vcmp.gt.f32.partialorder %v4743_v58, 0.0  ;;  %v4807_v41 = vmul.f32 0.2, %v4743_v58  ;;  %v4664_v49 = vsel %vm11336_vm10, %v4663_v22, %v4659_v6  ;;  %v4355_v6 = vpop.xlane.xlu0 %4354  ;;  %v11343_v22 = vld [vmem:[#allocation72_spill] sm:$0xff] }
 0x9f0   :  { %v10258_v24 = vsel %vm11338_vm6, %v4836_v37, -9e+15  ;;  %vm11340_vm7 = vnez %v11339_v56  ;;  %vm11341_vm3 = vcmask 392512   ;;  %v4838_v55 = vsel %vm4774_vm2, %v4742_v51, %v4806_v36 }
 0x9f1   :  { %v10262_v5 = vsel %vm11340_vm7, %v4837_v50, -9e+15  ;;  %v4669_v9 = vsel %vm11341_vm3, %v4668_v44, %v4664_v49  ;;  %v4808_v42 = vmul.f32 0.2, %v4744_v59  ;;  %v4746_v10 = vadd.f32 %v10189_v23, %v10122_v19 }
 0x9f2   :  { %vm11342_vm0 = vcmask 458112   ;;  %v4359_v0 = vpop.xlane.xlu1 %4358  ;;  %4906 = vmax.xlane.f32.xlu0 %v10258_v24  ;;  %v4839_v2 = vsel %vm4775_vm8, %v4743_v58, %v4807_v41  ;;  %vm4776_vm11 = vcmp.gt.f32.partialorder %v4744_v59, 0.0  ;;  %v4809_v54 = vmul.f32 0.2, %v4745_v27  ;;  %v11349_v41 = vld [vmem:[#allocation74_spill] sm:$0xff] }
 0x9f3   :  { %v4674_v57 = vsel %vm11342_vm0, %v4673_v47, %v4669_v9  ;;  %4908 = vmax.xlane.f32.xlu1 %v10262_v5  ;;  %v4678_v15 = vrot.slane %v4353_v17, %v11303_v34  ;;  %vm4777_vm5 = vcmp.gt.f32.partialorder %v4745_v27, 0.0  ;;  %vm11344_vm14 = vnez %v11343_v22  ;;  %v4361_v1 = vpop.xlane.xlu0 %4360 }
 0x9f4   :  { %v10273_v51 = vsel %vm11344_vm14, %v4838_v55, -9e+15  ;;  %v4747_v19 = vadd.f32 %v10189_v23, %v10124_v7  ;;  %vm11345_vm4 = vcmask 523712   ;;  %vm11347_vm15 = vnez %v11346_v4  ;;  %v11354_v55 = vld [vmem:[#allocation76_spill] sm:$0xff] }
 0x9f5   :  { %v4679_v21 = vsel %vm11345_vm4, %v4678_v15, %v4674_v57  ;;  %v10280_v37 = vsel %vm11347_vm15, %v4839_v2, -9e+15  ;;  %v4840_v60 = vsel %vm4776_vm11, %v4744_v59, %v4808_v42  ;;  %v4810_v50 = vmul.f32 0.2, %v4746_v10  ;;  %v11356_v57 = vld [vmem:[#allocation75_spill] sm:$0xff] }
 0x9f6   :  { %v4357_v36 = vpop.xlane.xlu1 %4356  ;;  %4910 = vmax.xlane.f32.xlu0 %v10273_v51  ;;  %v4841_v34 = vsel %vm4777_vm5, %v4745_v27, %v4809_v54  ;;  %v4811_v17 = vmul.f32 0.2, %v4747_v19  ;;  %v4748_v58 = vadd.f32 %v10189_v23, %v10128_v35  ;;  %v4749_v7 = vadd.f32 %v10189_v23, %v10126_v20  ;;  %v11351_v27 = vld [vmem:[#allocation73_spill] sm:$0xff] }
 0x9f7   :  { %4912 = vmax.xlane.f32.xlu1 %v10280_v37  ;;  %v4683_v61 = vrot.slane %v4355_v6, %v11304_v62  ;;  %v4688_v44 = vrot.slane %v4357_v36, %v11307_v32  ;;  %vm4778_vm9 = vcmp.gt.f32.partialorder %v4746_v10, 0.0  ;;  %vm4779_vm12 = vcmp.gt.f32.partialorder %v4747_v19, 0.0 }
 0x9f8   :  { %vm11348_vm13 = vcmask 589312   ;;  %vm11350_vm2 = vnez %v11349_v41  ;;  %vm11352_vm8 = vnez %v11351_v27  ;;  %v4842_v20 = vsel %vm4778_vm9, %v4746_v10, %v4810_v50 }
 0x9f9   :  { %v4684_v59 = vsel %vm11348_vm13, %v4683_v61, %v4679_v21  ;;  %v10293_v49 = vsel %vm11350_vm2, %v4840_v60, -9e+15  ;;  %v10297_v47 = vsel %vm11352_vm8, %v4841_v34, -9e+15  ;;  %v4843_v62 = vsel %vm4779_vm12, %v4747_v19, %v4811_v17  ;;  %v11360_v21 = vld [vmem:[#allocation78_spill] sm:$0xff]  ;;  %v11362_v60 = vld [vmem:[#allocation77_spill] sm:$0xff] }
 0x9fa   :  { %v4363_v35 = vpop.xlane.xlu1 %4362  ;;  %4914 = vmax.xlane.f32.xlu0 %v10293_v49  ;;  %v4812_v32 = vmul.f32 0.2, %v4748_v58  ;;  %v4813_v23 = vmul.f32 0.2, %v4749_v7  ;;  %vm11353_vm10 = vcmask 654912   ;;  %vm4780_vm6 = vcmp.gt.f32.partialorder %v4748_v58, 0.0 }
 0x9fb   :  { %4916 = vmax.xlane.f32.xlu1 %v10297_v47  ;;  %v4689_v56 = vsel %vm11353_vm10, %v4688_v44, %v4684_v59  ;;  %vm4781_vm7 = vcmp.gt.f32.partialorder %v4749_v7, 0.0  ;;  %v4693_v9 = vrot.slane %v4359_v0, %v11308_v39  ;;  %vm11355_vm3 = vnez %v11354_v55  ;;  %v4367_v0 = vpop.xlane.xlu0 %4366 }
 0x9fc   :  { %v10305_v42 = vsel %vm11355_vm3, %v4842_v20, -9e+15  ;;  %vm11357_vm0 = vnez %v11356_v57  ;;  %vm11358_vm11 = vcmask 720512   ;;  %v4844_v15 = vsel %vm4780_vm6, %v4748_v58, %v4812_v32  ;;  %v11370_v32 = vld [vmem:[#allocation80_spill] sm:$0xff]  ;;  %v11372_v57 = vld [vmem:[#allocation81_spill] sm:$0xff] }
 0x9fd   :  { %v10309_v2 = vsel %vm11357_vm0, %v4843_v62, -9e+15  ;;  %v4694_v10 = vsel %vm11358_vm11, %v4693_v9, %v4689_v56  ;;  %v4845_v6 = vsel %vm4781_vm7, %v4749_v7, %v4813_v23  ;;  %v4698_v22 = vrot.slane %v4361_v1, %v11311_v31  ;;  %v11368_v62 = vld [vmem:[#allocation79_spill] sm:$0xff] }
 0x9fe   :  { %v4369_v54 = vpop.xlane.xlu1 %4368  ;;  %4918 = vmax.xlane.f32.xlu0 %v10305_v42  ;;  %v4703_v39 = vrot.slane %v4363_v35, %v11312_v43  ;;  %vm11359_vm5 = vcmask 786112   ;;  %vm11361_vm14 = vnez %v11360_v21  ;;  %vm11363_vm4 = vnez %v11362_v60  ;;  %v11378_v60 = vld [vmem:[#allocation84_spill] sm:$0xff] }
 0x9ff   :  { %4920 = vmax.xlane.f32.xlu1 %v10309_v2  ;;  %v4699_v19 = vsel %vm11359_vm5, %v4698_v22, %v4694_v10  ;;  %v10319_v4 = vsel %vm11361_vm14, %v4844_v15, -9e+15  ;;  %v10323_v50 = vsel %vm11363_vm4, %v4845_v6, -9e+15  ;;  %v4713_v43 = vrot.slane %v4367_v0, %v11316_v46 }
 0xa00   :  { %vm11364_vm15 = vcmask 851712   ;;  %v4718_v17 = vrot.slane %v4369_v54, %v11317_v63  ;;  %vm11365_vm9 = vcmask 917312   ;;  %vm11366_vm12 = vcmask 982912   ;;  %v11374_v54 = vld [vmem:[#allocation82_spill] sm:$0xff] }
 0xa01   :  { %v4704_v34 = vsel %vm11364_vm15, %v4703_v39, %v4699_v19  ;;  %vm11367_vm13 = vcmask 1048512   ;;  %vm11369_vm7 = vnez %v11368_v62  ;;  %vm11371_vm3 = vnez %v11370_v32  ;;  %v11376_v19 = vld [vmem:[#allocation83_spill] sm:$0xff]  ;;  %v11386_v62 = vld [vmem:[#allocation89_spill] sm:$0xff] }
 0xa02   :  { %v4365_v36 = vpop.xlane.xlu1 %4364  ;;  %4922 = vmax.xlane.f32.xlu0 %v10319_v4  ;;  %vm11373_vm5 = vnez %v11372_v57  ;;  %vm11375_vm14 = vnez %v11374_v54  ;;  %v11390_v57 = vld [vmem:[#allocation90_spill] sm:$0xff] }
 0xa03   :  { %4924 = vmax.xlane.f32.xlu1 %v10323_v50  ;;  %v4708_v31 = vrot.slane %v4365_v36, %v11315_v11 }
 0xa05   :  { %v4709_v58 = vsel %vm11365_vm9, %v4708_v31, %v4704_v34  ;;  %vm11377_vm9 = vnez %v11376_v19 }
 0xa06   :  { %v4714_v7 = vsel %vm11366_vm12, %v4713_v43, %v4709_v58  ;;  %vm11379_vm12 = vnez %v11378_v60  ;;  %v11380_v58 = vld [vmem:[#allocation85_spill] sm:$0xff] }
 0xa07   :  { %v10334_v61 = vsel %vm11367_vm13, %v4718_v17, %v4714_v7 }
 0xa08   :  { %v4751_v44 = vadd.f32 %v10334_v61, %v10130_v12  ;;  %v4750_v59 = vadd.f32 %v10334_v61, %v10132_v40  ;;  %v4753_v46 = vadd.f32 %v10334_v61, %v10134_v38  ;;  %v4752_v11 = vadd.f32 %v10334_v61, %v10136_v8 }
 0xa09   :  { %v4755_v41 = vadd.f32 %v10334_v61, %v10138_v16  ;;  %v4754_v12 = vadd.f32 %v10334_v61, %v10140_v25  ;;  %v4757_v56 = vadd.f32 %v10334_v61, %v10142_v33  ;;  %v4756_v55 = vadd.f32 %v10334_v61, %v10144_v14 }
 0xa0a   :  { %vm4783_vm2 = vcmp.gt.f32.partialorder %v4751_v44, 0.0  ;;  %v4815_v63 = vmul.f32 0.2, %v4751_v44  ;;  %vm4782_vm8 = vcmp.gt.f32.partialorder %v4750_v59, 0.0  ;;  %v4814_v27 = vmul.f32 0.2, %v4750_v59 }
 0xa0b   :  { %vm4785_vm10 = vcmp.gt.f32.partialorder %v4753_v46, 0.0  ;;  %v4817_v35 = vmul.f32 0.2, %v4753_v46  ;;  %vm4784_vm6 = vcmp.gt.f32.partialorder %v4752_v11, 0.0  ;;  %v4816_v40 = vmul.f32 0.2, %v4752_v11 }
 0xa0c   :  { %v4847_v20 = vsel %vm4783_vm2, %v4751_v44, %v4815_v63  ;;  %v4846_v8 = vsel %vm4782_vm8, %v4750_v59, %v4814_v27  ;;  %v4819_v1 = vmul.f32 0.2, %v4755_v41  ;;  %vm4787_vm0 = vcmp.gt.f32.partialorder %v4755_v41, 0.0 }
 0xa0d   :  { %v10350_v38 = vsel %vm11369_vm7, %v4847_v20, -9e+15  ;;  %v10355_v23 = vsel %vm11371_vm3, %v4846_v8, -9e+15  ;;  %v4849_v16 = vsel %vm4785_vm10, %v4753_v46, %v4817_v35  ;;  %v4848_v25 = vsel %vm4784_vm6, %v4752_v11, %v4816_v40  ;;  %v4523_v35 = vpop.permute.xlu1 %4522  ;;  %v11384_v20 = vld [vmem:[#allocation87_spill] sm:$0xff] }
 0xa0e   :  { %4928 = vmax.xlane.f32.xlu1 %v10350_v38  ;;  %4926 = vmax.xlane.f32.xlu0 %v10355_v23  ;;  %v4818_v9 = vmul.f32 0.2, %v4754_v12  ;;  %vm4786_vm11 = vcmp.gt.f32.partialorder %v4754_v12, 0.0  ;;  %v10364_v10 = vsel %vm11373_vm5, %v4849_v16, -9e+15  ;;  %v4851_v33 = vsel %vm4787_vm0, %v4755_v41, %v4819_v1  ;;  %v11383_v41 = vld [vmem:[#allocation53_spill] sm:$0xff] }
 0xa0f   :  { %v10369_v15 = vsel %vm11375_vm14, %v4848_v25, -9e+15  ;;  %v4821_v6 = vmul.f32 0.2, %v4757_v56  ;;  %v4759_v22 = vadd.f32 %v10334_v61, %v10146_v52  ;;  %vm4789_vm4 = vcmp.gt.f32.partialorder %v4757_v56, 0.0 }
 0xa10   :  { %v4850_v39 = vsel %vm4786_vm11, %v4754_v12, %v4818_v9  ;;  %v4820_v14 = vmul.f32 0.2, %v4756_v55  ;;  %v4758_v0 = vadd.f32 %v10334_v61, %v10148_v18  ;;  %vm4788_vm15 = vcmp.gt.f32.partialorder %v4756_v55, 0.0  ;;  %v4528_v12 = vpop.permute.xlu0 %4527  ;;  %v11388_v9 = vld [vmem:[#allocation88_spill] sm:$0xff] }
 0xa11   :  { %v10378_v21 = vsel %vm11377_vm9, %v4851_v33, -9e+15  ;;  %v10383_v36 = vsel %vm11379_vm12, %v4850_v39, -9e+15  ;;  %v4853_v52 = vsel %vm4789_vm4, %v4757_v56, %v4821_v6  ;;  %v4823_v31 = vmul.f32 0.2, %v4759_v22 }
 0xa12   :  { %4932 = vmax.xlane.f32.xlu1 %v10364_v10  ;;  %4930 = vmax.xlane.f32.xlu0 %v10369_v15  ;;  %v4761_v43 = vadd.f32 %v10334_v61, %v10150_v45  ;;  %v4852_v34 = vsel %vm4788_vm15, %v4756_v55, %v4820_v14  ;;  %vm4791_vm13 = vcmp.gt.f32.partialorder %v4759_v22, 0.0  ;;  %v4822_v18 = vmul.f32 0.2, %v4758_v0  ;;  %v11392_v39 = vld [vmem:[#allocation91_spill] sm:$0xff] }
 0xa13   :  { %v4760_v17 = vadd.f32 %v10334_v61, %v10152_v26  ;;  %vm4790_vm2 = vcmp.gt.f32.partialorder %v4758_v0, 0.0  ;;  %vm11381_vm8 = vnez %v11380_v58  ;;  %v10397_v59 = vsel %vm8856_vm1, %v4852_v34, -9e+15  ;;  %v11398_v34 = vld [vmem:[#allocation94_spill] sm:$0xff] }
 0xa14   :  { %v10392_v7 = vsel %vm11381_vm8, %v4853_v52, -9e+15  ;;  %v4855_v45 = vsel %vm4791_vm13, %v4759_v22, %v4823_v31  ;;  %v4825_v46 = vmul.f32 0.2, %v4761_v43  ;;  %v4763_v11 = vadd.f32 %v10334_v61, %v10154_v28  ;;  %v11396_v31 = vld [vmem:[#allocation93_spill] sm:$0xff] }
 0xa15   :  { %v4854_v63 = vsel %vm4790_vm2, %v4758_v0, %v4822_v18  ;;  %vm4793_vm10 = vcmp.gt.f32.partialorder %v4761_v43, 0.0  ;;  %v4824_v26 = vmul.f32 0.2, %v4760_v17  ;;  %v4762_v27 = vadd.f32 %v10334_v61, %v11383_v41  ;;  %v11394_v0 = vld [vmem:[#allocation92_spill] sm:$0xff] }
 0xa16   :  { %4936 = vmax.xlane.f32.xlu1 %v10378_v21  ;;  %4934 = vmax.xlane.f32.xlu0 %v10383_v36  ;;  %vm4792_vm6 = vcmp.gt.f32.partialorder %v4760_v17, 0.0  ;;  %vm11385_vm7 = vnez %v11384_v20  ;;  %vm11387_vm1 = vnez %v11386_v62  ;;  %v4857_v8 = vsel %vm4793_vm10, %v4761_v43, %v4825_v46 }
 0xa17   :  { %v10406_v40 = vsel %vm11385_vm7, %v4855_v45, -9e+15  ;;  %v10411_v28 = vsel %vm11387_vm1, %v4854_v63, -9e+15  ;;  %v4827_v32 = vmul.f32 0.2, %v4763_v11  ;;  %v4765_v16 = vadd.f32 %v10334_v61, %v4528_v12 }
 0xa18   :  { %v4764_v1 = vadd.f32 %v10334_v61, %v4523_v35  ;;  %v4856_v56 = vsel %vm4792_vm6, %v4760_v17, %v4824_v26  ;;  %vm4795_vm3 = vcmp.gt.f32.partialorder %v4763_v11, 0.0  ;;  %v4826_v25 = vmul.f32 0.2, %v4762_v27 }
 0xa19   :  { %vm4794_vm0 = vcmp.gt.f32.partialorder %v4762_v27, 0.0  ;;  %vm11389_vm11 = vnez %v11388_v9  ;;  %vm11391_vm5 = vnez %v11390_v57  ;;  %v4859_v33 = vsel %vm4795_vm3, %v4763_v11, %v4827_v32 }
 0xa1a   :  { %4940 = vmax.xlane.f32.xlu1 %v10392_v7  ;;  %4938 = vmax.xlane.f32.xlu0 %v10397_v59  ;;  %v10418_v55 = vsel %vm11389_vm11, %v4857_v8, -9e+15  ;;  %v10423_v54 = vsel %vm11391_vm5, %v4856_v56, -9e+15  ;;  %v4829_v6 = vmul.f32 0.2, %v4765_v16  ;;  %v4858_v61 = vsel %vm4794_vm0, %v4762_v27, %v4826_v25 }
 0xa1b   :  { %v4828_v22 = vmul.f32 0.2, %v4764_v1  ;;  %vm4797_vm14 = vcmp.gt.f32.partialorder %v4765_v16, 0.0  ;;  %vm4796_vm4 = vcmp.gt.f32.partialorder %v4764_v1, 0.0  ;;  %vm11393_vm15 = vnez %v11392_v39 }
 0xa1c   :  { %v10428_v14 = vsel %vm11393_vm15, %v4859_v33, -9e+15  ;;  %vm11395_vm9 = vnez %v11394_v0  ;;  %v4861_v60 = vsel %vm4797_vm14, %v4765_v16, %v4829_v6  ;;  %vm11397_vm12 = vnez %v11396_v31 }
 0xa1d   :  { %v10433_v19 = vsel %vm11395_vm9, %v4858_v61, -9e+15  ;;  %v4860_v52 = vsel %vm4796_vm4, %v4764_v1, %v4828_v22  ;;  %v10438_v43 = vsel %vm11397_vm12, %v4861_v60, -9e+15  ;;  %vm11399_vm13 = vnez %v11398_v34 }
 0xa1e   :  { %4944 = vmax.xlane.f32.xlu1 %v10406_v40  ;;  %4942 = vmax.xlane.f32.xlu0 %v10411_v28  ;;  %v10442_v18 = vsel %vm11399_vm13, %v4860_v52, -9e+15 }
 0xa22   :  { %4948 = vmax.xlane.f32.xlu1 %v10418_v55  ;;  %4946 = vmax.xlane.f32.xlu0 %v10423_v54 }
 0xa26   :  { %4952 = vmax.xlane.f32.xlu1 %v10428_v14  ;;  %4950 = vmax.xlane.f32.xlu0 %v10433_v19 }
 0xa2a   :  { %4956 = vmax.xlane.f32.xlu1 %v10438_v43  ;;  %4954 = vmax.xlane.f32.xlu0 %v10442_v18 }
 0xa73   :  { %v4897_v58 = vpop.xlane.xlu0 %4896 }
 0xa74   :  { %v4895_v17 = vpop.xlane.xlu1 %4894  ;;  %v4959_v45 = vsub.f32 %v10212_v53, %v4897_v58 }
 0xa75   :  { %v4958_v44 = vsub.f32 %v10216_v13, %v4895_v17 }
 0xa76   :  { %v4992_v11 = vmul.f32 1.442695, %v4959_v45 }
 0xa77   :  { %v4990_v46 = vmul.f32 1.442695, %v4958_v44  ;;  %v4899_v26 = vpop.xlane.xlu0 %4898 }
 0xa78   :  { %v4901_v63 = vpop.xlane.xlu1 %4900  ;;  %v4960_v27 = vsub.f32 %v10223_v48, %v4899_v26 }
 0xa79   :  { %6937 = vpow2.f32 %v4990_v46  ;;  %v4961_v41 = vsub.f32 %v10227_v30, %v4901_v63 }
 0xa7a   :  { %6939 = vpow2.f32 %v4992_v11  ;;  %v4994_v12 = vmul.f32 1.442695, %v4960_v27 }
 0xa7b   :  { %v4996_v35 = vmul.f32 1.442695, %v4961_v41  ;;  %v4903_v62 = vpop.xlane.xlu0 %4902 }
 0xa7c   :  { %v4905_v20 = vpop.xlane.xlu1 %4904  ;;  %v4962_v13 = vsub.f32 %v10239_v3, %v4903_v62 }
 0xa7d   :  { %6941 = vpow2.f32 %v4996_v35  ;;  %v4963_v8 = vsub.f32 %v10243_v29, %v4905_v20 }
 0xa7e   :  { %6943 = vpow2.f32 %v4994_v12  ;;  %v4998_v32 = vmul.f32 1.442695, %v4962_v13 }
 0xa7f   :  { %v5000_v53 = vmul.f32 1.442695, %v4963_v8  ;;  %v4907_v1 = vpop.xlane.xlu0 %4906 }
 0xa80   :  { %v4909_v16 = vpop.xlane.xlu1 %4908  ;;  %v4964_v48 = vsub.f32 %v10258_v24, %v4907_v1 }
 0xa81   :  { %6945 = vpow2.f32 %v5000_v53  ;;  %v4965_v30 = vsub.f32 %v10262_v5, %v4909_v16 }
 0xa82   :  { %6947 = vpow2.f32 %v4998_v32  ;;  %v5002_v9 = vmul.f32 1.442695, %v4964_v48 }
 0xa83   :  { %v10454_v56 = vpop.eup %6937  ;;  %v5004_v25 = vmul.f32 1.442695, %v4965_v30  ;;  %v4911_v3 = vpop.xlane.xlu0 %4910 }
 0xa84   :  { %v10456_v57 = vpop.eup %6939  ;;  %v4913_v29 = vpop.xlane.xlu1 %4912  ;;  %5054 = vadd.xlane.f32.xlu0 %v10454_v56  ;;  %v4966_v5 = vsub.f32 %v10273_v51, %v4911_v3 }
 0xa85   :  { %6949 = vpow2.f32 %v5004_v25  ;;  %v4967_v33 = vsub.f32 %v10280_v37, %v4913_v29  ;;  %5056 = vadd.xlane.f32.xlu1 %v10456_v57 }
 0xa86   :  { %6951 = vpow2.f32 %v5002_v9  ;;  %v5006_v22 = vmul.f32 1.442695, %v4966_v5 }
 0xa87   :  { %v10462_v24 = vpop.eup %6941  ;;  %v5008_v6 = vmul.f32 1.442695, %v4967_v33  ;;  %v4915_v0 = vpop.xlane.xlu0 %4914 }
 0xa88   :  { %v10464_v61 = vpop.eup %6943  ;;  %v4917_v39 = vpop.xlane.xlu1 %4916  ;;  %v4968_v37 = vsub.f32 %v10293_v49, %v4915_v0 }
 0xa89   :  { %6953 = vpow2.f32 %v5008_v6  ;;  %v4969_v60 = vsub.f32 %v10297_v47, %v4917_v39  ;;  %5060 = vadd.xlane.f32.xlu1 %v10462_v24  ;;  %5058 = vadd.xlane.f32.xlu0 %v10464_v61 }
 0xa8a   :  { %6955 = vpow2.f32 %v5006_v22  ;;  %v5010_v31 = vmul.f32 1.442695, %v4968_v37 }
 0xa8b   :  { %v10470_v51 = vpop.eup %6945  ;;  %v5012_v52 = vmul.f32 1.442695, %v4969_v60  ;;  %v4919_v58 = vpop.xlane.xlu0 %4918 }
 0xa8c   :  { %v10472_v34 = vpop.eup %6947  ;;  %v4921_v17 = vpop.xlane.xlu1 %4920  ;;  %v4970_v47 = vsub.f32 %v10305_v42, %v4919_v58 }
 0xa8d   :  { %6957 = vpow2.f32 %v5012_v52  ;;  %v4971_v44 = vsub.f32 %v10309_v2, %v4921_v17  ;;  %5064 = vadd.xlane.f32.xlu1 %v10470_v51  ;;  %5062 = vadd.xlane.f32.xlu0 %v10472_v34 }
 0xa8e   :  { %6959 = vpow2.f32 %v5010_v31  ;;  %v5014_v46 = vmul.f32 1.442695, %v4970_v47 }
 0xa8f   :  { %v10478_v49 = vpop.eup %6949  ;;  %v5016_v45 = vmul.f32 1.442695, %v4971_v44  ;;  %v4923_v26 = vpop.xlane.xlu0 %4922 }
 0xa90   :  { %v10480_v11 = vpop.eup %6951  ;;  %v4925_v63 = vpop.xlane.xlu1 %4924  ;;  %v4972_v2 = vsub.f32 %v10319_v4, %v4923_v26 }
 0xa91   :  { %6961 = vpow2.f32 %v5016_v45  ;;  %v4973_v41 = vsub.f32 %v10323_v50, %v4925_v63  ;;  %5068 = vadd.xlane.f32.xlu1 %v10478_v49  ;;  %5066 = vadd.xlane.f32.xlu0 %v10480_v11 }
 0xa92   :  { %6963 = vpow2.f32 %v5014_v46  ;;  %v5018_v35 = vmul.f32 1.442695, %v4972_v2 }
 0xa93   :  { %v10486_v42 = vpop.eup %6953  ;;  %v5020_v27 = vmul.f32 1.442695, %v4973_v41 }
 0xa94   :  { %v10488_v12 = vpop.eup %6955 }
 0xa95   :  { %6965 = vpow2.f32 %v5020_v27  ;;  %5072 = vadd.xlane.f32.xlu1 %v10486_v42  ;;  %5070 = vadd.xlane.f32.xlu0 %v10488_v12 }
 0xa96   :  { %6967 = vpow2.f32 %v5018_v35 }
 0xa97   :  { %v10492_v50 = vpop.eup %6957 }
 0xa98   :  { %v10494_v20 = vpop.eup %6959 }
 0xa99   :  { %5076 = vadd.xlane.f32.xlu1 %v10492_v50  ;;  %5074 = vadd.xlane.f32.xlu0 %v10494_v20 }
 0xa9b   :  { %v10498_v4 = vpop.eup %6961  ;;  %v4929_v8 = vpop.xlane.xlu1 %4928 }
 0xa9c   :  { %v10500_v62 = vpop.eup %6963  ;;  %v4975_v13 = vsub.f32 %v10350_v38, %v4929_v8  ;;  %v4927_v53 = vpop.xlane.xlu0 %4926 }
 0xa9d   :  { %5080 = vadd.xlane.f32.xlu1 %v10498_v4  ;;  %5078 = vadd.xlane.f32.xlu0 %v10500_v62  ;;  %v4974_v32 = vsub.f32 %v10355_v23, %v4927_v53 }
 0xa9e   :  { %v5024_v1 = vmul.f32 1.442695, %v4975_v13 }
 0xa9f   :  { %v10506_v16 = vpop.eup %6965  ;;  %v5022_v48 = vmul.f32 1.442695, %v4974_v32  ;;  %v4933_v25 = vpop.xlane.xlu1 %4932 }
 0xaa0   :  { %v10508_v30 = vpop.eup %6967  ;;  %6969 = vpow2.f32 %v5024_v1  ;;  %v4977_v9 = vsub.f32 %v10364_v10, %v4933_v25  ;;  %v4931_v38 = vpop.xlane.xlu0 %4930 }
 0xaa1   :  { %5084 = vadd.xlane.f32.xlu1 %v10506_v16  ;;  %5082 = vadd.xlane.f32.xlu0 %v10508_v30  ;;  %6971 = vpow2.f32 %v5022_v48  ;;  %v4976_v29 = vsub.f32 %v10369_v15, %v4931_v38 }
 0xaa2   :  { %v5028_v3 = vmul.f32 1.442695, %v4977_v9 }
 0xaa3   :  { %v5026_v23 = vmul.f32 1.442695, %v4976_v29  ;;  %v4937_v33 = vpop.xlane.xlu1 %4936 }
 0xaa4   :  { %6973 = vpow2.f32 %v5028_v3  ;;  %v4979_v5 = vsub.f32 %v10378_v21, %v4937_v33  ;;  %v4935_v6 = vpop.xlane.xlu0 %4934 }
 0xaa5   :  { %6975 = vpow2.f32 %v5026_v23  ;;  %v4978_v22 = vsub.f32 %v10383_v36, %v4935_v6 }
 0xaa6   :  { %v5032_v39 = vmul.f32 1.442695, %v4979_v5 }
 0xaa7   :  { %v5030_v10 = vmul.f32 1.442695, %v4978_v22  ;;  %v4941_v0 = vpop.xlane.xlu1 %4940 }
 0xaa8   :  { %6977 = vpow2.f32 %v5032_v39  ;;  %v4981_v60 = vsub.f32 %v10392_v7, %v4941_v0  ;;  %v4939_v37 = vpop.xlane.xlu0 %4938 }
 0xaa9   :  { %6979 = vpow2.f32 %v5030_v10  ;;  %v4980_v15 = vsub.f32 %v10397_v59, %v4939_v37 }
 0xaaa   :  { %v10518_v52 = vpop.eup %6969  ;;  %v5036_v31 = vmul.f32 1.442695, %v4981_v60 }
 0xaab   :  { %v10520_v17 = vpop.eup %6971  ;;  %v5034_v21 = vmul.f32 1.442695, %v4980_v15  ;;  %v4945_v58 = vpop.xlane.xlu1 %4944  ;;  %5088 = vadd.xlane.f32.xlu1 %v10518_v52 }
 0xaac   :  { %6981 = vpow2.f32 %v5036_v31  ;;  %v4983_v36 = vsub.f32 %v10406_v40, %v4945_v58  ;;  %5086 = vadd.xlane.f32.xlu0 %v10520_v17  ;;  %v4943_v44 = vpop.xlane.xlu0 %4942 }
 0xaad   :  { %6983 = vpow2.f32 %v5034_v21  ;;  %v4982_v7 = vsub.f32 %v10411_v28, %v4943_v44 }
 0xaae   :  { %v10526_v47 = vpop.eup %6973  ;;  %v5040_v59 = vmul.f32 1.442695, %v4983_v36 }
 0xaaf   :  { %v10528_v45 = vpop.eup %6975  ;;  %v5038_v46 = vmul.f32 1.442695, %v4982_v7  ;;  %v4949_v63 = vpop.xlane.xlu1 %4948  ;;  %5092 = vadd.xlane.f32.xlu1 %v10526_v47 }
 0xab0   :  { %6985 = vpow2.f32 %v5040_v59  ;;  %v4985_v26 = vsub.f32 %v10418_v55, %v4949_v63  ;;  %5090 = vadd.xlane.f32.xlu0 %v10528_v45  ;;  %v4947_v40 = vpop.xlane.xlu0 %4946 }
 0xab1   :  { %6987 = vpow2.f32 %v5038_v46  ;;  %v4984_v41 = vsub.f32 %v10423_v54, %v4947_v40 }
 0xab2   :  { %v10534_v2 = vpop.eup %6977  ;;  %v5044_v28 = vmul.f32 1.442695, %v4985_v26 }
 0xab3   :  { %v10536_v27 = vpop.eup %6979  ;;  %v5042_v35 = vmul.f32 1.442695, %v4984_v41  ;;  %v4953_v8 = vpop.xlane.xlu1 %4952  ;;  %5096 = vadd.xlane.f32.xlu1 %v10534_v2 }
 0xab4   :  { %6989 = vpow2.f32 %v5044_v28  ;;  %v4987_v13 = vsub.f32 %v10428_v14, %v4953_v8  ;;  %5094 = vadd.xlane.f32.xlu0 %v10536_v27  ;;  %v4951_v55 = vpop.xlane.xlu0 %4950 }
 0xab5   :  { %6991 = vpow2.f32 %v5042_v35  ;;  %v4986_v53 = vsub.f32 %v10433_v19, %v4951_v55 }
 0xab6   :  { %v10542_v32 = vpop.eup %6981  ;;  %v5048_v54 = vmul.f32 1.442695, %v4987_v13 }
 0xab7   :  { %v10544_v1 = vpop.eup %6983  ;;  %v5046_v48 = vmul.f32 1.442695, %v4986_v53  ;;  %v4957_v25 = vpop.xlane.xlu1 %4956  ;;  %5100 = vadd.xlane.f32.xlu1 %v10542_v32  ;;  %v11400_v53 = vld [vmem:[#allocation46_spill] sm:$0xff] }
 0xab8   :  { %6993 = vpow2.f32 %v5048_v54  ;;  %v4989_v9 = vsub.f32 %v10438_v43, %v4957_v25  ;;  %5098 = vadd.xlane.f32.xlu0 %v10544_v1  ;;  %v4955_v14 = vpop.xlane.xlu0 %4954  ;;  %v11401_v54 = vld [vmem:[#allocation45_spill] sm:$0xff] }
 0xab9   :  { %6995 = vpow2.f32 %v5046_v48  ;;  %v4988_v38 = vsub.f32 %v10442_v18, %v4955_v14 }
 0xaba   :  { %v10550_v29 = vpop.eup %6985  ;;  %v5052_v19 = vmul.f32 1.442695, %v4989_v9 }
 0xabb   :  { %v10552_v3 = vpop.eup %6987  ;;  %v5050_v23 = vmul.f32 1.442695, %v4988_v38  ;;  %5104 = vadd.xlane.f32.xlu1 %v10550_v29 }
 0xabc   :  { %6997 = vpow2.f32 %v5052_v19  ;;  %5102 = vadd.xlane.f32.xlu0 %v10552_v3  ;;  %v11402_v19 = vld [vmem:[#allocation48_spill] sm:$0xff] }
 0xabd   :  { %6999 = vpow2.f32 %v5050_v23 }
 0xabe   :  { %v10556_v33 = vpop.eup %6989 }
 0xabf   :  { %v10558_v43 = vpop.eup %6991  ;;  %5108 = vadd.xlane.f32.xlu1 %v10556_v33 }
 0xac0   :  { %5106 = vadd.xlane.f32.xlu0 %v10558_v43 }
 0xac2   :  { %v10562_v18 = vpop.eup %6993 }
 0xac3   :  { %v10564_v5 = vpop.eup %6995  ;;  %5112 = vadd.xlane.f32.xlu1 %v10562_v18 }
 0xac4   :  { %5110 = vadd.xlane.f32.xlu0 %v10564_v5 }
 0xac6   :  { %v10568_v6 = vpop.eup %6997 }
 0xac7   :  { %v10570_v22 = vpop.eup %6999  ;;  %5116 = vadd.xlane.f32.xlu1 %v10568_v6 }
 0xac8   :  { %5114 = vadd.xlane.f32.xlu0 %v10570_v22 }
 0xb11   :  { %v5055_v39 = vpop.xlane.xlu0 %5054 }
 0xb12   :  { %v5057_v10 = vpop.xlane.xlu1 %5056  ;;  %7001 = vrcp.f32 %v5055_v39 }
 0xb13   :  { %7003 = vrcp.f32 %v5057_v10 }
 0xb16   :  { %v5061_v0 = vpop.xlane.xlu1 %5060  ;;  %v5059_v60 = vpop.xlane.xlu0 %5058 }
 0xb17   :  { %7005 = vrcp.f32 %v5061_v0 }
 0xb18   :  { %7007 = vrcp.f32 %v5059_v60 }
 0xb1a   :  { %v5065_v37 = vpop.xlane.xlu1 %5064  ;;  %v5063_v15 = vpop.xlane.xlu0 %5062 }
 0xb1b   :  { %7009 = vrcp.f32 %v5065_v37  ;;  %v11403_v37 = vld [vmem:[#allocation47_spill] sm:$0xff] }
 0xb1c   :  { %v7002_v31 = vpop.eup %7001  ;;  %7011 = vrcp.f32 %v5063_v15 }
 0xb1d   :  { %v7004_v21 = vpop.eup %7003  ;;  %v5150_v58 = vmul.f32 %v7002_v31, %v10454_v56 }
 0xb1e   :  { %v5069_v36 = vpop.xlane.xlu1 %5068  ;;  %v5067_v44 = vpop.xlane.xlu0 %5066  ;;  %v5151_v7 = vmul.f32 %v7004_v21, %v10456_v57 }
 0xb1f   :  { %7013 = vrcp.f32 %v5069_v36  ;;  %5440 = vst [vmem:[#allocation9] sm:$0xff] %v5150_v58 }
 0xb20   :  { %7015 = vrcp.f32 %v5067_v44  ;;  %v5182_v59 = vpack.c.bf16 %v5151_v7, %v5150_v58  ;;  %5441 = vst [vmem:[#allocation9 + $0x8] sm:$0xff] %v5151_v7 }
 0xb21   :  { %v7006_v46 = vpop.eup %7005 }
 0xb22   :  { %v7008_v63 = vpop.eup %7007  ;;  %v5153_v26 = vmul.f32 %v7006_v46, %v10462_v24  ;;  %v5073_v40 = vpop.xlane.xlu1 %5072  ;;  %6365 = vmatprep.mubr.bf16.mxu1 %v5182_v59  ;;  %v11405_v46 = vld [vmem:[#allocation49_spill] sm:$0xff] }
 0xb23   :  { %v5071_v41 = vpop.xlane.xlu0 %5070  ;;  %v5152_v28 = vmul.f32 %v7008_v63, %v10464_v61  ;;  %7017 = vrcp.f32 %v5073_v40 }
 0xb24   :  { %5443 = vst [vmem:[#allocation9 + $0x18] sm:$0xff] %v5153_v26  ;;  %7019 = vrcp.f32 %v5071_v41 }
 0xb25   :  { %v7010_v56 = vpop.eup %7009  ;;  %5442 = vst [vmem:[#allocation9 + $0x10] sm:$0xff] %v5152_v28  ;;  %v5183_v57 = vpack.c.bf16 %v5153_v26, %v5152_v28 }
 0xb26   :  { %v7012_v35 = vpop.eup %7011  ;;  %v5077_v8 = vpop.xlane.xlu1 %5076  ;;  %v5155_v55 = vmul.f32 %v7010_v56, %v10470_v51 }
 0xb27   :  { %v5075_v13 = vpop.xlane.xlu0 %5074  ;;  %7021 = vrcp.f32 %v5077_v8  ;;  %6366 = vmatmul.mubr.bf16.vlgmr.msra.gmra.mrb[80].mxu1 %v5183_v57  ;;  %v5154_v24 = vmul.f32 %v7012_v35, %v10472_v34  ;;  %v11407_v35 = vld [vmem:[#allocation51_spill] sm:$0xff] }
 0xb28   :  { %6382 = vmatpush3.bf16.msra.mxu1 %v11400_v53  ;;  %7023 = vrcp.f32 %v5075_v13  ;;  %5445 = vst [vmem:[#allocation9 + $0x28] sm:$0xff] %v5155_v55 }
 0xb29   :  { %v7014_v61 = vpop.eup %7013  ;;  %6383 = vmatprep.subr.bf16.mxu1 %v11401_v54  ;;  %v5184_v48 = vpack.c.bf16 %v5155_v55, %v5154_v24  ;;  %5444 = vst [vmem:[#allocation9 + $0x20] sm:$0xff] %v5154_v24 }
 0xb2a   :  { %v7016_v25 = vpop.eup %7015  ;;  %v5081_v9 = vpop.xlane.xlu1 %5080  ;;  %v5157_v38 = vmul.f32 %v7014_v61, %v10478_v49 }
 0xb2b   :  { %v5079_v14 = vpop.xlane.xlu0 %5078  ;;  %7025 = vrcp.f32 %v5081_v9  ;;  %6369 = vmatprep.mubr.bf16.mxu1 %v5184_v48  ;;  %v5156_v51 = vmul.f32 %v7016_v25, %v10480_v11 }
 0xb2c   :  { %6384 = vmatpush3.bf16.msra.mxu1 %v11401_v54  ;;  %7027 = vrcp.f32 %v5079_v14  ;;  %5447 = vst [vmem:[#allocation9 + $0x38] sm:$0xff] %v5157_v38 }
 0xb2d   :  { %v7018_v34 = vpop.eup %7017  ;;  %6385 = vmatprep.subr.bf16.mxu1 %v11402_v19  ;;  %v5185_v23 = vpack.c.bf16 %v5157_v38, %v5156_v51  ;;  %5446 = vst [vmem:[#allocation9 + $0x30] sm:$0xff] %v5156_v51 }
 0xb2e   :  { %v7020_v39 = vpop.eup %7019  ;;  %v5085_v10 = vpop.xlane.xlu1 %5084  ;;  %v5159_v60 = vmul.f32 %v7018_v34, %v10486_v42 }
 0xb2f   :  { %v5083_v0 = vpop.xlane.xlu0 %5082  ;;  %7029 = vrcp.f32 %v5085_v10  ;;  %6370 = vmatmul.mubr.bf16.gmra.mrb[84].mxu1 %v5185_v23  ;;  %v5158_v49 = vmul.f32 %v7020_v39, %v10488_v12  ;;  %v11404_v12 = vld [vmem:[#allocation50_spill] sm:$0xff] }
 0xb30   :  { %6386 = vmatpush3.bf16.msra.mxu1 %v11402_v19  ;;  %7031 = vrcp.f32 %v5083_v0  ;;  %5449 = vst [vmem:[#allocation9 + $0x48] sm:$0xff] %v5159_v60 }
 0xb31   :  { %v7022_v11 = vpop.eup %7021  ;;  %6387 = vmatprep.subr.bf16.mxu1 %v11403_v37  ;;  %v5186_v15 = vpack.c.bf16 %v5159_v60, %v5158_v49  ;;  %5448 = vst [vmem:[#allocation9 + $0x40] sm:$0xff] %v5158_v49 }
 0xb32   :  { %v7024_v31 = vpop.eup %7023  ;;  %v5161_v21 = vmul.f32 %v7022_v11, %v10492_v50 }
 0xb33   :  { %6373 = vmatprep.mubr.bf16.mxu1 %v5186_v15  ;;  %v5160_v58 = vmul.f32 %v7024_v31, %v10494_v20 }
 0xb34   :  { %6388 = vmatpush3.bf16.msra.mxu1 %v11403_v37  ;;  %5451 = vst [vmem:[#allocation9 + $0x58] sm:$0xff] %v5161_v21 }
 0xb35   :  { %v7026_v42 = vpop.eup %7025  ;;  %6389 = vmatprep.subr.bf16.mxu1 %v11404_v12  ;;  %v5187_v36 = vpack.c.bf16 %v5161_v21, %v5160_v58  ;;  %5450 = vst [vmem:[#allocation9 + $0x50] sm:$0xff] %v5160_v58 }
 0xb36   :  { %v7028_v44 = vpop.eup %7027  ;;  %v5163_v7 = vmul.f32 %v7026_v42, %v10498_v4 }
 0xb37   :  { %6374 = vmatmul.mubr.bf16.gmra.mrb[88].mxu1 %v5187_v36  ;;  %v5162_v59 = vmul.f32 %v7028_v44, %v10500_v62  ;;  %v11406_v62 = vld [vmem:[#allocation52_spill] sm:$0xff] }
 0xb38   :  { %6390 = vmatpush3.bf16.msra.mxu1 %v11404_v12  ;;  %5453 = vst [vmem:[#allocation9 + $0x68] sm:$0xff] %v5163_v7  ;;  %v5089_v20 = vpop.xlane.xlu1 %5088 }
 0xb39   :  { %v7030_v50 = vpop.eup %7029  ;;  %6391 = vmatprep.subr.bf16.mxu1 %v11405_v46  ;;  %v5188_v63 = vpack.c.bf16 %v5163_v7, %v5162_v59  ;;  %5452 = vst [vmem:[#allocation9 + $0x60] sm:$0xff] %v5162_v59  ;;  %7033 = vrcp.f32 %v5089_v20  ;;  %v5087_v40 = vpop.xlane.xlu0 %5086 }
 0xb3a   :  { %v7032_v26 = vpop.eup %7031  ;;  %v5165_v41 = vmul.f32 %v7030_v50, %v10506_v16  ;;  %7035 = vrcp.f32 %v5087_v40 }
 0xb3b   :  { %6377 = vmatprep.mubr.bf16.mxu1 %v5188_v63  ;;  %v5164_v4 = vmul.f32 %v7032_v26, %v10508_v30 }
 0xb3c   :  { %6392 = vmatpush3.bf16.msra.mxu1 %v11405_v46  ;;  %5455 = vst [vmem:[#allocation9 + $0x78] sm:$0xff] %v5165_v41  ;;  %v5093_v28 = vpop.xlane.xlu1 %5092 }
 0xb3d   :  { %6393 = vmatprep.subr.bf16.mxu1 %v11406_v62  ;;  %v5189_v56 = vpack.c.bf16 %v5165_v41, %v5164_v4  ;;  %5454 = vst [vmem:[#allocation9 + $0x70] sm:$0xff] %v5164_v4  ;;  %7037 = vrcp.f32 %v5093_v28  ;;  %v5091_v57 = vpop.xlane.xlu0 %5090 }
 0xb3e   :  { %7039 = vrcp.f32 %v5091_v57 }
 0xb3f   :  { %6378 = vmatmul.mubr.bf16.gmra.mrb[92].mxu1 %v5189_v56 }
 0xb40   :  { %6394 = vmatpush3.bf16.msra.mxu1 %v11406_v62  ;;  %v5097_v16 = vpop.xlane.xlu1 %5096 }
 0xb41   :  { %6395 = vmatprep.subr.bf16.mxu1 %v11407_v35  ;;  %7041 = vrcp.f32 %v5097_v16  ;;  %v5095_v8 = vpop.xlane.xlu0 %5094 }
 0xb42   :  { %7043 = vrcp.f32 %v5095_v8 }
 0xb43   :  { %v7034_v30 = vpop.eup %7033 }
 0xb44   :  { %6396 = vmatpush3.bf16.msra.mxu1 %v11407_v35  ;;  %v7036_v13 = vpop.eup %7035  ;;  %v5101_v55 = vpop.xlane.xlu1 %5100  ;;  %v5167_v24 = vmul.f32 %v7034_v30, %v10518_v52 }
 0xb45   :  { %7045 = vrcp.f32 %v5101_v55  ;;  %v5099_v53 = vpop.xlane.xlu0 %5098  ;;  %v5166_v61 = vmul.f32 %v7036_v13, %v10520_v17 }
 0xb46   :  { %7047 = vrcp.f32 %v5099_v53  ;;  %5457 = vst [vmem:[#allocation9 + $0x88] sm:$0xff] %v5167_v24 }
 0xb47   :  { %v7038_v54 = vpop.eup %7037  ;;  %v5190_v48 = vpack.c.bf16 %v5167_v24, %v5166_v61  ;;  %5456 = vst [vmem:[#allocation9 + $0x80] sm:$0xff] %v5166_v61 }
 0xb48   :  { %v7040_v25 = vpop.eup %7039  ;;  %v5169_v9 = vmul.f32 %v7038_v54, %v10526_v47  ;;  %v5105_v14 = vpop.xlane.xlu1 %5104 }
 0xb49   :  { %v5168_v38 = vmul.f32 %v7040_v25, %v10528_v45  ;;  %7049 = vrcp.f32 %v5105_v14  ;;  %6397 = vmatprep.mubr.bf16.mxu1 %v5190_v48  ;;  %v5103_v51 = vpop.xlane.xlu0 %5102 }
 0xb4a   :  { %5459 = vst [vmem:[#allocation9 + $0x98] sm:$0xff] %v5169_v9  ;;  %7051 = vrcp.f32 %v5103_v51 }
 0xb4b   :  { %v7042_v52 = vpop.eup %7041  ;;  %5458 = vst [vmem:[#allocation9 + $0x90] sm:$0xff] %v5168_v38  ;;  %v5191_v34 = vpack.c.bf16 %v5169_v9, %v5168_v38 }
 0xb4c   :  { %v7044_v17 = vpop.eup %7043  ;;  %v5109_v19 = vpop.xlane.xlu1 %5108  ;;  %v5171_v23 = vmul.f32 %v7042_v52, %v10534_v2 }
 0xb4d   :  { %7053 = vrcp.f32 %v5109_v19  ;;  %6398 = vmatmul.mubr.bf16.vlgmr.msra.gmra.mrb[96].mxu1 %v5191_v34  ;;  %v5107_v39 = vpop.xlane.xlu0 %5106  ;;  %v5170_v47 = vmul.f32 %v7044_v17, %v10536_v27 }
 0xb4e   :  { %7055 = vrcp.f32 %v5107_v39  ;;  %5461 = vst [vmem:[#allocation9 + $0xa8] sm:$0xff] %v5171_v23 }
 0xb4f   :  { %v7046_v45 = vpop.eup %7045  ;;  %v5192_v10 = vpack.c.bf16 %v5171_v23, %v5170_v47  ;;  %5460 = vst [vmem:[#allocation9 + $0xa0] sm:$0xff] %v5170_v47 }
 0xb50   :  { %v7048_v0 = vpop.eup %7047  ;;  %v5113_v60 = vpop.xlane.xlu1 %5112  ;;  %v5173_v49 = vmul.f32 %v7046_v45, %v10542_v32 }
 0xb51   :  { %7057 = vrcp.f32 %v5113_v60  ;;  %6401 = vmatprep.mubr.bf16.mxu1 %v5192_v10  ;;  %v5111_v11 = vpop.xlane.xlu0 %5110  ;;  %v5172_v37 = vmul.f32 %v7048_v0, %v10544_v1 }
 0xb52   :  { %7059 = vrcp.f32 %v5111_v11  ;;  %5463 = vst [vmem:[#allocation9 + $0xb8] sm:$0xff] %v5173_v49 }
 0xb53   :  { %v7050_v2 = vpop.eup %7049  ;;  %v5193_v15 = vpack.c.bf16 %v5173_v49, %v5172_v37  ;;  %5462 = vst [vmem:[#allocation9 + $0xb0] sm:$0xff] %v5172_v37 }
 0xb54   :  { %v7052_v27 = vpop.eup %7051  ;;  %v5117_v31 = vpop.xlane.xlu1 %5116  ;;  %v5175_v21 = vmul.f32 %v7050_v2, %v10550_v29 }
 0xb55   :  { %7061 = vrcp.f32 %v5117_v31  ;;  %6402 = vmatmul.mubr.bf16.gmra.mrb[100].mxu1 %v5193_v15  ;;  %v5115_v58 = vpop.xlane.xlu0 %5114  ;;  %v5174_v42 = vmul.f32 %v7052_v27, %v10552_v3 }
 0xb56   :  { %7063 = vrcp.f32 %v5115_v58  ;;  %5465 = vst [vmem:[#allocation9 + $0xc8] sm:$0xff] %v5175_v21 }
 0xb57   :  { %v7054_v32 = vpop.eup %7053  ;;  %v5194_v12 = vpack.c.bf16 %v5175_v21, %v5174_v42  ;;  %5464 = vst [vmem:[#allocation9 + $0xc0] sm:$0xff] %v5174_v42 }
 0xb58   :  { %v7056_v1 = vpop.eup %7055  ;;  %v5177_v36 = vmul.f32 %v7054_v32, %v10556_v33 }
 0xb59   :  { %6405 = vmatprep.mubr.bf16.mxu1 %v5194_v12  ;;  %v5176_v44 = vmul.f32 %v7056_v1, %v10558_v43 }
 0xb5a   :  { %5467 = vst [vmem:[#allocation9 + $0xd8] sm:$0xff] %v5177_v36 }
 0xb5b   :  { %v7058_v7 = vpop.eup %7057  ;;  %v5195_v59 = vpack.c.bf16 %v5177_v36, %v5176_v44  ;;  %5466 = vst [vmem:[#allocation9 + $0xd0] sm:$0xff] %v5176_v44 }
 0xb5c   :  { %v7060_v29 = vpop.eup %7059  ;;  %v5179_v50 = vmul.f32 %v7058_v7, %v10562_v18 }
 0xb5d   :  { %6406 = vmatmul.mubr.bf16.gmra.mrb[104].mxu1 %v5195_v59  ;;  %v5178_v3 = vmul.f32 %v7060_v29, %v10564_v5 }
 0xb5e   :  { %5469 = vst [vmem:[#allocation9 + $0xe8] sm:$0xff] %v5179_v50 }
 0xb5f   :  { %v7062_v46 = vpop.eup %7061  ;;  %v5196_v20 = vpack.c.bf16 %v5179_v50, %v5178_v3  ;;  %5468 = vst [vmem:[#allocation9 + $0xe0] sm:$0xff] %v5178_v3 }
 0xb60   :  { %v7064_v63 = vpop.eup %7063  ;;  %v5181_v33 = vmul.f32 %v7062_v46, %v10568_v6 }
 0xb61   :  { %6409 = vmatprep.mubr.bf16.mxu1 %v5196_v20  ;;  %v5180_v43 = vmul.f32 %v7064_v63, %v10570_v22 }
 0xb62   :  { %5471 = vst [vmem:[#allocation9 + $0xf8] sm:$0xff] %v5181_v33 }
 0xb63   :  { %v5197_v26 = vpack.c.bf16 %v5181_v33, %v5180_v43  ;;  %5470 = vst [vmem:[#allocation9 + $0xf0] sm:$0xff] %v5180_v43 }
 0xb65   :  { %6410 = vmatmul.mubr.bf16.gmra.mrb[108].mxu1 %v5197_v26 }
 0xb66   :  { %7174 = shalt.err (!%p7171_p0)
}
 0xb67   :  { %s7175_s20 = scalar_lea.hbm %s10663_s12, 4096 }
 0xb68   :  { %p7176_p1 = scmp.ne.s32.totalorder %s10663_s12, %s7175_s20  ;;  %p7179_p2 = scmp.lt.u32.totalorder %s7175_s20, %s10663_s12 }
 0xb6a   :  { %p7181_p3 = pnand %p7179_p2, %p7176_p1 }
 0xb6c   :  { %7184 = shalt.err (!%p7181_p3)
}
 0xb6d   :  { %5495 = dma.vmem_to_hbm [thread:$0]  %s5490_s14, 4096, %s10663_s12, [#allocation10], %s7220_s1, %s7220_s1, %s7221_s24  }
 0xb6e   :  { %s7224_s12 = smov [#allocation8]  }
 0xb6f   :  { %s5477_s26 = sshll.u32 %s7224_s12, 4  ;;  %s5478_s26 = int_to_ptr.vmem [resolvable:$true] %s5477_s26 }
 0xb70   :  { %s7185_s5 = scalar_lea.vmem %s5478_s26, 4096  ;;  %p7190_p5 = scmp.lt.s32.totalorder %s5478_s26, %s5478_s26 }
 0xb71   :  { %p7186_p4 = scmp.ne.s32.totalorder %s5478_s26, %s7185_s5  ;;  %p7191_p6 = scmp.lt.s32.totalorder %s7185_s5, %s7185_s5 }
 0xb73   :  { %p7192_p7 = por %p7191_p6, %p7190_p5 }
 0xb75   :  { %p7193_p8 = pnand %p7192_p7, %p7186_p4 }
 0xbfa   :  { %v6367_v18 = vpop.f32.mrb[80].mxu1 }
 0xbfb   :  { %5410 = vst [vmem:[#allocation8 + $0x10] sm:$0xff] %v6367_v18  ;;  %v5248_v5 = vpop.f32.mrb[81].mxu1 }
 0xbfc   :  { %5408 = vst [vmem:[#allocation8] sm:$0xff] %v5248_v5  ;;  %v6368_v6 = vpop.f32.mrb[82].mxu1 }
 0xbfd   :  { %5411 = vst [vmem:[#allocation8 + $0x18] sm:$0xff] %v6368_v6  ;;  %v5251_v22 = vpop.f32.mrb[83].mxu1 }
 0xbfe   :  { %5409 = vst [vmem:[#allocation8 + $0x8] sm:$0xff] %v5251_v22 }
 0xc02   :  { %v6371_v40 = vpop.f32.mrb[84].mxu1 }
 0xc03   :  { %5414 = vst [vmem:[#allocation8 + $0x30] sm:$0xff] %v6371_v40  ;;  %v5264_v41 = vpop.f32.mrb[85].mxu1 }
 0xc04   :  { %5412 = vst [vmem:[#allocation8 + $0x20] sm:$0xff] %v5264_v41  ;;  %v6372_v4 = vpop.f32.mrb[86].mxu1 }
 0xc05   :  { %5415 = vst [vmem:[#allocation8 + $0x38] sm:$0xff] %v6372_v4  ;;  %v5267_v62 = vpop.f32.mrb[87].mxu1 }
 0xc06   :  { %5413 = vst [vmem:[#allocation8 + $0x28] sm:$0xff] %v5267_v62 }
 0xc0a   :  { %v6375_v28 = vpop.f32.mrb[88].mxu1 }
 0xc0b   :  { %5418 = vst [vmem:[#allocation8 + $0x50] sm:$0xff] %v6375_v28  ;;  %v5280_v56 = vpop.f32.mrb[89].mxu1 }
 0xc0c   :  { %5416 = vst [vmem:[#allocation8 + $0x40] sm:$0xff] %v5280_v56  ;;  %v6376_v57 = vpop.f32.mrb[90].mxu1 }
 0xc0d   :  { %5419 = vst [vmem:[#allocation8 + $0x58] sm:$0xff] %v6376_v57  ;;  %v5283_v35 = vpop.f32.mrb[91].mxu1 }
 0xc0e   :  { %5417 = vst [vmem:[#allocation8 + $0x48] sm:$0xff] %v5283_v35 }
 0xc12   :  { %v6379_v16 = vpop.f32.mrb[92].mxu1 }
 0xc13   :  { %5422 = vst [vmem:[#allocation8 + $0x70] sm:$0xff] %v6379_v16  ;;  %v5296_v8 = vpop.f32.mrb[93].mxu1 }
 0xc14   :  { %5420 = vst [vmem:[#allocation8 + $0x60] sm:$0xff] %v5296_v8  ;;  %v6380_v30 = vpop.f32.mrb[94].mxu1 }
 0xc15   :  { %5423 = vst [vmem:[#allocation8 + $0x78] sm:$0xff] %v6380_v30  ;;  %v5299_v13 = vpop.f32.mrb[95].mxu1 }
 0xc16   :  { %5421 = vst [vmem:[#allocation8 + $0x68] sm:$0xff] %v5299_v13 }
 0xc20   :  { %v6399_v55 = vpop.f32.mrb[96].mxu1 }
 0xc21   :  { %5426 = vst [vmem:[#allocation8 + $0x90] sm:$0xff] %v6399_v55  ;;  %v5345_v24 = vpop.f32.mrb[97].mxu1 }
 0xc22   :  { %5424 = vst [vmem:[#allocation8 + $0x80] sm:$0xff] %v5345_v24  ;;  %v6400_v53 = vpop.f32.mrb[98].mxu1 }
 0xc23   :  { %5427 = vst [vmem:[#allocation8 + $0x98] sm:$0xff] %v6400_v53  ;;  %v5348_v61 = vpop.f32.mrb[99].mxu1 }
 0xc24   :  { %5425 = vst [vmem:[#allocation8 + $0x88] sm:$0xff] %v5348_v61 }
 0xc28   :  { %v6403_v54 = vpop.f32.mrb[100].mxu1 }
 0xc29   :  { %5430 = vst [vmem:[#allocation8 + $0xb0] sm:$0xff] %v6403_v54  ;;  %v5361_v48 = vpop.f32.mrb[101].mxu1 }
 0xc2a   :  { %5428 = vst [vmem:[#allocation8 + $0xa0] sm:$0xff] %v5361_v48  ;;  %v6404_v25 = vpop.f32.mrb[102].mxu1 }
 0xc2b   :  { %5431 = vst [vmem:[#allocation8 + $0xb8] sm:$0xff] %v6404_v25  ;;  %v5364_v9 = vpop.f32.mrb[103].mxu1 }
 0xc2c   :  { %5429 = vst [vmem:[#allocation8 + $0xa8] sm:$0xff] %v5364_v9 }
 0xc30   :  { %v6407_v14 = vpop.f32.mrb[104].mxu1 }
 0xc31   :  { %5434 = vst [vmem:[#allocation8 + $0xd0] sm:$0xff] %v6407_v14  ;;  %v5377_v38 = vpop.f32.mrb[105].mxu1 }
 0xc32   :  { %5432 = vst [vmem:[#allocation8 + $0xc0] sm:$0xff] %v5377_v38  ;;  %v6408_v51 = vpop.f32.mrb[106].mxu1 }
 0xc33   :  { %5435 = vst [vmem:[#allocation8 + $0xd8] sm:$0xff] %v6408_v51  ;;  %v5380_v52 = vpop.f32.mrb[107].mxu1 }
 0xc34   :  { %5433 = vst [vmem:[#allocation8 + $0xc8] sm:$0xff] %v5380_v52 }
 0xc38   :  { %v6411_v34 = vpop.f32.mrb[108].mxu1 }
 0xc39   :  { %5438 = vst [vmem:[#allocation8 + $0xf0] sm:$0xff] %v6411_v34  ;;  %v5393_v17 = vpop.f32.mrb[109].mxu1 }
 0xc3a   :  { %5436 = vst [vmem:[#allocation8 + $0xe0] sm:$0xff] %v5393_v17  ;;  %v6412_v19 = vpop.f32.mrb[110].mxu1 }
 0xc3b   :  { %5439 = vst [vmem:[#allocation8 + $0xf8] sm:$0xff] %v6412_v19  ;;  %v5396_v23 = vpop.f32.mrb[111].mxu1 }
 0xc3c   :  { %5437 = vst [vmem:[#allocation8 + $0xe8] sm:$0xff] %v5396_v23 }
 0xc3d   :  { %7196 = shalt.err (!%p7193_p8)
}
 0xc3e   :  { %s7197_s2 = scalar_lea.hbm %s10662_s11, 4096 }
 0xc3f   :  { %p7198_p9 = scmp.ne.s32.totalorder %s10662_s11, %s7197_s2  ;;  %p7201_p10 = scmp.lt.u32.totalorder %s7197_s2, %s10662_s11 }
 0xc41   :  { %p7203_p11 = pnand %p7201_p10, %p7198_p9 }
 0xc43   :  { %7206 = shalt.err (!%p7203_p11)
}
 0xc44   :  { %5483 = dma.vmem_to_hbm [thread:$0]  %s5478_s26, 4096, %s10662_s11, [#allocation4], %s7220_s1, %s7220_s1, %s7221_s24  }
 0xc45   :  { %7211 = dma.done.wait [#allocation4], 4096  }
 0xc46   :  { %7212 = vsyncadd [#allocation4], 4294963200 }
 0xc47   :  { %7213 = dma.done.wait [#allocation10], 4096  }
 0xc48   :  { %7214 = vsyncadd [#allocation10], 4294963200 }
 0xc49   :  { %5502 = vsyncpa [#allocation3], 1 }
 0xc4a   :  { %5503 = vsyncpa [#allocation6], 1 }
 0xc4b   :  { %5504 = vsyncpa [#allocation4], 1 }
 0xc4c   :  { %5505 = vsyncpa [#allocation10], 1 }

</bundles_post_ra>
